<compile_context>
chip_gen: v6e
topology: v6e:2x2x1
jax: 0.10.0
libtpu: 0.0.40
codegen_flags: <defaults>
</compile_context>

<pallas_src>
import functools

import jax
import jax.numpy as jnp
from jax.experimental import pallas as pl
from jax.experimental.pallas import tpu as pltpu

LEAKY_SLOPE = 0.2
BN_EPS = 1e-5

# (cin, cout, stride, pad, use_bn, activation) for the 5 convs of the module.
LAYER_CFG = [
    (3,   64,  2, 1, False, "leaky"),
    (64,  128, 2, 1, True,  "leaky"),
    (128, 256, 2, 1, True,  "leaky"),
    (256, 512, 2, 1, True,  "leaky"),
    (512, 1,   1, 0, False, "sigmoid"),
]


def _round_up(x, m):
    return (x + m - 1) // m * m


def _pick_tiles(M, K, Np):
    """Pick (tm, tn) so tiles divide the arrays exactly and the grid has >= 2
    steps (v7x megacore) whenever the shapes allow it."""
    tn = 128 if Np > 128 else Np
    gn = Np // tn
    # Largest power-of-two M tile dividing M with <= ~2 MiB of bf16 LHS.
    tm = M  # fallback: one full-M tile (block dim == array dim is legal)
    for t in (1024, 512, 256, 128, 64, 32, 16, 8):
        if M % t == 0 and t * K * 2 <= (2 << 20):
            tm = t
            break
    # If the whole grid would be a single step, halve the M tile when possible
    # so the second TensorCore (v7x) gets work.
    if gn * (M // tm) < 2:
        for t in (512, 256, 128, 64, 32, 16, 8):
            if t < tm and M % t == 0:
                tm = t
                break
    return tm, tn


# ----------------------------------------------------------------------------
# Kernels
# ----------------------------------------------------------------------------
def _matmul_act_kernel(a_ref, w_ref, o_ref, *, act):
    """bf16 im2col-matmul (f32 accumulation) + fused activation epilogue."""
    y = jnp.dot(a_ref[...], w_ref[...], preferred_element_type=jnp.float32)
    if act == "leaky":
        y = jnp.where(y >= 0.0, y, LEAKY_SLOPE * y)
    elif act == "sigmoid":
        # Exact divide (tiny last layer); exp runs on the EUP.
        y = 1.0 / (1.0 + jnp.exp(-y))
    o_ref[...] = y.astype(o_ref.dtype)


def _matmul_stats_kernel(a_ref, w_ref, y_ref, stats_ref):
    """bf16 matmul + per-tile per-channel sum / sum-of-squares (f32)."""
    y = jnp.dot(a_ref[...], w_ref[...], preferred_element_type=jnp.float32)
    y_ref[...] = y.astype(y_ref.dtype)
    s1 = jnp.sum(y, axis=0, keepdims=True)       # (1, tn)
    s2 = jnp.sum(y * y, axis=0, keepdims=True)   # (1, tn)
    row = jax.lax.broadcasted_iota(jnp.int32, stats_ref.shape, 0)
    stats_ref[...] = jnp.where(row == 0, s1, jnp.where(row == 1, s2, 0.0))


# ----------------------------------------------------------------------------
# pallas_call wrappers (2-D parallel grid over M-tiles x N-tiles)
# ----------------------------------------------------------------------------
def _conv_matmul(a, w, *, act, out_dtype, tm, tn):
    M, K = a.shape
    _, Np = w.shape
    gm, gn = M // tm, Np // tn
    return pl.pallas_call(
        functools.partial(_matmul_act_kernel, act=act),
        out_shape=jax.ShapeDtypeStruct((M, Np), out_dtype),
        grid=(gm, gn),
        in_specs=[pl.BlockSpec((tm, K), lambda i, j: (i, 0)),
                  pl.BlockSpec((K, tn), lambda i, j: (0, j))],
        out_specs=pl.BlockSpec((tm, tn), lambda i, j: (i, j)),
        compiler_params=pltpu.CompilerParams(
            dimension_semantics=("parallel", "parallel")),
    )(a, w)


def _conv_matmul_with_stats(a, w, *, tm, tn):
    M, K = a.shape
    _, Np = w.shape
    gm, gn = M // tm, Np // tn
    return pl.pallas_call(
        _matmul_stats_kernel,
        out_shape=(jax.ShapeDtypeStruct((M, Np), jnp.bfloat16),
                   jax.ShapeDtypeStruct((gm * 8, Np), jnp.float32)),
        grid=(gm, gn),
        in_specs=[pl.BlockSpec((tm, K), lambda i, j: (i, 0)),
                  pl.BlockSpec((K, tn), lambda i, j: (0, j))],
        out_specs=(pl.BlockSpec((tm, tn), lambda i, j: (i, j)),
                   pl.BlockSpec((8, tn), lambda i, j: (i, j))),
        compiler_params=pltpu.CompilerParams(
            dimension_semantics=("parallel", "parallel")),
    )(a, w)


# ----------------------------------------------------------------------------
# JAX glue (fuses into single XLA fusions between the matmul kernels)
# ----------------------------------------------------------------------------
def im2col(x_nhwc, k, stride, pad):
    """(kh, kw, cin)-ordered patches: returns ((N*Ho*Wo, k*k*C), Ho, Wo)."""
    N, H, W, C = x_nhwc.shape
    if pad:
        x_nhwc = jnp.pad(x_nhwc, ((0, 0), (pad, pad), (pad, pad), (0, 0)))
    Ho = (H + 2 * pad - k) // stride + 1
    Wo = (W + 2 * pad - k) // stride + 1
    cols = []
    for kh in range(k):
        for kw in range(k):
            cols.append(x_nhwc[:, kh:kh + stride * Ho:stride,
                               kw:kw + stride * Wo:stride, :])
    patches = jnp.stack(cols, axis=3)            # (N, Ho, Wo, k*k, C)
    return patches.reshape(N * Ho * Wo, k * k * C), Ho, Wo


def init_params(key):
    """DCGAN-style init: conv weights ~ N(0, 0.02) (OIHW), BN gamma=1, beta=0."""
    params = []
    for (cin, cout, *_rest) in LAYER_CFG:
        key, wk = jax.random.split(key)
        w = 0.02 * jax.random.normal(wk, (cout, cin, 4, 4), jnp.float32)
        params.append((w, jnp.ones((cout,), jnp.float32),
                       jnp.zeros((cout,), jnp.float32)))
    return params


def pack_params(params):
    """One-time packing: OIHW -> (K, Np) bf16 matmul operand.

    Cin is rounded up to a multiple of 4 (only layer 1: 3 -> 4, so K = 64),
    Cout to a multiple of 128 (lane-dense output tiles); extra rows/cols are
    zero so results are unaffected."""
    packed = []
    for (cin, cout, *_rest), (w, gamma, beta) in zip(LAYER_CFG, params):
        cin_p = _round_up(cin, 4)
        Np = _round_up(cout, 128)
        w_k = jnp.transpose(w, (2, 3, 1, 0))     # (KH, KW, Cin, Cout)
        w_k = jnp.pad(w_k, ((0, 0), (0, 0), (0, cin_p - cin), (0, Np - cout)))
        w_p = w_k.reshape(4 * 4 * cin_p, Np).astype(jnp.bfloat16)
        packed.append((w_p, gamma, beta))
    return packed


def discriminator_forward(x_nchw, packed_params):
    # Accept NCHW (PyTorch convention); run NHWC / im2col internally in bf16.
    x = jnp.transpose(x_nchw, (0, 2, 3, 1)).astype(jnp.bfloat16)
    N = x.shape[0]
    n_layers = len(LAYER_CFG)
    pending = None   # (scale, shift) of the previous BN layer, not yet applied
    for li, ((cin, cout, stride, pad, use_bn, act),
             (w_p, gamma, beta)) in enumerate(zip(LAYER_CFG, packed_params)):
        del cin
        # Fuse the previous layer's BN affine + LeakyReLU into this layer's
        # im2col fusion.  Applied BEFORE the conv's zero padding so padded
        # border pixels remain exactly zero (matching nn.Sequential order).
        if pending is not None:
            scale, shift = pending
            xf = x.astype(jnp.float32) * scale + shift
            x = jnp.where(xf >= 0.0, xf, LEAKY_SLOPE * xf).astype(jnp.bfloat16)
            pending = None
        cin_p = w_p.shape[0] // 16
        if x.shape[-1] < cin_p:          # layer 1 only: Cin 3 -> 4 (K = 64)
            x = jnp.pad(x, ((0, 0), (0, 0), (0, 0), (0, cin_p - x.shape[-1])))

        patches, Ho, Wo = im2col(x, 4, stride, pad)
        M, K = patches.shape
        Np = w_p.shape[1]
        tm, tn = _pick_tiles(M, K, Np)

        if use_bn:
            # Pass 1: tiled matmul + per-tile channel stats (f32 accumulation).
            y, stats = _conv_matmul_with_stats(patches, w_p, tm=tm, tn=tn)
            gm = M // tm
            st = stats.reshape(gm, 8, Np)
            ssum = jnp.sum(st[:, 0, :cout], axis=0)
            ssq = jnp.sum(st[:, 1, :cout], axis=0)
            mean = ssum / M
            # E[x^2] - mean^2 in f32; conv outputs here are near zero-mean so
            # the cancellation risk is benign for this architecture.
            var = jnp.maximum(ssq / M - mean * mean, 0.0)
            inv = jax.lax.rsqrt(var + BN_EPS)
            scale = gamma * inv
            shift = beta - mean * scale
            pending = (scale, shift)     # consumed by the next layer's im2col
        else:
            out_dtype = jnp.float32 if li == n_layers - 1 else jnp.bfloat16
            y = _conv_matmul(patches, w_p, act=act, out_dtype=out_dtype,
                             tm=tm, tn=tn)

        x = y[:, :cout].reshape(N, Ho, Wo, cout)
    return jnp.transpose(x, (0, 3, 1, 2)).astype(jnp.float32)  # (N, 1, 1, 1)


if __name__ == "__main__":
    key = jax.random.PRNGKey(0)
    pkey, xkey = jax.random.split(key)
    packed = pack_params(init_params(pkey))
    # 64x64 input is required by the architecture (final 4x4 valid conv -> 1x1).
    x = jax.random.normal(xkey, (2, 3, 64, 64), jnp.float32)
    fwd = jax.jit(discriminator_forward)
    out = jax.block_until_ready(fwd(x, packed))
    assert out.shape == (2, 1, 1, 1), out.shape
    assert bool(jnp.all((out >= 0.0) & (out <= 1.0)))  # sigmoid range
    print("KERNEL_OK")
</pallas_src>

<mosaic_0001>
module attributes {stable_mosaic.version = 11 : i64} {
  func.func @_matmul_act_kernel(%arg0: i32, %arg1: i32, %arg2: memref<1024x64xbf16, #tpu.memory_space<vmem>>, %arg3: memref<64x128xbf16, #tpu.memory_space<vmem>>, %arg4: memref<1024x128xbf16, #tpu.memory_space<vmem>>) attributes {dimension_semantics = [#tpu.dimension_semantics<parallel>, #tpu.dimension_semantics<parallel>], iteration_bounds = array<i64: 2, 1>, scalar_prefetch = 0 : i64, scratch_operands = 0 : i64, tpu.core_type = #tpu.core_type<tc>, window_params = [{transform_indices = @transform_0, window_bounds = array<i64: 1024, 64>}, {transform_indices = @transform_1, window_bounds = array<i64: 64, 128>}, {transform_indices = @transform_2, window_bounds = array<i64: 1024, 128>}]} {
    %c0 = arith.constant 0 : index
    %c0_0 = arith.constant 0 : index
    %0 = vector.load %arg2[%c0, %c0_0] : memref<1024x64xbf16, #tpu.memory_space<vmem>>, vector<1024x64xbf16>
    %c0_1 = arith.constant 0 : index
    %c0_2 = arith.constant 0 : index
    %1 = vector.load %arg3[%c0_1, %c0_2] : memref<64x128xbf16, #tpu.memory_space<vmem>>, vector<64x128xbf16>
    %cst = arith.constant dense<0.000000e+00> : vector<1024x128xf32>
    %2 = tpu.matmul %0, %1, %cst {dimension_numbers = #tpu.dot_dimension_numbers<[1], [0], [0], [1], [0, 0, 1, 1], [], []>} : vector<1024x64xbf16>, vector<64x128xbf16>, vector<1024x128xf32> -> vector<1024x128xf32>
    %cst_3 = arith.constant 0.000000e+00 : f32
    %3 = vector.broadcast %cst_3 : f32 to vector<1024x128xf32>
    %4 = arith.cmpf oge, %2, %3 : vector<1024x128xf32>
    %cst_4 = arith.constant 2.000000e-01 : f32
    %5 = vector.broadcast %cst_4 : f32 to vector<1024x128xf32>
    %6 = arith.mulf %5, %2 : vector<1024x128xf32>
    %7 = arith.select %4, %2, %6 : vector<1024x128xi1>, vector<1024x128xf32>
    %8 = arith.truncf %7 : vector<1024x128xf32> to vector<1024x128xbf16>
    %c0_5 = arith.constant 0 : index
    %c0_6 = arith.constant 0 : index
    %9 = vector.load %arg4[%c0_5, %c0_6] : memref<1024x128xbf16, #tpu.memory_space<vmem>>, vector<1024x128xbf16>
    tpu.vector_store %arg4[%c0_5, %c0_6], %8 {strides = array<i32>} : memref<1024x128xbf16, #tpu.memory_space<vmem>>, vector<1024x128xbf16>,
    return
  }
  func.func @transform_0(%arg0: i32, %arg1: i32) -> (i32, i32) {
    %c0_i32 = arith.constant 0 : i32
    %c0_i32_0 = arith.constant 0 : i32
    return %arg0, %c0_i32 : i32, i32
  }
  func.func @transform_1(%arg0: i32, %arg1: i32) -> (i32, i32) {
    %c0_i32 = arith.constant 0 : i32
    %c0_i32_0 = arith.constant 0 : i32
    return %c0_i32, %arg1 : i32, i32
  }
  func.func @transform_2(%arg0: i32, %arg1: i32) -> (i32, i32) {
    %c0_i32 = arith.constant 0 : i32
    return %arg0, %arg1 : i32, i32
  }
}

module attributes {stable_mosaic.version = 11 : i64} {
  func.func @_matmul_stats_kernel(%arg0: i32, %arg1: i32, %arg2: memref<256x1024xbf16, #tpu.memory_space<vmem>>, %arg3: memref<1024x128xbf16, #tpu.memory_space<vmem>>, %arg4: memref<256x128xbf16, #tpu.memory_space<vmem>>, %arg5: memref<8x128xf32, #tpu.memory_space<vmem>>) attributes {dimension_semantics = [#tpu.dimension_semantics<parallel>, #tpu.dimension_semantics<parallel>], iteration_bounds = array<i64: 2, 1>, scalar_prefetch = 0 : i64, scratch_operands = 0 : i64, tpu.core_type = #tpu.core_type<tc>, window_params = [{transform_indices = @transform_0, window_bounds = array<i64: 256, 1024>}, {transform_indices = @transform_1, window_bounds = array<i64: 1024, 128>}, {transform_indices = @transform_2, window_bounds = array<i64: 256, 128>}, {transform_indices = @transform_3, window_bounds = array<i64: 8, 128>}]} {
    %c0 = arith.constant 0 : index
    %c0_0 = arith.constant 0 : index
    %0 = vector.load %arg2[%c0, %c0_0] : memref<256x1024xbf16, #tpu.memory_space<vmem>>, vector<256x1024xbf16>
    %c0_1 = arith.constant 0 : index
    %c0_2 = arith.constant 0 : index
    %1 = vector.load %arg3[%c0_1, %c0_2] : memref<1024x128xbf16, #tpu.memory_space<vmem>>, vector<1024x128xbf16>
    %cst = arith.constant dense<0.000000e+00> : vector<256x128xf32>
    %2 = tpu.matmul %0, %1, %cst {dimension_numbers = #tpu.dot_dimension_numbers<[1], [0], [0], [1], [0, 0, 1, 1], [], []>} : vector<256x1024xbf16>, vector<1024x128xbf16>, vector<256x128xf32> -> vector<256x128xf32>
    %3 = arith.truncf %2 : vector<256x128xf32> to vector<256x128xbf16>
    %c0_3 = arith.constant 0 : index
    %c0_4 = arith.constant 0 : index
    %4 = vector.load %arg4[%c0_3, %c0_4] : memref<256x128xbf16, #tpu.memory_space<vmem>>, vector<256x128xbf16>
    tpu.vector_store %arg4[%c0_3, %c0_4], %3 {strides = array<i32>} : memref<256x128xbf16, #tpu.memory_space<vmem>>, vector<256x128xbf16>,
    %cst_5 = arith.constant dense<0.000000e+00> : vector<128xf32>
    %5 = vector.multi_reduction <add>, %2, %cst_5 [0] : vector<256x128xf32> to vector<128xf32>
    %6 = vector.shape_cast %5 : vector<128xf32> to vector<1x128xf32>
    %7 = arith.mulf %2, %2 : vector<256x128xf32>
    %cst_6 = arith.constant dense<0.000000e+00> : vector<128xf32>
    %8 = vector.multi_reduction <add>, %7, %cst_6 [0] : vector<256x128xf32> to vector<128xf32>
    %9 = vector.shape_cast %8 : vector<128xf32> to vector<1x128xf32>
    %10 = tpu.iota {dimensions = array<i32: 0>} : vector<8x128xi32>
    %c0_i32 = arith.constant 0 : i32
    %11 = vector.broadcast %c0_i32 : i32 to vector<8x128xi32>
    %12 = arith.cmpi eq, %10, %11 : vector<8x128xi32>
    %c1_i32 = arith.constant 1 : i32
    %13 = vector.broadcast %c1_i32 : i32 to vector<8x128xi32>
    %14 = arith.cmpi eq, %10, %13 : vector<8x128xi32>
    %cst_7 = arith.constant 0.000000e+00 : f32
    %15 = vector.shape_cast %9 : vector<1x128xf32> to vector<1x128xf32>
    %16 = vector.broadcast %15 : vector<1x128xf32> to vector<8x128xf32>
    %17 = vector.broadcast %cst_7 : f32 to vector<8x128xf32>
    %18 = arith.select %14, %16, %17 : vector<8x128xi1>, vector<8x128xf32>
    %19 = vector.shape_cast %6 : vector<1x128xf32> to vector<1x128xf32>
    %20 = vector.broadcast %19 : vector<1x128xf32> to vector<8x128xf32>
    %21 = arith.select %12, %20, %18 : vector<8x128xi1>, vector<8x128xf32>
    %c0_8 = arith.constant 0 : index
    %c0_9 = arith.constant 0 : index
    %22 = vector.load %arg5[%c0_8, %c0_9] : memref<8x128xf32, #tpu.memory_space<vmem>>, vector<8x128xf32>
    tpu.vector_store %arg5[%c0_8, %c0_9], %21 {strides = array<i32>} : memref<8x128xf32, #tpu.memory_space<vmem>>, vector<8x128xf32>,
    return
  }
  func.func @transform_0(%arg0: i32, %arg1: i32) -> (i32, i32) {
    %c0_i32 = arith.constant 0 : i32
    %c0_i32_0 = arith.constant 0 : i32
    return %arg0, %c0_i32 : i32, i32
  }
  func.func @transform_1(%arg0: i32, %arg1: i32) -> (i32, i32) {
    %c0_i32 = arith.constant 0 : i32
    %c0_i32_0 = arith.constant 0 : i32
    return %c0_i32, %arg1 : i32, i32
  }
  func.func @transform_2(%arg0: i32, %arg1: i32) -> (i32, i32) {
    %c0_i32 = arith.constant 0 : i32
    return %arg0, %arg1 : i32, i32
  }
  func.func @transform_3(%arg0: i32, %arg1: i32) -> (i32, i32) {
    %c0_i32 = arith.constant 0 : i32
    return %arg0, %arg1 : i32, i32
  }
}

module attributes {stable_mosaic.version = 11 : i64} {
  func.func @_matmul_stats_kernel(%arg0: i32, %arg1: i32, %arg2: memref<128x2048xbf16, #tpu.memory_space<vmem>>, %arg3: memref<2048x128xbf16, #tpu.memory_space<vmem>>, %arg4: memref<128x128xbf16, #tpu.memory_space<vmem>>, %arg5: memref<8x128xf32, #tpu.memory_space<vmem>>) attributes {dimension_semantics = [#tpu.dimension_semantics<parallel>, #tpu.dimension_semantics<parallel>], iteration_bounds = array<i64: 1, 2>, scalar_prefetch = 0 : i64, scratch_operands = 0 : i64, tpu.core_type = #tpu.core_type<tc>, window_params = [{transform_indices = @transform_0, window_bounds = array<i64: 128, 2048>}, {transform_indices = @transform_1, window_bounds = array<i64: 2048, 128>}, {transform_indices = @transform_2, window_bounds = array<i64: 128, 128>}, {transform_indices = @transform_3, window_bounds = array<i64: 8, 128>}]} {
    %c0 = arith.constant 0 : index
    %c0_0 = arith.constant 0 : index
    %0 = vector.load %arg2[%c0, %c0_0] : memref<128x2048xbf16, #tpu.memory_space<vmem>>, vector<128x2048xbf16>
    %c0_1 = arith.constant 0 : index
    %c0_2 = arith.constant 0 : index
    %1 = vector.load %arg3[%c0_1, %c0_2] : memref<2048x128xbf16, #tpu.memory_space<vmem>>, vector<2048x128xbf16>
    %cst = arith.constant dense<0.000000e+00> : vector<128x128xf32>
    %2 = tpu.matmul %0, %1, %cst {dimension_numbers = #tpu.dot_dimension_numbers<[1], [0], [0], [1], [0, 0, 1, 1], [], []>} : vector<128x2048xbf16>, vector<2048x128xbf16>, vector<128x128xf32> -> vector<128x128xf32>
    %3 = arith.truncf %2 : vector<128x128xf32> to vector<128x128xbf16>
    %c0_3 = arith.constant 0 : index
    %c0_4 = arith.constant 0 : index
    %4 = vector.load %arg4[%c0_3, %c0_4] : memref<128x128xbf16, #tpu.memory_space<vmem>>, vector<128x128xbf16>
    tpu.vector_store %arg4[%c0_3, %c0_4], %3 {strides = array<i32>} : memref<128x128xbf16, #tpu.memory_space<vmem>>, vector<128x128xbf16>,
    %cst_5 = arith.constant dense<0.000000e+00> : vector<128xf32>
    %5 = vector.multi_reduction <add>, %2, %cst_5 [0] : vector<128x128xf32> to vector<128xf32>
    %6 = vector.shape_cast %5 : vector<128xf32> to vector<1x128xf32>
    %7 = arith.mulf %2, %2 : vector<128x128xf32>
    %cst_6 = arith.constant dense<0.000000e+00> : vector<128xf32>
    %8 = vector.multi_reduction <add>, %7, %cst_6 [0] : vector<128x128xf32> to vector<128xf32>
    %9 = vector.shape_cast %8 : vector<128xf32> to vector<1x128xf32>
    %10 = tpu.iota {dimensions = array<i32: 0>} : vector<8x128xi32>
    %c0_i32 = arith.constant 0 : i32
    %11 = vector.broadcast %c0_i32 : i32 to vector<8x128xi32>
    %12 = arith.cmpi eq, %10, %11 : vector<8x128xi32>
    %c1_i32 = arith.constant 1 : i32
    %13 = vector.broadcast %c1_i32 : i32 to vector<8x128xi32>
    %14 = arith.cmpi eq, %10, %13 : vector<8x128xi32>
    %cst_7 = arith.constant 0.000000e+00 : f32
    %15 = vector.shape_cast %9 : vector<1x128xf32> to vector<1x128xf32>
    %16 = vector.broadcast %15 : vector<1x128xf32> to vector<8x128xf32>
    %17 = vector.broadcast %cst_7 : f32 to vector<8x128xf32>
    %18 = arith.select %14, %16, %17 : vector<8x128xi1>, vector<8x128xf32>
    %19 = vector.shape_cast %6 : vector<1x128xf32> to vector<1x128xf32>
    %20 = vector.broadcast %19 : vector<1x128xf32> to vector<8x128xf32>
    %21 = arith.select %12, %20, %18 : vector<8x128xi1>, vector<8x128xf32>
    %c0_8 = arith.constant 0 : index
    %c0_9 = arith.constant 0 : index
    %22 = vector.load %arg5[%c0_8, %c0_9] : memref<8x128xf32, #tpu.memory_space<vmem>>, vector<8x128xf32>
    tpu.vector_store %arg5[%c0_8, %c0_9], %21 {strides = array<i32>} : memref<8x128xf32, #tpu.memory_space<vmem>>, vector<8x128xf32>,
    return
  }
  func.func @transform_0(%arg0: i32, %arg1: i32) -> (i32, i32) {
    %c0_i32 = arith.constant 0 : i32
    %c0_i32_0 = arith.constant 0 : i32
    return %arg0, %c0_i32 : i32, i32
  }
  func.func @transform_1(%arg0: i32, %arg1: i32) -> (i32, i32) {
    %c0_i32 = arith.constant 0 : i32
    %c0_i32_0 = arith.constant 0 : i32
    return %c0_i32, %arg1 : i32, i32
  }
  func.func @transform_2(%arg0: i32, %arg1: i32) -> (i32, i32) {
    %c0_i32 = arith.constant 0 : i32
    return %arg0, %arg1 : i32, i32
  }
  func.func @transform_3(%arg0: i32, %arg1: i32) -> (i32, i32) {
    %c0_i32 = arith.constant 0 : i32
    return %arg0, %arg1 : i32, i32
  }
}

module attributes {stable_mosaic.version = 11 : i64} {
  func.func @_matmul_stats_kernel(%arg0: i32, %arg1: i32, %arg2: memref<32x4096xbf16, #tpu.memory_space<vmem>>, %arg3: memref<4096x128xbf16, #tpu.memory_space<vmem>>, %arg4: memref<32x128xbf16, #tpu.memory_space<vmem>>, %arg5: memref<8x128xf32, #tpu.memory_space<vmem>>) attributes {dimension_semantics = [#tpu.dimension_semantics<parallel>, #tpu.dimension_semantics<parallel>], iteration_bounds = array<i64: 1, 4>, scalar_prefetch = 0 : i64, scratch_operands = 0 : i64, tpu.core_type = #tpu.core_type<tc>, window_params = [{transform_indices = @transform_0, window_bounds = array<i64: 32, 4096>}, {transform_indices = @transform_1, window_bounds = array<i64: 4096, 128>}, {transform_indices = @transform_2, window_bounds = array<i64: 32, 128>}, {transform_indices = @transform_3, window_bounds = array<i64: 8, 128>}]} {
    %c0 = arith.constant 0 : index
    %c0_0 = arith.constant 0 : index
    %0 = vector.load %arg2[%c0, %c0_0] : memref<32x4096xbf16, #tpu.memory_space<vmem>>, vector<32x4096xbf16>
    %c0_1 = arith.constant 0 : index
    %c0_2 = arith.constant 0 : index
    %1 = vector.load %arg3[%c0_1, %c0_2] : memref<4096x128xbf16, #tpu.memory_space<vmem>>, vector<4096x128xbf16>
    %cst = arith.constant dense<0.000000e+00> : vector<32x128xf32>
    %2 = tpu.matmul %0, %1, %cst {dimension_numbers = #tpu.dot_dimension_numbers<[1], [0], [0], [1], [0, 0, 1, 1], [], []>} : vector<32x4096xbf16>, vector<4096x128xbf16>, vector<32x128xf32> -> vector<32x128xf32>
    %3 = arith.truncf %2 : vector<32x128xf32> to vector<32x128xbf16>
    %c0_3 = arith.constant 0 : index
    %c0_4 = arith.constant 0 : index
    %4 = vector.load %arg4[%c0_3, %c0_4] : memref<32x128xbf16, #tpu.memory_space<vmem>>, vector<32x128xbf16>
    tpu.vector_store %arg4[%c0_3, %c0_4], %3 {strides = array<i32>} : memref<32x128xbf16, #tpu.memory_space<vmem>>, vector<32x128xbf16>,
    %cst_5 = arith.constant dense<0.000000e+00> : vector<128xf32>
    %5 = vector.multi_reduction <add>, %2, %cst_5 [0] : vector<32x128xf32> to vector<128xf32>
    %6 = vector.shape_cast %5 : vector<128xf32> to vector<1x128xf32>
    %7 = arith.mulf %2, %2 : vector<32x128xf32>
    %cst_6 = arith.constant dense<0.000000e+00> : vector<128xf32>
    %8 = vector.multi_reduction <add>, %7, %cst_6 [0] : vector<32x128xf32> to vector<128xf32>
    %9 = vector.shape_cast %8 : vector<128xf32> to vector<1x128xf32>
    %10 = tpu.iota {dimensions = array<i32: 0>} : vector<8x128xi32>
    %c0_i32 = arith.constant 0 : i32
    %11 = vector.broadcast %c0_i32 : i32 to vector<8x128xi32>
    %12 = arith.cmpi eq, %10, %11 : vector<8x128xi32>
    %c1_i32 = arith.constant 1 : i32
    %13 = vector.broadcast %c1_i32 : i32 to vector<8x128xi32>
    %14 = arith.cmpi eq, %10, %13 : vector<8x128xi32>
    %cst_7 = arith.constant 0.000000e+00 : f32
    %15 = vector.shape_cast %9 : vector<1x128xf32> to vector<1x128xf32>
    %16 = vector.broadcast %15 : vector<1x128xf32> to vector<8x128xf32>
    %17 = vector.broadcast %cst_7 : f32 to vector<8x128xf32>
    %18 = arith.select %14, %16, %17 : vector<8x128xi1>, vector<8x128xf32>
    %19 = vector.shape_cast %6 : vector<1x128xf32> to vector<1x128xf32>
    %20 = vector.broadcast %19 : vector<1x128xf32> to vector<8x128xf32>
    %21 = arith.select %12, %20, %18 : vector<8x128xi1>, vector<8x128xf32>
    %c0_8 = arith.constant 0 : index
    %c0_9 = arith.constant 0 : index
    %22 = vector.load %arg5[%c0_8, %c0_9] : memref<8x128xf32, #tpu.memory_space<vmem>>, vector<8x128xf32>
    tpu.vector_store %arg5[%c0_8, %c0_9], %21 {strides = array<i32>} : memref<8x128xf32, #tpu.memory_space<vmem>>, vector<8x128xf32>,
    return
  }
  func.func @transform_0(%arg0: i32, %arg1: i32) -> (i32, i32) {
    %c0_i32 = arith.constant 0 : i32
    %c0_i32_0 = arith.constant 0 : i32
    return %arg0, %c0_i32 : i32, i32
  }
  func.func @transform_1(%arg0: i32, %arg1: i32) -> (i32, i32) {
    %c0_i32 = arith.constant 0 : i32
    %c0_i32_0 = arith.constant 0 : i32
    return %c0_i32, %arg1 : i32, i32
  }
  func.func @transform_2(%arg0: i32, %arg1: i32) -> (i32, i32) {
    %c0_i32 = arith.constant 0 : i32
    return %arg0, %arg1 : i32, i32
  }
  func.func @transform_3(%arg0: i32, %arg1: i32) -> (i32, i32) {
    %c0_i32 = arith.constant 0 : i32
    return %arg0, %arg1 : i32, i32
  }
}

module attributes {stable_mosaic.version = 11 : i64} {
  func.func @_matmul_act_kernel(%arg0: i32, %arg1: i32, %arg2: memref<2x8192xbf16, #tpu.memory_space<vmem>>, %arg3: memref<8192x128xbf16, #tpu.memory_space<vmem>>, %arg4: memref<2x128xf32, #tpu.memory_space<vmem>>) attributes {dimension_semantics = [#tpu.dimension_semantics<parallel>, #tpu.dimension_semantics<parallel>], iteration_bounds = array<i64: 1, 1>, scalar_prefetch = 0 : i64, scratch_operands = 0 : i64, tpu.core_type = #tpu.core_type<tc>, window_params = [{transform_indices = @transform_0, window_bounds = array<i64: 2, 8192>}, {transform_indices = @transform_1, window_bounds = array<i64: 8192, 128>}, {transform_indices = @transform_2, window_bounds = array<i64: 2, 128>}]} {
    %c0 = arith.constant 0 : index
    %c0_0 = arith.constant 0 : index
    %0 = vector.load %arg2[%c0, %c0_0] : memref<2x8192xbf16, #tpu.memory_space<vmem>>, vector<2x8192xbf16>
    %c0_1 = arith.constant 0 : index
    %c0_2 = arith.constant 0 : index
    %1 = vector.load %arg3[%c0_1, %c0_2] : memref<8192x128xbf16, #tpu.memory_space<vmem>>, vector<8192x128xbf16>
    %cst = arith.constant dense<0.000000e+00> : vector<2x128xf32>
    %2 = tpu.matmul %0, %1, %cst {dimension_numbers = #tpu.dot_dimension_numbers<[1], [0], [0], [1], [0, 0, 1, 1], [], []>} : vector<2x8192xbf16>, vector<8192x128xbf16>, vector<2x128xf32> -> vector<2x128xf32>
    %cst_3 = arith.constant 0.000000e+00 : f32
    %3 = vector.broadcast %cst_3 : f32 to vector<2x128xf32>
    %4 = arith.subf %3, %2 : vector<2x128xf32>
    %5 = math.exp %4 : vector<2x128xf32>
    %cst_4 = arith.constant 1.000000e+00 : f32
    %6 = vector.broadcast %cst_4 : f32 to vector<2x128xf32>
    %7 = arith.addf %6, %5 : vector<2x128xf32>
    %cst_5 = arith.constant 1.000000e+00 : f32
    %8 = vector.broadcast %cst_5 : f32 to vector<2x128xf32>
    %9 = arith.divf %8, %7 : vector<2x128xf32>
    %c0_6 = arith.constant 0 : index
    %c0_7 = arith.constant 0 : index
    %10 = vector.load %arg4[%c0_6, %c0_7] : memref<2x128xf32, #tpu.memory_space<vmem>>, vector<2x128xf32>
    tpu.vector_store %arg4[%c0_6, %c0_7], %9 {strides = array<i32>} : memref<2x128xf32, #tpu.memory_space<vmem>>, vector<2x128xf32>,
    return
  }
  func.func @transform_0(%arg0: i32, %arg1: i32) -> (i32, i32) {
    %c0_i32 = arith.constant 0 : i32
    %c0_i32_0 = arith.constant 0 : i32
    return %arg0, %c0_i32 : i32, i32
  }
  func.func @transform_1(%arg0: i32, %arg1: i32) -> (i32, i32) {
    %c0_i32 = arith.constant 0 : i32
    %c0_i32_0 = arith.constant 0 : i32
    return %c0_i32, %arg1 : i32, i32
  }
  func.func @transform_2(%arg0: i32, %arg1: i32) -> (i32, i32) {
    %c0_i32 = arith.constant 0 : i32
    return %arg0, %arg1 : i32, i32
  }
}

</mosaic_0001>

<bundles_post_ra>
// kernel: discriminator_forward.5
= control target key start
LH: loop header
LB: loop body
LE: loop exit
PB: predicated region body
PF: predicated region fallthrough
CT: control target
= control target key end

     0   :  { %s3643_s9 = smov 0   ;;  %s3645_s10 = smov 0   ;;  %s3908_s0 = inlined_call_operand.vmem [shape: bf16[2048,64], index: 0, kind: input, shape index: {}]   ;;  %s3909_s1 = inlined_call_operand.vmem [shape: bf16[64,128], index: 1, kind: input, shape index: {}]   ;;  %s3910_s2 = inlined_call_operand.vmem [shape: bf16[2048,128], index: 2, kind: output, shape index: {}]  }
   0x1   :  { %s3647_s11 = smov 0  }
   0x2 LB: > { %s24_s12 = sadd.s32 1, %s3622_s10  ;;  %p2522_p0 = scmp.ge.s32.totalorder %s3626_s11, 1  ;;  %s3626_s11 = sphi %s3647_s11, %s12_s11   ;;  %s3622_s10 = sphi %s3645_s10, %s3912_s10   ;;  %s3618_s9 = sphi %s3643_s9, %s3911_s9  }
   0x3   : > { %p26_p1 = scmp.ge.s32.totalorder %s24_s12, 2  ;;  %p136_p2 = scmp.lt.s32.totalorder %s3626_s11, 3 }
   0x5   : > { %s3914_s12 = smov (%p26_p1, %s24_s12), 0  ;;  %p137_p3 = pnand %p2522_p0, %p136_p2 }
   0x6   : > { %s2523_s15 = sshll.u32 (!%p137_p3), %s3618_s9, 7 }
   0x7   : > { %140 = sbr.rel (%p137_p3) target bundleno = 355 (0x163), region = 28  ;;  %p166_p4 = scmp.lt.s32.totalorder (!%p137_p3), %s2523_s15, 255 }
   0xc   : > { %v3536_v0 = vld [vmem:[%s3909_s1 + $0x18] sm:$0xff]   ;;  %v3537_v1 = vld [vmem:[%s3909_s1 + $0x10] sm:$0xff]   ;;  %s3916_s15 = smov (!%p166_p4, %s2523_s15), 255  ;;  %v3538_v2 = vld [vmem:[%s3909_s1 + $0x8] sm:$0xff]   ;;  %vm665_vm0 = vcmask 523264  }
   0xd   : > { %3368 = vmatprep.subr.bf16.mxu0 %v3536_v0  ;;  %3504 = vmatprep.subr.bf16.mxu1 %v3536_v0  ;;  %s2524_s20 = sshll.u32 %s3916_s15, 2  ;;  %v3539_v3 = vld [vmem:[%s3909_s1] sm:$0xff]  }
   0xe   : > { %3369 = vmatpush3.bf16.msra.mxu0 %v3536_v0  ;;  %3508 = vmatpush3.bf16.msra.mxu1 %v3536_v0  ;;  %s3681_s25 = scalar_lea.vmem %s3908_s0, %s2524_s20  ;;  %s3816_s28 = scalar_lea.vmem %s3910_s2, %s2524_s20 }
   0xf   : > { %3370 = vmatprep.subr.bf16.mxu0 %v3537_v1  ;;  %3505 = vmatprep.subr.bf16.mxu1 %v3537_v1  ;;  %v3540_v4 = vld [vmem:[%s3681_s25] sm:$0xff]   ;;  %v3542_v6 = vld [vmem:[%s3681_s25 + $0x8] sm:$0xff]   ;;  %v3544_v8 = vld [vmem:[%s3681_s25 + $0x10] sm:$0xff]  }
  0x10   : > { %v3541_v5 = vld [vmem:[%s3681_s25 + $0x100] sm:$0xff]   ;;  %3376 = vmatprep.mubr.msk.bf16.mxu0 %vm665_vm0, %v3540_v4  ;;  %v3543_v7 = vld [vmem:[%s3681_s25 + $0x108] sm:$0xff]   ;;  %v3545_v9 = vld [vmem:[%s3681_s25 + $0x110] sm:$0xff]  }
  0x11   : > { %3440 = vmatprep.mubr.msk.bf16.mxu1 %vm665_vm0, %v3541_v5  ;;  %v3546_v10 = vld [vmem:[%s3681_s25 + $0x18] sm:$0xff]   ;;  %v3548_v12 = vld [vmem:[%s3681_s25 + $0x20] sm:$0xff]   ;;  %v3550_v14 = vld [vmem:[%s3681_s25 + $0x28] sm:$0xff]  }
  0x12   : > { %3371 = vmatpush3.bf16.msra.mxu0 %v3537_v1  ;;  %3509 = vmatpush3.bf16.msra.mxu1 %v3537_v1  ;;  %v3547_v11 = vld [vmem:[%s3681_s25 + $0x118] sm:$0xff]   ;;  %v3549_v13 = vld [vmem:[%s3681_s25 + $0x120] sm:$0xff]   ;;  %v3551_v15 = vld [vmem:[%s3681_s25 + $0x128] sm:$0xff]  }
  0x13   : > { %3372 = vmatprep.subr.bf16.mxu0 %v3538_v2  ;;  %3506 = vmatprep.subr.bf16.mxu1 %v3538_v2  ;;  %v3552_v16 = vld [vmem:[%s3681_s25 + $0x30] sm:$0xff]   ;;  %v3554_v18 = vld [vmem:[%s3681_s25 + $0x38] sm:$0xff]   ;;  %v3556_v20 = vld [vmem:[%s3681_s25 + $0x40] sm:$0xff]  }
  0x14   : > { %v3553_v17 = vld [vmem:[%s3681_s25 + $0x130] sm:$0xff]   ;;  %v3555_v19 = vld [vmem:[%s3681_s25 + $0x138] sm:$0xff]   ;;  %v3557_v21 = vld [vmem:[%s3681_s25 + $0x140] sm:$0xff]  }
  0x15   : > { %v3558_v22 = vld [vmem:[%s3681_s25 + $0x48] sm:$0xff]   ;;  %v3560_v24 = vld [vmem:[%s3681_s25 + $0x50] sm:$0xff]   ;;  %v3562_v26 = vld [vmem:[%s3681_s25 + $0x58] sm:$0xff]  }
  0x16   : > { %3373 = vmatpush3.bf16.msra.mxu0 %v3538_v2  ;;  %3510 = vmatpush3.bf16.msra.mxu1 %v3538_v2  ;;  %v3559_v23 = vld [vmem:[%s3681_s25 + $0x148] sm:$0xff]   ;;  %v3561_v25 = vld [vmem:[%s3681_s25 + $0x150] sm:$0xff]   ;;  %v3563_v27 = vld [vmem:[%s3681_s25 + $0x158] sm:$0xff]  }
  0x17   : > { %3374 = vmatprep.subr.bf16.mxu0 %v3539_v3  ;;  %3507 = vmatprep.subr.bf16.mxu1 %v3539_v3  ;;  %v3564_v28 = vld [vmem:[%s3681_s25 + $0x60] sm:$0xff]   ;;  %v3566_v30 = vld [vmem:[%s3681_s25 + $0x68] sm:$0xff]   ;;  %v3568_v32 = vld [vmem:[%s3681_s25 + $0x70] sm:$0xff]  }
  0x18   : > { %v3565_v29 = vld [vmem:[%s3681_s25 + $0x160] sm:$0xff]   ;;  %v3567_v31 = vld [vmem:[%s3681_s25 + $0x168] sm:$0xff]   ;;  %v3569_v33 = vld [vmem:[%s3681_s25 + $0x170] sm:$0xff]  }
  0x19   : > { %v3570_v34 = vld [vmem:[%s3681_s25 + $0x78] sm:$0xff]   ;;  %v3572_v36 = vld [vmem:[%s3681_s25 + $0x80] sm:$0xff]   ;;  %v3574_v38 = vld [vmem:[%s3681_s25 + $0x88] sm:$0xff]  }
  0x1a   : > { %3375 = vmatpush3.bf16.msra.mxu0 %v3539_v3  ;;  %3511 = vmatpush3.bf16.msra.mxu1 %v3539_v3  ;;  %v3571_v35 = vld [vmem:[%s3681_s25 + $0x178] sm:$0xff]   ;;  %v3573_v37 = vld [vmem:[%s3681_s25 + $0x180] sm:$0xff]   ;;  %v3575_v39 = vld [vmem:[%s3681_s25 + $0x188] sm:$0xff]  }
  0x1b   : > { %v3576_v40 = vld [vmem:[%s3681_s25 + $0x90] sm:$0xff]   ;;  %v3578_v42 = vld [vmem:[%s3681_s25 + $0x98] sm:$0xff]   ;;  %v3580_v44 = vld [vmem:[%s3681_s25 + $0xa0] sm:$0xff]  }
  0x1c   : > { %v3577_v41 = vld [vmem:[%s3681_s25 + $0x190] sm:$0xff]   ;;  %v3579_v43 = vld [vmem:[%s3681_s25 + $0x198] sm:$0xff]   ;;  %v3581_v45 = vld [vmem:[%s3681_s25 + $0x1a0] sm:$0xff]  }
  0x1d   : > { %3377 = vmatmul.mubr.msk.bf16.vlgmr.msra.gmra.mxu0 %vm665_vm0, %v3542_v6  ;;  %3441 = vmatmul.mubr.msk.bf16.vlgmr.msra.gmra.mxu1 %vm665_vm0, %v3543_v7  ;;  %v3582_v46 = vld [vmem:[%s3681_s25 + $0xa8] sm:$0xff]   ;;  %v3584_v48 = vld [vmem:[%s3681_s25 + $0xb0] sm:$0xff]   ;;  %v3586_v50 = vld [vmem:[%s3681_s25 + $0xb8] sm:$0xff]  }
  0x1e   : > { %3380 = vmatprep.mubr.msk.bf16.mxu0 %vm665_vm0, %v3544_v8  ;;  %3444 = vmatprep.mubr.msk.bf16.mxu1 %vm665_vm0, %v3545_v9  ;;  %v3583_v47 = vld [vmem:[%s3681_s25 + $0x1a8] sm:$0xff]   ;;  %v3585_v49 = vld [vmem:[%s3681_s25 + $0x1b0] sm:$0xff]   ;;  %v3587_v51 = vld [vmem:[%s3681_s25 + $0x1b8] sm:$0xff]  }
  0x1f   : > { %v3588_v52 = vld [vmem:[%s3681_s25 + $0xc0] sm:$0xff]   ;;  %v3590_v54 = vld [vmem:[%s3681_s25 + $0xc8] sm:$0xff]   ;;  %v3592_v56 = vld [vmem:[%s3681_s25 + $0xd0] sm:$0xff]  }
  0x20   : > { %v3589_v53 = vld [vmem:[%s3681_s25 + $0x1c0] sm:$0xff]   ;;  %v3591_v55 = vld [vmem:[%s3681_s25 + $0x1c8] sm:$0xff]   ;;  %v3593_v57 = vld [vmem:[%s3681_s25 + $0x1d0] sm:$0xff]  }
  0x21   : > { %v3594_v58 = vld [vmem:[%s3681_s25 + $0xd8] sm:$0xff]   ;;  %v3596_v60 = vld [vmem:[%s3681_s25 + $0xe0] sm:$0xff]   ;;  %v3598_v62 = vld [vmem:[%s3681_s25 + $0xe8] sm:$0xff]  }
  0x22   : > { %v3595_v59 = vld [vmem:[%s3681_s25 + $0x1d8] sm:$0xff]   ;;  %v3597_v61 = vld [vmem:[%s3681_s25 + $0x1e0] sm:$0xff]   ;;  %v3599_v63 = vld [vmem:[%s3681_s25 + $0x1e8] sm:$0xff]  }
  0x23   : > { %v3600_v0 = vld [vmem:[%s3681_s25 + $0xf0] sm:$0xff]   ;;  %v3602_v2 = vld [vmem:[%s3681_s25 + $0xf8] sm:$0xff]  }
  0x24   : > { %v3601_v1 = vld [vmem:[%s3681_s25 + $0x1f0] sm:$0xff]   ;;  %v3603_v3 = vld [vmem:[%s3681_s25 + $0x1f8] sm:$0xff]  }
  0x25   : > { %3381 = vmatmul.mubr.msk.bf16.gmra.mxu0 %vm665_vm0, %v3546_v10  ;;  %3445 = vmatmul.mubr.msk.bf16.gmra.mxu1 %vm665_vm0, %v3547_v11 }
  0x26   : > { %3384 = vmatprep.mubr.msk.bf16.mxu0 %vm665_vm0, %v3548_v12  ;;  %3448 = vmatprep.mubr.msk.bf16.mxu1 %vm665_vm0, %v3549_v13 }
  0x2d   : > { %3385 = vmatmul.mubr.msk.bf16.gmra.mxu0 %vm665_vm0, %v3550_v14  ;;  %3449 = vmatmul.mubr.msk.bf16.gmra.mxu1 %vm665_vm0, %v3551_v15 }
  0x2e   : > { %3388 = vmatprep.mubr.msk.bf16.mxu0 %vm665_vm0, %v3552_v16  ;;  %3452 = vmatprep.mubr.msk.bf16.mxu1 %vm665_vm0, %v3553_v17 }
  0x35   : > { %3389 = vmatmul.mubr.msk.bf16.gmra.mxu0 %vm665_vm0, %v3554_v18  ;;  %3453 = vmatmul.mubr.msk.bf16.gmra.mxu1 %vm665_vm0, %v3555_v19 }
  0x36   : > { %3392 = vmatprep.mubr.msk.bf16.mxu0 %vm665_vm0, %v3556_v20  ;;  %3456 = vmatprep.mubr.msk.bf16.mxu1 %vm665_vm0, %v3557_v21 }
  0x3d   : > { %3393 = vmatmul.mubr.msk.bf16.gmra.mxu0 %vm665_vm0, %v3558_v22  ;;  %3457 = vmatmul.mubr.msk.bf16.gmra.mxu1 %vm665_vm0, %v3559_v23 }
  0x3e   : > { %3396 = vmatprep.mubr.msk.bf16.mxu0 %vm665_vm0, %v3560_v24  ;;  %3460 = vmatprep.mubr.msk.bf16.mxu1 %vm665_vm0, %v3561_v25 }
  0x45   : > { %3397 = vmatmul.mubr.msk.bf16.gmra.mxu0 %vm665_vm0, %v3562_v26  ;;  %3461 = vmatmul.mubr.msk.bf16.gmra.mxu1 %vm665_vm0, %v3563_v27 }
  0x46   : > { %3400 = vmatprep.mubr.msk.bf16.mxu0 %vm665_vm0, %v3564_v28  ;;  %3464 = vmatprep.mubr.msk.bf16.mxu1 %vm665_vm0, %v3565_v29 }
  0x4d   : > { %3401 = vmatmul.mubr.msk.bf16.gmra.mxu0 %vm665_vm0, %v3566_v30  ;;  %3465 = vmatmul.mubr.msk.bf16.gmra.mxu1 %vm665_vm0, %v3567_v31 }
  0x4e   : > { %3404 = vmatprep.mubr.msk.bf16.mxu0 %vm665_vm0, %v3568_v32  ;;  %3468 = vmatprep.mubr.msk.bf16.mxu1 %vm665_vm0, %v3569_v33 }
  0x55   : > { %3405 = vmatmul.mubr.msk.bf16.gmra.mxu0 %vm665_vm0, %v3570_v34  ;;  %3469 = vmatmul.mubr.msk.bf16.gmra.mxu1 %vm665_vm0, %v3571_v35 }
  0x56   : > { %3408 = vmatprep.mubr.msk.bf16.mxu0 %vm665_vm0, %v3572_v36  ;;  %3472 = vmatprep.mubr.msk.bf16.mxu1 %vm665_vm0, %v3573_v37 }
  0x5d   : > { %3409 = vmatmul.mubr.msk.bf16.gmra.mxu0 %vm665_vm0, %v3574_v38  ;;  %3473 = vmatmul.mubr.msk.bf16.gmra.mxu1 %vm665_vm0, %v3575_v39 }
  0x5e   : > { %3412 = vmatprep.mubr.msk.bf16.mxu0 %vm665_vm0, %v3576_v40  ;;  %3476 = vmatprep.mubr.msk.bf16.mxu1 %vm665_vm0, %v3577_v41 }
  0x65   : > { %3413 = vmatmul.mubr.msk.bf16.gmra.mxu0 %vm665_vm0, %v3578_v42  ;;  %3477 = vmatmul.mubr.msk.bf16.gmra.mxu1 %vm665_vm0, %v3579_v43 }
  0x66   : > { %3416 = vmatprep.mubr.msk.bf16.mxu0 %vm665_vm0, %v3580_v44  ;;  %3480 = vmatprep.mubr.msk.bf16.mxu1 %vm665_vm0, %v3581_v45 }
  0x6d   : > { %3417 = vmatmul.mubr.msk.bf16.gmra.mxu0 %vm665_vm0, %v3582_v46  ;;  %3481 = vmatmul.mubr.msk.bf16.gmra.mxu1 %vm665_vm0, %v3583_v47 }
  0x6e   : > { %3420 = vmatprep.mubr.msk.bf16.mxu0 %vm665_vm0, %v3584_v48  ;;  %3484 = vmatprep.mubr.msk.bf16.mxu1 %vm665_vm0, %v3585_v49 }
  0x75   : > { %3421 = vmatmul.mubr.msk.bf16.gmra.mxu0 %vm665_vm0, %v3586_v50  ;;  %3485 = vmatmul.mubr.msk.bf16.gmra.mxu1 %vm665_vm0, %v3587_v51 }
  0x76   : > { %3424 = vmatprep.mubr.msk.bf16.mxu0 %vm665_vm0, %v3588_v52  ;;  %3488 = vmatprep.mubr.msk.bf16.mxu1 %vm665_vm0, %v3589_v53 }
  0x7d   : > { %3425 = vmatmul.mubr.msk.bf16.gmra.mxu0 %vm665_vm0, %v3590_v54  ;;  %3489 = vmatmul.mubr.msk.bf16.gmra.mxu1 %vm665_vm0, %v3591_v55 }
  0x7e   : > { %3428 = vmatprep.mubr.msk.bf16.mxu0 %vm665_vm0, %v3592_v56  ;;  %3492 = vmatprep.mubr.msk.bf16.mxu1 %vm665_vm0, %v3593_v57 }
  0x85   : > { %3429 = vmatmul.mubr.msk.bf16.gmra.mxu0 %vm665_vm0, %v3594_v58  ;;  %3493 = vmatmul.mubr.msk.bf16.gmra.mxu1 %vm665_vm0, %v3595_v59 }
  0x86   : > { %3432 = vmatprep.mubr.msk.bf16.mxu0 %vm665_vm0, %v3596_v60  ;;  %3496 = vmatprep.mubr.msk.bf16.mxu1 %vm665_vm0, %v3597_v61 }
  0x8d   : > { %3433 = vmatmul.mubr.msk.bf16.gmra.mxu0 %vm665_vm0, %v3598_v62  ;;  %3497 = vmatmul.mubr.msk.bf16.gmra.mxu1 %vm665_vm0, %v3599_v63 }
  0x8e   : > { %3436 = vmatprep.mubr.msk.bf16.mxu0 %vm665_vm0, %v3600_v0  ;;  %3500 = vmatprep.mubr.msk.bf16.mxu1 %vm665_vm0, %v3601_v1 }
  0x95   : > { %3437 = vmatmul.mubr.msk.bf16.gmra.mxu0 %vm665_vm0, %v3602_v2  ;;  %3501 = vmatmul.mubr.msk.bf16.gmra.mxu1 %vm665_vm0, %v3603_v3 }
  0xdd   : > { %v3378_v4 = vpop.f32.mrf.mxu0  ;;  %v3442_v5 = vpop.f32.mrf.mxu1 }
  0xde   : > { %vm1405_vm1 = vcmp.ge.f32.partialorder %v3378_v4, 0.0  ;;  %v1533_v6 = vmul.f32 0.2, %v3378_v4  ;;  %v1597_v7 = vmul.f32 0.2, %v3442_v5  ;;  %vm1469_vm2 = vcmp.ge.f32.partialorder %v3442_v5, 0.0 }
  0xdf   : > { %v892_v8 = vpop.f32.mrf.mxu0  ;;  %v1148_v9 = vpop.f32.mrf.mxu1 }
  0xe0   : > { %v1661_v10 = vsel %vm1405_vm1, %v3378_v4, %v1533_v6  ;;  %v1531_v11 = vmul.f32 0.2, %v892_v8  ;;  %vm1403_vm3 = vcmp.ge.f32.partialorder %v892_v8, 0.0  ;;  %v1725_v15 = vsel %vm1469_vm2, %v3442_v5, %v1597_v7 }
  0xe1   : > { %v3379_v12 = vpop.f32.mrf.mxu0  ;;  %v3443_v13 = vpop.f32.mrf.mxu1  ;;  %vm1467_vm6 = vcmp.ge.f32.partialorder %v1148_v9, 0.0  ;;  %v1595_v16 = vmul.f32 0.2, %v1148_v9 }
  0xe2   : > { %vm1406_vm4 = vcmp.ge.f32.partialorder %v3379_v12, 0.0  ;;  %v1534_v14 = vmul.f32 0.2, %v3379_v12  ;;  %vm1470_vm5 = vcmp.ge.f32.partialorder %v3443_v13, 0.0  ;;  %v1598_v17 = vmul.f32 0.2, %v3443_v13 }
  0xe3   : > { %v895_v18 = vpop.f32.mrf.mxu0  ;;  %v1151_v19 = vpop.f32.mrf.mxu1  ;;  %v1659_v22 = vsel %vm1403_vm3, %v892_v8, %v1531_v11  ;;  %v1723_v31 = vsel %vm1467_vm6, %v1148_v9, %v1595_v16 }
  0xe4   : > { %v1662_v20 = vsel %vm1406_vm4, %v3379_v12, %v1534_v14  ;;  %vm1404_vm7 = vcmp.ge.f32.partialorder %v895_v18, 0.0  ;;  %v1532_v21 = vmul.f32 0.2, %v895_v18  ;;  %vm1468_vm8 = vcmp.ge.f32.partialorder %v1151_v19, 0.0 }
  0xe5   : > { %v2925_v23 = vpack.c.bf16 %v1662_v20, %v1661_v10  ;;  %v1726_v24 = vsel %vm1470_vm5, %v3443_v13, %v1598_v17  ;;  %v1596_v25 = vmul.f32 0.2, %v1151_v19  ;;  %v3382_v26 = vpop.f32.mrf.mxu0  ;;  %v3446_v27 = vpop.f32.mrf.mxu1 }
  0xe6   : > { %v3085_v28 = vpack.c.bf16 %v1726_v24, %v1725_v15  ;;  %v1660_v29 = vsel %vm1404_vm7, %v895_v18, %v1532_v21  ;;  %vm1409_vm9 = vcmp.ge.f32.partialorder %v3382_v26, 0.0  ;;  %v1537_v30 = vmul.f32 0.2, %v3382_v26 }
  0xe7   : > { %3237 = vst [vmem:[%s3816_s28 + $0x8] sm:$0xff] %v2925_v23   ;;  %v2920_v32 = vpack.c.bf16 %v1660_v29, %v1659_v22  ;;  %v1724_v33 = vsel %vm1468_vm8, %v1151_v19, %v1596_v25  ;;  %v1601_v34 = vmul.f32 0.2, %v3446_v27  ;;  %v908_v35 = vpop.f32.mrf.mxu0  ;;  %v1164_v36 = vpop.f32.mrf.mxu1  ;;  %vm1473_vm10 = vcmp.ge.f32.partialorder %v3446_v27, 0.0 }
  0xe8   : > { %3269 = vst [vmem:[%s3816_s28 + $0x108] sm:$0xff] %v3085_v28   ;;  %v3080_v37 = vpack.c.bf16 %v1724_v33, %v1723_v31  ;;  %v1665_v38 = vsel %vm1409_vm9, %v3382_v26, %v1537_v30  ;;  %v1535_v39 = vmul.f32 0.2, %v908_v35  ;;  %vm1407_vm11 = vcmp.ge.f32.partialorder %v908_v35, 0.0 }
  0xe9   : > { %2921 = vst [vmem:[%s3816_s28] sm:$0xff] %v2920_v32   ;;  %v3383_v40 = vpop.f32.mrf.mxu0  ;;  %v3447_v41 = vpop.f32.mrf.mxu1  ;;  %v1729_v43 = vsel %vm1473_vm10, %v3446_v27, %v1601_v34  ;;  %vm1471_vm14 = vcmp.ge.f32.partialorder %v1164_v36, 0.0  ;;  %v1599_v44 = vmul.f32 0.2, %v1164_v36 }
  0xea   : > { %3268 = vst [vmem:[%s3816_s28 + $0x100] sm:$0xff] %v3080_v37   ;;  %vm1410_vm12 = vcmp.ge.f32.partialorder %v3383_v40, 0.0  ;;  %v1538_v42 = vmul.f32 0.2, %v3383_v40  ;;  %vm1474_vm13 = vcmp.ge.f32.partialorder %v3447_v41, 0.0  ;;  %v1663_v50 = vsel %vm1407_vm11, %v908_v35, %v1535_v39 }
  0xeb   : > { %v1602_v45 = vmul.f32 0.2, %v3447_v41  ;;  %v911_v46 = vpop.f32.mrf.mxu0  ;;  %v1167_v47 = vpop.f32.mrf.mxu1  ;;  %v1727_v59 = vsel %vm1471_vm14, %v1164_v36, %v1599_v44 }
  0xec   : > { %v1666_v48 = vsel %vm1410_vm12, %v3383_v40, %v1538_v42  ;;  %vm1408_vm15 = vcmp.ge.f32.partialorder %v911_v46, 0.0  ;;  %v1536_v49 = vmul.f32 0.2, %v911_v46  ;;  %vm1472_vm0 = vcmp.ge.f32.partialorder %v1167_v47, 0.0 }
  0xed   : > { %v2935_v51 = vpack.c.bf16 %v1666_v48, %v1665_v38  ;;  %v1730_v52 = vsel %vm1474_vm13, %v3447_v41, %v1602_v45  ;;  %v1600_v53 = vmul.f32 0.2, %v1167_v47  ;;  %v3386_v54 = vpop.f32.mrf.mxu0  ;;  %v3450_v55 = vpop.f32.mrf.mxu1 }
  0xee   : > { %v3095_v56 = vpack.c.bf16 %v1730_v52, %v1729_v43  ;;  %v1664_v57 = vsel %vm1408_vm15, %v911_v46, %v1536_v49  ;;  %vm1413_vm1 = vcmp.ge.f32.partialorder %v3386_v54, 0.0  ;;  %v1541_v58 = vmul.f32 0.2, %v3386_v54 }
  0xef   : > { %3239 = vst [vmem:[%s3816_s28 + $0x18] sm:$0xff] %v2935_v51   ;;  %v2930_v60 = vpack.c.bf16 %v1664_v57, %v1663_v50  ;;  %v1728_v61 = vsel %vm1472_vm0, %v1167_v47, %v1600_v53  ;;  %v1605_v62 = vmul.f32 0.2, %v3450_v55  ;;  %v924_v63 = vpop.f32.mrf.mxu0  ;;  %v1180_v0 = vpop.f32.mrf.mxu1  ;;  %vm1477_vm2 = vcmp.ge.f32.partialorder %v3450_v55, 0.0 }
  0xf0   : > { %3271 = vst [vmem:[%s3816_s28 + $0x118] sm:$0xff] %v3095_v56   ;;  %v3090_v1 = vpack.c.bf16 %v1728_v61, %v1727_v59  ;;  %v1669_v2 = vsel %vm1413_vm1, %v3386_v54, %v1541_v58  ;;  %v1539_v3 = vmul.f32 0.2, %v924_v63  ;;  %vm1411_vm3 = vcmp.ge.f32.partialorder %v924_v63, 0.0 }
  0xf1   : > { %3238 = vst [vmem:[%s3816_s28 + $0x10] sm:$0xff] %v2930_v60   ;;  %v3387_v4 = vpop.f32.mrf.mxu0  ;;  %v3451_v5 = vpop.f32.mrf.mxu1  ;;  %v1733_v7 = vsel %vm1477_vm2, %v3450_v55, %v1605_v62  ;;  %vm1475_vm6 = vcmp.ge.f32.partialorder %v1180_v0, 0.0  ;;  %v1603_v8 = vmul.f32 0.2, %v1180_v0 }
  0xf2   : > { %3270 = vst [vmem:[%s3816_s28 + $0x110] sm:$0xff] %v3090_v1   ;;  %vm1414_vm4 = vcmp.ge.f32.partialorder %v3387_v4, 0.0  ;;  %v1542_v6 = vmul.f32 0.2, %v3387_v4  ;;  %vm1478_vm5 = vcmp.ge.f32.partialorder %v3451_v5, 0.0  ;;  %v1667_v14 = vsel %vm1411_vm3, %v924_v63, %v1539_v3 }
  0xf3   : > { %v1606_v9 = vmul.f32 0.2, %v3451_v5  ;;  %v927_v10 = vpop.f32.mrf.mxu0  ;;  %v1183_v11 = vpop.f32.mrf.mxu1  ;;  %v1731_v23 = vsel %vm1475_vm6, %v1180_v0, %v1603_v8 }
  0xf4   : > { %v1670_v12 = vsel %vm1414_vm4, %v3387_v4, %v1542_v6  ;;  %vm1412_vm7 = vcmp.ge.f32.partialorder %v927_v10, 0.0  ;;  %v1540_v13 = vmul.f32 0.2, %v927_v10  ;;  %vm1476_vm8 = vcmp.ge.f32.partialorder %v1183_v11, 0.0 }
  0xf5   : > { %v2945_v15 = vpack.c.bf16 %v1670_v12, %v1669_v2  ;;  %v1734_v16 = vsel %vm1478_vm5, %v3451_v5, %v1606_v9  ;;  %v1604_v17 = vmul.f32 0.2, %v1183_v11  ;;  %v3390_v18 = vpop.f32.mrf.mxu0  ;;  %v3454_v19 = vpop.f32.mrf.mxu1 }
  0xf6   : > { %v3105_v20 = vpack.c.bf16 %v1734_v16, %v1733_v7  ;;  %v1668_v21 = vsel %vm1412_vm7, %v927_v10, %v1540_v13  ;;  %vm1417_vm9 = vcmp.ge.f32.partialorder %v3390_v18, 0.0  ;;  %v1545_v22 = vmul.f32 0.2, %v3390_v18 }
  0xf7   : > { %3241 = vst [vmem:[%s3816_s28 + $0x28] sm:$0xff] %v2945_v15   ;;  %v2940_v24 = vpack.c.bf16 %v1668_v21, %v1667_v14  ;;  %v1732_v25 = vsel %vm1476_vm8, %v1183_v11, %v1604_v17  ;;  %v1609_v26 = vmul.f32 0.2, %v3454_v19  ;;  %v940_v27 = vpop.f32.mrf.mxu0  ;;  %v1196_v28 = vpop.f32.mrf.mxu1  ;;  %vm1481_vm10 = vcmp.ge.f32.partialorder %v3454_v19, 0.0 }
  0xf8   : > { %3273 = vst [vmem:[%s3816_s28 + $0x128] sm:$0xff] %v3105_v20   ;;  %v3100_v29 = vpack.c.bf16 %v1732_v25, %v1731_v23  ;;  %v1673_v30 = vsel %vm1417_vm9, %v3390_v18, %v1545_v22  ;;  %v1543_v31 = vmul.f32 0.2, %v940_v27  ;;  %vm1415_vm11 = vcmp.ge.f32.partialorder %v940_v27, 0.0 }
  0xf9   : > { %3240 = vst [vmem:[%s3816_s28 + $0x20] sm:$0xff] %v2940_v24   ;;  %v3391_v32 = vpop.f32.mrf.mxu0  ;;  %v3455_v33 = vpop.f32.mrf.mxu1  ;;  %v1737_v35 = vsel %vm1481_vm10, %v3454_v19, %v1609_v26  ;;  %vm1479_vm14 = vcmp.ge.f32.partialorder %v1196_v28, 0.0  ;;  %v1607_v36 = vmul.f32 0.2, %v1196_v28 }
  0xfa   : > { %3272 = vst [vmem:[%s3816_s28 + $0x120] sm:$0xff] %v3100_v29   ;;  %vm1418_vm12 = vcmp.ge.f32.partialorder %v3391_v32, 0.0  ;;  %v1546_v34 = vmul.f32 0.2, %v3391_v32  ;;  %vm1482_vm13 = vcmp.ge.f32.partialorder %v3455_v33, 0.0  ;;  %v1671_v42 = vsel %vm1415_vm11, %v940_v27, %v1543_v31 }
  0xfb   : > { %v1610_v37 = vmul.f32 0.2, %v3455_v33  ;;  %v943_v38 = vpop.f32.mrf.mxu0  ;;  %v1199_v39 = vpop.f32.mrf.mxu1  ;;  %v1735_v51 = vsel %vm1479_vm14, %v1196_v28, %v1607_v36 }
  0xfc   : > { %v1674_v40 = vsel %vm1418_vm12, %v3391_v32, %v1546_v34  ;;  %vm1416_vm15 = vcmp.ge.f32.partialorder %v943_v38, 0.0  ;;  %v1544_v41 = vmul.f32 0.2, %v943_v38  ;;  %vm1480_vm0 = vcmp.ge.f32.partialorder %v1199_v39, 0.0 }
  0xfd   : > { %v2955_v43 = vpack.c.bf16 %v1674_v40, %v1673_v30  ;;  %v1738_v44 = vsel %vm1482_vm13, %v3455_v33, %v1610_v37  ;;  %v1608_v45 = vmul.f32 0.2, %v1199_v39  ;;  %v3394_v46 = vpop.f32.mrf.mxu0  ;;  %v3458_v47 = vpop.f32.mrf.mxu1 }
  0xfe   : > { %v3115_v48 = vpack.c.bf16 %v1738_v44, %v1737_v35  ;;  %v1672_v49 = vsel %vm1416_vm15, %v943_v38, %v1544_v41  ;;  %vm1421_vm1 = vcmp.ge.f32.partialorder %v3394_v46, 0.0  ;;  %v1549_v50 = vmul.f32 0.2, %v3394_v46 }
  0xff   : > { %3243 = vst [vmem:[%s3816_s28 + $0x38] sm:$0xff] %v2955_v43   ;;  %v2950_v52 = vpack.c.bf16 %v1672_v49, %v1671_v42  ;;  %v1736_v53 = vsel %vm1480_vm0, %v1199_v39, %v1608_v45  ;;  %v1613_v54 = vmul.f32 0.2, %v3458_v47  ;;  %v956_v55 = vpop.f32.mrf.mxu0  ;;  %v1212_v56 = vpop.f32.mrf.mxu1  ;;  %vm1485_vm2 = vcmp.ge.f32.partialorder %v3458_v47, 0.0 }
 0x100   : > { %3275 = vst [vmem:[%s3816_s28 + $0x138] sm:$0xff] %v3115_v48   ;;  %v3110_v57 = vpack.c.bf16 %v1736_v53, %v1735_v51  ;;  %v1677_v58 = vsel %vm1421_vm1, %v3394_v46, %v1549_v50  ;;  %v1547_v59 = vmul.f32 0.2, %v956_v55  ;;  %vm1419_vm3 = vcmp.ge.f32.partialorder %v956_v55, 0.0 }
 0x101   : > { %3242 = vst [vmem:[%s3816_s28 + $0x30] sm:$0xff] %v2950_v52   ;;  %v3395_v60 = vpop.f32.mrf.mxu0  ;;  %v3459_v61 = vpop.f32.mrf.mxu1  ;;  %v1741_v63 = vsel %vm1485_vm2, %v3458_v47, %v1613_v54  ;;  %vm1483_vm6 = vcmp.ge.f32.partialorder %v1212_v56, 0.0  ;;  %v1611_v0 = vmul.f32 0.2, %v1212_v56 }
 0x102   : > { %3274 = vst [vmem:[%s3816_s28 + $0x130] sm:$0xff] %v3110_v57   ;;  %vm1422_vm4 = vcmp.ge.f32.partialorder %v3395_v60, 0.0  ;;  %v1550_v62 = vmul.f32 0.2, %v3395_v60  ;;  %vm1486_vm5 = vcmp.ge.f32.partialorder %v3459_v61, 0.0  ;;  %v1675_v6 = vsel %vm1419_vm3, %v956_v55, %v1547_v59 }
 0x103   : > { %v1614_v1 = vmul.f32 0.2, %v3459_v61  ;;  %v959_v2 = vpop.f32.mrf.mxu0  ;;  %v1215_v3 = vpop.f32.mrf.mxu1  ;;  %v1739_v15 = vsel %vm1483_vm6, %v1212_v56, %v1611_v0 }
 0x104   : > { %v1678_v4 = vsel %vm1422_vm4, %v3395_v60, %v1550_v62  ;;  %vm1420_vm7 = vcmp.ge.f32.partialorder %v959_v2, 0.0  ;;  %v1548_v5 = vmul.f32 0.2, %v959_v2  ;;  %vm1484_vm8 = vcmp.ge.f32.partialorder %v1215_v3, 0.0 }
 0x105   : > { %v2965_v7 = vpack.c.bf16 %v1678_v4, %v1677_v58  ;;  %v1742_v8 = vsel %vm1486_vm5, %v3459_v61, %v1614_v1  ;;  %v1612_v9 = vmul.f32 0.2, %v1215_v3  ;;  %v3398_v10 = vpop.f32.mrf.mxu0  ;;  %v3462_v11 = vpop.f32.mrf.mxu1 }
 0x106   : > { %v3125_v12 = vpack.c.bf16 %v1742_v8, %v1741_v63  ;;  %v1676_v13 = vsel %vm1420_vm7, %v959_v2, %v1548_v5  ;;  %vm1425_vm9 = vcmp.ge.f32.partialorder %v3398_v10, 0.0  ;;  %v1553_v14 = vmul.f32 0.2, %v3398_v10 }
 0x107   : > { %3245 = vst [vmem:[%s3816_s28 + $0x48] sm:$0xff] %v2965_v7   ;;  %v2960_v16 = vpack.c.bf16 %v1676_v13, %v1675_v6  ;;  %v1740_v17 = vsel %vm1484_vm8, %v1215_v3, %v1612_v9  ;;  %v1617_v18 = vmul.f32 0.2, %v3462_v11  ;;  %v972_v19 = vpop.f32.mrf.mxu0  ;;  %v1228_v20 = vpop.f32.mrf.mxu1  ;;  %vm1489_vm10 = vcmp.ge.f32.partialorder %v3462_v11, 0.0 }
 0x108   : > { %3277 = vst [vmem:[%s3816_s28 + $0x148] sm:$0xff] %v3125_v12   ;;  %v3120_v21 = vpack.c.bf16 %v1740_v17, %v1739_v15  ;;  %v1681_v22 = vsel %vm1425_vm9, %v3398_v10, %v1553_v14  ;;  %v1551_v23 = vmul.f32 0.2, %v972_v19  ;;  %vm1423_vm11 = vcmp.ge.f32.partialorder %v972_v19, 0.0 }
 0x109   : > { %3244 = vst [vmem:[%s3816_s28 + $0x40] sm:$0xff] %v2960_v16   ;;  %v3399_v24 = vpop.f32.mrf.mxu0  ;;  %v3463_v25 = vpop.f32.mrf.mxu1  ;;  %v1745_v27 = vsel %vm1489_vm10, %v3462_v11, %v1617_v18  ;;  %vm1487_vm14 = vcmp.ge.f32.partialorder %v1228_v20, 0.0  ;;  %v1615_v28 = vmul.f32 0.2, %v1228_v20 }
 0x10a   : > { %3276 = vst [vmem:[%s3816_s28 + $0x140] sm:$0xff] %v3120_v21   ;;  %vm1426_vm12 = vcmp.ge.f32.partialorder %v3399_v24, 0.0  ;;  %v1554_v26 = vmul.f32 0.2, %v3399_v24  ;;  %vm1490_vm13 = vcmp.ge.f32.partialorder %v3463_v25, 0.0  ;;  %v1679_v34 = vsel %vm1423_vm11, %v972_v19, %v1551_v23 }
 0x10b   : > { %v1618_v29 = vmul.f32 0.2, %v3463_v25  ;;  %v975_v30 = vpop.f32.mrf.mxu0  ;;  %v1231_v31 = vpop.f32.mrf.mxu1  ;;  %v1743_v43 = vsel %vm1487_vm14, %v1228_v20, %v1615_v28 }
 0x10c   : > { %v1682_v32 = vsel %vm1426_vm12, %v3399_v24, %v1554_v26  ;;  %vm1424_vm15 = vcmp.ge.f32.partialorder %v975_v30, 0.0  ;;  %v1552_v33 = vmul.f32 0.2, %v975_v30  ;;  %vm1488_vm0 = vcmp.ge.f32.partialorder %v1231_v31, 0.0 }
 0x10d   : > { %v2975_v35 = vpack.c.bf16 %v1682_v32, %v1681_v22  ;;  %v1746_v36 = vsel %vm1490_vm13, %v3463_v25, %v1618_v29  ;;  %v1616_v37 = vmul.f32 0.2, %v1231_v31  ;;  %v3402_v38 = vpop.f32.mrf.mxu0  ;;  %v3466_v39 = vpop.f32.mrf.mxu1 }
 0x10e   : > { %v3135_v40 = vpack.c.bf16 %v1746_v36, %v1745_v27  ;;  %v1680_v41 = vsel %vm1424_vm15, %v975_v30, %v1552_v33  ;;  %vm1429_vm1 = vcmp.ge.f32.partialorder %v3402_v38, 0.0  ;;  %v1557_v42 = vmul.f32 0.2, %v3402_v38 }
 0x10f   : > { %3247 = vst [vmem:[%s3816_s28 + $0x58] sm:$0xff] %v2975_v35   ;;  %v2970_v44 = vpack.c.bf16 %v1680_v41, %v1679_v34  ;;  %v1744_v45 = vsel %vm1488_vm0, %v1231_v31, %v1616_v37  ;;  %v1621_v46 = vmul.f32 0.2, %v3466_v39  ;;  %v988_v47 = vpop.f32.mrf.mxu0  ;;  %v1244_v48 = vpop.f32.mrf.mxu1  ;;  %vm1493_vm2 = vcmp.ge.f32.partialorder %v3466_v39, 0.0 }
 0x110   : > { %3279 = vst [vmem:[%s3816_s28 + $0x158] sm:$0xff] %v3135_v40   ;;  %v3130_v49 = vpack.c.bf16 %v1744_v45, %v1743_v43  ;;  %v1685_v50 = vsel %vm1429_vm1, %v3402_v38, %v1557_v42  ;;  %v1555_v51 = vmul.f32 0.2, %v988_v47  ;;  %vm1427_vm3 = vcmp.ge.f32.partialorder %v988_v47, 0.0 }
 0x111   : > { %3246 = vst [vmem:[%s3816_s28 + $0x50] sm:$0xff] %v2970_v44   ;;  %v3403_v52 = vpop.f32.mrf.mxu0  ;;  %v3467_v53 = vpop.f32.mrf.mxu1  ;;  %v1749_v55 = vsel %vm1493_vm2, %v3466_v39, %v1621_v46  ;;  %vm1491_vm6 = vcmp.ge.f32.partialorder %v1244_v48, 0.0  ;;  %v1619_v56 = vmul.f32 0.2, %v1244_v48 }
 0x112   : > { %3278 = vst [vmem:[%s3816_s28 + $0x150] sm:$0xff] %v3130_v49   ;;  %vm1430_vm4 = vcmp.ge.f32.partialorder %v3403_v52, 0.0  ;;  %v1558_v54 = vmul.f32 0.2, %v3403_v52  ;;  %vm1494_vm5 = vcmp.ge.f32.partialorder %v3467_v53, 0.0  ;;  %v1683_v62 = vsel %vm1427_vm3, %v988_v47, %v1555_v51 }
 0x113   : > { %v1622_v57 = vmul.f32 0.2, %v3467_v53  ;;  %v991_v58 = vpop.f32.mrf.mxu0  ;;  %v1247_v59 = vpop.f32.mrf.mxu1  ;;  %v1747_v7 = vsel %vm1491_vm6, %v1244_v48, %v1619_v56 }
 0x114   : > { %v1686_v60 = vsel %vm1430_vm4, %v3403_v52, %v1558_v54  ;;  %vm1428_vm7 = vcmp.ge.f32.partialorder %v991_v58, 0.0  ;;  %v1556_v61 = vmul.f32 0.2, %v991_v58  ;;  %vm1492_vm8 = vcmp.ge.f32.partialorder %v1247_v59, 0.0 }
 0x115   : > { %v2985_v63 = vpack.c.bf16 %v1686_v60, %v1685_v50  ;;  %v1750_v0 = vsel %vm1494_vm5, %v3467_v53, %v1622_v57  ;;  %v1620_v1 = vmul.f32 0.2, %v1247_v59  ;;  %v3406_v2 = vpop.f32.mrf.mxu0  ;;  %v3470_v3 = vpop.f32.mrf.mxu1 }
 0x116   : > { %v3145_v4 = vpack.c.bf16 %v1750_v0, %v1749_v55  ;;  %v1684_v5 = vsel %vm1428_vm7, %v991_v58, %v1556_v61  ;;  %vm1433_vm9 = vcmp.ge.f32.partialorder %v3406_v2, 0.0  ;;  %v1561_v6 = vmul.f32 0.2, %v3406_v2 }
 0x117   : > { %3249 = vst [vmem:[%s3816_s28 + $0x68] sm:$0xff] %v2985_v63   ;;  %v2980_v8 = vpack.c.bf16 %v1684_v5, %v1683_v62  ;;  %v1748_v9 = vsel %vm1492_vm8, %v1247_v59, %v1620_v1  ;;  %v1625_v10 = vmul.f32 0.2, %v3470_v3  ;;  %v1004_v11 = vpop.f32.mrf.mxu0  ;;  %v1260_v12 = vpop.f32.mrf.mxu1  ;;  %vm1497_vm10 = vcmp.ge.f32.partialorder %v3470_v3, 0.0 }
 0x118   : > { %3281 = vst [vmem:[%s3816_s28 + $0x168] sm:$0xff] %v3145_v4   ;;  %v3140_v13 = vpack.c.bf16 %v1748_v9, %v1747_v7  ;;  %v1689_v14 = vsel %vm1433_vm9, %v3406_v2, %v1561_v6  ;;  %v1559_v15 = vmul.f32 0.2, %v1004_v11  ;;  %vm1431_vm11 = vcmp.ge.f32.partialorder %v1004_v11, 0.0 }
 0x119   : > { %3248 = vst [vmem:[%s3816_s28 + $0x60] sm:$0xff] %v2980_v8   ;;  %v3407_v16 = vpop.f32.mrf.mxu0  ;;  %v3471_v17 = vpop.f32.mrf.mxu1  ;;  %v1753_v19 = vsel %vm1497_vm10, %v3470_v3, %v1625_v10  ;;  %vm1495_vm14 = vcmp.ge.f32.partialorder %v1260_v12, 0.0  ;;  %v1623_v20 = vmul.f32 0.2, %v1260_v12 }
 0x11a   : > { %3280 = vst [vmem:[%s3816_s28 + $0x160] sm:$0xff] %v3140_v13   ;;  %vm1434_vm12 = vcmp.ge.f32.partialorder %v3407_v16, 0.0  ;;  %v1562_v18 = vmul.f32 0.2, %v3407_v16  ;;  %vm1498_vm13 = vcmp.ge.f32.partialorder %v3471_v17, 0.0  ;;  %v1687_v26 = vsel %vm1431_vm11, %v1004_v11, %v1559_v15 }
 0x11b   : > { %v1626_v21 = vmul.f32 0.2, %v3471_v17  ;;  %v1007_v22 = vpop.f32.mrf.mxu0  ;;  %v1263_v23 = vpop.f32.mrf.mxu1  ;;  %v1751_v35 = vsel %vm1495_vm14, %v1260_v12, %v1623_v20 }
 0x11c   : > { %v1690_v24 = vsel %vm1434_vm12, %v3407_v16, %v1562_v18  ;;  %vm1432_vm15 = vcmp.ge.f32.partialorder %v1007_v22, 0.0  ;;  %v1560_v25 = vmul.f32 0.2, %v1007_v22  ;;  %vm1496_vm0 = vcmp.ge.f32.partialorder %v1263_v23, 0.0 }
 0x11d   : > { %v2995_v27 = vpack.c.bf16 %v1690_v24, %v1689_v14  ;;  %v1754_v28 = vsel %vm1498_vm13, %v3471_v17, %v1626_v21  ;;  %v1624_v29 = vmul.f32 0.2, %v1263_v23  ;;  %v3410_v30 = vpop.f32.mrf.mxu0  ;;  %v3474_v31 = vpop.f32.mrf.mxu1 }
 0x11e   : > { %v3155_v32 = vpack.c.bf16 %v1754_v28, %v1753_v19  ;;  %v1688_v33 = vsel %vm1432_vm15, %v1007_v22, %v1560_v25  ;;  %vm1437_vm1 = vcmp.ge.f32.partialorder %v3410_v30, 0.0  ;;  %v1565_v34 = vmul.f32 0.2, %v3410_v30 }
 0x11f   : > { %3251 = vst [vmem:[%s3816_s28 + $0x78] sm:$0xff] %v2995_v27   ;;  %v2990_v36 = vpack.c.bf16 %v1688_v33, %v1687_v26  ;;  %v1752_v37 = vsel %vm1496_vm0, %v1263_v23, %v1624_v29  ;;  %v1629_v38 = vmul.f32 0.2, %v3474_v31  ;;  %v1020_v39 = vpop.f32.mrf.mxu0  ;;  %v1276_v40 = vpop.f32.mrf.mxu1  ;;  %vm1501_vm2 = vcmp.ge.f32.partialorder %v3474_v31, 0.0 }
 0x120   : > { %3283 = vst [vmem:[%s3816_s28 + $0x178] sm:$0xff] %v3155_v32   ;;  %v3150_v41 = vpack.c.bf16 %v1752_v37, %v1751_v35  ;;  %v1693_v42 = vsel %vm1437_vm1, %v3410_v30, %v1565_v34  ;;  %v1563_v43 = vmul.f32 0.2, %v1020_v39  ;;  %vm1435_vm3 = vcmp.ge.f32.partialorder %v1020_v39, 0.0 }
 0x121   : > { %3250 = vst [vmem:[%s3816_s28 + $0x70] sm:$0xff] %v2990_v36   ;;  %v3411_v44 = vpop.f32.mrf.mxu0  ;;  %v3475_v45 = vpop.f32.mrf.mxu1  ;;  %v1757_v47 = vsel %vm1501_vm2, %v3474_v31, %v1629_v38  ;;  %vm1499_vm6 = vcmp.ge.f32.partialorder %v1276_v40, 0.0  ;;  %v1627_v48 = vmul.f32 0.2, %v1276_v40 }
 0x122   : > { %3282 = vst [vmem:[%s3816_s28 + $0x170] sm:$0xff] %v3150_v41   ;;  %vm1438_vm4 = vcmp.ge.f32.partialorder %v3411_v44, 0.0  ;;  %v1566_v46 = vmul.f32 0.2, %v3411_v44  ;;  %vm1502_vm5 = vcmp.ge.f32.partialorder %v3475_v45, 0.0  ;;  %v1691_v54 = vsel %vm1435_vm3, %v1020_v39, %v1563_v43 }
 0x123   : > { %v1630_v49 = vmul.f32 0.2, %v3475_v45  ;;  %v1023_v50 = vpop.f32.mrf.mxu0  ;;  %v1279_v51 = vpop.f32.mrf.mxu1  ;;  %v1755_v63 = vsel %vm1499_vm6, %v1276_v40, %v1627_v48 }
 0x124   : > { %v1694_v52 = vsel %vm1438_vm4, %v3411_v44, %v1566_v46  ;;  %vm1436_vm7 = vcmp.ge.f32.partialorder %v1023_v50, 0.0  ;;  %v1564_v53 = vmul.f32 0.2, %v1023_v50  ;;  %vm1500_vm8 = vcmp.ge.f32.partialorder %v1279_v51, 0.0 }
 0x125   : > { %v3005_v55 = vpack.c.bf16 %v1694_v52, %v1693_v42  ;;  %v1758_v56 = vsel %vm1502_vm5, %v3475_v45, %v1630_v49  ;;  %v1628_v57 = vmul.f32 0.2, %v1279_v51  ;;  %v3414_v58 = vpop.f32.mrf.mxu0  ;;  %v3478_v59 = vpop.f32.mrf.mxu1 }
 0x126   : > { %v3165_v60 = vpack.c.bf16 %v1758_v56, %v1757_v47  ;;  %v1692_v61 = vsel %vm1436_vm7, %v1023_v50, %v1564_v53  ;;  %vm1441_vm9 = vcmp.ge.f32.partialorder %v3414_v58, 0.0  ;;  %v1569_v62 = vmul.f32 0.2, %v3414_v58 }
 0x127   : > { %3253 = vst [vmem:[%s3816_s28 + $0x88] sm:$0xff] %v3005_v55   ;;  %v3000_v0 = vpack.c.bf16 %v1692_v61, %v1691_v54  ;;  %v1756_v1 = vsel %vm1500_vm8, %v1279_v51, %v1628_v57  ;;  %v1633_v2 = vmul.f32 0.2, %v3478_v59  ;;  %v1036_v3 = vpop.f32.mrf.mxu0  ;;  %v1292_v4 = vpop.f32.mrf.mxu1  ;;  %vm1505_vm10 = vcmp.ge.f32.partialorder %v3478_v59, 0.0 }
 0x128   : > { %3285 = vst [vmem:[%s3816_s28 + $0x188] sm:$0xff] %v3165_v60   ;;  %v3160_v5 = vpack.c.bf16 %v1756_v1, %v1755_v63  ;;  %v1697_v6 = vsel %vm1441_vm9, %v3414_v58, %v1569_v62  ;;  %v1567_v7 = vmul.f32 0.2, %v1036_v3  ;;  %vm1439_vm11 = vcmp.ge.f32.partialorder %v1036_v3, 0.0 }
 0x129   : > { %3252 = vst [vmem:[%s3816_s28 + $0x80] sm:$0xff] %v3000_v0   ;;  %v3415_v8 = vpop.f32.mrf.mxu0  ;;  %v3479_v9 = vpop.f32.mrf.mxu1  ;;  %v1761_v11 = vsel %vm1505_vm10, %v3478_v59, %v1633_v2  ;;  %vm1503_vm14 = vcmp.ge.f32.partialorder %v1292_v4, 0.0  ;;  %v1631_v12 = vmul.f32 0.2, %v1292_v4 }
 0x12a   : > { %3284 = vst [vmem:[%s3816_s28 + $0x180] sm:$0xff] %v3160_v5   ;;  %vm1442_vm12 = vcmp.ge.f32.partialorder %v3415_v8, 0.0  ;;  %v1570_v10 = vmul.f32 0.2, %v3415_v8  ;;  %vm1506_vm13 = vcmp.ge.f32.partialorder %v3479_v9, 0.0  ;;  %v1695_v18 = vsel %vm1439_vm11, %v1036_v3, %v1567_v7 }
 0x12b   : > { %v1634_v13 = vmul.f32 0.2, %v3479_v9  ;;  %v1039_v14 = vpop.f32.mrf.mxu0  ;;  %v1295_v15 = vpop.f32.mrf.mxu1  ;;  %v1759_v27 = vsel %vm1503_vm14, %v1292_v4, %v1631_v12 }
 0x12c   : > { %v1698_v16 = vsel %vm1442_vm12, %v3415_v8, %v1570_v10  ;;  %vm1440_vm15 = vcmp.ge.f32.partialorder %v1039_v14, 0.0  ;;  %v1568_v17 = vmul.f32 0.2, %v1039_v14  ;;  %vm1504_vm0 = vcmp.ge.f32.partialorder %v1295_v15, 0.0 }
 0x12d   : > { %v3015_v19 = vpack.c.bf16 %v1698_v16, %v1697_v6  ;;  %v1762_v20 = vsel %vm1506_vm13, %v3479_v9, %v1634_v13  ;;  %v1632_v21 = vmul.f32 0.2, %v1295_v15  ;;  %v3418_v22 = vpop.f32.mrf.mxu0  ;;  %v3482_v23 = vpop.f32.mrf.mxu1 }
 0x12e   : > { %v3175_v24 = vpack.c.bf16 %v1762_v20, %v1761_v11  ;;  %v1696_v25 = vsel %vm1440_vm15, %v1039_v14, %v1568_v17  ;;  %vm1445_vm1 = vcmp.ge.f32.partialorder %v3418_v22, 0.0  ;;  %v1573_v26 = vmul.f32 0.2, %v3418_v22 }
 0x12f   : > { %3255 = vst [vmem:[%s3816_s28 + $0x98] sm:$0xff] %v3015_v19   ;;  %v3010_v28 = vpack.c.bf16 %v1696_v25, %v1695_v18  ;;  %v1760_v29 = vsel %vm1504_vm0, %v1295_v15, %v1632_v21  ;;  %v1637_v30 = vmul.f32 0.2, %v3482_v23  ;;  %v1052_v31 = vpop.f32.mrf.mxu0  ;;  %v1308_v32 = vpop.f32.mrf.mxu1  ;;  %vm1509_vm2 = vcmp.ge.f32.partialorder %v3482_v23, 0.0 }
 0x130   : > { %3287 = vst [vmem:[%s3816_s28 + $0x198] sm:$0xff] %v3175_v24   ;;  %v3170_v33 = vpack.c.bf16 %v1760_v29, %v1759_v27  ;;  %v1701_v34 = vsel %vm1445_vm1, %v3418_v22, %v1573_v26  ;;  %v1571_v35 = vmul.f32 0.2, %v1052_v31  ;;  %vm1443_vm3 = vcmp.ge.f32.partialorder %v1052_v31, 0.0 }
 0x131   : > { %3254 = vst [vmem:[%s3816_s28 + $0x90] sm:$0xff] %v3010_v28   ;;  %v3419_v36 = vpop.f32.mrf.mxu0  ;;  %v3483_v37 = vpop.f32.mrf.mxu1  ;;  %v1765_v39 = vsel %vm1509_vm2, %v3482_v23, %v1637_v30  ;;  %vm1507_vm6 = vcmp.ge.f32.partialorder %v1308_v32, 0.0  ;;  %v1635_v40 = vmul.f32 0.2, %v1308_v32 }
 0x132   : > { %3286 = vst [vmem:[%s3816_s28 + $0x190] sm:$0xff] %v3170_v33   ;;  %vm1446_vm4 = vcmp.ge.f32.partialorder %v3419_v36, 0.0  ;;  %v1574_v38 = vmul.f32 0.2, %v3419_v36  ;;  %vm1510_vm5 = vcmp.ge.f32.partialorder %v3483_v37, 0.0  ;;  %v1699_v46 = vsel %vm1443_vm3, %v1052_v31, %v1571_v35 }
 0x133   : > { %v1638_v41 = vmul.f32 0.2, %v3483_v37  ;;  %v1055_v42 = vpop.f32.mrf.mxu0  ;;  %v1311_v43 = vpop.f32.mrf.mxu1  ;;  %v1763_v55 = vsel %vm1507_vm6, %v1308_v32, %v1635_v40 }
 0x134   : > { %v1702_v44 = vsel %vm1446_vm4, %v3419_v36, %v1574_v38  ;;  %vm1444_vm7 = vcmp.ge.f32.partialorder %v1055_v42, 0.0  ;;  %v1572_v45 = vmul.f32 0.2, %v1055_v42  ;;  %vm1508_vm8 = vcmp.ge.f32.partialorder %v1311_v43, 0.0 }
 0x135   : > { %v3025_v47 = vpack.c.bf16 %v1702_v44, %v1701_v34  ;;  %v1766_v48 = vsel %vm1510_vm5, %v3483_v37, %v1638_v41  ;;  %v1636_v49 = vmul.f32 0.2, %v1311_v43  ;;  %v3422_v50 = vpop.f32.mrf.mxu0  ;;  %v3486_v51 = vpop.f32.mrf.mxu1 }
 0x136   : > { %v3185_v52 = vpack.c.bf16 %v1766_v48, %v1765_v39  ;;  %v1700_v53 = vsel %vm1444_vm7, %v1055_v42, %v1572_v45  ;;  %vm1449_vm9 = vcmp.ge.f32.partialorder %v3422_v50, 0.0  ;;  %v1577_v54 = vmul.f32 0.2, %v3422_v50 }
 0x137   : > { %3257 = vst [vmem:[%s3816_s28 + $0xa8] sm:$0xff] %v3025_v47   ;;  %v3020_v56 = vpack.c.bf16 %v1700_v53, %v1699_v46  ;;  %v1764_v57 = vsel %vm1508_vm8, %v1311_v43, %v1636_v49  ;;  %v1641_v58 = vmul.f32 0.2, %v3486_v51  ;;  %v1068_v59 = vpop.f32.mrf.mxu0  ;;  %v1324_v60 = vpop.f32.mrf.mxu1  ;;  %vm1513_vm10 = vcmp.ge.f32.partialorder %v3486_v51, 0.0 }
 0x138   : > { %3289 = vst [vmem:[%s3816_s28 + $0x1a8] sm:$0xff] %v3185_v52   ;;  %v3180_v61 = vpack.c.bf16 %v1764_v57, %v1763_v55  ;;  %v1705_v62 = vsel %vm1449_vm9, %v3422_v50, %v1577_v54  ;;  %v1575_v63 = vmul.f32 0.2, %v1068_v59  ;;  %vm1447_vm11 = vcmp.ge.f32.partialorder %v1068_v59, 0.0 }
 0x139   : > { %3256 = vst [vmem:[%s3816_s28 + $0xa0] sm:$0xff] %v3020_v56   ;;  %v3423_v0 = vpop.f32.mrf.mxu0  ;;  %v3487_v1 = vpop.f32.mrf.mxu1  ;;  %v1769_v3 = vsel %vm1513_vm10, %v3486_v51, %v1641_v58  ;;  %vm1511_vm14 = vcmp.ge.f32.partialorder %v1324_v60, 0.0  ;;  %v1639_v4 = vmul.f32 0.2, %v1324_v60 }
 0x13a   : > { %3288 = vst [vmem:[%s3816_s28 + $0x1a0] sm:$0xff] %v3180_v61   ;;  %vm1450_vm12 = vcmp.ge.f32.partialorder %v3423_v0, 0.0  ;;  %v1578_v2 = vmul.f32 0.2, %v3423_v0  ;;  %vm1514_vm13 = vcmp.ge.f32.partialorder %v3487_v1, 0.0  ;;  %v1703_v10 = vsel %vm1447_vm11, %v1068_v59, %v1575_v63 }
 0x13b   : > { %v1642_v5 = vmul.f32 0.2, %v3487_v1  ;;  %v1071_v6 = vpop.f32.mrf.mxu0  ;;  %v1327_v7 = vpop.f32.mrf.mxu1  ;;  %v1767_v19 = vsel %vm1511_vm14, %v1324_v60, %v1639_v4 }
 0x13c   : > { %v1706_v8 = vsel %vm1450_vm12, %v3423_v0, %v1578_v2  ;;  %vm1448_vm15 = vcmp.ge.f32.partialorder %v1071_v6, 0.0  ;;  %v1576_v9 = vmul.f32 0.2, %v1071_v6  ;;  %vm1512_vm0 = vcmp.ge.f32.partialorder %v1327_v7, 0.0 }
 0x13d   : > { %v3035_v11 = vpack.c.bf16 %v1706_v8, %v1705_v62  ;;  %v1770_v12 = vsel %vm1514_vm13, %v3487_v1, %v1642_v5  ;;  %v1640_v13 = vmul.f32 0.2, %v1327_v7  ;;  %v3426_v14 = vpop.f32.mrf.mxu0  ;;  %v3490_v15 = vpop.f32.mrf.mxu1 }
 0x13e   : > { %v3195_v16 = vpack.c.bf16 %v1770_v12, %v1769_v3  ;;  %v1704_v17 = vsel %vm1448_vm15, %v1071_v6, %v1576_v9  ;;  %vm1453_vm1 = vcmp.ge.f32.partialorder %v3426_v14, 0.0  ;;  %v1581_v18 = vmul.f32 0.2, %v3426_v14 }
 0x13f   : > { %3259 = vst [vmem:[%s3816_s28 + $0xb8] sm:$0xff] %v3035_v11   ;;  %v3030_v20 = vpack.c.bf16 %v1704_v17, %v1703_v10  ;;  %v1768_v21 = vsel %vm1512_vm0, %v1327_v7, %v1640_v13  ;;  %v1645_v22 = vmul.f32 0.2, %v3490_v15  ;;  %v1084_v23 = vpop.f32.mrf.mxu0  ;;  %v1340_v24 = vpop.f32.mrf.mxu1  ;;  %vm1517_vm2 = vcmp.ge.f32.partialorder %v3490_v15, 0.0 }
 0x140   : > { %3291 = vst [vmem:[%s3816_s28 + $0x1b8] sm:$0xff] %v3195_v16   ;;  %v3190_v25 = vpack.c.bf16 %v1768_v21, %v1767_v19  ;;  %v1709_v26 = vsel %vm1453_vm1, %v3426_v14, %v1581_v18  ;;  %v1579_v27 = vmul.f32 0.2, %v1084_v23  ;;  %vm1451_vm3 = vcmp.ge.f32.partialorder %v1084_v23, 0.0 }
 0x141   : > { %3258 = vst [vmem:[%s3816_s28 + $0xb0] sm:$0xff] %v3030_v20   ;;  %v3427_v28 = vpop.f32.mrf.mxu0  ;;  %v3491_v29 = vpop.f32.mrf.mxu1  ;;  %v1773_v31 = vsel %vm1517_vm2, %v3490_v15, %v1645_v22  ;;  %vm1515_vm6 = vcmp.ge.f32.partialorder %v1340_v24, 0.0  ;;  %v1643_v32 = vmul.f32 0.2, %v1340_v24 }
 0x142   : > { %3290 = vst [vmem:[%s3816_s28 + $0x1b0] sm:$0xff] %v3190_v25   ;;  %vm1454_vm4 = vcmp.ge.f32.partialorder %v3427_v28, 0.0  ;;  %v1582_v30 = vmul.f32 0.2, %v3427_v28  ;;  %vm1518_vm5 = vcmp.ge.f32.partialorder %v3491_v29, 0.0  ;;  %v1707_v38 = vsel %vm1451_vm3, %v1084_v23, %v1579_v27 }
 0x143   : > { %v1646_v33 = vmul.f32 0.2, %v3491_v29  ;;  %v1087_v34 = vpop.f32.mrf.mxu0  ;;  %v1343_v35 = vpop.f32.mrf.mxu1  ;;  %v1771_v47 = vsel %vm1515_vm6, %v1340_v24, %v1643_v32 }
 0x144   : > { %v1710_v36 = vsel %vm1454_vm4, %v3427_v28, %v1582_v30  ;;  %vm1452_vm7 = vcmp.ge.f32.partialorder %v1087_v34, 0.0  ;;  %v1580_v37 = vmul.f32 0.2, %v1087_v34  ;;  %vm1516_vm8 = vcmp.ge.f32.partialorder %v1343_v35, 0.0 }
 0x145   : > { %v3045_v39 = vpack.c.bf16 %v1710_v36, %v1709_v26  ;;  %v1774_v40 = vsel %vm1518_vm5, %v3491_v29, %v1646_v33  ;;  %v1644_v41 = vmul.f32 0.2, %v1343_v35  ;;  %v3430_v42 = vpop.f32.mrf.mxu0  ;;  %v3494_v43 = vpop.f32.mrf.mxu1 }
 0x146   : > { %v3205_v44 = vpack.c.bf16 %v1774_v40, %v1773_v31  ;;  %v1708_v45 = vsel %vm1452_vm7, %v1087_v34, %v1580_v37  ;;  %vm1457_vm9 = vcmp.ge.f32.partialorder %v3430_v42, 0.0  ;;  %v1585_v46 = vmul.f32 0.2, %v3430_v42 }
 0x147   : > { %3261 = vst [vmem:[%s3816_s28 + $0xc8] sm:$0xff] %v3045_v39   ;;  %v3040_v48 = vpack.c.bf16 %v1708_v45, %v1707_v38  ;;  %v1772_v49 = vsel %vm1516_vm8, %v1343_v35, %v1644_v41  ;;  %v1649_v50 = vmul.f32 0.2, %v3494_v43  ;;  %v1100_v51 = vpop.f32.mrf.mxu0  ;;  %v1356_v52 = vpop.f32.mrf.mxu1  ;;  %vm1521_vm10 = vcmp.ge.f32.partialorder %v3494_v43, 0.0 }
 0x148   : > { %3293 = vst [vmem:[%s3816_s28 + $0x1c8] sm:$0xff] %v3205_v44   ;;  %v3200_v53 = vpack.c.bf16 %v1772_v49, %v1771_v47  ;;  %v1713_v54 = vsel %vm1457_vm9, %v3430_v42, %v1585_v46  ;;  %v1583_v55 = vmul.f32 0.2, %v1100_v51  ;;  %vm1455_vm11 = vcmp.ge.f32.partialorder %v1100_v51, 0.0 }
 0x149   : > { %3260 = vst [vmem:[%s3816_s28 + $0xc0] sm:$0xff] %v3040_v48   ;;  %v3431_v56 = vpop.f32.mrf.mxu0  ;;  %v3495_v57 = vpop.f32.mrf.mxu1  ;;  %v1777_v59 = vsel %vm1521_vm10, %v3494_v43, %v1649_v50  ;;  %vm1519_vm14 = vcmp.ge.f32.partialorder %v1356_v52, 0.0  ;;  %v1647_v60 = vmul.f32 0.2, %v1356_v52 }
 0x14a   : > { %3292 = vst [vmem:[%s3816_s28 + $0x1c0] sm:$0xff] %v3200_v53   ;;  %vm1458_vm12 = vcmp.ge.f32.partialorder %v3431_v56, 0.0  ;;  %v1586_v58 = vmul.f32 0.2, %v3431_v56  ;;  %vm1522_vm13 = vcmp.ge.f32.partialorder %v3495_v57, 0.0  ;;  %v1711_v2 = vsel %vm1455_vm11, %v1100_v51, %v1583_v55 }
 0x14b   : > { %v1650_v61 = vmul.f32 0.2, %v3495_v57  ;;  %v1103_v62 = vpop.f32.mrf.mxu0  ;;  %v1359_v63 = vpop.f32.mrf.mxu1  ;;  %v1775_v11 = vsel %vm1519_vm14, %v1356_v52, %v1647_v60 }
 0x14c   : > { %v1714_v0 = vsel %vm1458_vm12, %v3431_v56, %v1586_v58  ;;  %vm1456_vm15 = vcmp.ge.f32.partialorder %v1103_v62, 0.0  ;;  %v1584_v1 = vmul.f32 0.2, %v1103_v62  ;;  %vm1520_vm0 = vcmp.ge.f32.partialorder %v1359_v63, 0.0 }
 0x14d   : > { %v3055_v3 = vpack.c.bf16 %v1714_v0, %v1713_v54  ;;  %v1778_v4 = vsel %vm1522_vm13, %v3495_v57, %v1650_v61  ;;  %v1648_v5 = vmul.f32 0.2, %v1359_v63  ;;  %v3434_v6 = vpop.f32.mrf.mxu0  ;;  %v3498_v7 = vpop.f32.mrf.mxu1 }
 0x14e   : > { %v3215_v8 = vpack.c.bf16 %v1778_v4, %v1777_v59  ;;  %v1712_v9 = vsel %vm1456_vm15, %v1103_v62, %v1584_v1  ;;  %vm1461_vm1 = vcmp.ge.f32.partialorder %v3434_v6, 0.0  ;;  %v1589_v10 = vmul.f32 0.2, %v3434_v6 }
 0x14f   : > { %3263 = vst [vmem:[%s3816_s28 + $0xd8] sm:$0xff] %v3055_v3   ;;  %v3050_v12 = vpack.c.bf16 %v1712_v9, %v1711_v2  ;;  %v1776_v13 = vsel %vm1520_vm0, %v1359_v63, %v1648_v5  ;;  %v1653_v14 = vmul.f32 0.2, %v3498_v7  ;;  %v1116_v15 = vpop.f32.mrf.mxu0  ;;  %v1372_v16 = vpop.f32.mrf.mxu1  ;;  %vm1525_vm2 = vcmp.ge.f32.partialorder %v3498_v7, 0.0 }
 0x150   : > { %3295 = vst [vmem:[%s3816_s28 + $0x1d8] sm:$0xff] %v3215_v8   ;;  %v3210_v17 = vpack.c.bf16 %v1776_v13, %v1775_v11  ;;  %v1717_v18 = vsel %vm1461_vm1, %v3434_v6, %v1589_v10  ;;  %v1587_v19 = vmul.f32 0.2, %v1116_v15  ;;  %vm1459_vm3 = vcmp.ge.f32.partialorder %v1116_v15, 0.0 }
 0x151   : > { %3262 = vst [vmem:[%s3816_s28 + $0xd0] sm:$0xff] %v3050_v12   ;;  %v3435_v20 = vpop.f32.mrf.mxu0  ;;  %v3499_v21 = vpop.f32.mrf.mxu1  ;;  %v1781_v23 = vsel %vm1525_vm2, %v3498_v7, %v1653_v14  ;;  %vm1523_vm6 = vcmp.ge.f32.partialorder %v1372_v16, 0.0  ;;  %v1651_v24 = vmul.f32 0.2, %v1372_v16 }
 0x152   : > { %3294 = vst [vmem:[%s3816_s28 + $0x1d0] sm:$0xff] %v3210_v17   ;;  %vm1462_vm4 = vcmp.ge.f32.partialorder %v3435_v20, 0.0  ;;  %v1590_v22 = vmul.f32 0.2, %v3435_v20  ;;  %vm1526_vm5 = vcmp.ge.f32.partialorder %v3499_v21, 0.0  ;;  %v1715_v30 = vsel %vm1459_vm3, %v1116_v15, %v1587_v19 }
 0x153   : > { %v1654_v25 = vmul.f32 0.2, %v3499_v21  ;;  %v1119_v26 = vpop.f32.mrf.mxu0  ;;  %v1375_v27 = vpop.f32.mrf.mxu1  ;;  %v1779_v39 = vsel %vm1523_vm6, %v1372_v16, %v1651_v24 }
 0x154   : > { %v1718_v28 = vsel %vm1462_vm4, %v3435_v20, %v1590_v22  ;;  %vm1460_vm7 = vcmp.ge.f32.partialorder %v1119_v26, 0.0  ;;  %v1588_v29 = vmul.f32 0.2, %v1119_v26  ;;  %vm1524_vm8 = vcmp.ge.f32.partialorder %v1375_v27, 0.0 }
 0x155   : > { %v3065_v31 = vpack.c.bf16 %v1718_v28, %v1717_v18  ;;  %v1782_v32 = vsel %vm1526_vm5, %v3499_v21, %v1654_v25  ;;  %v1652_v33 = vmul.f32 0.2, %v1375_v27  ;;  %v3438_v34 = vpop.f32.mrf.mxu0  ;;  %v3502_v35 = vpop.f32.mrf.mxu1 }
 0x156   : > { %v3225_v36 = vpack.c.bf16 %v1782_v32, %v1781_v23  ;;  %v1716_v37 = vsel %vm1460_vm7, %v1119_v26, %v1588_v29  ;;  %vm1465_vm9 = vcmp.ge.f32.partialorder %v3438_v34, 0.0  ;;  %v1593_v38 = vmul.f32 0.2, %v3438_v34 }
 0x157   : > { %3265 = vst [vmem:[%s3816_s28 + $0xe8] sm:$0xff] %v3065_v31   ;;  %v3060_v40 = vpack.c.bf16 %v1716_v37, %v1715_v30  ;;  %v1780_v41 = vsel %vm1524_vm8, %v1375_v27, %v1652_v33  ;;  %v1132_v42 = vpop.f32.mrf.mxu0  ;;  %v1388_v43 = vpop.f32.mrf.mxu1  ;;  %vm1529_vm10 = vcmp.ge.f32.partialorder %v3502_v35, 0.0  ;;  %v1657_v46 = vmul.f32 0.2, %v3502_v35 }
 0x158   : > { %3297 = vst [vmem:[%s3816_s28 + $0x1e8] sm:$0xff] %v3225_v36   ;;  %v3220_v44 = vpack.c.bf16 %v1780_v41, %v1779_v39  ;;  %v1721_v45 = vsel %vm1465_vm9, %v3438_v34, %v1593_v38  ;;  %v1591_v49 = vmul.f32 0.2, %v1132_v42  ;;  %vm1463_vm13 = vcmp.ge.f32.partialorder %v1132_v42, 0.0 }
 0x159   : > { %3264 = vst [vmem:[%s3816_s28 + $0xe0] sm:$0xff] %v3060_v40   ;;  %v3439_v47 = vpop.f32.mrf.mxu0  ;;  %v3503_v48 = vpop.f32.mrf.mxu1  ;;  %vm1527_vm14 = vcmp.ge.f32.partialorder %v1388_v43, 0.0  ;;  %v1655_v51 = vmul.f32 0.2, %v1388_v43  ;;  %v1785_v57 = vsel %vm1529_vm10, %v3502_v35, %v1657_v46 }
 0x15a   : > { %3296 = vst [vmem:[%s3816_s28 + $0x1e0] sm:$0xff] %v3220_v44   ;;  %vm1466_vm11 = vcmp.ge.f32.partialorder %v3439_v47, 0.0  ;;  %v1594_v50 = vmul.f32 0.2, %v3439_v47  ;;  %vm1530_vm12 = vcmp.ge.f32.partialorder %v3503_v48, 0.0  ;;  %v1719_v61 = vsel %vm1463_vm13, %v1132_v42, %v1591_v49 }
 0x15b   : > { %v1658_v52 = vmul.f32 0.2, %v3503_v48  ;;  %v1135_v53 = vpop.f32.mrf.mxu0  ;;  %v1391_v54 = vpop.f32.mrf.mxu1  ;;  %v1783_v0 = vsel %vm1527_vm14, %v1388_v43, %v1655_v51 }
 0x15c   : > { %v1722_v55 = vsel %vm1466_vm11, %v3439_v47, %v1594_v50  ;;  %vm1464_vm15 = vcmp.ge.f32.partialorder %v1135_v53, 0.0  ;;  %v1592_v56 = vmul.f32 0.2, %v1135_v53  ;;  %vm1528_vm0 = vcmp.ge.f32.partialorder %v1391_v54, 0.0 }
 0x15d   : > { %v3075_v58 = vpack.c.bf16 %v1722_v55, %v1721_v45  ;;  %v1786_v59 = vsel %vm1530_vm12, %v3503_v48, %v1658_v52  ;;  %v1656_v60 = vmul.f32 0.2, %v1391_v54 }
 0x15e   : > { %v3235_v62 = vpack.c.bf16 %v1786_v59, %v1785_v57  ;;  %v1720_v63 = vsel %vm1464_vm15, %v1135_v53, %v1592_v56 }
 0x15f   : > { %3267 = vst [vmem:[%s3816_s28 + $0xf8] sm:$0xff] %v3075_v58   ;;  %v3070_v1 = vpack.c.bf16 %v1720_v63, %v1719_v61  ;;  %v1784_v2 = vsel %vm1528_vm0, %v1391_v54, %v1656_v60 }
 0x160   : > { %3299 = vst [vmem:[%s3816_s28 + $0x1f8] sm:$0xff] %v3235_v62   ;;  %v3230_v3 = vpack.c.bf16 %v1784_v2, %v1783_v0 }
 0x161   : > { %3266 = vst [vmem:[%s3816_s28 + $0xf0] sm:$0xff] %v3070_v1  }
 0x162   : > { %3298 = vst [vmem:[%s3816_s28 + $0x1f0] sm:$0xff] %v3230_v3  }
 0x163 PF: > { %s12_s11 = sadd.s32 1, %s3626_s11   ;;  %s3911_s9 = smov %s3622_s10 }
 0x164   : > { %p9_p5 = scmp.ge.s32.totalorder %s12_s11, 4   ;;  %s3912_s10 = smov %s3914_s12 }
 0x166   :  { %11 = sbr.rel (!%p9_p5) target bundleno = 2 (0x2), region = 61 }

// kernel: discriminator_forward.6
= control target key start
LH: loop header
LB: loop body
LE: loop exit
PB: predicated region body
PF: predicated region fallthrough
CT: control target
= control target key end

     0   :  { %s3508_s12 = smov 0   ;;  %s3510_s13 = smov 0   ;;  %s3989_s0 = inlined_call_operand.vmem [shape: bf16[512,1024], index: 0, kind: input, shape index: {}]   ;;  %s3990_s1 = inlined_call_operand.vmem [shape: bf16[1024,128], index: 1, kind: input, shape index: {}]   ;;  %s3991_s2 = inlined_call_operand.vmem [shape: bf16[512,128], index: 2, kind: output, shape index: {0}]   ;;  %s3992_s3 = inlined_call_operand.vmem [shape: f32[16,128], index: 3, kind: output, shape index: {1}]  }
   0x1   :  { %s3512_s14 = smov 0  }
   0x2 LB: > { %s26_s15 = sadd.s32 1, %s3482_s13  ;;  %p2567_p0 = scmp.ge.s32.totalorder %s3486_s14, 1  ;;  %s3486_s14 = sphi %s3512_s14, %s14_s14   ;;  %s3482_s13 = sphi %s3510_s13, %s3994_s13   ;;  %s3478_s12 = sphi %s3508_s12, %s3993_s12  }
   0x3   : > { %p28_p1 = scmp.ge.s32.totalorder %s26_s15, 2  ;;  %p167_p2 = scmp.lt.s32.totalorder %s3486_s14, 3 }
   0x5   : > { %s3996_s15 = smov (%p28_p1, %s26_s15), 0  ;;  %p168_p3 = pnand %p2567_p0, %p167_p2 }
   0x6   : > { %s2568_s25 = sshll.u32 (!%p168_p3), %s3478_s12, 5  ;;  %p226_p5 = scmp.lt.s32.totalorder (!%p168_p3), %s3478_s12, 1 }
   0x7   : > { %171 = sbr.rel (%p168_p3) target bundleno = 518 (0x206), region = 28  ;;  %p207_p4 = scmp.lt.s32.totalorder (!%p168_p3), %s2568_s25, 63 }
   0xc   : > { %v3400_v0 = vld [vmem:[%s3990_s1 + $0x78] sm:$0xff]   ;;  %v3404_v4 = vld [vmem:[%s3990_s1 + $0x70] sm:$0xff]   ;;  %v3408_v8 = vld [vmem:[%s3990_s1 + $0x68] sm:$0xff]   ;;  %s3998_s25 = smov (!%p207_p4, %s2568_s25), 63  ;;  %s4000_s12 = smov (!%p226_p5, %s3478_s12), 1 }
   0xd   : > { %v3401_v1 = vld [vmem:[%s3990_s1 + $0xf8] sm:$0xff]   ;;  %2928 = vmatprep.subr.bf16.mxu0 %v3400_v0  ;;  %v3405_v5 = vld [vmem:[%s3990_s1 + $0xf0] sm:$0xff]   ;;  %v3409_v9 = vld [vmem:[%s3990_s1 + $0xe8] sm:$0xff]   ;;  %s2800_s26 = sshll.u32 %s3998_s25, 5 }
   0xe   : > { %v3402_v2 = vld [vmem:[%s3990_s1 + $0x38] sm:$0xff]   ;;  %3040 = vmatprep.subr.bf16.mxu1 %v3401_v1  ;;  %v3406_v6 = vld [vmem:[%s3990_s1 + $0x30] sm:$0xff]   ;;  %v3410_v10 = vld [vmem:[%s3990_s1 + $0x28] sm:$0xff]   ;;  %s3625_s8 = scalar_lea.vmem %s3989_s0, %s2800_s26 }
   0xf   : > { %v3403_v3 = vld [vmem:[%s3990_s1 + $0xb8] sm:$0xff]   ;;  %2929 = vmatpush3.bf16.msra.mxu0 %v3402_v2  ;;  %v3407_v7 = vld [vmem:[%s3990_s1 + $0xb0] sm:$0xff]   ;;  %v3411_v11 = vld [vmem:[%s3990_s1 + $0xa8] sm:$0xff]  }
  0x10   : > { %3041 = vmatpush3.bf16.msra.mxu1 %v3403_v3  ;;  %2930 = vmatprep.subr.bf16.mxu0 %v3404_v4  ;;  %v3412_v12 = vld [vmem:[%s3990_s1 + $0x60] sm:$0xff]   ;;  %v3416_v16 = vld [vmem:[%s3990_s1 + $0x58] sm:$0xff]   ;;  %v3420_v20 = vld [vmem:[%s3990_s1 + $0x50] sm:$0xff]  }
  0x11   : > { %3042 = vmatprep.subr.bf16.mxu1 %v3405_v5  ;;  %v3413_v13 = vld [vmem:[%s3990_s1 + $0xe0] sm:$0xff]   ;;  %v3417_v17 = vld [vmem:[%s3990_s1 + $0xd8] sm:$0xff]   ;;  %v3421_v21 = vld [vmem:[%s3990_s1 + $0xd0] sm:$0xff]  }
  0x12   : > { %v3414_v14 = vld [vmem:[%s3990_s1 + $0x20] sm:$0xff]   ;;  %v3418_v18 = vld [vmem:[%s3990_s1 + $0x18] sm:$0xff]   ;;  %v3422_v22 = vld [vmem:[%s3990_s1 + $0x10] sm:$0xff]  }
  0x13   : > { %2931 = vmatpush3.bf16.msra.mxu0 %v3406_v6  ;;  %v3415_v15 = vld [vmem:[%s3990_s1 + $0xa0] sm:$0xff]   ;;  %v3419_v19 = vld [vmem:[%s3990_s1 + $0x98] sm:$0xff]   ;;  %v3423_v23 = vld [vmem:[%s3990_s1 + $0x90] sm:$0xff]  }
  0x14   : > { %3043 = vmatpush3.bf16.msra.mxu1 %v3407_v7  ;;  %2932 = vmatprep.subr.bf16.mxu0 %v3408_v8  ;;  %v3424_v24 = vld [vmem:[%s3990_s1 + $0x48] sm:$0xff]   ;;  %v3428_v28 = vld [vmem:[%s3990_s1 + $0x40] sm:$0xff]   ;;  %v3432_v40 = vld [vmem:[%s3990_s1 + $0x178] sm:$0xff]  }
  0x15   : > { %3044 = vmatprep.subr.bf16.mxu1 %v3409_v9  ;;  %v3425_v25 = vld [vmem:[%s3990_s1 + $0xc8] sm:$0xff]   ;;  %v3429_v29 = vld [vmem:[%s3990_s1 + $0xc0] sm:$0xff]   ;;  %v3433_v41 = vld [vmem:[%s3990_s1 + $0x138] sm:$0xff]  }
  0x16   : > { %v3426_v26 = vld [vmem:[%s3990_s1 + $0x8] sm:$0xff]   ;;  %v3430_v30 = vld [vmem:[%s3990_s1] sm:$0xff]   ;;  %v3434_v42 = vld [vmem:[%s3990_s1 + $0x1f8] sm:$0xff]  }
  0x17   : > { %2933 = vmatpush3.bf16.msra.mxu0 %v3410_v10  ;;  %v3427_v27 = vld [vmem:[%s3990_s1 + $0x88] sm:$0xff]   ;;  %v3431_v31 = vld [vmem:[%s3990_s1 + $0x80] sm:$0xff]   ;;  %v3435_v43 = vld [vmem:[%s3990_s1 + $0x1b8] sm:$0xff]  }
  0x18   : > { %3045 = vmatpush3.bf16.msra.mxu1 %v3411_v11  ;;  %2934 = vmatprep.subr.bf16.mxu0 %v3412_v12  ;;  %v234_v32 = vld [vmem:[%s3625_s8] sm:$0xff]  ;;  %v235_v34 = vld [vmem:[%s3625_s8 + $0x8] sm:$0xff]  ;;  %v3436_v55 = vld [vmem:[%s3990_s1 + $0x170] sm:$0xff]  }
  0x19   : > { %3046 = vmatprep.subr.bf16.mxu1 %v3413_v13  ;;  %v238_v33 = vld [vmem:[%s3625_s8 + $0x20] sm:$0xff]  ;;  %v239_v37 = vld [vmem:[%s3625_s8 + $0x28] sm:$0xff]  ;;  %v3437_v58 = vld [vmem:[%s3990_s1 + $0x130] sm:$0xff]  }
  0x1a   : > { %v2574_v35 = vcombine.low %v234_v32, %v238_v33  ;;  %v2575_v36 = vcombine.high %v234_v32, %v238_v33  ;;  %v2576_v38 = vcombine.low %v235_v34, %v239_v37  ;;  %v2577_v39 = vcombine.high %v235_v34, %v239_v37  ;;  %v242_v44 = vld [vmem:[%s3625_s8 + $0x40] sm:$0xff]  ;;  %v243_v47 = vld [vmem:[%s3625_s8 + $0x48] sm:$0xff]  ;;  %v3438_v60 = vld [vmem:[%s3990_s1 + $0x1f0] sm:$0xff]  }
  0x1b   : > { %2935 = vmatpush3.bf16.msra.mxu0 %v3414_v14  ;;  %v246_v45 = vld [vmem:[%s3625_s8 + $0x60] sm:$0xff]  ;;  %v247_v48 = vld [vmem:[%s3625_s8 + $0x68] sm:$0xff]  ;;  %v3439_v61 = vld [vmem:[%s3990_s1 + $0x1b0] sm:$0xff]  }
  0x1c   : > { %3047 = vmatpush3.bf16.msra.mxu1 %v3415_v15  ;;  %2936 = vmatprep.subr.bf16.mxu0 %v3416_v16  ;;  %v2583_v46 = vcombine.high %v242_v44, %v246_v45  ;;  %v250_v49 = vld [vmem:[%s3625_s8 + $0x80] sm:$0xff]  ;;  %v2585_v50 = vcombine.high %v243_v47, %v247_v48  ;;  %v251_v52 = vld [vmem:[%s3625_s8 + $0x88] sm:$0xff]  ;;  %v2582_v54 = vcombine.low %v242_v44, %v246_v45  ;;  %v3452_v34 = vld [vmem:[%s3990_s1 + $0x150] sm:$0xff]  }
  0x1d   : > { %3048 = vmatprep.subr.bf16.mxu1 %v3417_v17  ;;  %1546 = vmatprep.mubr.bf16.mxu0 %v2575_v36  ;;  %v254_v51 = vld [vmem:[%s3625_s8 + $0xa0] sm:$0xff]  ;;  %v255_v53 = vld [vmem:[%s3625_s8 + $0xa8] sm:$0xff]  ;;  %v2584_v56 = vcombine.low %v243_v47, %v247_v48  ;;  %v3453_v36 = vld [vmem:[%s3990_s1 + $0x110] sm:$0xff]  }
  0x1e   : > { %1707 = vmatprep.mubr.bf16.mxu1 %v2577_v39  ;;  %v2591_v57 = vcombine.high %v250_v49, %v254_v51  ;;  %v2593_v59 = vcombine.high %v251_v52, %v255_v53  ;;  %v258_v62 = vld [vmem:[%s3625_s8 + $0xc0] sm:$0xff]  ;;  %v259_v0 = vld [vmem:[%s3625_s8 + $0xc8] sm:$0xff]  ;;  %v2590_v3 = vcombine.low %v250_v49, %v254_v51  ;;  %v2592_v5 = vcombine.low %v251_v52, %v255_v53  ;;  %v3454_v37 = vld [vmem:[%s3990_s1 + $0x1d0] sm:$0xff]  }
  0x1f   : > { %2937 = vmatpush3.bf16.msra.mxu0 %v3418_v18  ;;  %v262_v63 = vld [vmem:[%s3625_s8 + $0xe0] sm:$0xff]  ;;  %v263_v1 = vld [vmem:[%s3625_s8 + $0xe8] sm:$0xff]  ;;  %v3455_v39 = vld [vmem:[%s3990_s1 + $0x190] sm:$0xff]  }
  0x20   : > { %3049 = vmatpush3.bf16.msra.mxu1 %v3419_v19  ;;  %2938 = vmatprep.subr.bf16.mxu0 %v3420_v20  ;;  %v3440_v2 = vld [vmem:[%s3990_s1 + $0x168] sm:$0xff]   ;;  %v2599_v6 = vcombine.high %v258_v62, %v262_v63  ;;  %v2601_v8 = vcombine.high %v259_v0, %v263_v1  ;;  %v266_v10 = vld [vmem:[%s3625_s8 + $0x100] sm:$0xff]  ;;  %v2598_v16 = vcombine.low %v258_v62, %v262_v63 }
  0x21   : > { %3050 = vmatprep.subr.bf16.mxu1 %v3421_v21  ;;  %v3441_v4 = vld [vmem:[%s3990_s1 + $0x128] sm:$0xff]   ;;  %v270_v11 = vld [vmem:[%s3625_s8 + $0x120] sm:$0xff]  ;;  %v2600_v18 = vcombine.low %v259_v0, %v263_v1 }
  0x22   : > { %v3442_v7 = vld [vmem:[%s3990_s1 + $0x1e8] sm:$0xff]   ;;  %v3444_v14 = vld [vmem:[%s3990_s1 + $0x160] sm:$0xff]   ;;  %v2607_v19 = vcombine.high %v266_v10, %v270_v11 }
  0x23   : > { %2939 = vmatpush3.bf16.msra.mxu0 %v3422_v22  ;;  %v3443_v9 = vld [vmem:[%s3990_s1 + $0x1a8] sm:$0xff]   ;;  %v3445_v15 = vld [vmem:[%s3990_s1 + $0x120] sm:$0xff]  }
  0x24   : > { %3051 = vmatpush3.bf16.msra.mxu1 %v3423_v23  ;;  %2940 = vmatprep.subr.bf16.mxu0 %v3424_v24  ;;  %v267_v12 = vld [vmem:[%s3625_s8 + $0x108] sm:$0xff]  ;;  %v3446_v17 = vld [vmem:[%s3990_s1 + $0x1e0] sm:$0xff]   ;;  %v3448_v24 = vld [vmem:[%s3990_s1 + $0x158] sm:$0xff]  }
  0x25   : > { %3052 = vmatprep.subr.bf16.mxu1 %v3425_v25  ;;  %v271_v13 = vld [vmem:[%s3625_s8 + $0x128] sm:$0xff]  ;;  %v3447_v20 = vld [vmem:[%s3990_s1 + $0x1a0] sm:$0xff]  }
  0x26   : > { %v2609_v21 = vcombine.high %v267_v12, %v271_v13  ;;  %v274_v22 = vld [vmem:[%s3625_s8 + $0x140] sm:$0xff]  ;;  %v275_v25 = vld [vmem:[%s3625_s8 + $0x148] sm:$0xff] }
  0x27   : > { %2941 = vmatpush3.bf16.msra.mxu0 %v3426_v26  ;;  %v278_v23 = vld [vmem:[%s3625_s8 + $0x160] sm:$0xff]  ;;  %v279_v26 = vld [vmem:[%s3625_s8 + $0x168] sm:$0xff] }
  0x28   : > { %3053 = vmatpush3.bf16.msra.mxu1 %v3427_v27  ;;  %2942 = vmatprep.subr.bf16.mxu0 %v3428_v28  ;;  %v3449_v27 = vld [vmem:[%s3990_s1 + $0x118] sm:$0xff]   ;;  %v2615_v32 = vcombine.high %v274_v22, %v278_v23  ;;  %v2617_v33 = vcombine.high %v275_v25, %v279_v26  ;;  %v3457_v47 = vld [vmem:[%s3990_s1 + $0x108] sm:$0xff]   ;;  %v294_v51 = vld [vmem:[%s3625_s8 + $0x1e0] sm:$0xff] }
  0x29   : > { %3054 = vmatprep.subr.bf16.mxu1 %v3429_v29  ;;  %v3450_v28 = vld [vmem:[%s3990_s1 + $0x1d8] sm:$0xff]   ;;  %v3458_v48 = vld [vmem:[%s3990_s1 + $0x1c8] sm:$0xff]   ;;  %v298_v62 = vld [vmem:[%s3625_s8 + $0x200] sm:$0xff] }
  0x2a   : > { %v3451_v29 = vld [vmem:[%s3990_s1 + $0x198] sm:$0xff]   ;;  %v3459_v49 = vld [vmem:[%s3990_s1 + $0x188] sm:$0xff]   ;;  %v302_v63 = vld [vmem:[%s3625_s8 + $0x220] sm:$0xff] }
  0x2b   : > { %2943 = vmatpush3.bf16.msra.mxu0 %v3430_v30  ;;  %v2606_v30 = vcombine.low %v266_v10, %v270_v11  ;;  %v291_v52 = vld [vmem:[%s3625_s8 + $0x1c8] sm:$0xff]  ;;  %v2638_v10 = vcombine.low %v298_v62, %v302_v63 }
  0x2c   : > { %3055 = vmatpush3.bf16.msra.mxu1 %v3431_v31  ;;  %3152 = vmatprep.subr.bf16.mxu0 %v3432_v40  ;;  %v2608_v31 = vcombine.low %v267_v12, %v271_v13  ;;  %v283_v40 = vld [vmem:[%s3625_s8 + $0x188] sm:$0xff] }
  0x2d   : > { %3264 = vmatprep.subr.bf16.mxu1 %v3434_v42  ;;  %v2614_v42 = vcombine.low %v274_v22, %v278_v23  ;;  %v295_v53 = vld [vmem:[%s3625_s8 + $0x1e8] sm:$0xff]  ;;  %v322_v22 = vld [vmem:[%s3625_s8 + $0x2c0] sm:$0xff] }
  0x2e   : > { %1547 = vmatmul.mubr.bf16.vlgmr.msra.gmra.mxu0 %v2574_v35  ;;  %v282_v35 = vld [vmem:[%s3625_s8 + $0x180] sm:$0xff]  ;;  %v299_v0 = vld [vmem:[%s3625_s8 + $0x208] sm:$0xff] }
  0x2f   : > { %1708 = vmatmul.mubr.bf16.vlgmr.msra.gmra.mxu1 %v2576_v38  ;;  %3153 = vmatpush3.bf16.msra.mxu0 %v3433_v41  ;;  %v286_v38 = vld [vmem:[%s3625_s8 + $0x1a0] sm:$0xff]  ;;  %v287_v41 = vld [vmem:[%s3625_s8 + $0x1a8] sm:$0xff] }
  0x30   : > { %3265 = vmatpush3.bf16.msra.mxu1 %v3435_v43  ;;  %1554 = vmatprep.mubr.bf16.mxu0 %v2583_v46  ;;  %v2616_v43 = vcombine.low %v275_v25, %v279_v26  ;;  %v2623_v44 = vcombine.high %v282_v35, %v286_v38  ;;  %v2625_v45 = vcombine.high %v283_v40, %v287_v41  ;;  %v3456_v46 = vld [vmem:[%s3990_s1 + $0x148] sm:$0xff]   ;;  %v326_v23 = vld [vmem:[%s3625_s8 + $0x2e0] sm:$0xff] }
  0x31   : > { %1715 = vmatprep.mubr.bf16.mxu1 %v2585_v50  ;;  %3154 = vmatprep.subr.bf16.mxu0 %v3436_v55  ;;  %v290_v50 = vld [vmem:[%s3625_s8 + $0x1c0] sm:$0xff]  ;;  %v303_v1 = vld [vmem:[%s3625_s8 + $0x228] sm:$0xff] }
  0x32   : > { %3266 = vmatprep.subr.bf16.mxu1 %v3438_v60  ;;  %v3460_v55 = vld [vmem:[%s3990_s1 + $0x140] sm:$0xff]   ;;  %v2640_v11 = vcombine.low %v299_v0, %v303_v1  ;;  %v327_v25 = vld [vmem:[%s3625_s8 + $0x2e8] sm:$0xff] }
  0x33   : > { %3155 = vmatpush3.bf16.msra.mxu0 %v3437_v58  ;;  %v3461_v58 = vld [vmem:[%s3990_s1 + $0x100] sm:$0xff]  }
  0x34   : > { %3267 = vmatpush3.bf16.msra.mxu1 %v3439_v61  ;;  %3156 = vmatprep.subr.bf16.mxu0 %v3440_v2  ;;  %v3462_v60 = vld [vmem:[%s3990_s1 + $0x1c0] sm:$0xff]   ;;  %v2630_v2 = vcombine.low %v290_v50, %v294_v51 }
  0x35   : > { %3268 = vmatprep.subr.bf16.mxu1 %v3442_v7  ;;  %v3463_v61 = vld [vmem:[%s3990_s1 + $0x180] sm:$0xff]  }
  0x36   : > { %1555 = vmatmul.mubr.bf16.gmra.mxu0 %v2582_v54  ;;  %v2622_v54 = vcombine.low %v282_v35, %v286_v38  ;;  %v310_v7 = vld [vmem:[%s3625_s8 + $0x260] sm:$0xff] }
  0x37   : > { %1716 = vmatmul.mubr.bf16.gmra.mxu1 %v2584_v56  ;;  %1562 = vmatprep.mubr.bf16.mxu0 %v2591_v57  ;;  %v2624_v56 = vcombine.low %v283_v40, %v287_v41  ;;  %v2631_v57 = vcombine.high %v290_v50, %v294_v51  ;;  %v338_v38 = vld [vmem:[%s3625_s8 + $0x340] sm:$0xff]  ;;  %v339_v40 = vld [vmem:[%s3625_s8 + $0x348] sm:$0xff] }
  0x38   : > { %1723 = vmatprep.mubr.bf16.mxu1 %v2593_v59  ;;  %3157 = vmatpush3.bf16.msra.mxu0 %v3441_v4  ;;  %v2633_v59 = vcombine.high %v291_v52, %v295_v53  ;;  %v2639_v4 = vcombine.high %v298_v62, %v302_v63  ;;  %v343_v41 = vld [vmem:[%s3625_s8 + $0x368] sm:$0xff]  ;;  %v236_v62 = vld [vmem:[%s3625_s8 + $0x10] sm:$0xff] }
  0x39   : > { %3269 = vmatpush3.bf16.msra.mxu1 %v3443_v9  ;;  %3158 = vmatprep.subr.bf16.mxu0 %v3444_v14  ;;  %v311_v9 = vld [vmem:[%s3625_s8 + $0x268] sm:$0xff]  ;;  %v314_v14 = vld [vmem:[%s3625_s8 + $0x280] sm:$0xff]  ;;  %v2680_v51 = vcombine.low %v339_v40, %v343_v41  ;;  %v240_v63 = vld [vmem:[%s3625_s8 + $0x30] sm:$0xff] }
  0x3a   : > { %3270 = vmatprep.subr.bf16.mxu1 %v3446_v17  ;;  %v319_v17 = vld [vmem:[%s3625_s8 + $0x2a8] sm:$0xff] }
  0x3c   : > { %3159 = vmatpush3.bf16.msra.mxu0 %v3445_v15  ;;  %v318_v15 = vld [vmem:[%s3625_s8 + $0x2a0] sm:$0xff] }
  0x3d   : > { %3271 = vmatpush3.bf16.msra.mxu1 %v3447_v20  ;;  %3160 = vmatprep.subr.bf16.mxu0 %v3448_v24  ;;  %v2655_v20 = vcombine.high %v314_v14, %v318_v15  ;;  %v323_v24 = vld [vmem:[%s3625_s8 + $0x2c8] sm:$0xff]  ;;  %v2654_v26 = vcombine.low %v314_v14, %v318_v15  ;;  %v252_v14 = vld [vmem:[%s3625_s8 + $0x90] sm:$0xff] }
  0x3e   : > { %1563 = vmatmul.mubr.bf16.gmra.mxu0 %v2590_v3  ;;  %3272 = vmatprep.subr.bf16.mxu1 %v3450_v28  ;;  %v2632_v3 = vcombine.low %v291_v52, %v295_v53  ;;  %v2663_v28 = vcombine.high %v322_v22, %v326_v23  ;;  %v2664_v35 = vcombine.low %v323_v24, %v327_v25  ;;  %v256_v15 = vld [vmem:[%s3625_s8 + $0xb0] sm:$0xff] }
  0x3f   : > { %1724 = vmatmul.mubr.bf16.gmra.mxu1 %v2592_v5  ;;  %1570 = vmatprep.mubr.bf16.mxu0 %v2599_v6  ;;  %v2641_v5 = vcombine.high %v299_v0, %v303_v1  ;;  %v306_v6 = vld [vmem:[%s3625_s8 + $0x240] sm:$0xff]  ;;  %v237_v0 = vld [vmem:[%s3625_s8 + $0x18] sm:$0xff] }
  0x40   : > { %1731 = vmatprep.mubr.bf16.mxu1 %v2601_v8  ;;  %3161 = vmatpush3.bf16.msra.mxu0 %v3449_v27  ;;  %v307_v8 = vld [vmem:[%s3625_s8 + $0x248] sm:$0xff]  ;;  %v2647_v12 = vcombine.high %v306_v6, %v310_v7  ;;  %v241_v1 = vld [vmem:[%s3625_s8 + $0x38] sm:$0xff] }
  0x41   : > { %3273 = vmatpush3.bf16.msra.mxu1 %v3451_v29  ;;  %3162 = vmatprep.subr.bf16.mxu0 %v3452_v34  ;;  %v2649_v13 = vcombine.high %v307_v8, %v311_v9  ;;  %v2665_v29 = vcombine.high %v323_v24, %v327_v25  ;;  %v2662_v34 = vcombine.low %v322_v22, %v326_v23  ;;  %v260_v22 = vld [vmem:[%s3625_s8 + $0xd0] sm:$0xff]  ;;  %v261_v24 = vld [vmem:[%s3625_s8 + $0xd8] sm:$0xff] }
  0x42   : > { %3274 = vmatprep.subr.bf16.mxu1 %v3454_v37  ;;  %v264_v23 = vld [vmem:[%s3625_s8 + $0xf0] sm:$0xff]  ;;  %v265_v25 = vld [vmem:[%s3625_s8 + $0xf8] sm:$0xff] }
  0x44   : > { %3163 = vmatpush3.bf16.msra.mxu0 %v3453_v36 }
  0x45   : > { %3275 = vmatpush3.bf16.msra.mxu1 %v3455_v39  ;;  %3164 = vmatprep.subr.bf16.mxu0 %v3456_v46  ;;  %v342_v39 = vld [vmem:[%s3625_s8 + $0x360] sm:$0xff] }
  0x46   : > { %1571 = vmatmul.mubr.bf16.gmra.mxu0 %v2598_v16  ;;  %3276 = vmatprep.subr.bf16.mxu1 %v3458_v48  ;;  %v315_v16 = vld [vmem:[%s3625_s8 + $0x288] sm:$0xff]  ;;  %v346_v46 = vld [vmem:[%s3625_s8 + $0x380] sm:$0xff]  ;;  %v2678_v50 = vcombine.low %v338_v38, %v342_v39 }
  0x47   : > { %1732 = vmatmul.mubr.bf16.gmra.mxu1 %v2600_v18  ;;  %1578 = vmatprep.mubr.bf16.mxu0 %v2607_v19  ;;  %v2646_v18 = vcombine.low %v306_v6, %v310_v7  ;;  %v2648_v19 = vcombine.low %v307_v8, %v311_v9  ;;  %v2656_v27 = vcombine.low %v315_v16, %v319_v17  ;;  %v347_v48 = vld [vmem:[%s3625_s8 + $0x388] sm:$0xff]  ;;  %v244_v6 = vld [vmem:[%s3625_s8 + $0x50] sm:$0xff]  ;;  %v245_v8 = vld [vmem:[%s3625_s8 + $0x58] sm:$0xff] }
  0x48   : > { %1739 = vmatprep.mubr.bf16.mxu1 %v2609_v21  ;;  %3165 = vmatpush3.bf16.msra.mxu0 %v3457_v47  ;;  %v2657_v21 = vcombine.high %v315_v16, %v319_v17  ;;  %v350_v47 = vld [vmem:[%s3625_s8 + $0x3a0] sm:$0xff]  ;;  %v248_v7 = vld [vmem:[%s3625_s8 + $0x70] sm:$0xff]  ;;  %v249_v9 = vld [vmem:[%s3625_s8 + $0x78] sm:$0xff] }
  0x49   : > { %3277 = vmatpush3.bf16.msra.mxu1 %v3459_v49  ;;  %3166 = vmatprep.subr.bf16.mxu0 %v3460_v55  ;;  %v351_v49 = vld [vmem:[%s3625_s8 + $0x3a8] sm:$0xff]  ;;  %v2687_v52 = vcombine.high %v346_v46, %v350_v47  ;;  %v358_v55 = vld [vmem:[%s3625_s8 + $0x3e0] sm:$0xff]  ;;  %v253_v16 = vld [vmem:[%s3625_s8 + $0x98] sm:$0xff] }
  0x4a   : > { %3278 = vmatprep.subr.bf16.mxu1 %v3462_v60  ;;  %v2689_v53 = vcombine.high %v347_v48, %v351_v49  ;;  %v257_v17 = vld [vmem:[%s3625_s8 + $0xb8] sm:$0xff] }
  0x4c   : > { %3167 = vmatpush3.bf16.msra.mxu0 %v3461_v58  ;;  %v2686_v58 = vcombine.low %v346_v46, %v350_v47  ;;  %v284_v46 = vld [vmem:[%s3625_s8 + $0x190] sm:$0xff] }
  0x4d   : > { %3279 = vmatpush3.bf16.msra.mxu1 %v3463_v61  ;;  %v288_v47 = vld [vmem:[%s3625_s8 + $0x1b0] sm:$0xff] }
  0x4e   : > { %1579 = vmatmul.mubr.bf16.gmra.mxu0 %v2606_v30  ;;  %v330_v30 = vld [vmem:[%s3625_s8 + $0x300] sm:$0xff] }
  0x4f   : > { %1740 = vmatmul.mubr.bf16.gmra.mxu1 %v2608_v31  ;;  %1586 = vmatprep.mubr.bf16.mxu0 %v2615_v32  ;;  %v334_v31 = vld [vmem:[%s3625_s8 + $0x320] sm:$0xff]  ;;  %v331_v32 = vld [vmem:[%s3625_s8 + $0x308] sm:$0xff] }
  0x50   : > { %1747 = vmatprep.mubr.bf16.mxu1 %v2617_v33  ;;  %v335_v33 = vld [vmem:[%s3625_s8 + $0x328] sm:$0xff]  ;;  %v2671_v36 = vcombine.high %v330_v30, %v334_v31 }
  0x51   : > { %v2673_v37 = vcombine.high %v331_v32, %v335_v33 }
  0x56   : > { %1587 = vmatmul.mubr.bf16.gmra.mxu0 %v2614_v42  ;;  %v2670_v42 = vcombine.low %v330_v30, %v334_v31  ;;  %v268_v30 = vld [vmem:[%s3625_s8 + $0x110] sm:$0xff] }
  0x57   : > { %1748 = vmatmul.mubr.bf16.gmra.mxu1 %v2616_v43  ;;  %1594 = vmatprep.mubr.bf16.mxu0 %v2623_v44  ;;  %v2672_v43 = vcombine.low %v331_v32, %v335_v33  ;;  %v2679_v44 = vcombine.high %v338_v38, %v342_v39  ;;  %v272_v31 = vld [vmem:[%s3625_s8 + $0x130] sm:$0xff]  ;;  %v269_v32 = vld [vmem:[%s3625_s8 + $0x118] sm:$0xff] }
  0x58   : > { %1755 = vmatprep.mubr.bf16.mxu1 %v2625_v45  ;;  %v2681_v45 = vcombine.high %v339_v40, %v343_v41  ;;  %v273_v33 = vld [vmem:[%s3625_s8 + $0x138] sm:$0xff]  ;;  %v276_v38 = vld [vmem:[%s3625_s8 + $0x150] sm:$0xff] }
  0x59   : > { %v280_v39 = vld [vmem:[%s3625_s8 + $0x170] sm:$0xff]  ;;  %v277_v40 = vld [vmem:[%s3625_s8 + $0x158] sm:$0xff] }
  0x5a   : > { %v281_v41 = vld [vmem:[%s3625_s8 + $0x178] sm:$0xff] }
  0x5e   : > { %1595 = vmatmul.mubr.bf16.gmra.mxu0 %v2622_v54  ;;  %v354_v54 = vld [vmem:[%s3625_s8 + $0x3c0] sm:$0xff] }
  0x5f   : > { %1756 = vmatmul.mubr.bf16.gmra.mxu1 %v2624_v56  ;;  %1602 = vmatprep.mubr.bf16.mxu0 %v2631_v57  ;;  %v355_v56 = vld [vmem:[%s3625_s8 + $0x3c8] sm:$0xff]  ;;  %v2695_v60 = vcombine.high %v354_v54, %v358_v55 }
  0x60   : > { %1763 = vmatprep.mubr.bf16.mxu1 %v2633_v59  ;;  %v359_v57 = vld [vmem:[%s3625_s8 + $0x3e8] sm:$0xff]  ;;  %v2688_v59 = vcombine.low %v347_v48, %v351_v49  ;;  %v285_v48 = vld [vmem:[%s3625_s8 + $0x198] sm:$0xff] }
  0x61   : > { %v2697_v61 = vcombine.high %v355_v56, %v359_v57  ;;  %v289_v49 = vld [vmem:[%s3625_s8 + $0x1b8] sm:$0xff] }
  0x66   : > { %1603 = vmatmul.mubr.bf16.gmra.mxu0 %v2630_v2  ;;  %v2694_v2 = vcombine.low %v354_v54, %v358_v55  ;;  %v292_v54 = vld [vmem:[%s3625_s8 + $0x1d0] sm:$0xff] }
  0x67   : > { %1764 = vmatmul.mubr.bf16.gmra.mxu1 %v2632_v3  ;;  %1610 = vmatprep.mubr.bf16.mxu0 %v2639_v4  ;;  %v2696_v3 = vcombine.low %v355_v56, %v359_v57  ;;  %v2579_v4 = vcombine.high %v236_v62, %v240_v63  ;;  %v296_v55 = vld [vmem:[%s3625_s8 + $0x1f0] sm:$0xff]  ;;  %v293_v56 = vld [vmem:[%s3625_s8 + $0x1d8] sm:$0xff] }
  0x68   : > { %1771 = vmatprep.mubr.bf16.mxu1 %v2641_v5  ;;  %v2581_v5 = vcombine.high %v237_v0, %v241_v1  ;;  %v297_v57 = vld [vmem:[%s3625_s8 + $0x1f8] sm:$0xff] }
  0x6e   : > { %1611 = vmatmul.mubr.bf16.gmra.mxu0 %v2638_v10  ;;  %v2578_v10 = vcombine.low %v236_v62, %v240_v63  ;;  %v300_v62 = vld [vmem:[%s3625_s8 + $0x210] sm:$0xff] }
  0x6f   : > { %1772 = vmatmul.mubr.bf16.gmra.mxu1 %v2640_v11  ;;  %1618 = vmatprep.mubr.bf16.mxu0 %v2647_v12  ;;  %v2580_v11 = vcombine.low %v237_v0, %v241_v1  ;;  %v2587_v12 = vcombine.high %v244_v6, %v248_v7  ;;  %v304_v63 = vld [vmem:[%s3625_s8 + $0x230] sm:$0xff]  ;;  %v301_v0 = vld [vmem:[%s3625_s8 + $0x218] sm:$0xff] }
  0x70   : > { %1779 = vmatprep.mubr.bf16.mxu1 %v2649_v13  ;;  %v2589_v13 = vcombine.high %v245_v8, %v249_v9  ;;  %v305_v1 = vld [vmem:[%s3625_s8 + $0x238] sm:$0xff] }
  0x76   : > { %1619 = vmatmul.mubr.bf16.gmra.mxu0 %v2646_v18  ;;  %v2586_v18 = vcombine.low %v244_v6, %v248_v7  ;;  %v308_v6 = vld [vmem:[%s3625_s8 + $0x250] sm:$0xff] }
  0x77   : > { %1780 = vmatmul.mubr.bf16.gmra.mxu1 %v2648_v19  ;;  %1626 = vmatprep.mubr.bf16.mxu0 %v2655_v20  ;;  %v2588_v19 = vcombine.low %v245_v8, %v249_v9  ;;  %v2595_v20 = vcombine.high %v252_v14, %v256_v15  ;;  %v312_v7 = vld [vmem:[%s3625_s8 + $0x270] sm:$0xff]  ;;  %v309_v8 = vld [vmem:[%s3625_s8 + $0x258] sm:$0xff] }
  0x78   : > { %1787 = vmatprep.mubr.bf16.mxu1 %v2657_v21  ;;  %v2597_v21 = vcombine.high %v253_v16, %v257_v17  ;;  %v313_v9 = vld [vmem:[%s3625_s8 + $0x278] sm:$0xff] }
  0x7e   : > { %1627 = vmatmul.mubr.bf16.gmra.mxu0 %v2654_v26  ;;  %v2594_v26 = vcombine.low %v252_v14, %v256_v15 }
  0x7f   : > { %1788 = vmatmul.mubr.bf16.gmra.mxu1 %v2656_v27  ;;  %1634 = vmatprep.mubr.bf16.mxu0 %v2663_v28  ;;  %v2596_v27 = vcombine.low %v253_v16, %v257_v17  ;;  %v2603_v28 = vcombine.high %v260_v22, %v264_v23  ;;  %v316_v17 = vld [vmem:[%s3625_s8 + $0x290] sm:$0xff] }
  0x80   : > { %1795 = vmatprep.mubr.bf16.mxu1 %v2665_v29  ;;  %v2605_v29 = vcombine.high %v261_v24, %v265_v25 }
  0x86   : > { %1635 = vmatmul.mubr.bf16.gmra.mxu0 %v2662_v34  ;;  %v2602_v34 = vcombine.low %v260_v22, %v264_v23  ;;  %v321_v22 = vld [vmem:[%s3625_s8 + $0x2b8] sm:$0xff] }
  0x87   : > { %1796 = vmatmul.mubr.bf16.gmra.mxu1 %v2664_v35  ;;  %1642 = vmatprep.mubr.bf16.mxu0 %v2671_v36  ;;  %v2604_v35 = vcombine.low %v261_v24, %v265_v25  ;;  %v2611_v36 = vcombine.high %v268_v30, %v272_v31  ;;  %v2650_v25 = vcombine.low %v308_v6, %v312_v7 }
  0x88   : > { %1803 = vmatprep.mubr.bf16.mxu1 %v2673_v37  ;;  %v2613_v37 = vcombine.high %v269_v32, %v273_v33 }
  0x8e   : > { %1643 = vmatmul.mubr.bf16.gmra.mxu0 %v2670_v42  ;;  %v2610_v42 = vcombine.low %v268_v30, %v272_v31 }
  0x8f   : > { %1804 = vmatmul.mubr.bf16.gmra.mxu1 %v2672_v43  ;;  %1650 = vmatprep.mubr.bf16.mxu0 %v2679_v44  ;;  %v2612_v43 = vcombine.low %v269_v32, %v273_v33  ;;  %v2619_v44 = vcombine.high %v276_v38, %v280_v39 }
  0x90   : > { %1811 = vmatprep.mubr.bf16.mxu1 %v2681_v45  ;;  %v2621_v45 = vcombine.high %v277_v40, %v281_v41 }
  0x96   : > { %1651 = vmatmul.mubr.bf16.gmra.mxu0 %v2678_v50  ;;  %v2618_v50 = vcombine.low %v276_v38, %v280_v39  ;;  %v324_v39 = vld [vmem:[%s3625_s8 + $0x2d0] sm:$0xff] }
  0x97   : > { %1812 = vmatmul.mubr.bf16.gmra.mxu1 %v2680_v51  ;;  %1658 = vmatprep.mubr.bf16.mxu0 %v2687_v52  ;;  %v2620_v51 = vcombine.low %v277_v40, %v281_v41  ;;  %v2627_v52 = vcombine.high %v284_v46, %v288_v47  ;;  %v328_v40 = vld [vmem:[%s3625_s8 + $0x2f0] sm:$0xff] }
  0x98   : > { %1819 = vmatprep.mubr.bf16.mxu1 %v2689_v53  ;;  %v2629_v53 = vcombine.high %v285_v48, %v289_v49 }
  0x9e   : > { %1659 = vmatmul.mubr.bf16.gmra.mxu0 %v2686_v58  ;;  %v2626_v58 = vcombine.low %v284_v46, %v288_v47 }
  0x9f   : > { %1820 = vmatmul.mubr.bf16.gmra.mxu1 %v2688_v59  ;;  %1666 = vmatprep.mubr.bf16.mxu0 %v2695_v60  ;;  %v2628_v59 = vcombine.low %v285_v48, %v289_v49  ;;  %v2635_v60 = vcombine.high %v292_v54, %v296_v55 }
  0xa0   : > { %1827 = vmatprep.mubr.bf16.mxu1 %v2697_v61  ;;  %v2637_v61 = vcombine.high %v293_v56, %v297_v57 }
  0xa6   : > { %1667 = vmatmul.mubr.bf16.gmra.mxu0 %v2694_v2  ;;  %v2634_v2 = vcombine.low %v292_v54, %v296_v55 }
  0xa7   : > { %1828 = vmatmul.mubr.bf16.gmra.mxu1 %v2696_v3  ;;  %1868 = vmatprep.mubr.bf16.mxu0 %v2579_v4  ;;  %v2636_v3 = vcombine.low %v293_v56, %v297_v57  ;;  %v2643_v4 = vcombine.high %v300_v62, %v304_v63 }
  0xa8   : > { %2029 = vmatprep.mubr.bf16.mxu1 %v2581_v5  ;;  %v2645_v5 = vcombine.high %v301_v0, %v305_v1 }
  0xae   : > { %1869 = vmatmul.mubr.bf16.vlgmr.msra.gmra.mxu0 %v2578_v10  ;;  %v2642_v10 = vcombine.low %v300_v62, %v304_v63  ;;  %v336_v62 = vld [vmem:[%s3625_s8 + $0x330] sm:$0xff] }
  0xaf   : > { %2030 = vmatmul.mubr.bf16.vlgmr.msra.gmra.mxu1 %v2580_v11  ;;  %1876 = vmatprep.mubr.bf16.mxu0 %v2587_v12  ;;  %v2644_v11 = vcombine.low %v301_v0, %v305_v1  ;;  %v2651_v12 = vcombine.high %v308_v6, %v312_v7  ;;  %v333_v1 = vld [vmem:[%s3625_s8 + $0x318] sm:$0xff] }
  0xb0   : > { %2037 = vmatprep.mubr.bf16.mxu1 %v2589_v13  ;;  %v2653_v13 = vcombine.high %v309_v8, %v313_v9 }
  0xb6   : > { %1877 = vmatmul.mubr.bf16.gmra.mxu0 %v2586_v18  ;;  %v320_v18 = vld [vmem:[%s3625_s8 + $0x2b0] sm:$0xff] }
  0xb7   : > { %2038 = vmatmul.mubr.bf16.gmra.mxu1 %v2588_v19  ;;  %1884 = vmatprep.mubr.bf16.mxu0 %v2595_v20  ;;  %v2658_v47 = vcombine.low %v316_v17, %v320_v18 }
  0xb8   : > { %2045 = vmatprep.mubr.bf16.mxu1 %v2597_v21  ;;  %v317_v21 = vld [vmem:[%s3625_s8 + $0x298] sm:$0xff] }
  0xb9   : > { %v2661_v31 = vcombine.high %v317_v21, %v321_v22  ;;  %v2660_v49 = vcombine.low %v317_v21, %v321_v22 }
  0xbe   : > { %1885 = vmatmul.mubr.bf16.gmra.mxu0 %v2594_v26 }
  0xbf   : > { %2046 = vmatmul.mubr.bf16.gmra.mxu1 %v2596_v27  ;;  %1892 = vmatprep.mubr.bf16.mxu0 %v2603_v28  ;;  %v2652_v27 = vcombine.low %v309_v8, %v313_v9  ;;  %v2659_v28 = vcombine.high %v316_v17, %v320_v18 }
  0xc0   : > { %2053 = vmatprep.mubr.bf16.mxu1 %v2605_v29 }
  0xc6   : > { %1893 = vmatmul.mubr.bf16.gmra.mxu0 %v2602_v34 }
  0xc7   : > { %2054 = vmatmul.mubr.bf16.gmra.mxu1 %v2604_v35  ;;  %1900 = vmatprep.mubr.bf16.mxu0 %v2611_v36 }
  0xc8   : > { %2061 = vmatprep.mubr.bf16.mxu1 %v2613_v37 }
  0xce   : > { %1901 = vmatmul.mubr.bf16.gmra.mxu0 %v2610_v42 }
  0xcf   : > { %2062 = vmatmul.mubr.bf16.gmra.mxu1 %v2612_v43  ;;  %1908 = vmatprep.mubr.bf16.mxu0 %v2619_v44  ;;  %v325_v43 = vld [vmem:[%s3625_s8 + $0x2d8] sm:$0xff] }
  0xd0   : > { %2069 = vmatprep.mubr.bf16.mxu1 %v2621_v45  ;;  %v329_v44 = vld [vmem:[%s3625_s8 + $0x2f8] sm:$0xff] }
  0xd1   : > { %v2668_v7 = vcombine.low %v325_v43, %v329_v44 }
  0xd6   : > { %1909 = vmatmul.mubr.bf16.gmra.mxu0 %v2618_v50  ;;  %v2667_v50 = vcombine.high %v324_v39, %v328_v40 }
  0xd7   : > { %2070 = vmatmul.mubr.bf16.gmra.mxu1 %v2620_v51  ;;  %1916 = vmatprep.mubr.bf16.mxu0 %v2627_v52 }
  0xd8   : > { %2077 = vmatprep.mubr.bf16.mxu1 %v2629_v53  ;;  %v2669_v53 = vcombine.high %v325_v43, %v329_v44  ;;  %v348_v43 = vld [vmem:[%s3625_s8 + $0x390] sm:$0xff] }
  0xd9   : > { %v352_v44 = vld [vmem:[%s3625_s8 + $0x3b0] sm:$0xff] }
  0xde   : > { %1917 = vmatmul.mubr.bf16.gmra.mxu0 %v2626_v58 }
  0xdf   : > { %2078 = vmatmul.mubr.bf16.gmra.mxu1 %v2628_v59  ;;  %1924 = vmatprep.mubr.bf16.mxu0 %v2635_v60 }
  0xe0   : > { %2085 = vmatprep.mubr.bf16.mxu1 %v2637_v61  ;;  %v332_v61 = vld [vmem:[%s3625_s8 + $0x310] sm:$0xff] }
  0xe1   : > { %v2675_v8 = vcombine.high %v332_v61, %v336_v62 }
  0xe6   : > { %1925 = vmatmul.mubr.bf16.gmra.mxu0 %v2634_v2  ;;  %v337_v2 = vld [vmem:[%s3625_s8 + $0x338] sm:$0xff] }
  0xe7   : > { %2086 = vmatmul.mubr.bf16.gmra.mxu1 %v2636_v3  ;;  %1932 = vmatprep.mubr.bf16.mxu0 %v2643_v4 }
  0xe8   : > { %2093 = vmatprep.mubr.bf16.mxu1 %v2645_v5  ;;  %v2666_v5 = vcombine.low %v324_v39, %v328_v40 }
  0xee   : > { %v2944_v14 = vpop.f32.mrf.mxu0  ;;  %1933 = vmatmul.mubr.bf16.gmra.mxu0 %v2642_v10 }
  0xef   : > { %v3056_v15 = vpop.f32.mrf.mxu1  ;;  %2094 = vmatmul.mubr.bf16.gmra.mxu1 %v2644_v11  ;;  %1940 = vmatprep.mubr.bf16.mxu0 %v2651_v12  ;;  %v2677_v11 = vcombine.high %v333_v1, %v337_v2 }
  0xf0   : > { %v2945_v16 = vpop.f32.mrf.mxu0  ;;  %2101 = vmatprep.mubr.bf16.mxu1 %v2653_v13 }
  0xf1   : > { %v2946_v19 = vadd.f32 %v2945_v16, %v2944_v14  ;;  %v3057_v20 = vpop.f32.mrf.mxu1 }
  0xf2   : > { %v3058_v23 = vadd.f32 %v3057_v20, %v3056_v15  ;;  %v2947_v24 = vpop.f32.mrf.mxu0  ;;  %v344_v20 = vld [vmem:[%s3625_s8 + $0x370] sm:$0xff] }
  0xf3   : > { %v3059_v26 = vpop.f32.mrf.mxu1 }
  0xf4   : > { %v3837_v29 = vadd.f32 %v3058_v23, %v2946_v19  ;;  %v2948_v30 = vpop.f32.mrf.mxu0  ;;  %v340_v19 = vld [vmem:[%s3625_s8 + $0x350] sm:$0xff]  ;;  %v341_v23 = vld [vmem:[%s3625_s8 + $0x358] sm:$0xff] }
  0xf5   : > { %v2949_v32 = vadd.f32 %v2948_v30, %v2947_v24  ;;  %v3060_v33 = vpop.f32.mrf.mxu1  ;;  %v345_v24 = vld [vmem:[%s3625_s8 + $0x378] sm:$0xff]  ;;  %v2676_v30 = vcombine.low %v333_v1, %v337_v2 }
  0xf6   : > { %v3061_v34 = vadd.f32 %v3060_v33, %v3059_v26  ;;  %v2950_v35 = vpop.f32.mrf.mxu0  ;;  %1941 = vmatmul.mubr.bf16.gmra.mxu0 %v2650_v25 }
  0xf7   : > { %v3062_v36 = vpop.f32.mrf.mxu1  ;;  %2102 = vmatmul.mubr.bf16.gmra.mxu1 %v2652_v27  ;;  %1948 = vmatprep.mubr.bf16.mxu0 %v2659_v28  ;;  %v2674_v27 = vcombine.low %v332_v61, %v336_v62 }
  0xf8   : > { %v3839_v37 = vadd.f32 %v3061_v34, %v2949_v32  ;;  %v2951_v38 = vpop.f32.mrf.mxu0  ;;  %2109 = vmatprep.mubr.bf16.mxu1 %v2661_v31  ;;  %v2683_v31 = vcombine.high %v340_v19, %v344_v20  ;;  %v2685_v34 = vcombine.high %v341_v23, %v345_v24 }
  0xf9   : > { %v2952_v41 = vadd.f32 %v2951_v38, %v2950_v35  ;;  %v3063_v42 = vpop.f32.mrf.mxu1 }
  0xfa   : > { %v3064_v45 = vadd.f32 %v3063_v42, %v3062_v36  ;;  %v2953_v46 = vpop.f32.mrf.mxu0 }
  0xfb   : > { %v3065_v48 = vpop.f32.mrf.mxu1 }
  0xfc   : > { %v3845_v51 = vadd.f32 %v3064_v45, %v2952_v41  ;;  %v2954_v52 = vpop.f32.mrf.mxu0 }
  0xfd   : > { %v2955_v54 = vadd.f32 %v2954_v52, %v2953_v46  ;;  %v3066_v55 = vpop.f32.mrf.mxu1  ;;  %v2682_v52 = vcombine.low %v340_v19, %v344_v20 }
  0xfe   : > { %v3067_v56 = vadd.f32 %v3066_v55, %v3065_v48  ;;  %v2956_v57 = vpop.f32.mrf.mxu0  ;;  %1949 = vmatmul.mubr.bf16.gmra.mxu0 %v2658_v47  ;;  %v349_v47 = vld [vmem:[%s3625_s8 + $0x398] sm:$0xff]  ;;  %v2691_v55 = vcombine.high %v348_v43, %v352_v44 }
  0xff   : > { %v3068_v58 = vpop.f32.mrf.mxu1  ;;  %2110 = vmatmul.mubr.bf16.gmra.mxu1 %v2660_v49  ;;  %1956 = vmatprep.mubr.bf16.mxu0 %v2667_v50  ;;  %v353_v48 = vld [vmem:[%s3625_s8 + $0x3b8] sm:$0xff] }
 0x100   : > { %v3847_v59 = vadd.f32 %v3067_v56, %v2955_v54  ;;  %v2957_v60 = vpop.f32.mrf.mxu0  ;;  %2117 = vmatprep.mubr.bf16.mxu1 %v2669_v53  ;;  %v2684_v54 = vcombine.low %v341_v23, %v345_v24 }
 0x101   : > { %v2958_v63 = vadd.f32 %v2957_v60, %v2956_v57  ;;  %v3069_v0 = vpop.f32.mrf.mxu1 }
 0x102   : > { %v3070_v3 = vadd.f32 %v3069_v0, %v3068_v58  ;;  %v2959_v4 = vpop.f32.mrf.mxu0  ;;  %v2693_v58 = vcombine.high %v349_v47, %v353_v48 }
 0x103   : > { %v3071_v6 = vpop.f32.mrf.mxu1 }
 0x104   : > { %v3853_v9 = vadd.f32 %v3070_v3, %v2958_v63  ;;  %v2960_v10 = vpop.f32.mrf.mxu0  ;;  %v356_v3 = vld [vmem:[%s3625_s8 + $0x3d0] sm:$0xff] }
 0x105   : > { %v2961_v12 = vadd.f32 %v2960_v10, %v2959_v4  ;;  %v3072_v13 = vpop.f32.mrf.mxu1  ;;  %v360_v4 = vld [vmem:[%s3625_s8 + $0x3f0] sm:$0xff] }
 0x106   : > { %v3073_v14 = vadd.f32 %v3072_v13, %v3071_v6  ;;  %v2962_v15 = vpop.f32.mrf.mxu0  ;;  %1957 = vmatmul.mubr.bf16.gmra.mxu0 %v2666_v5 }
 0x107   : > { %v3074_v16 = vpop.f32.mrf.mxu1  ;;  %2118 = vmatmul.mubr.bf16.gmra.mxu1 %v2668_v7  ;;  %1964 = vmatprep.mubr.bf16.mxu0 %v2675_v8  ;;  %v357_v7 = vld [vmem:[%s3625_s8 + $0x3d8] sm:$0xff] }
 0x108   : > { %v3855_v17 = vadd.f32 %v3073_v14, %v2961_v12  ;;  %v2963_v18 = vpop.f32.mrf.mxu0  ;;  %2125 = vmatprep.mubr.bf16.mxu1 %v2677_v11  ;;  %v361_v8 = vld [vmem:[%s3625_s8 + $0x3f8] sm:$0xff]  ;;  %v2690_v12 = vcombine.low %v348_v43, %v352_v44  ;;  %v2692_v14 = vcombine.low %v349_v47, %v353_v48  ;;  %s2572_s8 = sshll.u32 %s3998_s25, 2  ;;  %s2573_s25 = sshll.u32 %s4000_s12, 3 }
 0x109   : > { %v2964_v21 = vadd.f32 %v2963_v18, %v2962_v15  ;;  %v3075_v22 = vpop.f32.mrf.mxu1  ;;  %v2699_v15 = vcombine.high %v356_v3, %v360_v4  ;;  %v2701_v19 = vcombine.high %v357_v7, %v361_v8  ;;  %s3927_s20 = scalar_lea.vmem %s3991_s2, %s2572_s8  ;;  %s232_s23 = scalar_lea.vmem %s3992_s3, %s2573_s25 }
 0x10a   : > { %v3076_v25 = vadd.f32 %v3075_v22, %v3074_v16  ;;  %v2965_v26 = vpop.f32.mrf.mxu0 }
 0x10b   : > { %v3077_v28 = vpop.f32.mrf.mxu1 }
 0x10c   : > { %v3861_v32 = vadd.f32 %v3076_v25, %v2964_v21  ;;  %v2966_v33 = vpop.f32.mrf.mxu0 }
 0x10d   : > { %v2967_v35 = vadd.f32 %v2966_v33, %v2965_v26  ;;  %v3078_v36 = vpop.f32.mrf.mxu1  ;;  %v2698_v33 = vcombine.low %v356_v3, %v360_v4 }
 0x10e   : > { %v3079_v38 = vadd.f32 %v3078_v36, %v3077_v28  ;;  %v2968_v39 = vpop.f32.mrf.mxu0  ;;  %1965 = vmatmul.mubr.bf16.gmra.mxu0 %v2674_v27 }
 0x10f   : > { %v3080_v40 = vpop.f32.mrf.mxu1  ;;  %2126 = vmatmul.mubr.bf16.gmra.mxu1 %v2676_v30  ;;  %1972 = vmatprep.mubr.bf16.mxu0 %v2683_v31 }
 0x110   : > { %v3863_v41 = vadd.f32 %v3079_v38, %v2967_v35  ;;  %v2969_v42 = vpop.f32.mrf.mxu0  ;;  %2133 = vmatprep.mubr.bf16.mxu1 %v2685_v34  ;;  %v2700_v35 = vcombine.low %v357_v7, %v361_v8 }
 0x111   : > { %v2970_v45 = vadd.f32 %v2969_v42, %v2968_v39  ;;  %v3081_v46 = vpop.f32.mrf.mxu1 }
 0x112   : > { %v3082_v49 = vadd.f32 %v3081_v46, %v3080_v40  ;;  %v2971_v50 = vpop.f32.mrf.mxu0 }
 0x113   : > { %v3083_v53 = vpop.f32.mrf.mxu1 }
 0x114   : > { %v3869_v56 = vadd.f32 %v3082_v49, %v2970_v45  ;;  %v2972_v57 = vpop.f32.mrf.mxu0 }
 0x115   : > { %v2973_v60 = vadd.f32 %v2972_v57, %v2971_v50  ;;  %v3084_v61 = vpop.f32.mrf.mxu1 }
 0x116   : > { %v3085_v62 = vadd.f32 %v3084_v61, %v3083_v53  ;;  %v2974_v63 = vpop.f32.mrf.mxu0  ;;  %1973 = vmatmul.mubr.bf16.gmra.mxu0 %v2682_v52 }
 0x117   : > { %v3086_v0 = vpop.f32.mrf.mxu1  ;;  %2134 = vmatmul.mubr.bf16.gmra.mxu1 %v2684_v54  ;;  %1980 = vmatprep.mubr.bf16.mxu0 %v2691_v55 }
 0x118   : > { %v3871_v1 = vadd.f32 %v3085_v62, %v2973_v60  ;;  %v2975_v2 = vpop.f32.mrf.mxu0  ;;  %2141 = vmatprep.mubr.bf16.mxu1 %v2693_v58 }
 0x119   : > { %v2976_v5 = vadd.f32 %v2975_v2, %v2974_v63  ;;  %v3087_v6 = vpop.f32.mrf.mxu1 }
 0x11a   : > { %v3088_v10 = vadd.f32 %v3087_v6, %v3086_v0  ;;  %v2977_v11 = vpop.f32.mrf.mxu0 }
 0x11b   : > { %v3089_v13 = vpop.f32.mrf.mxu1 }
 0x11c   : > { %v3877_v16 = vadd.f32 %v3088_v10, %v2976_v5  ;;  %v2978_v18 = vpop.f32.mrf.mxu0 }
 0x11d   : > { %v2979_v20 = vadd.f32 %v2978_v18, %v2977_v11  ;;  %v3090_v21 = vpop.f32.mrf.mxu1 }
 0x11e   : > { %v3091_v22 = vadd.f32 %v3090_v21, %v3089_v13  ;;  %v2980_v23 = vpop.f32.mrf.mxu0  ;;  %1981 = vmatmul.mubr.bf16.gmra.mxu0 %v2690_v12 }
 0x11f   : > { %v3092_v24 = vpop.f32.mrf.mxu1  ;;  %2142 = vmatmul.mubr.bf16.gmra.mxu1 %v2692_v14  ;;  %1988 = vmatprep.mubr.bf16.mxu0 %v2699_v15 }
 0x120   : > { %v3879_v25 = vadd.f32 %v3091_v22, %v2979_v20  ;;  %v2981_v26 = vpop.f32.mrf.mxu0  ;;  %2149 = vmatprep.mubr.bf16.mxu1 %v2701_v19 }
 0x121   : > { %v2982_v27 = vadd.f32 %v2981_v26, %v2980_v23  ;;  %v3093_v28 = vpop.f32.mrf.mxu1 }
 0x122   : > { %v3094_v30 = vadd.f32 %v3093_v28, %v3092_v24  ;;  %v2983_v31 = vpop.f32.mrf.mxu0 }
 0x123   : > { %v3095_v34 = vpop.f32.mrf.mxu1 }
 0x124   : > { %v3881_v36 = vadd.f32 %v3094_v30, %v2982_v27  ;;  %v2984_v38 = vpop.f32.mrf.mxu0 }
 0x125   : > { %v2985_v39 = vadd.f32 %v2984_v38, %v2983_v31  ;;  %v3096_v40 = vpop.f32.mrf.mxu1 }
 0x126   : > { %v3097_v42 = vadd.f32 %v3096_v40, %v3095_v34  ;;  %v2986_v43 = vpop.f32.mrf.mxu0  ;;  %1989 = vmatmul.mubr.bf16.gmra.mxu0 %v2698_v33 }
 0x127   : > { %v3098_v44 = vpop.f32.mrf.mxu1  ;;  %2150 = vmatmul.mubr.bf16.gmra.mxu1 %v2700_v35 }
 0x128   : > { %v3883_v45 = vadd.f32 %v3097_v42, %v2985_v39  ;;  %v2987_v46 = vpop.f32.mrf.mxu0 }
 0x129   : > { %v2988_v47 = vadd.f32 %v2987_v46, %v2986_v43  ;;  %v3099_v48 = vpop.f32.mrf.mxu1 }
 0x12a   : > { %v3100_v49 = vadd.f32 %v3099_v48, %v3098_v44  ;;  %v2989_v50 = vpop.f32.mrf.mxu0 }
 0x12b   : > { %v3101_v52 = vpop.f32.mrf.mxu1 }
 0x12c   : > { %v3885_v53 = vadd.f32 %v3100_v49, %v2988_v47  ;;  %v2990_v54 = vpop.f32.mrf.mxu0 }
 0x12d   : > { %v2991_v55 = vadd.f32 %v2990_v54, %v2989_v50  ;;  %v3102_v57 = vpop.f32.mrf.mxu1 }
 0x12e   : > { %v3103_v58 = vadd.f32 %v3102_v57, %v3101_v52  ;;  %v2992_v60 = vpop.f32.mrf.mxu0 }
 0x12f   : > { %v3104_v61 = vpop.f32.mrf.mxu1 }
 0x130   : > { %v3887_v62 = vadd.f32 %v3103_v58, %v2991_v55  ;;  %v2993_v63 = vpop.f32.mrf.mxu0 }
 0x131   : > { %v2994_v0 = vadd.f32 %v2993_v63, %v2992_v60  ;;  %v3105_v2 = vpop.f32.mrf.mxu1 }
 0x132   : > { %v3106_v3 = vadd.f32 %v3105_v2, %v3104_v61  ;;  %v2995_v4 = vpop.f32.mrf.mxu0 }
 0x133   : > { %v3107_v5 = vpop.f32.mrf.mxu1 }
 0x134   : > { %v3889_v6 = vadd.f32 %v3106_v3, %v2994_v0  ;;  %v2996_v7 = vpop.f32.mrf.mxu0 }
 0x135   : > { %v2997_v8 = vadd.f32 %v2996_v7, %v2995_v4  ;;  %v3108_v10 = vpop.f32.mrf.mxu1 }
 0x136   : > { %v3109_v11 = vadd.f32 %v3108_v10, %v3107_v5  ;;  %v2998_v12 = vpop.f32.mrf.mxu0 }
 0x137   : > { %v3110_v13 = vpop.f32.mrf.mxu1 }
 0x138   : > { %v3891_v14 = vadd.f32 %v3109_v11, %v2997_v8  ;;  %v2999_v15 = vpop.f32.mrf.mxu0 }
 0x139   : > { %v3000_v18 = vadd.f32 %v2999_v15, %v2998_v12  ;;  %v3111_v19 = vpop.f32.mrf.mxu1 }
 0x13a   : > { %v3112_v20 = vadd.f32 %v3111_v19, %v3110_v13  ;;  %v3001_v21 = vpop.f32.mrf.mxu0 }
 0x13b   : > { %v3113_v22 = vpop.f32.mrf.mxu1 }
 0x13c   : > { %v3893_v23 = vadd.f32 %v3112_v20, %v3000_v18  ;;  %v3002_v24 = vpop.f32.mrf.mxu0 }
 0x13d   : > { %v3003_v26 = vadd.f32 %v3002_v24, %v3001_v21  ;;  %v3114_v27 = vpop.f32.mrf.mxu1 }
 0x13e   : > { %v3115_v28 = vadd.f32 %v3114_v27, %v3113_v22  ;;  %v3004_v30 = vpop.f32.mrf.mxu0 }
 0x13f   : > { %v3116_v31 = vpop.f32.mrf.mxu1 }
 0x140   : > { %v3895_v33 = vadd.f32 %v3115_v28, %v3003_v26  ;;  %v3005_v34 = vpop.f32.mrf.mxu0 }
 0x141   : > { %v3006_v35 = vadd.f32 %v3005_v34, %v3004_v30  ;;  %v3117_v38 = vpop.f32.mrf.mxu1 }
 0x142   : > { %v3118_v39 = vadd.f32 %v3117_v38, %v3116_v31  ;;  %v3007_v40 = vpop.f32.mrf.mxu0 }
 0x143   : > { %v3119_v42 = vpop.f32.mrf.mxu1 }
 0x144   : > { %v3897_v43 = vadd.f32 %v3118_v39, %v3006_v35  ;;  %v3008_v44 = vpop.f32.mrf.mxu0 }
 0x145   : > { %v3009_v46 = vadd.f32 %v3008_v44, %v3007_v40  ;;  %v3120_v47 = vpop.f32.mrf.mxu1 }
 0x146   : > { %v3121_v48 = vadd.f32 %v3120_v47, %v3119_v42  ;;  %v3010_v49 = vpop.f32.mrf.mxu0 }
 0x147   : > { %v3122_v50 = vpop.f32.mrf.mxu1 }
 0x148   : > { %v3899_v52 = vadd.f32 %v3121_v48, %v3009_v46  ;;  %v3011_v54 = vpop.f32.mrf.mxu0 }
 0x149   : > { %v3012_v55 = vadd.f32 %v3011_v54, %v3010_v49  ;;  %v3123_v57 = vpop.f32.mrf.mxu1 }
 0x14a   : > { %v3124_v58 = vadd.f32 %v3123_v57, %v3122_v50  ;;  %v3013_v60 = vpop.f32.mrf.mxu0 }
 0x14b   : > { %v3125_v61 = vpop.f32.mrf.mxu1 }
 0x14c   : > { %v3901_v63 = vadd.f32 %v3124_v58, %v3012_v55  ;;  %v3014_v0 = vpop.f32.mrf.mxu0 }
 0x14d   : > { %v3015_v2 = vadd.f32 %v3014_v0, %v3013_v60  ;;  %v3126_v3 = vpop.f32.mrf.mxu1 }
 0x14e   : > { %v3127_v4 = vadd.f32 %v3126_v3, %v3125_v61  ;;  %v3016_v5 = vpop.f32.mrf.mxu0 }
 0x14f   : > { %v3128_v7 = vpop.f32.mrf.mxu1 }
 0x150   : > { %v3903_v8 = vadd.f32 %v3127_v4, %v3015_v2  ;;  %v3017_v10 = vpop.f32.mrf.mxu0 }
 0x151   : > { %v3018_v11 = vadd.f32 %v3017_v10, %v3016_v5  ;;  %v3129_v12 = vpop.f32.mrf.mxu1 }
 0x152   : > { %v3130_v13 = vadd.f32 %v3129_v12, %v3128_v7  ;;  %v3019_v15 = vpop.f32.mrf.mxu0 }
 0x153   : > { %v3131_v18 = vpop.f32.mrf.mxu1 }
 0x154   : > { %v3905_v19 = vadd.f32 %v3130_v13, %v3018_v11  ;;  %v3020_v20 = vpop.f32.mrf.mxu0 }
 0x155   : > { %v3021_v21 = vadd.f32 %v3020_v20, %v3019_v15  ;;  %v3132_v22 = vpop.f32.mrf.mxu1 }
 0x156   : > { %v3133_v24 = vadd.f32 %v3132_v22, %v3131_v18  ;;  %v3022_v26 = vpop.f32.mrf.mxu0 }
 0x157   : > { %v3134_v27 = vpop.f32.mrf.mxu1 }
 0x158   : > { %v3907_v28 = vadd.f32 %v3133_v24, %v3021_v21  ;;  %v3023_v30 = vpop.f32.mrf.mxu0 }
 0x159   : > { %v3024_v31 = vadd.f32 %v3023_v30, %v3022_v26  ;;  %v3135_v34 = vpop.f32.mrf.mxu1 }
 0x15a   : > { %v3136_v35 = vadd.f32 %v3135_v34, %v3134_v27  ;;  %v3025_v38 = vpop.f32.mrf.mxu0 }
 0x15b   : > { %v3137_v39 = vpop.f32.mrf.mxu1 }
 0x15c   : > { %v3909_v40 = vadd.f32 %v3136_v35, %v3024_v31  ;;  %v3026_v42 = vpop.f32.mrf.mxu0 }
 0x15d   : > { %v3027_v44 = vadd.f32 %v3026_v42, %v3025_v38  ;;  %v3138_v46 = vpop.f32.mrf.mxu1 }
 0x15e   : > { %v3139_v47 = vadd.f32 %v3138_v46, %v3137_v39  ;;  %v3028_v48 = vpop.f32.mrf.mxu0 }
 0x15f   : > { %v3140_v49 = vpop.f32.mrf.mxu1 }
 0x160   : > { %v3911_v50 = vadd.f32 %v3139_v47, %v3027_v44  ;;  %v3029_v54 = vpop.f32.mrf.mxu0 }
 0x161   : > { %v3030_v55 = vadd.f32 %v3029_v54, %v3028_v48  ;;  %v3141_v57 = vpop.f32.mrf.mxu1 }
 0x162   : > { %v3142_v58 = vadd.f32 %v3141_v57, %v3140_v49  ;;  %v3031_v60 = vpop.f32.mrf.mxu0 }
 0x163   : > { %v3143_v61 = vpop.f32.mrf.mxu1 }
 0x164   : > { %v3913_v0 = vadd.f32 %v3142_v58, %v3030_v55  ;;  %v3032_v2 = vpop.f32.mrf.mxu0 }
 0x165   : > { %v3033_v3 = vadd.f32 %v3032_v2, %v3031_v60  ;;  %v3144_v4 = vpop.f32.mrf.mxu1 }
 0x166   : > { %v3145_v5 = vadd.f32 %v3144_v4, %v3143_v61  ;;  %v3034_v7 = vpop.f32.mrf.mxu0 }
 0x167   : > { %v3146_v10 = vpop.f32.mrf.mxu1 }
 0x168   : > { %v3915_v11 = vadd.f32 %v3145_v5, %v3033_v3  ;;  %v3035_v12 = vpop.f32.mrf.mxu0 }
 0x169   : > { %v3036_v13 = vadd.f32 %v3035_v12, %v3034_v7  ;;  %v3147_v15 = vpop.f32.mrf.mxu1 }
 0x16a   : > { %v3148_v18 = vadd.f32 %v3147_v15, %v3146_v10  ;;  %v3037_v20 = vpop.f32.mrf.mxu0 }
 0x16b   : > { %v3149_v21 = vpop.f32.mrf.mxu1 }
 0x16c   : > { %v3917_v22 = vadd.f32 %v3148_v18, %v3036_v13  ;;  %v3038_v24 = vpop.f32.mrf.mxu0 }
 0x16d   : > { %v3039_v26 = vadd.f32 %v3038_v24, %v3037_v20  ;;  %v3150_v27 = vpop.f32.mrf.mxu1 }
 0x16e   : > { %v3151_v30 = vadd.f32 %v3150_v27, %v3149_v21  ;;  %v3168_v31 = vpop.f32.mrf.mxu0 }
 0x16f   : > { %v3280_v34 = vpop.f32.mrf.mxu1 }
 0x170   : > { %v3919_v35 = vadd.f32 %v3151_v30, %v3039_v26  ;;  %v3169_v38 = vpop.f32.mrf.mxu0 }
 0x171   : > { %v3170_v39 = vadd.f32 %v3169_v38, %v3168_v31  ;;  %v3281_v42 = vpop.f32.mrf.mxu1 }
 0x172   : > { %v3171_v44 = vpop.f32.mrf.mxu0  ;;  %v3282_v48 = vadd.f32 %v3281_v42, %v3280_v34 }
 0x173   : > { %v1871_v46 = vadd.f32 %v3170_v39, %v3837_v29  ;;  %v3283_v47 = vpop.f32.mrf.mxu1 }
 0x174   : > { %v3172_v49 = vpop.f32.mrf.mxu0 }
 0x175   : > { %v3173_v54 = vadd.f32 %v3172_v49, %v3171_v44  ;;  %v3284_v55 = vpop.f32.mrf.mxu1  ;;  %v2032_v57 = vadd.f32 %v3282_v48, %v1871_v46 }
 0x176   : > { %v3174_v58 = vpop.f32.mrf.mxu0  ;;  %v3285_v61 = vadd.f32 %v3284_v55, %v3283_v47 }
 0x177   : > { %v1874_v60 = vadd.f32 %v3173_v54, %v3839_v37  ;;  %v3286_v2 = vpop.f32.mrf.mxu1  ;;  %v2355_v10 = vmul.f32 %v2032_v57, %v2032_v57 }
 0x178   : > { %v3175_v3 = vpop.f32.mrf.mxu0 }
 0x179   : > { %v2035_v4 = vadd.f32 %v3285_v61, %v1874_v60  ;;  %v3176_v5 = vadd.f32 %v3175_v3, %v3174_v58  ;;  %v3287_v7 = vpop.f32.mrf.mxu1 }
 0x17a   : > { %v3288_v29 = vadd.f32 %v3287_v7, %v3286_v2  ;;  %v3177_v12 = vpop.f32.mrf.mxu0 }
 0x17b   : > { %v2836_v13 = vpack.c.bf16 %v2035_v4, %v2032_v57  ;;  %v2318_v15 = vadd.f32 %v2035_v4, %v2032_v57  ;;  %v2356_v18 = vmul.f32 %v2035_v4, %v2035_v4  ;;  %v1879_v37 = vadd.f32 %v3176_v5, %v3845_v51  ;;  %v3289_v20 = vpop.f32.mrf.mxu1 }
 0x17c   : > { %v3178_v21 = vpop.f32.mrf.mxu0 }
 0x17d   : > { %2837 = vst [vmem:[%s3927_s20] sm:$0xff] %v2836_v13   ;;  %v2387_v24 = vadd.f32 %v2356_v18, %v2355_v10  ;;  %v2040_v26 = vadd.f32 %v3288_v29, %v1879_v37  ;;  %v3179_v27 = vadd.f32 %v3178_v21, %v3177_v12  ;;  %v3290_v30 = vpop.f32.mrf.mxu1 }
 0x17e   : > { %v3180_v31 = vpop.f32.mrf.mxu0  ;;  %v3291_v42 = vadd.f32 %v3290_v30, %v3289_v20 }
 0x17f   : > { %v2319_v34 = vadd.f32 %v2318_v15, %v2040_v26  ;;  %v2357_v38 = vmul.f32 %v2040_v26, %v2040_v26  ;;  %v1882_v39 = vadd.f32 %v3179_v27, %v3847_v59  ;;  %v3292_v44 = vpop.f32.mrf.mxu1 }
 0x180   : > { %v3181_v46 = vpop.f32.mrf.mxu0 }
 0x181   : > { %v2388_v47 = vadd.f32 %v2387_v24, %v2357_v38  ;;  %v2043_v48 = vadd.f32 %v3291_v42, %v1882_v39  ;;  %v3182_v49 = vadd.f32 %v3181_v46, %v3180_v31  ;;  %v3293_v51 = vpop.f32.mrf.mxu1 }
 0x182   : > { %v3294_v54 = vadd.f32 %v3293_v51, %v3292_v44  ;;  %v3183_v55 = vpop.f32.mrf.mxu0 }
 0x183   : > { %v2841_v57 = vpack.c.bf16 %v2043_v48, %v2040_v26  ;;  %v2320_v58 = vadd.f32 %v2319_v34, %v2043_v48  ;;  %v2358_v60 = vmul.f32 %v2043_v48, %v2043_v48  ;;  %v1887_v61 = vadd.f32 %v3182_v49, %v3853_v9  ;;  %v3295_v2 = vpop.f32.mrf.mxu1 }
 0x184   : > { %v3184_v3 = vpop.f32.mrf.mxu0 }
 0x185   : > { %2913 = vst [vmem:[%s3927_s20 + $0x8] sm:$0xff] %v2841_v57   ;;  %v2389_v4 = vadd.f32 %v2388_v47, %v2358_v60  ;;  %v2048_v59 = vadd.f32 %v3294_v54, %v1887_v61  ;;  %v3185_v5 = vadd.f32 %v3184_v3, %v3183_v55  ;;  %v3296_v7 = vpop.f32.mrf.mxu1 }
 0x186   : > { %v3186_v10 = vpop.f32.mrf.mxu0  ;;  %v3297_v15 = vadd.f32 %v3296_v7, %v3295_v2 }
 0x187   : > { %v2321_v29 = vadd.f32 %v2320_v58, %v2048_v59  ;;  %v2359_v12 = vmul.f32 %v2048_v59, %v2048_v59  ;;  %v1890_v13 = vadd.f32 %v3185_v5, %v3855_v17  ;;  %v3298_v18 = vpop.f32.mrf.mxu1 }
 0x188   : > { %v3187_v37 = vpop.f32.mrf.mxu0 }
 0x189   : > { %v2390_v20 = vadd.f32 %v2389_v4, %v2359_v12  ;;  %v2051_v21 = vadd.f32 %v3297_v15, %v1890_v13  ;;  %v3188_v24 = vadd.f32 %v3187_v37, %v3186_v10  ;;  %v3299_v9 = vpop.f32.mrf.mxu1 }
 0x18a   : > { %v3300_v26 = vadd.f32 %v3299_v9, %v3298_v18  ;;  %v3189_v27 = vpop.f32.mrf.mxu0 }
 0x18b   : > { %v2846_v30 = vpack.c.bf16 %v2051_v21, %v2048_v59  ;;  %v2322_v31 = vadd.f32 %v2321_v29, %v2051_v21  ;;  %v2360_v34 = vmul.f32 %v2051_v21, %v2051_v21  ;;  %v1895_v38 = vadd.f32 %v3188_v24, %v3861_v32  ;;  %v3301_v39 = vpop.f32.mrf.mxu1 }
 0x18c   : > { %v3190_v42 = vpop.f32.mrf.mxu0 }
 0x18d   : > { %2914 = vst [vmem:[%s3927_s20 + $0x10] sm:$0xff] %v2846_v30   ;;  %v2391_v44 = vadd.f32 %v2390_v20, %v2360_v34  ;;  %v2056_v17 = vadd.f32 %v3300_v26, %v1895_v38  ;;  %v3191_v46 = vadd.f32 %v3190_v42, %v3189_v27  ;;  %v3302_v47 = vpop.f32.mrf.mxu1 }
 0x18e   : > { %v3192_v48 = vpop.f32.mrf.mxu0  ;;  %v3303_v55 = vadd.f32 %v3302_v47, %v3301_v39 }
 0x18f   : > { %v2323_v49 = vadd.f32 %v2322_v31, %v2056_v17  ;;  %v2361_v51 = vmul.f32 %v2056_v17, %v2056_v17  ;;  %v1898_v54 = vadd.f32 %v3191_v46, %v3863_v41  ;;  %v3304_v57 = vpop.f32.mrf.mxu1 }
 0x190   : > { %v3193_v58 = vpop.f32.mrf.mxu0 }
 0x191   : > { %v2392_v60 = vadd.f32 %v2391_v44, %v2361_v51  ;;  %v2059_v61 = vadd.f32 %v3303_v55, %v1898_v54  ;;  %v3194_v2 = vadd.f32 %v3193_v58, %v3192_v48  ;;  %v3305_v32 = vpop.f32.mrf.mxu1 }
 0x192   : > { %v3306_v3 = vadd.f32 %v3305_v32, %v3304_v57  ;;  %v3195_v4 = vpop.f32.mrf.mxu0 }
 0x193   : > { %v2851_v59 = vpack.c.bf16 %v2059_v61, %v2056_v17  ;;  %v2324_v5 = vadd.f32 %v2323_v49, %v2059_v61  ;;  %v2362_v7 = vmul.f32 %v2059_v61, %v2059_v61  ;;  %v1903_v10 = vadd.f32 %v3194_v2, %v3869_v56  ;;  %v3307_v29 = vpop.f32.mrf.mxu1 }
 0x194   : > { %v3196_v12 = vpop.f32.mrf.mxu0 }
 0x195   : > { %2915 = vst [vmem:[%s3927_s20 + $0x18] sm:$0xff] %v2851_v59   ;;  %v2393_v13 = vadd.f32 %v2392_v60, %v2362_v7  ;;  %v2064_v41 = vadd.f32 %v3306_v3, %v1903_v10  ;;  %v3197_v15 = vadd.f32 %v3196_v12, %v3195_v4  ;;  %v3308_v18 = vpop.f32.mrf.mxu1 }
 0x196   : > { %v3198_v37 = vpop.f32.mrf.mxu0  ;;  %v3309_v9 = vadd.f32 %v3308_v18, %v3307_v29 }
 0x197   : > { %v2325_v20 = vadd.f32 %v2324_v5, %v2064_v41  ;;  %v2363_v21 = vmul.f32 %v2064_v41, %v2064_v41  ;;  %v1906_v24 = vadd.f32 %v3197_v15, %v3871_v1  ;;  %v3310_v26 = vpop.f32.mrf.mxu1 }
 0x198   : > { %v3199_v27 = vpop.f32.mrf.mxu0 }
 0x199   : > { %v2394_v30 = vadd.f32 %v2393_v13, %v2363_v21  ;;  %v2067_v31 = vadd.f32 %v3309_v9, %v1906_v24  ;;  %v3200_v34 = vadd.f32 %v3199_v27, %v3198_v37  ;;  %v3311_v56 = vpop.f32.mrf.mxu1 }
 0x19a   : > { %v3312_v38 = vadd.f32 %v3311_v56, %v3310_v26  ;;  %v3201_v39 = vpop.f32.mrf.mxu0 }
 0x19b   : > { %v2856_v42 = vpack.c.bf16 %v2067_v31, %v2064_v41  ;;  %v2326_v44 = vadd.f32 %v2325_v20, %v2067_v31  ;;  %v2364_v17 = vmul.f32 %v2067_v31, %v2067_v31  ;;  %v1911_v46 = vadd.f32 %v3200_v34, %v3877_v16  ;;  %v3313_v47 = vpop.f32.mrf.mxu1 }
 0x19c   : > { %v3202_v48 = vpop.f32.mrf.mxu0 }
 0x19d   : > { %2916 = vst [vmem:[%s3927_s20 + $0x20] sm:$0xff] %v2856_v42   ;;  %v2395_v49 = vadd.f32 %v2394_v30, %v2364_v17  ;;  %v2072_v1 = vadd.f32 %v3312_v38, %v1911_v46  ;;  %v3203_v51 = vadd.f32 %v3202_v48, %v3201_v39  ;;  %v3314_v54 = vpop.f32.mrf.mxu1 }
 0x19e   : > { %v3204_v55 = vpop.f32.mrf.mxu0  ;;  %v3315_v61 = vadd.f32 %v3314_v54, %v3313_v47 }
 0x19f   : > { %v2327_v57 = vadd.f32 %v2326_v44, %v2072_v1  ;;  %v2365_v58 = vmul.f32 %v2072_v1, %v2072_v1  ;;  %v1914_v60 = vadd.f32 %v3203_v51, %v3879_v25  ;;  %v3316_v2 = vpop.f32.mrf.mxu1 }
 0x1a0   : > { %v3205_v32 = vpop.f32.mrf.mxu0 }
 0x1a1   : > { %v2396_v3 = vadd.f32 %v2395_v49, %v2365_v58  ;;  %v2075_v4 = vadd.f32 %v3315_v61, %v1914_v60  ;;  %v3206_v59 = vadd.f32 %v3205_v32, %v3204_v55  ;;  %v3317_v16 = vpop.f32.mrf.mxu1 }
 0x1a2   : > { %v3318_v5 = vadd.f32 %v3317_v16, %v3316_v2  ;;  %v3207_v7 = vpop.f32.mrf.mxu0 }
 0x1a3   : > { %v2861_v10 = vpack.c.bf16 %v2075_v4, %v2072_v1  ;;  %v2328_v29 = vadd.f32 %v2327_v57, %v2075_v4  ;;  %v2366_v12 = vmul.f32 %v2075_v4, %v2075_v4  ;;  %v1919_v13 = vadd.f32 %v3206_v59, %v3881_v36  ;;  %v3319_v41 = vpop.f32.mrf.mxu1 }
 0x1a4   : > { %v3208_v15 = vpop.f32.mrf.mxu0 }
 0x1a5   : > { %2917 = vst [vmem:[%s3927_s20 + $0x28] sm:$0xff] %v2861_v10   ;;  %v2397_v18 = vadd.f32 %v2396_v3, %v2366_v12  ;;  %v2080_v25 = vadd.f32 %v3318_v5, %v1919_v13  ;;  %v3209_v37 = vadd.f32 %v3208_v15, %v3207_v7  ;;  %v3320_v20 = vpop.f32.mrf.mxu1 }
 0x1a6   : > { %v3210_v21 = vpop.f32.mrf.mxu0  ;;  %v3321_v27 = vadd.f32 %v3320_v20, %v3319_v41 }
 0x1a7   : > { %v2329_v24 = vadd.f32 %v2328_v29, %v2080_v25  ;;  %v2367_v9 = vmul.f32 %v2080_v25, %v2080_v25  ;;  %v1922_v26 = vadd.f32 %v3209_v37, %v3883_v45  ;;  %v3322_v30 = vpop.f32.mrf.mxu1 }
 0x1a8   : > { %v3211_v31 = vpop.f32.mrf.mxu0 }
 0x1a9   : > { %v2398_v34 = vadd.f32 %v2397_v18, %v2367_v9  ;;  %v2083_v56 = vadd.f32 %v3321_v27, %v1922_v26  ;;  %v3212_v38 = vadd.f32 %v3211_v31, %v3210_v21  ;;  %v3323_v36 = vpop.f32.mrf.mxu1 }
 0x1aa   : > { %v3324_v39 = vadd.f32 %v3323_v36, %v3322_v30  ;;  %v3213_v42 = vpop.f32.mrf.mxu0 }
 0x1ab   : > { %v2866_v44 = vpack.c.bf16 %v2083_v56, %v2080_v25  ;;  %v2330_v17 = vadd.f32 %v2329_v24, %v2083_v56  ;;  %v2368_v46 = vmul.f32 %v2083_v56, %v2083_v56  ;;  %v1927_v47 = vadd.f32 %v3212_v38, %v3885_v53  ;;  %v3325_v48 = vpop.f32.mrf.mxu1 }
 0x1ac   : > { %v3214_v49 = vpop.f32.mrf.mxu0 }
 0x1ad   : > { %2918 = vst [vmem:[%s3927_s20 + $0x30] sm:$0xff] %v2866_v44   ;;  %v2399_v1 = vadd.f32 %v2398_v34, %v2368_v46  ;;  %v2088_v45 = vadd.f32 %v3324_v39, %v1927_v47  ;;  %v3215_v51 = vadd.f32 %v3214_v49, %v3213_v42  ;;  %v3326_v54 = vpop.f32.mrf.mxu1 }
 0x1ae   : > { %v3216_v55 = vpop.f32.mrf.mxu0  ;;  %v3327_v61 = vadd.f32 %v3326_v54, %v3325_v48 }
 0x1af   : > { %v2331_v57 = vadd.f32 %v2330_v17, %v2088_v45  ;;  %v2369_v58 = vmul.f32 %v2088_v45, %v2088_v45  ;;  %v1930_v60 = vadd.f32 %v3215_v51, %v3887_v62  ;;  %v3328_v2 = vpop.f32.mrf.mxu1 }
 0x1b0   : > { %v3217_v32 = vpop.f32.mrf.mxu0 }
 0x1b1   : > { %v2400_v3 = vadd.f32 %v2399_v1, %v2369_v58  ;;  %v2091_v4 = vadd.f32 %v3327_v61, %v1930_v60  ;;  %v3218_v59 = vadd.f32 %v3217_v32, %v3216_v55  ;;  %v3329_v53 = vpop.f32.mrf.mxu1 }
 0x1b2   : > { %v3330_v16 = vadd.f32 %v3329_v53, %v3328_v2  ;;  %v3219_v5 = vpop.f32.mrf.mxu0 }
 0x1b3   : > { %v2871_v7 = vpack.c.bf16 %v2091_v4, %v2088_v45  ;;  %v2332_v10 = vadd.f32 %v2331_v57, %v2091_v4  ;;  %v2370_v29 = vmul.f32 %v2091_v4, %v2091_v4  ;;  %v1935_v12 = vadd.f32 %v3218_v59, %v3889_v6  ;;  %v3331_v13 = vpop.f32.mrf.mxu1 }
 0x1b4   : > { %v3220_v41 = vpop.f32.mrf.mxu0 }
 0x1b5   : > { %2919 = vst [vmem:[%s3927_s20 + $0x38] sm:$0xff] %v2871_v7   ;;  %v2401_v15 = vadd.f32 %v2400_v3, %v2370_v29  ;;  %v2096_v62 = vadd.f32 %v3330_v16, %v1935_v12  ;;  %v3221_v18 = vadd.f32 %v3220_v41, %v3219_v5  ;;  %v3332_v25 = vpop.f32.mrf.mxu1 }
 0x1b6   : > { %v3222_v37 = vpop.f32.mrf.mxu0  ;;  %v3333_v9 = vadd.f32 %v3332_v25, %v3331_v13 }
 0x1b7   : > { %v2333_v20 = vadd.f32 %v2332_v10, %v2096_v62  ;;  %v2371_v21 = vmul.f32 %v2096_v62, %v2096_v62  ;;  %v1938_v24 = vadd.f32 %v3221_v18, %v3891_v14  ;;  %v3334_v26 = vpop.f32.mrf.mxu1 }
 0x1b8   : > { %v3223_v27 = vpop.f32.mrf.mxu0 }
 0x1b9   : > { %v2402_v30 = vadd.f32 %v2401_v15, %v2371_v21  ;;  %v2099_v31 = vadd.f32 %v3333_v9, %v1938_v24  ;;  %v3224_v34 = vadd.f32 %v3223_v27, %v3222_v37  ;;  %v3335_v6 = vpop.f32.mrf.mxu1 }
 0x1ba   : > { %v3336_v56 = vadd.f32 %v3335_v6, %v3334_v26  ;;  %v3225_v38 = vpop.f32.mrf.mxu0 }
 0x1bb   : > { %v2876_v36 = vpack.c.bf16 %v2099_v31, %v2096_v62  ;;  %v2334_v39 = vadd.f32 %v2333_v20, %v2099_v31  ;;  %v2372_v42 = vmul.f32 %v2099_v31, %v2099_v31  ;;  %v1943_v44 = vadd.f32 %v3224_v34, %v3893_v23  ;;  %v3337_v17 = vpop.f32.mrf.mxu1 }
 0x1bc   : > { %v3226_v46 = vpop.f32.mrf.mxu0 }
 0x1bd   : > { %2920 = vst [vmem:[%s3927_s20 + $0x40] sm:$0xff] %v2876_v36   ;;  %v2403_v47 = vadd.f32 %v2402_v30, %v2372_v42  ;;  %v2104_v14 = vadd.f32 %v3336_v56, %v1943_v44  ;;  %v3227_v48 = vadd.f32 %v3226_v46, %v3225_v38  ;;  %v3338_v49 = vpop.f32.mrf.mxu1 }
 0x1be   : > { %v3228_v1 = vpop.f32.mrf.mxu0  ;;  %v3339_v55 = vadd.f32 %v3338_v49, %v3337_v17 }
 0x1bf   : > { %v2335_v45 = vadd.f32 %v2334_v39, %v2104_v14  ;;  %v2373_v51 = vmul.f32 %v2104_v14, %v2104_v14  ;;  %v1946_v54 = vadd.f32 %v3227_v48, %v3895_v33  ;;  %v3340_v57 = vpop.f32.mrf.mxu1 }
 0x1c0   : > { %v3229_v58 = vpop.f32.mrf.mxu0 }
 0x1c1   : > { %v2404_v60 = vadd.f32 %v2403_v47, %v2373_v51  ;;  %v2107_v61 = vadd.f32 %v3339_v55, %v1946_v54  ;;  %v3230_v2 = vadd.f32 %v3229_v58, %v3228_v1  ;;  %v3341_v23 = vpop.f32.mrf.mxu1 }
 0x1c2   : > { %v3342_v32 = vadd.f32 %v3341_v23, %v3340_v57  ;;  %v3231_v3 = vpop.f32.mrf.mxu0 }
 0x1c3   : > { %v2881_v4 = vpack.c.bf16 %v2107_v61, %v2104_v14  ;;  %v2336_v59 = vadd.f32 %v2335_v45, %v2107_v61  ;;  %v2374_v53 = vmul.f32 %v2107_v61, %v2107_v61  ;;  %v1951_v16 = vadd.f32 %v3230_v2, %v3897_v43  ;;  %v3343_v5 = vpop.f32.mrf.mxu1 }
 0x1c4   : > { %v3232_v7 = vpop.f32.mrf.mxu0 }
 0x1c5   : > { %2921 = vst [vmem:[%s3927_s20 + $0x48] sm:$0xff] %v2881_v4   ;;  %v2405_v10 = vadd.f32 %v2404_v60, %v2374_v53  ;;  %v2112_v33 = vadd.f32 %v3342_v32, %v1951_v16  ;;  %v3233_v29 = vadd.f32 %v3232_v7, %v3231_v3  ;;  %v3344_v12 = vpop.f32.mrf.mxu1 }
 0x1c6   : > { %v3234_v13 = vpop.f32.mrf.mxu0  ;;  %v3345_v18 = vadd.f32 %v3344_v12, %v3343_v5 }
 0x1c7   : > { %v2337_v41 = vadd.f32 %v2336_v59, %v2112_v33  ;;  %v2375_v15 = vmul.f32 %v2112_v33, %v2112_v33  ;;  %v1954_v62 = vadd.f32 %v3233_v29, %v3899_v52  ;;  %v3346_v25 = vpop.f32.mrf.mxu1 }
 0x1c8   : > { %v3235_v37 = vpop.f32.mrf.mxu0 }
 0x1c9   : > { %v2406_v20 = vadd.f32 %v2405_v10, %v2375_v15  ;;  %v2115_v21 = vadd.f32 %v3345_v18, %v1954_v62  ;;  %v3236_v24 = vadd.f32 %v3235_v37, %v3234_v13  ;;  %v3347_v43 = vpop.f32.mrf.mxu1 }
 0x1ca   : > { %v3348_v9 = vadd.f32 %v3347_v43, %v3346_v25  ;;  %v3237_v26 = vpop.f32.mrf.mxu0 }
 0x1cb   : > { %v2886_v27 = vpack.c.bf16 %v2115_v21, %v2112_v33  ;;  %v2338_v30 = vadd.f32 %v2337_v41, %v2115_v21  ;;  %v2376_v31 = vmul.f32 %v2115_v21, %v2115_v21  ;;  %v1959_v34 = vadd.f32 %v3236_v24, %v3901_v63  ;;  %v3349_v6 = vpop.f32.mrf.mxu1 }
 0x1cc   : > { %v3238_v56 = vpop.f32.mrf.mxu0 }
 0x1cd   : > { %2922 = vst [vmem:[%s3927_s20 + $0x50] sm:$0xff] %v2886_v27   ;;  %v2407_v38 = vadd.f32 %v2406_v20, %v2376_v31  ;;  %v2120_v52 = vadd.f32 %v3348_v9, %v1959_v34  ;;  %v3239_v36 = vadd.f32 %v3238_v56, %v3237_v26  ;;  %v3350_v39 = vpop.f32.mrf.mxu1 }
 0x1ce   : > { %v3240_v42 = vpop.f32.mrf.mxu0  ;;  %v3351_v47 = vadd.f32 %v3350_v39, %v3349_v6 }
 0x1cf   : > { %v2339_v44 = vadd.f32 %v2338_v30, %v2120_v52  ;;  %v2377_v17 = vmul.f32 %v2120_v52, %v2120_v52  ;;  %v1962_v46 = vadd.f32 %v3239_v36, %v3903_v8  ;;  %v3352_v14 = vpop.f32.mrf.mxu1 }
 0x1d0   : > { %v3241_v48 = vpop.f32.mrf.mxu0 }
 0x1d1   : > { %v2408_v49 = vadd.f32 %v2407_v38, %v2377_v17  ;;  %v2123_v1 = vadd.f32 %v3351_v47, %v1962_v46  ;;  %v3242_v45 = vadd.f32 %v3241_v48, %v3240_v42  ;;  %v3353_v63 = vpop.f32.mrf.mxu1 }
 0x1d2   : > { %v3354_v51 = vadd.f32 %v3353_v63, %v3352_v14  ;;  %v3243_v54 = vpop.f32.mrf.mxu0 }
 0x1d3   : > { %v2891_v55 = vpack.c.bf16 %v2123_v1, %v2120_v52  ;;  %v2340_v57 = vadd.f32 %v2339_v44, %v2123_v1  ;;  %v2378_v58 = vmul.f32 %v2123_v1, %v2123_v1  ;;  %v1967_v60 = vadd.f32 %v3242_v45, %v3905_v19  ;;  %v3355_v61 = vpop.f32.mrf.mxu1 }
 0x1d4   : > { %v3244_v2 = vpop.f32.mrf.mxu0 }
 0x1d5   : > { %2923 = vst [vmem:[%s3927_s20 + $0x58] sm:$0xff] %v2891_v55   ;;  %v2409_v23 = vadd.f32 %v2408_v49, %v2378_v58  ;;  %v2128_v8 = vadd.f32 %v3354_v51, %v1967_v60  ;;  %v3245_v32 = vadd.f32 %v3244_v2, %v3243_v54  ;;  %v3356_v3 = vpop.f32.mrf.mxu1 }
 0x1d6   : > { %v3246_v4 = vpop.f32.mrf.mxu0  ;;  %v3357_v5 = vadd.f32 %v3356_v3, %v3355_v61 }
 0x1d7   : > { %v2341_v59 = vadd.f32 %v2340_v57, %v2128_v8  ;;  %v2379_v53 = vmul.f32 %v2128_v8, %v2128_v8  ;;  %v1970_v16 = vadd.f32 %v3245_v32, %v3907_v28  ;;  %v3358_v7 = vpop.f32.mrf.mxu1 }
 0x1d8   : > { %v3247_v10 = vpop.f32.mrf.mxu0 }
 0x1d9   : > { %v2410_v33 = vadd.f32 %v2409_v23, %v2379_v53  ;;  %v2131_v29 = vadd.f32 %v3357_v5, %v1970_v16  ;;  %v3248_v12 = vadd.f32 %v3247_v10, %v3246_v4  ;;  %v3359_v19 = vpop.f32.mrf.mxu1 }
 0x1da   : > { %v3360_v13 = vadd.f32 %v3359_v19, %v3358_v7  ;;  %v3249_v41 = vpop.f32.mrf.mxu0 }
 0x1db   : > { %v2896_v15 = vpack.c.bf16 %v2131_v29, %v2128_v8  ;;  %v2342_v62 = vadd.f32 %v2341_v59, %v2131_v29  ;;  %v2380_v18 = vmul.f32 %v2131_v29, %v2131_v29  ;;  %v1975_v25 = vadd.f32 %v3248_v12, %v3909_v40  ;;  %v3361_v37 = vpop.f32.mrf.mxu1 }
 0x1dc   : > { %v3250_v20 = vpop.f32.mrf.mxu0 }
 0x1dd   : > { %2924 = vst [vmem:[%s3927_s20 + $0x60] sm:$0xff] %v2896_v15   ;;  %v2411_v21 = vadd.f32 %v2410_v33, %v2380_v18  ;;  %v2136_v28 = vadd.f32 %v3360_v13, %v1975_v25  ;;  %v3251_v24 = vadd.f32 %v3250_v20, %v3249_v41  ;;  %v3362_v43 = vpop.f32.mrf.mxu1 }
 0x1de   : > { %v3252_v9 = vpop.f32.mrf.mxu0  ;;  %v3363_v31 = vadd.f32 %v3362_v43, %v3361_v37 }
 0x1df   : > { %v2343_v26 = vadd.f32 %v2342_v62, %v2136_v28  ;;  %v2381_v27 = vmul.f32 %v2136_v28, %v2136_v28  ;;  %v1978_v30 = vadd.f32 %v3251_v24, %v3911_v50  ;;  %v3364_v34 = vpop.f32.mrf.mxu1 }
 0x1e0   : > { %v3253_v6 = vpop.f32.mrf.mxu0 }
 0x1e1   : > { %v2412_v56 = vadd.f32 %v2411_v21, %v2381_v27  ;;  %v2139_v38 = vadd.f32 %v3363_v31, %v1978_v30  ;;  %v3254_v52 = vadd.f32 %v3253_v6, %v3252_v9  ;;  %v3365_v40 = vpop.f32.mrf.mxu1  ;;  %v2424_v21 = vlaneseq }
 0x1e2   : > { %v3366_v36 = vadd.f32 %v3365_v40, %v3364_v34  ;;  %v3255_v39 = vpop.f32.mrf.mxu0 }
 0x1e3   : > { %v2901_v42 = vpack.c.bf16 %v2139_v38, %v2136_v28  ;;  %v2344_v44 = vadd.f32 %v2343_v26, %v2139_v38  ;;  %v2382_v17 = vmul.f32 %v2139_v38, %v2139_v38  ;;  %v1983_v46 = vadd.f32 %v3254_v52, %v3913_v0  ;;  %v3367_v47 = vpop.f32.mrf.mxu1 }
 0x1e4   : > { %v3256_v14 = vpop.f32.mrf.mxu0 }
 0x1e5   : > { %2925 = vst [vmem:[%s3927_s20 + $0x68] sm:$0xff] %v2901_v42   ;;  %v2413_v48 = vadd.f32 %v2412_v56, %v2382_v17  ;;  %v2144_v50 = vadd.f32 %v3366_v36, %v1983_v46  ;;  %v3257_v49 = vadd.f32 %v3256_v14, %v3255_v39  ;;  %v3368_v1 = vpop.f32.mrf.mxu1 }
 0x1e6   : > { %v3258_v45 = vpop.f32.mrf.mxu0  ;;  %v3369_v55 = vadd.f32 %v3368_v1, %v3367_v47 }
 0x1e7   : > { %v2345_v63 = vadd.f32 %v2344_v44, %v2144_v50  ;;  %v2383_v51 = vmul.f32 %v2144_v50, %v2144_v50  ;;  %v1986_v54 = vadd.f32 %v3257_v49, %v3915_v11  ;;  %v3370_v57 = vpop.f32.mrf.mxu1 }
 0x1e8   : > { %v3259_v58 = vpop.f32.mrf.mxu0 }
 0x1e9   : > { %v2414_v60 = vadd.f32 %v2413_v48, %v2383_v51  ;;  %v2147_v61 = vadd.f32 %v3369_v55, %v1986_v54  ;;  %v3260_v2 = vadd.f32 %v3259_v58, %v3258_v45  ;;  %v3371_v0 = vpop.f32.mrf.mxu1 }
 0x1ea   : > { %v3372_v23 = vadd.f32 %v3371_v0, %v3370_v57  ;;  %v3261_v8 = vpop.f32.mrf.mxu0 }
 0x1eb   : > { %v2906_v32 = vpack.c.bf16 %v2147_v61, %v2144_v50  ;;  %v2346_v3 = vadd.f32 %v2345_v63, %v2147_v61  ;;  %v2384_v4 = vmul.f32 %v2147_v61, %v2147_v61  ;;  %v1991_v59 = vadd.f32 %v3260_v2, %v3917_v22  ;;  %v3373_v53 = vpop.f32.mrf.mxu1 }
 0x1ec   : > { %v3262_v16 = vpop.f32.mrf.mxu0 }
 0x1ed   : > { %2926 = vst [vmem:[%s3927_s20 + $0x70] sm:$0xff] %v2906_v32   ;;  %v2415_v11 = vadd.f32 %v2414_v60, %v2384_v4  ;;  %v2152_v5 = vadd.f32 %v3372_v23, %v1991_v59  ;;  %v3263_v7 = vadd.f32 %v3262_v16, %v3261_v8  ;;  %v3374_v10 = vpop.f32.mrf.mxu1 }
 0x1ee   : > { %v3375_v19 = vadd.f32 %v3374_v10, %v3373_v53 }
 0x1ef   : > { %v2347_v33 = vadd.f32 %v2346_v3, %v2152_v5  ;;  %v2385_v29 = vmul.f32 %v2152_v5, %v2152_v5  ;;  %v1994_v12 = vadd.f32 %v3263_v7, %v3919_v35  ;;  %v2425_v35 = vshrl.u32 %v2424_v21, 7 }
 0x1f1   : > { %v2416_v13 = vadd.f32 %v2415_v11, %v2385_v29  ;;  %v2155_v41 = vadd.f32 %v3375_v19, %v1994_v12  ;;  %vm2427_vm0 = vcmp.eq.s32.totalorder %v2425_v35, 1  ;;  %vm2426_vm1 = vcmp.eq.s32.totalorder %v2425_v35, 0 }
 0x1f3   : > { %v2911_v15 = vpack.c.bf16 %v2155_v41, %v2152_v5  ;;  %v2348_v62 = vadd.f32 %v2347_v33, %v2155_v41  ;;  %v2386_v22 = vmul.f32 %v2155_v41, %v2155_v41 }
 0x1f5   : > { %2927 = vst [vmem:[%s3927_s20 + $0x78] sm:$0xff] %v2911_v15   ;;  %v2349_v18 = vrot.slane %v2348_v62, 4  ;;  %v2417_v25 = vadd.f32 %v2416_v13, %v2386_v22 }
 0x1f7   : > { %v2350_v37 = vadd.f32 %v2349_v18, %v2348_v62  ;;  %v2418_v20 = vrot.slane %v2417_v25, 4 }
 0x1f9   : > { %v2351_v28 = vrot.slane %v2350_v37, 2  ;;  %v2419_v24 = vadd.f32 %v2418_v20, %v2417_v25 }
 0x1fb   : > { %v2352_v43 = vadd.f32 %v2351_v28, %v2350_v37  ;;  %v2420_v9 = vrot.slane %v2419_v24, 2 }
 0x1fd   : > { %v2421_v26 = vadd.f32 %v2420_v9, %v2419_v24  ;;  %v2353_v27 = vrot.slane %v2352_v43, 1 }
 0x1ff   : > { %v2422_v30 = vrot.slane %v2421_v26, 1  ;;  %v2354_v34 = vadd.f32 %v2353_v27, %v2352_v43 }
 0x201   : > { %v2423_v31 = vadd.f32 %v2422_v30, %v2421_v26 }
 0x203   : > { %v2428_v6 = vsel %vm2427_vm0, %v2423_v31, 0.0 }
 0x204   : > { %v2429_v56 = vsel %vm2426_vm1, %v2354_v34, %v2428_v6 }
 0x205   : > { %2430 = vst [vmem:[%s232_s23] sm:$0xff] %v2429_v56 }
 0x206 PF: > { %s14_s14 = sadd.s32 1, %s3486_s14   ;;  %s3993_s12 = smov %s3482_s13 }
 0x207   : > { %p11_p6 = scmp.ge.s32.totalorder %s14_s14, 4   ;;  %s3994_s13 = smov %s3996_s15 }
 0x209   :  { %13 = sbr.rel (!%p11_p6) target bundleno = 2 (0x2), region = 73 }

// kernel: discriminator_forward.7
= control target key start
LH: loop header
LB: loop body
LE: loop exit
PB: predicated region body
PF: predicated region fallthrough
CT: control target
= control target key end

     0   :  { %s5335_s12 = smov 0   ;;  %s5337_s13 = smov 0   ;;  %s6704_s0 = inlined_call_operand.vmem [shape: bf16[128,2048], index: 0, kind: input, shape index: {}]   ;;  %s6705_s1 = inlined_call_operand.vmem [shape: bf16[2048,256], index: 1, kind: input, shape index: {}]   ;;  %s6706_s2 = inlined_call_operand.vmem [shape: bf16[128,256], index: 2, kind: output, shape index: {0}]   ;;  %s6707_s3 = inlined_call_operand.vmem [shape: f32[8,256], index: 3, kind: output, shape index: {1}]  }
   0x1   :  { %s5339_s14 = smov 0   ;;  %s5341_s15 = smov 0  }
   0x2   :  { %s5343_s16 = smov 0  }
   0x3 LB: > { %s23_s17 = sadd.s32 1, %s5309_s15  ;;  %s4245_s18 = sadd.s32 4294967295, %s5313_s16   ;;  %s5313_s16 = sphi %s5343_s16, %s14_s16   ;;  %s5309_s15 = sphi %s5341_s15, %s6714_s15   ;;  %s5305_s14 = sphi %s5339_s14, %s6713_s14   ;;  %s5301_s13 = sphi %s5337_s13, %s6712_s13   ;;  %s5297_s12 = sphi %s5335_s12, %s6711_s12  }
   0x4   : > { %p24_p0 = scmp.ge.s32.totalorder %s23_s17, 2  ;;  %p66_p1 = scmp.ne.s32.totalorder %s5301_s13, %s5297_s12 }
   0x5   : > { %p67_p2 = scmp.eq.s32.totalorder %s5313_s16, 0  ;;  %p98_p4 = scmp.eq.s32.totalorder %s4245_s18, 1 }
   0x6   : > { %s6716_s17 = smov (%p24_p0, %s23_s17), 0  ;;  %s59_s20 = sadd.s32 1, %s5301_s13 }
   0x7   : > { %p68_p3 = por %p67_p2, %p66_p1  ;;  %s56_s19 = ssub.s32 %s5309_s15, %s6716_s17 }
   0x8   : > { %p57_p5 = scmp.eq.s32.totalorder %s56_s19, 0  ;;  %p5370_p6 = por %p98_p4, %p66_p1 }
   0x9   : > { %p4249_p7 = scmp.ge.s32.totalorder %s5313_s16, 2 }
   0xa   : > { %s5375_s22 = scalar_select %p57_p5, %s5301_s13, %s59_s20  }
   0xb   : > { %158 = sbr.rel (%p4249_p7) target bundleno = 190 (0xbe), region = 20 }
  0x10   : > { %161 = sbr.rel (!%p68_p3) target bundleno = 190 (0xbe), region = 24  ;;  %s163_s23 = sand.u32 (%p68_p3), 1, %s5301_s13  }
  0x11   : > { %s4251_s24 = sshll.u32 (%p68_p3), %s5309_s15, 2  ;;  %s4250_s25 = sshll.u32 (%p68_p3), %s163_s23, 10 }
  0x12   : > { %s5383_s28 = scalar_lea.vmem (%p68_p3), %s6705_s1, %s4251_s24  ;;  %s5387_s29 = scalar_lea.vmem (%p68_p3), [#allocation2], %s4250_s25 }
  0x13   : > { %v184_v0 = vld [vmem:[%s5383_s28] sm:$0xf] (%p68_p3)  ;;  %v186_v1 = vld [vmem:[%s5383_s28 + $0x8] sm:$0xf] (%p68_p3)  ;;  %v188_v2 = vld [vmem:[%s5383_s28 + $0x10] sm:$0xf] (%p68_p3) }
  0x14   : > { %185 = vst [vmem:[%s5387_s29] sm:$0xf] (%p68_p3), %v184_v0  ;;  %187 = vst [vmem:[%s5387_s29 + $0x4] sm:$0xf] (%p68_p3), %v186_v1  ;;  %v190_v3 = vld [vmem:[%s5383_s28 + $0x18] sm:$0xf] (%p68_p3) }
  0x15   : > { %v192_v4 = vld [vmem:[%s5383_s28 + $0x20] sm:$0xf]  ;;  %189 = vst [vmem:[%s5387_s29 + $0x8] sm:$0xf] %v188_v2  ;;  %191 = vst [vmem:[%s5387_s29 + $0xc] sm:$0xf] %v190_v3 }
  0x16   : > { %193 = vst [vmem:[%s5387_s29 + $0x10] sm:$0xf] %v192_v4  ;;  %v194_v5 = vld [vmem:[%s5383_s28 + $0x28] sm:$0xf]  ;;  %v196_v6 = vld [vmem:[%s5383_s28 + $0x30] sm:$0xf] }
  0x17   : > { %v198_v7 = vld [vmem:[%s5383_s28 + $0x38] sm:$0xf]  ;;  %195 = vst [vmem:[%s5387_s29 + $0x14] sm:$0xf] %v194_v5  ;;  %197 = vst [vmem:[%s5387_s29 + $0x18] sm:$0xf] %v196_v6 }
  0x18   : > { %199 = vst [vmem:[%s5387_s29 + $0x1c] sm:$0xf] %v198_v7  ;;  %v200_v8 = vld [vmem:[%s5383_s28 + $0x40] sm:$0xf]  ;;  %v202_v9 = vld [vmem:[%s5383_s28 + $0x48] sm:$0xf] }
  0x19   : > { %v204_v10 = vld [vmem:[%s5383_s28 + $0x50] sm:$0xf]  ;;  %201 = vst [vmem:[%s5387_s29 + $0x20] sm:$0xf] %v200_v8  ;;  %203 = vst [vmem:[%s5387_s29 + $0x24] sm:$0xf] %v202_v9 }
  0x1a   : > { %205 = vst [vmem:[%s5387_s29 + $0x28] sm:$0xf] %v204_v10  ;;  %v206_v11 = vld [vmem:[%s5383_s28 + $0x58] sm:$0xf]  ;;  %v208_v12 = vld [vmem:[%s5383_s28 + $0x60] sm:$0xf] }
  0x1b   : > { %v210_v13 = vld [vmem:[%s5383_s28 + $0x68] sm:$0xf]  ;;  %207 = vst [vmem:[%s5387_s29 + $0x2c] sm:$0xf] %v206_v11  ;;  %209 = vst [vmem:[%s5387_s29 + $0x30] sm:$0xf] %v208_v12 }
  0x1c   : > { %211 = vst [vmem:[%s5387_s29 + $0x34] sm:$0xf] %v210_v13  ;;  %v212_v14 = vld [vmem:[%s5383_s28 + $0x70] sm:$0xf]  ;;  %v214_v15 = vld [vmem:[%s5383_s28 + $0x78] sm:$0xf] }
  0x1d   : > { %v216_v16 = vld [vmem:[%s5383_s28 + $0x80] sm:$0xf]  ;;  %213 = vst [vmem:[%s5387_s29 + $0x38] sm:$0xf] %v212_v14  ;;  %215 = vst [vmem:[%s5387_s29 + $0x3c] sm:$0xf] %v214_v15 }
  0x1e   : > { %217 = vst [vmem:[%s5387_s29 + $0x40] sm:$0xf] %v216_v16  ;;  %v218_v17 = vld [vmem:[%s5383_s28 + $0x88] sm:$0xf]  ;;  %v220_v18 = vld [vmem:[%s5383_s28 + $0x90] sm:$0xf] }
  0x1f   : > { %v222_v19 = vld [vmem:[%s5383_s28 + $0x98] sm:$0xf]  ;;  %219 = vst [vmem:[%s5387_s29 + $0x44] sm:$0xf] %v218_v17  ;;  %221 = vst [vmem:[%s5387_s29 + $0x48] sm:$0xf] %v220_v18 }
  0x20   : > { %223 = vst [vmem:[%s5387_s29 + $0x4c] sm:$0xf] %v222_v19  ;;  %v224_v20 = vld [vmem:[%s5383_s28 + $0xa0] sm:$0xf]  ;;  %v226_v21 = vld [vmem:[%s5383_s28 + $0xa8] sm:$0xf] }
  0x21   : > { %v228_v22 = vld [vmem:[%s5383_s28 + $0xb0] sm:$0xf]  ;;  %225 = vst [vmem:[%s5387_s29 + $0x50] sm:$0xf] %v224_v20  ;;  %227 = vst [vmem:[%s5387_s29 + $0x54] sm:$0xf] %v226_v21 }
  0x22   : > { %229 = vst [vmem:[%s5387_s29 + $0x58] sm:$0xf] %v228_v22  ;;  %v230_v23 = vld [vmem:[%s5383_s28 + $0xb8] sm:$0xf]  ;;  %v232_v24 = vld [vmem:[%s5383_s28 + $0xc0] sm:$0xf] }
  0x23   : > { %v234_v25 = vld [vmem:[%s5383_s28 + $0xc8] sm:$0xf]  ;;  %231 = vst [vmem:[%s5387_s29 + $0x5c] sm:$0xf] %v230_v23  ;;  %233 = vst [vmem:[%s5387_s29 + $0x60] sm:$0xf] %v232_v24 }
  0x24   : > { %235 = vst [vmem:[%s5387_s29 + $0x64] sm:$0xf] %v234_v25  ;;  %v236_v26 = vld [vmem:[%s5383_s28 + $0xd0] sm:$0xf]  ;;  %v238_v27 = vld [vmem:[%s5383_s28 + $0xd8] sm:$0xf] }
  0x25   : > { %v240_v28 = vld [vmem:[%s5383_s28 + $0xe0] sm:$0xf]  ;;  %237 = vst [vmem:[%s5387_s29 + $0x68] sm:$0xf] %v236_v26  ;;  %239 = vst [vmem:[%s5387_s29 + $0x6c] sm:$0xf] %v238_v27 }
  0x26   : > { %241 = vst [vmem:[%s5387_s29 + $0x70] sm:$0xf] %v240_v28  ;;  %v242_v29 = vld [vmem:[%s5383_s28 + $0xe8] sm:$0xf]  ;;  %v244_v30 = vld [vmem:[%s5383_s28 + $0xf0] sm:$0xf] }
  0x27   : > { %v246_v31 = vld [vmem:[%s5383_s28 + $0xf8] sm:$0xf]  ;;  %243 = vst [vmem:[%s5387_s29 + $0x74] sm:$0xf] %v242_v29  ;;  %245 = vst [vmem:[%s5387_s29 + $0x78] sm:$0xf] %v244_v30 }
  0x28   : > { %247 = vst [vmem:[%s5387_s29 + $0x7c] sm:$0xf] %v246_v31  ;;  %v248_v32 = vld [vmem:[%s5383_s28 + $0x100] sm:$0xf]  ;;  %v250_v33 = vld [vmem:[%s5383_s28 + $0x108] sm:$0xf] }
  0x29   : > { %v252_v34 = vld [vmem:[%s5383_s28 + $0x110] sm:$0xf]  ;;  %249 = vst [vmem:[%s5387_s29 + $0x80] sm:$0xf] %v248_v32  ;;  %251 = vst [vmem:[%s5387_s29 + $0x84] sm:$0xf] %v250_v33 }
  0x2a   : > { %253 = vst [vmem:[%s5387_s29 + $0x88] sm:$0xf] %v252_v34  ;;  %v254_v35 = vld [vmem:[%s5383_s28 + $0x118] sm:$0xf]  ;;  %v256_v36 = vld [vmem:[%s5383_s28 + $0x120] sm:$0xf] }
  0x2b   : > { %v258_v37 = vld [vmem:[%s5383_s28 + $0x128] sm:$0xf]  ;;  %255 = vst [vmem:[%s5387_s29 + $0x8c] sm:$0xf] %v254_v35  ;;  %257 = vst [vmem:[%s5387_s29 + $0x90] sm:$0xf] %v256_v36 }
  0x2c   : > { %259 = vst [vmem:[%s5387_s29 + $0x94] sm:$0xf] %v258_v37  ;;  %v260_v38 = vld [vmem:[%s5383_s28 + $0x130] sm:$0xf]  ;;  %v262_v39 = vld [vmem:[%s5383_s28 + $0x138] sm:$0xf] }
  0x2d   : > { %v264_v40 = vld [vmem:[%s5383_s28 + $0x140] sm:$0xf]  ;;  %261 = vst [vmem:[%s5387_s29 + $0x98] sm:$0xf] %v260_v38  ;;  %263 = vst [vmem:[%s5387_s29 + $0x9c] sm:$0xf] %v262_v39 }
  0x2e   : > { %265 = vst [vmem:[%s5387_s29 + $0xa0] sm:$0xf] %v264_v40  ;;  %v266_v41 = vld [vmem:[%s5383_s28 + $0x148] sm:$0xf]  ;;  %v268_v42 = vld [vmem:[%s5383_s28 + $0x150] sm:$0xf] }
  0x2f   : > { %v270_v43 = vld [vmem:[%s5383_s28 + $0x158] sm:$0xf]  ;;  %267 = vst [vmem:[%s5387_s29 + $0xa4] sm:$0xf] %v266_v41  ;;  %269 = vst [vmem:[%s5387_s29 + $0xa8] sm:$0xf] %v268_v42 }
  0x30   : > { %271 = vst [vmem:[%s5387_s29 + $0xac] sm:$0xf] %v270_v43  ;;  %v272_v44 = vld [vmem:[%s5383_s28 + $0x160] sm:$0xf]  ;;  %v274_v45 = vld [vmem:[%s5383_s28 + $0x168] sm:$0xf] }
  0x31   : > { %v276_v46 = vld [vmem:[%s5383_s28 + $0x170] sm:$0xf]  ;;  %273 = vst [vmem:[%s5387_s29 + $0xb0] sm:$0xf] %v272_v44  ;;  %275 = vst [vmem:[%s5387_s29 + $0xb4] sm:$0xf] %v274_v45 }
  0x32   : > { %277 = vst [vmem:[%s5387_s29 + $0xb8] sm:$0xf] %v276_v46  ;;  %v278_v47 = vld [vmem:[%s5383_s28 + $0x178] sm:$0xf]  ;;  %v280_v48 = vld [vmem:[%s5383_s28 + $0x180] sm:$0xf] }
  0x33   : > { %v282_v49 = vld [vmem:[%s5383_s28 + $0x188] sm:$0xf]  ;;  %279 = vst [vmem:[%s5387_s29 + $0xbc] sm:$0xf] %v278_v47  ;;  %281 = vst [vmem:[%s5387_s29 + $0xc0] sm:$0xf] %v280_v48 }
  0x34   : > { %283 = vst [vmem:[%s5387_s29 + $0xc4] sm:$0xf] %v282_v49  ;;  %v284_v50 = vld [vmem:[%s5383_s28 + $0x190] sm:$0xf]  ;;  %v286_v51 = vld [vmem:[%s5383_s28 + $0x198] sm:$0xf] }
  0x35   : > { %v288_v52 = vld [vmem:[%s5383_s28 + $0x1a0] sm:$0xf]  ;;  %285 = vst [vmem:[%s5387_s29 + $0xc8] sm:$0xf] %v284_v50  ;;  %287 = vst [vmem:[%s5387_s29 + $0xcc] sm:$0xf] %v286_v51 }
  0x36   : > { %289 = vst [vmem:[%s5387_s29 + $0xd0] sm:$0xf] %v288_v52  ;;  %v290_v53 = vld [vmem:[%s5383_s28 + $0x1a8] sm:$0xf]  ;;  %v292_v54 = vld [vmem:[%s5383_s28 + $0x1b0] sm:$0xf] }
  0x37   : > { %v294_v55 = vld [vmem:[%s5383_s28 + $0x1b8] sm:$0xf]  ;;  %291 = vst [vmem:[%s5387_s29 + $0xd4] sm:$0xf] %v290_v53  ;;  %293 = vst [vmem:[%s5387_s29 + $0xd8] sm:$0xf] %v292_v54 }
  0x38   : > { %295 = vst [vmem:[%s5387_s29 + $0xdc] sm:$0xf] %v294_v55  ;;  %v296_v56 = vld [vmem:[%s5383_s28 + $0x1c0] sm:$0xf]  ;;  %v298_v57 = vld [vmem:[%s5383_s28 + $0x1c8] sm:$0xf] }
  0x39   : > { %v300_v58 = vld [vmem:[%s5383_s28 + $0x1d0] sm:$0xf]  ;;  %297 = vst [vmem:[%s5387_s29 + $0xe0] sm:$0xf] %v296_v56  ;;  %299 = vst [vmem:[%s5387_s29 + $0xe4] sm:$0xf] %v298_v57 }
  0x3a   : > { %301 = vst [vmem:[%s5387_s29 + $0xe8] sm:$0xf] %v300_v58  ;;  %v302_v59 = vld [vmem:[%s5383_s28 + $0x1d8] sm:$0xf]  ;;  %v304_v60 = vld [vmem:[%s5383_s28 + $0x1e0] sm:$0xf] }
  0x3b   : > { %v306_v61 = vld [vmem:[%s5383_s28 + $0x1e8] sm:$0xf]  ;;  %303 = vst [vmem:[%s5387_s29 + $0xec] sm:$0xf] %v302_v59  ;;  %305 = vst [vmem:[%s5387_s29 + $0xf0] sm:$0xf] %v304_v60 }
  0x3c   : > { %307 = vst [vmem:[%s5387_s29 + $0xf4] sm:$0xf] %v306_v61  ;;  %v308_v62 = vld [vmem:[%s5383_s28 + $0x1f0] sm:$0xf]  ;;  %v310_v63 = vld [vmem:[%s5383_s28 + $0x1f8] sm:$0xf] }
  0x3d   : > { %v312_v0 = vld [vmem:[%s5383_s28 + $0x200] sm:$0xf]  ;;  %309 = vst [vmem:[%s5387_s29 + $0xf8] sm:$0xf] %v308_v62  ;;  %311 = vst [vmem:[%s5387_s29 + $0xfc] sm:$0xf] %v310_v63 }
  0x3e   : > { %313 = vst [vmem:[%s5387_s29 + $0x100] sm:$0xf] %v312_v0  ;;  %v314_v1 = vld [vmem:[%s5383_s28 + $0x208] sm:$0xf]  ;;  %v316_v2 = vld [vmem:[%s5383_s28 + $0x210] sm:$0xf] }
  0x3f   : > { %v318_v3 = vld [vmem:[%s5383_s28 + $0x218] sm:$0xf]  ;;  %315 = vst [vmem:[%s5387_s29 + $0x104] sm:$0xf] %v314_v1  ;;  %317 = vst [vmem:[%s5387_s29 + $0x108] sm:$0xf] %v316_v2 }
  0x40   : > { %319 = vst [vmem:[%s5387_s29 + $0x10c] sm:$0xf] %v318_v3  ;;  %v320_v4 = vld [vmem:[%s5383_s28 + $0x220] sm:$0xf]  ;;  %v322_v5 = vld [vmem:[%s5383_s28 + $0x228] sm:$0xf] }
  0x41   : > { %v324_v6 = vld [vmem:[%s5383_s28 + $0x230] sm:$0xf]  ;;  %321 = vst [vmem:[%s5387_s29 + $0x110] sm:$0xf] %v320_v4  ;;  %323 = vst [vmem:[%s5387_s29 + $0x114] sm:$0xf] %v322_v5 }
  0x42   : > { %325 = vst [vmem:[%s5387_s29 + $0x118] sm:$0xf] %v324_v6  ;;  %v326_v7 = vld [vmem:[%s5383_s28 + $0x238] sm:$0xf]  ;;  %v328_v8 = vld [vmem:[%s5383_s28 + $0x240] sm:$0xf] }
  0x43   : > { %v330_v9 = vld [vmem:[%s5383_s28 + $0x248] sm:$0xf]  ;;  %327 = vst [vmem:[%s5387_s29 + $0x11c] sm:$0xf] %v326_v7  ;;  %329 = vst [vmem:[%s5387_s29 + $0x120] sm:$0xf] %v328_v8 }
  0x44   : > { %331 = vst [vmem:[%s5387_s29 + $0x124] sm:$0xf] %v330_v9  ;;  %v332_v10 = vld [vmem:[%s5383_s28 + $0x250] sm:$0xf]  ;;  %v334_v11 = vld [vmem:[%s5383_s28 + $0x258] sm:$0xf] }
  0x45   : > { %v336_v12 = vld [vmem:[%s5383_s28 + $0x260] sm:$0xf]  ;;  %333 = vst [vmem:[%s5387_s29 + $0x128] sm:$0xf] %v332_v10  ;;  %335 = vst [vmem:[%s5387_s29 + $0x12c] sm:$0xf] %v334_v11 }
  0x46   : > { %337 = vst [vmem:[%s5387_s29 + $0x130] sm:$0xf] %v336_v12  ;;  %v338_v13 = vld [vmem:[%s5383_s28 + $0x268] sm:$0xf]  ;;  %v340_v14 = vld [vmem:[%s5383_s28 + $0x270] sm:$0xf] }
  0x47   : > { %v342_v15 = vld [vmem:[%s5383_s28 + $0x278] sm:$0xf]  ;;  %339 = vst [vmem:[%s5387_s29 + $0x134] sm:$0xf] %v338_v13  ;;  %341 = vst [vmem:[%s5387_s29 + $0x138] sm:$0xf] %v340_v14 }
  0x48   : > { %343 = vst [vmem:[%s5387_s29 + $0x13c] sm:$0xf] %v342_v15  ;;  %v344_v16 = vld [vmem:[%s5383_s28 + $0x280] sm:$0xf]  ;;  %v346_v17 = vld [vmem:[%s5383_s28 + $0x288] sm:$0xf] }
  0x49   : > { %v348_v18 = vld [vmem:[%s5383_s28 + $0x290] sm:$0xf]  ;;  %345 = vst [vmem:[%s5387_s29 + $0x140] sm:$0xf] %v344_v16  ;;  %347 = vst [vmem:[%s5387_s29 + $0x144] sm:$0xf] %v346_v17 }
  0x4a   : > { %349 = vst [vmem:[%s5387_s29 + $0x148] sm:$0xf] %v348_v18  ;;  %v350_v19 = vld [vmem:[%s5383_s28 + $0x298] sm:$0xf]  ;;  %v352_v20 = vld [vmem:[%s5383_s28 + $0x2a0] sm:$0xf] }
  0x4b   : > { %v354_v21 = vld [vmem:[%s5383_s28 + $0x2a8] sm:$0xf]  ;;  %351 = vst [vmem:[%s5387_s29 + $0x14c] sm:$0xf] %v350_v19  ;;  %353 = vst [vmem:[%s5387_s29 + $0x150] sm:$0xf] %v352_v20 }
  0x4c   : > { %355 = vst [vmem:[%s5387_s29 + $0x154] sm:$0xf] %v354_v21  ;;  %v356_v22 = vld [vmem:[%s5383_s28 + $0x2b0] sm:$0xf]  ;;  %v358_v23 = vld [vmem:[%s5383_s28 + $0x2b8] sm:$0xf] }
  0x4d   : > { %v360_v24 = vld [vmem:[%s5383_s28 + $0x2c0] sm:$0xf]  ;;  %357 = vst [vmem:[%s5387_s29 + $0x158] sm:$0xf] %v356_v22  ;;  %359 = vst [vmem:[%s5387_s29 + $0x15c] sm:$0xf] %v358_v23 }
  0x4e   : > { %361 = vst [vmem:[%s5387_s29 + $0x160] sm:$0xf] %v360_v24  ;;  %v362_v25 = vld [vmem:[%s5383_s28 + $0x2c8] sm:$0xf]  ;;  %v364_v26 = vld [vmem:[%s5383_s28 + $0x2d0] sm:$0xf] }
  0x4f   : > { %v366_v27 = vld [vmem:[%s5383_s28 + $0x2d8] sm:$0xf]  ;;  %363 = vst [vmem:[%s5387_s29 + $0x164] sm:$0xf] %v362_v25  ;;  %365 = vst [vmem:[%s5387_s29 + $0x168] sm:$0xf] %v364_v26 }
  0x50   : > { %367 = vst [vmem:[%s5387_s29 + $0x16c] sm:$0xf] %v366_v27  ;;  %v368_v28 = vld [vmem:[%s5383_s28 + $0x2e0] sm:$0xf]  ;;  %v370_v29 = vld [vmem:[%s5383_s28 + $0x2e8] sm:$0xf] }
  0x51   : > { %v372_v30 = vld [vmem:[%s5383_s28 + $0x2f0] sm:$0xf]  ;;  %369 = vst [vmem:[%s5387_s29 + $0x170] sm:$0xf] %v368_v28  ;;  %371 = vst [vmem:[%s5387_s29 + $0x174] sm:$0xf] %v370_v29 }
  0x52   : > { %373 = vst [vmem:[%s5387_s29 + $0x178] sm:$0xf] %v372_v30  ;;  %v374_v31 = vld [vmem:[%s5383_s28 + $0x2f8] sm:$0xf]  ;;  %v376_v32 = vld [vmem:[%s5383_s28 + $0x300] sm:$0xf] }
  0x53   : > { %v378_v33 = vld [vmem:[%s5383_s28 + $0x308] sm:$0xf]  ;;  %375 = vst [vmem:[%s5387_s29 + $0x17c] sm:$0xf] %v374_v31  ;;  %377 = vst [vmem:[%s5387_s29 + $0x180] sm:$0xf] %v376_v32 }
  0x54   : > { %379 = vst [vmem:[%s5387_s29 + $0x184] sm:$0xf] %v378_v33  ;;  %v380_v34 = vld [vmem:[%s5383_s28 + $0x310] sm:$0xf]  ;;  %v382_v35 = vld [vmem:[%s5383_s28 + $0x318] sm:$0xf] }
  0x55   : > { %v384_v36 = vld [vmem:[%s5383_s28 + $0x320] sm:$0xf]  ;;  %381 = vst [vmem:[%s5387_s29 + $0x188] sm:$0xf] %v380_v34  ;;  %383 = vst [vmem:[%s5387_s29 + $0x18c] sm:$0xf] %v382_v35 }
  0x56   : > { %385 = vst [vmem:[%s5387_s29 + $0x190] sm:$0xf] %v384_v36  ;;  %v386_v37 = vld [vmem:[%s5383_s28 + $0x328] sm:$0xf]  ;;  %v388_v38 = vld [vmem:[%s5383_s28 + $0x330] sm:$0xf] }
  0x57   : > { %v390_v39 = vld [vmem:[%s5383_s28 + $0x338] sm:$0xf]  ;;  %387 = vst [vmem:[%s5387_s29 + $0x194] sm:$0xf] %v386_v37  ;;  %389 = vst [vmem:[%s5387_s29 + $0x198] sm:$0xf] %v388_v38 }
  0x58   : > { %391 = vst [vmem:[%s5387_s29 + $0x19c] sm:$0xf] %v390_v39  ;;  %v392_v40 = vld [vmem:[%s5383_s28 + $0x340] sm:$0xf]  ;;  %v394_v41 = vld [vmem:[%s5383_s28 + $0x348] sm:$0xf] }
  0x59   : > { %v396_v42 = vld [vmem:[%s5383_s28 + $0x350] sm:$0xf]  ;;  %393 = vst [vmem:[%s5387_s29 + $0x1a0] sm:$0xf] %v392_v40  ;;  %395 = vst [vmem:[%s5387_s29 + $0x1a4] sm:$0xf] %v394_v41 }
  0x5a   : > { %397 = vst [vmem:[%s5387_s29 + $0x1a8] sm:$0xf] %v396_v42  ;;  %v398_v43 = vld [vmem:[%s5383_s28 + $0x358] sm:$0xf]  ;;  %v400_v44 = vld [vmem:[%s5383_s28 + $0x360] sm:$0xf] }
  0x5b   : > { %v402_v45 = vld [vmem:[%s5383_s28 + $0x368] sm:$0xf]  ;;  %399 = vst [vmem:[%s5387_s29 + $0x1ac] sm:$0xf] %v398_v43  ;;  %401 = vst [vmem:[%s5387_s29 + $0x1b0] sm:$0xf] %v400_v44 }
  0x5c   : > { %403 = vst [vmem:[%s5387_s29 + $0x1b4] sm:$0xf] %v402_v45  ;;  %v404_v46 = vld [vmem:[%s5383_s28 + $0x370] sm:$0xf]  ;;  %v406_v47 = vld [vmem:[%s5383_s28 + $0x378] sm:$0xf] }
  0x5d   : > { %v408_v48 = vld [vmem:[%s5383_s28 + $0x380] sm:$0xf]  ;;  %405 = vst [vmem:[%s5387_s29 + $0x1b8] sm:$0xf] %v404_v46  ;;  %407 = vst [vmem:[%s5387_s29 + $0x1bc] sm:$0xf] %v406_v47 }
  0x5e   : > { %409 = vst [vmem:[%s5387_s29 + $0x1c0] sm:$0xf] %v408_v48  ;;  %v410_v49 = vld [vmem:[%s5383_s28 + $0x388] sm:$0xf]  ;;  %v412_v50 = vld [vmem:[%s5383_s28 + $0x390] sm:$0xf] }
  0x5f   : > { %v414_v51 = vld [vmem:[%s5383_s28 + $0x398] sm:$0xf]  ;;  %411 = vst [vmem:[%s5387_s29 + $0x1c4] sm:$0xf] %v410_v49  ;;  %413 = vst [vmem:[%s5387_s29 + $0x1c8] sm:$0xf] %v412_v50 }
  0x60   : > { %415 = vst [vmem:[%s5387_s29 + $0x1cc] sm:$0xf] %v414_v51  ;;  %v416_v52 = vld [vmem:[%s5383_s28 + $0x3a0] sm:$0xf]  ;;  %v418_v53 = vld [vmem:[%s5383_s28 + $0x3a8] sm:$0xf] }
  0x61   : > { %v420_v54 = vld [vmem:[%s5383_s28 + $0x3b0] sm:$0xf]  ;;  %417 = vst [vmem:[%s5387_s29 + $0x1d0] sm:$0xf] %v416_v52  ;;  %419 = vst [vmem:[%s5387_s29 + $0x1d4] sm:$0xf] %v418_v53 }
  0x62   : > { %421 = vst [vmem:[%s5387_s29 + $0x1d8] sm:$0xf] %v420_v54  ;;  %v422_v55 = vld [vmem:[%s5383_s28 + $0x3b8] sm:$0xf]  ;;  %v424_v56 = vld [vmem:[%s5383_s28 + $0x3c0] sm:$0xf] }
  0x63   : > { %v426_v57 = vld [vmem:[%s5383_s28 + $0x3c8] sm:$0xf]  ;;  %423 = vst [vmem:[%s5387_s29 + $0x1dc] sm:$0xf] %v422_v55  ;;  %425 = vst [vmem:[%s5387_s29 + $0x1e0] sm:$0xf] %v424_v56 }
  0x64   : > { %427 = vst [vmem:[%s5387_s29 + $0x1e4] sm:$0xf] %v426_v57  ;;  %v428_v58 = vld [vmem:[%s5383_s28 + $0x3d0] sm:$0xf]  ;;  %v430_v59 = vld [vmem:[%s5383_s28 + $0x3d8] sm:$0xf] }
  0x65   : > { %v432_v60 = vld [vmem:[%s5383_s28 + $0x3e0] sm:$0xf]  ;;  %429 = vst [vmem:[%s5387_s29 + $0x1e8] sm:$0xf] %v428_v58  ;;  %431 = vst [vmem:[%s5387_s29 + $0x1ec] sm:$0xf] %v430_v59 }
  0x66   : > { %433 = vst [vmem:[%s5387_s29 + $0x1f0] sm:$0xf] %v432_v60  ;;  %v434_v61 = vld [vmem:[%s5383_s28 + $0x3e8] sm:$0xf]  ;;  %v436_v62 = vld [vmem:[%s5383_s28 + $0x3f0] sm:$0xf] }
  0x67   : > { %v438_v63 = vld [vmem:[%s5383_s28 + $0x3f8] sm:$0xf]  ;;  %435 = vst [vmem:[%s5387_s29 + $0x1f4] sm:$0xf] %v434_v61  ;;  %437 = vst [vmem:[%s5387_s29 + $0x1f8] sm:$0xf] %v436_v62 }
  0x68   : > { %439 = vst [vmem:[%s5387_s29 + $0x1fc] sm:$0xf] %v438_v63  ;;  %v440_v0 = vld [vmem:[%s5383_s28 + $0x400] sm:$0xf]  ;;  %v442_v1 = vld [vmem:[%s5383_s28 + $0x408] sm:$0xf] }
  0x69   : > { %v444_v2 = vld [vmem:[%s5383_s28 + $0x410] sm:$0xf]  ;;  %441 = vst [vmem:[%s5387_s29 + $0x200] sm:$0xf] %v440_v0  ;;  %443 = vst [vmem:[%s5387_s29 + $0x204] sm:$0xf] %v442_v1 }
  0x6a   : > { %445 = vst [vmem:[%s5387_s29 + $0x208] sm:$0xf] %v444_v2  ;;  %v446_v3 = vld [vmem:[%s5383_s28 + $0x418] sm:$0xf]  ;;  %v448_v4 = vld [vmem:[%s5383_s28 + $0x420] sm:$0xf] }
  0x6b   : > { %v450_v5 = vld [vmem:[%s5383_s28 + $0x428] sm:$0xf]  ;;  %447 = vst [vmem:[%s5387_s29 + $0x20c] sm:$0xf] %v446_v3  ;;  %449 = vst [vmem:[%s5387_s29 + $0x210] sm:$0xf] %v448_v4 }
  0x6c   : > { %451 = vst [vmem:[%s5387_s29 + $0x214] sm:$0xf] %v450_v5  ;;  %v452_v6 = vld [vmem:[%s5383_s28 + $0x430] sm:$0xf]  ;;  %v454_v7 = vld [vmem:[%s5383_s28 + $0x438] sm:$0xf] }
  0x6d   : > { %v456_v8 = vld [vmem:[%s5383_s28 + $0x440] sm:$0xf]  ;;  %453 = vst [vmem:[%s5387_s29 + $0x218] sm:$0xf] %v452_v6  ;;  %455 = vst [vmem:[%s5387_s29 + $0x21c] sm:$0xf] %v454_v7 }
  0x6e   : > { %457 = vst [vmem:[%s5387_s29 + $0x220] sm:$0xf] %v456_v8  ;;  %v458_v9 = vld [vmem:[%s5383_s28 + $0x448] sm:$0xf]  ;;  %v460_v10 = vld [vmem:[%s5383_s28 + $0x450] sm:$0xf] }
  0x6f   : > { %v462_v11 = vld [vmem:[%s5383_s28 + $0x458] sm:$0xf]  ;;  %459 = vst [vmem:[%s5387_s29 + $0x224] sm:$0xf] %v458_v9  ;;  %461 = vst [vmem:[%s5387_s29 + $0x228] sm:$0xf] %v460_v10 }
  0x70   : > { %463 = vst [vmem:[%s5387_s29 + $0x22c] sm:$0xf] %v462_v11  ;;  %v464_v12 = vld [vmem:[%s5383_s28 + $0x460] sm:$0xf]  ;;  %v466_v13 = vld [vmem:[%s5383_s28 + $0x468] sm:$0xf] }
  0x71   : > { %v468_v14 = vld [vmem:[%s5383_s28 + $0x470] sm:$0xf]  ;;  %465 = vst [vmem:[%s5387_s29 + $0x230] sm:$0xf] %v464_v12  ;;  %467 = vst [vmem:[%s5387_s29 + $0x234] sm:$0xf] %v466_v13 }
  0x72   : > { %469 = vst [vmem:[%s5387_s29 + $0x238] sm:$0xf] %v468_v14  ;;  %v470_v15 = vld [vmem:[%s5383_s28 + $0x478] sm:$0xf]  ;;  %v472_v16 = vld [vmem:[%s5383_s28 + $0x480] sm:$0xf] }
  0x73   : > { %v474_v17 = vld [vmem:[%s5383_s28 + $0x488] sm:$0xf]  ;;  %471 = vst [vmem:[%s5387_s29 + $0x23c] sm:$0xf] %v470_v15  ;;  %473 = vst [vmem:[%s5387_s29 + $0x240] sm:$0xf] %v472_v16 }
  0x74   : > { %475 = vst [vmem:[%s5387_s29 + $0x244] sm:$0xf] %v474_v17  ;;  %v476_v18 = vld [vmem:[%s5383_s28 + $0x490] sm:$0xf]  ;;  %v478_v19 = vld [vmem:[%s5383_s28 + $0x498] sm:$0xf] }
  0x75   : > { %v480_v20 = vld [vmem:[%s5383_s28 + $0x4a0] sm:$0xf]  ;;  %477 = vst [vmem:[%s5387_s29 + $0x248] sm:$0xf] %v476_v18  ;;  %479 = vst [vmem:[%s5387_s29 + $0x24c] sm:$0xf] %v478_v19 }
  0x76   : > { %481 = vst [vmem:[%s5387_s29 + $0x250] sm:$0xf] %v480_v20  ;;  %v482_v21 = vld [vmem:[%s5383_s28 + $0x4a8] sm:$0xf]  ;;  %v484_v22 = vld [vmem:[%s5383_s28 + $0x4b0] sm:$0xf] }
  0x77   : > { %v486_v23 = vld [vmem:[%s5383_s28 + $0x4b8] sm:$0xf]  ;;  %483 = vst [vmem:[%s5387_s29 + $0x254] sm:$0xf] %v482_v21  ;;  %485 = vst [vmem:[%s5387_s29 + $0x258] sm:$0xf] %v484_v22 }
  0x78   : > { %487 = vst [vmem:[%s5387_s29 + $0x25c] sm:$0xf] %v486_v23  ;;  %v488_v24 = vld [vmem:[%s5383_s28 + $0x4c0] sm:$0xf]  ;;  %v490_v25 = vld [vmem:[%s5383_s28 + $0x4c8] sm:$0xf] }
  0x79   : > { %v492_v26 = vld [vmem:[%s5383_s28 + $0x4d0] sm:$0xf]  ;;  %489 = vst [vmem:[%s5387_s29 + $0x260] sm:$0xf] %v488_v24  ;;  %491 = vst [vmem:[%s5387_s29 + $0x264] sm:$0xf] %v490_v25 }
  0x7a   : > { %493 = vst [vmem:[%s5387_s29 + $0x268] sm:$0xf] %v492_v26  ;;  %v494_v27 = vld [vmem:[%s5383_s28 + $0x4d8] sm:$0xf]  ;;  %v496_v28 = vld [vmem:[%s5383_s28 + $0x4e0] sm:$0xf] }
  0x7b   : > { %v498_v29 = vld [vmem:[%s5383_s28 + $0x4e8] sm:$0xf]  ;;  %495 = vst [vmem:[%s5387_s29 + $0x26c] sm:$0xf] %v494_v27  ;;  %497 = vst [vmem:[%s5387_s29 + $0x270] sm:$0xf] %v496_v28 }
  0x7c   : > { %499 = vst [vmem:[%s5387_s29 + $0x274] sm:$0xf] %v498_v29  ;;  %v500_v30 = vld [vmem:[%s5383_s28 + $0x4f0] sm:$0xf]  ;;  %v502_v31 = vld [vmem:[%s5383_s28 + $0x4f8] sm:$0xf] }
  0x7d   : > { %v504_v32 = vld [vmem:[%s5383_s28 + $0x500] sm:$0xf]  ;;  %501 = vst [vmem:[%s5387_s29 + $0x278] sm:$0xf] %v500_v30  ;;  %503 = vst [vmem:[%s5387_s29 + $0x27c] sm:$0xf] %v502_v31 }
  0x7e   : > { %505 = vst [vmem:[%s5387_s29 + $0x280] sm:$0xf] %v504_v32  ;;  %v506_v33 = vld [vmem:[%s5383_s28 + $0x508] sm:$0xf]  ;;  %v508_v34 = vld [vmem:[%s5383_s28 + $0x510] sm:$0xf] }
  0x7f   : > { %v510_v35 = vld [vmem:[%s5383_s28 + $0x518] sm:$0xf]  ;;  %507 = vst [vmem:[%s5387_s29 + $0x284] sm:$0xf] %v506_v33  ;;  %509 = vst [vmem:[%s5387_s29 + $0x288] sm:$0xf] %v508_v34 }
  0x80   : > { %511 = vst [vmem:[%s5387_s29 + $0x28c] sm:$0xf] %v510_v35  ;;  %v512_v36 = vld [vmem:[%s5383_s28 + $0x520] sm:$0xf]  ;;  %v514_v37 = vld [vmem:[%s5383_s28 + $0x528] sm:$0xf] }
  0x81   : > { %v516_v38 = vld [vmem:[%s5383_s28 + $0x530] sm:$0xf]  ;;  %513 = vst [vmem:[%s5387_s29 + $0x290] sm:$0xf] %v512_v36  ;;  %515 = vst [vmem:[%s5387_s29 + $0x294] sm:$0xf] %v514_v37 }
  0x82   : > { %517 = vst [vmem:[%s5387_s29 + $0x298] sm:$0xf] %v516_v38  ;;  %v518_v39 = vld [vmem:[%s5383_s28 + $0x538] sm:$0xf]  ;;  %v520_v40 = vld [vmem:[%s5383_s28 + $0x540] sm:$0xf] }
  0x83   : > { %v522_v41 = vld [vmem:[%s5383_s28 + $0x548] sm:$0xf]  ;;  %519 = vst [vmem:[%s5387_s29 + $0x29c] sm:$0xf] %v518_v39  ;;  %521 = vst [vmem:[%s5387_s29 + $0x2a0] sm:$0xf] %v520_v40 }
  0x84   : > { %523 = vst [vmem:[%s5387_s29 + $0x2a4] sm:$0xf] %v522_v41  ;;  %v524_v42 = vld [vmem:[%s5383_s28 + $0x550] sm:$0xf]  ;;  %v526_v43 = vld [vmem:[%s5383_s28 + $0x558] sm:$0xf] }
  0x85   : > { %v528_v44 = vld [vmem:[%s5383_s28 + $0x560] sm:$0xf]  ;;  %525 = vst [vmem:[%s5387_s29 + $0x2a8] sm:$0xf] %v524_v42  ;;  %527 = vst [vmem:[%s5387_s29 + $0x2ac] sm:$0xf] %v526_v43 }
  0x86   : > { %529 = vst [vmem:[%s5387_s29 + $0x2b0] sm:$0xf] %v528_v44  ;;  %v530_v45 = vld [vmem:[%s5383_s28 + $0x568] sm:$0xf]  ;;  %v532_v46 = vld [vmem:[%s5383_s28 + $0x570] sm:$0xf] }
  0x87   : > { %v534_v47 = vld [vmem:[%s5383_s28 + $0x578] sm:$0xf]  ;;  %531 = vst [vmem:[%s5387_s29 + $0x2b4] sm:$0xf] %v530_v45  ;;  %533 = vst [vmem:[%s5387_s29 + $0x2b8] sm:$0xf] %v532_v46 }
  0x88   : > { %535 = vst [vmem:[%s5387_s29 + $0x2bc] sm:$0xf] %v534_v47  ;;  %v536_v48 = vld [vmem:[%s5383_s28 + $0x580] sm:$0xf]  ;;  %v538_v49 = vld [vmem:[%s5383_s28 + $0x588] sm:$0xf] }
  0x89   : > { %v540_v50 = vld [vmem:[%s5383_s28 + $0x590] sm:$0xf]  ;;  %537 = vst [vmem:[%s5387_s29 + $0x2c0] sm:$0xf] %v536_v48  ;;  %539 = vst [vmem:[%s5387_s29 + $0x2c4] sm:$0xf] %v538_v49 }
  0x8a   : > { %541 = vst [vmem:[%s5387_s29 + $0x2c8] sm:$0xf] %v540_v50  ;;  %v542_v51 = vld [vmem:[%s5383_s28 + $0x598] sm:$0xf]  ;;  %v544_v52 = vld [vmem:[%s5383_s28 + $0x5a0] sm:$0xf] }
  0x8b   : > { %v546_v53 = vld [vmem:[%s5383_s28 + $0x5a8] sm:$0xf]  ;;  %543 = vst [vmem:[%s5387_s29 + $0x2cc] sm:$0xf] %v542_v51  ;;  %545 = vst [vmem:[%s5387_s29 + $0x2d0] sm:$0xf] %v544_v52 }
  0x8c   : > { %547 = vst [vmem:[%s5387_s29 + $0x2d4] sm:$0xf] %v546_v53  ;;  %v548_v54 = vld [vmem:[%s5383_s28 + $0x5b0] sm:$0xf]  ;;  %v550_v55 = vld [vmem:[%s5383_s28 + $0x5b8] sm:$0xf] }
  0x8d   : > { %v552_v56 = vld [vmem:[%s5383_s28 + $0x5c0] sm:$0xf]  ;;  %549 = vst [vmem:[%s5387_s29 + $0x2d8] sm:$0xf] %v548_v54  ;;  %551 = vst [vmem:[%s5387_s29 + $0x2dc] sm:$0xf] %v550_v55 }
  0x8e   : > { %553 = vst [vmem:[%s5387_s29 + $0x2e0] sm:$0xf] %v552_v56  ;;  %v554_v57 = vld [vmem:[%s5383_s28 + $0x5c8] sm:$0xf]  ;;  %v556_v58 = vld [vmem:[%s5383_s28 + $0x5d0] sm:$0xf] }
  0x8f   : > { %v558_v59 = vld [vmem:[%s5383_s28 + $0x5d8] sm:$0xf]  ;;  %555 = vst [vmem:[%s5387_s29 + $0x2e4] sm:$0xf] %v554_v57  ;;  %557 = vst [vmem:[%s5387_s29 + $0x2e8] sm:$0xf] %v556_v58 }
  0x90   : > { %559 = vst [vmem:[%s5387_s29 + $0x2ec] sm:$0xf] %v558_v59  ;;  %v560_v60 = vld [vmem:[%s5383_s28 + $0x5e0] sm:$0xf]  ;;  %v562_v61 = vld [vmem:[%s5383_s28 + $0x5e8] sm:$0xf] }
  0x91   : > { %v564_v62 = vld [vmem:[%s5383_s28 + $0x5f0] sm:$0xf]  ;;  %561 = vst [vmem:[%s5387_s29 + $0x2f0] sm:$0xf] %v560_v60  ;;  %563 = vst [vmem:[%s5387_s29 + $0x2f4] sm:$0xf] %v562_v61 }
  0x92   : > { %565 = vst [vmem:[%s5387_s29 + $0x2f8] sm:$0xf] %v564_v62  ;;  %v566_v63 = vld [vmem:[%s5383_s28 + $0x5f8] sm:$0xf]  ;;  %v568_v0 = vld [vmem:[%s5383_s28 + $0x600] sm:$0xf] }
  0x93   : > { %v570_v1 = vld [vmem:[%s5383_s28 + $0x608] sm:$0xf]  ;;  %567 = vst [vmem:[%s5387_s29 + $0x2fc] sm:$0xf] %v566_v63  ;;  %569 = vst [vmem:[%s5387_s29 + $0x300] sm:$0xf] %v568_v0 }
  0x94   : > { %571 = vst [vmem:[%s5387_s29 + $0x304] sm:$0xf] %v570_v1  ;;  %v572_v2 = vld [vmem:[%s5383_s28 + $0x610] sm:$0xf]  ;;  %v574_v3 = vld [vmem:[%s5383_s28 + $0x618] sm:$0xf] }
  0x95   : > { %v576_v4 = vld [vmem:[%s5383_s28 + $0x620] sm:$0xf]  ;;  %573 = vst [vmem:[%s5387_s29 + $0x308] sm:$0xf] %v572_v2  ;;  %575 = vst [vmem:[%s5387_s29 + $0x30c] sm:$0xf] %v574_v3 }
  0x96   : > { %577 = vst [vmem:[%s5387_s29 + $0x310] sm:$0xf] %v576_v4  ;;  %v578_v5 = vld [vmem:[%s5383_s28 + $0x628] sm:$0xf]  ;;  %v580_v6 = vld [vmem:[%s5383_s28 + $0x630] sm:$0xf] }
  0x97   : > { %v582_v7 = vld [vmem:[%s5383_s28 + $0x638] sm:$0xf]  ;;  %579 = vst [vmem:[%s5387_s29 + $0x314] sm:$0xf] %v578_v5  ;;  %581 = vst [vmem:[%s5387_s29 + $0x318] sm:$0xf] %v580_v6 }
  0x98   : > { %583 = vst [vmem:[%s5387_s29 + $0x31c] sm:$0xf] %v582_v7  ;;  %v584_v8 = vld [vmem:[%s5383_s28 + $0x640] sm:$0xf]  ;;  %v586_v9 = vld [vmem:[%s5383_s28 + $0x648] sm:$0xf] }
  0x99   : > { %v588_v10 = vld [vmem:[%s5383_s28 + $0x650] sm:$0xf]  ;;  %585 = vst [vmem:[%s5387_s29 + $0x320] sm:$0xf] %v584_v8  ;;  %587 = vst [vmem:[%s5387_s29 + $0x324] sm:$0xf] %v586_v9 }
  0x9a   : > { %589 = vst [vmem:[%s5387_s29 + $0x328] sm:$0xf] %v588_v10  ;;  %v590_v11 = vld [vmem:[%s5383_s28 + $0x658] sm:$0xf]  ;;  %v592_v12 = vld [vmem:[%s5383_s28 + $0x660] sm:$0xf] }
  0x9b   : > { %v594_v13 = vld [vmem:[%s5383_s28 + $0x668] sm:$0xf]  ;;  %591 = vst [vmem:[%s5387_s29 + $0x32c] sm:$0xf] %v590_v11  ;;  %593 = vst [vmem:[%s5387_s29 + $0x330] sm:$0xf] %v592_v12 }
  0x9c   : > { %595 = vst [vmem:[%s5387_s29 + $0x334] sm:$0xf] %v594_v13  ;;  %v596_v14 = vld [vmem:[%s5383_s28 + $0x670] sm:$0xf]  ;;  %v598_v15 = vld [vmem:[%s5383_s28 + $0x678] sm:$0xf] }
  0x9d   : > { %v600_v16 = vld [vmem:[%s5383_s28 + $0x680] sm:$0xf]  ;;  %597 = vst [vmem:[%s5387_s29 + $0x338] sm:$0xf] %v596_v14  ;;  %599 = vst [vmem:[%s5387_s29 + $0x33c] sm:$0xf] %v598_v15 }
  0x9e   : > { %601 = vst [vmem:[%s5387_s29 + $0x340] sm:$0xf] %v600_v16  ;;  %v602_v17 = vld [vmem:[%s5383_s28 + $0x688] sm:$0xf]  ;;  %v604_v18 = vld [vmem:[%s5383_s28 + $0x690] sm:$0xf] }
  0x9f   : > { %v606_v19 = vld [vmem:[%s5383_s28 + $0x698] sm:$0xf]  ;;  %603 = vst [vmem:[%s5387_s29 + $0x344] sm:$0xf] %v602_v17  ;;  %605 = vst [vmem:[%s5387_s29 + $0x348] sm:$0xf] %v604_v18 }
  0xa0   : > { %607 = vst [vmem:[%s5387_s29 + $0x34c] sm:$0xf] %v606_v19  ;;  %v608_v20 = vld [vmem:[%s5383_s28 + $0x6a0] sm:$0xf]  ;;  %v610_v21 = vld [vmem:[%s5383_s28 + $0x6a8] sm:$0xf] }
  0xa1   : > { %v612_v22 = vld [vmem:[%s5383_s28 + $0x6b0] sm:$0xf]  ;;  %609 = vst [vmem:[%s5387_s29 + $0x350] sm:$0xf] %v608_v20  ;;  %611 = vst [vmem:[%s5387_s29 + $0x354] sm:$0xf] %v610_v21 }
  0xa2   : > { %613 = vst [vmem:[%s5387_s29 + $0x358] sm:$0xf] %v612_v22  ;;  %v614_v23 = vld [vmem:[%s5383_s28 + $0x6b8] sm:$0xf]  ;;  %v616_v24 = vld [vmem:[%s5383_s28 + $0x6c0] sm:$0xf] }
  0xa3   : > { %v618_v25 = vld [vmem:[%s5383_s28 + $0x6c8] sm:$0xf]  ;;  %615 = vst [vmem:[%s5387_s29 + $0x35c] sm:$0xf] %v614_v23  ;;  %617 = vst [vmem:[%s5387_s29 + $0x360] sm:$0xf] %v616_v24 }
  0xa4   : > { %619 = vst [vmem:[%s5387_s29 + $0x364] sm:$0xf] %v618_v25  ;;  %v620_v26 = vld [vmem:[%s5383_s28 + $0x6d0] sm:$0xf]  ;;  %v622_v27 = vld [vmem:[%s5383_s28 + $0x6d8] sm:$0xf] }
  0xa5   : > { %v624_v28 = vld [vmem:[%s5383_s28 + $0x6e0] sm:$0xf]  ;;  %621 = vst [vmem:[%s5387_s29 + $0x368] sm:$0xf] %v620_v26  ;;  %623 = vst [vmem:[%s5387_s29 + $0x36c] sm:$0xf] %v622_v27 }
  0xa6   : > { %625 = vst [vmem:[%s5387_s29 + $0x370] sm:$0xf] %v624_v28  ;;  %v626_v29 = vld [vmem:[%s5383_s28 + $0x6e8] sm:$0xf]  ;;  %v628_v30 = vld [vmem:[%s5383_s28 + $0x6f0] sm:$0xf] }
  0xa7   : > { %v630_v31 = vld [vmem:[%s5383_s28 + $0x6f8] sm:$0xf]  ;;  %627 = vst [vmem:[%s5387_s29 + $0x374] sm:$0xf] %v626_v29  ;;  %629 = vst [vmem:[%s5387_s29 + $0x378] sm:$0xf] %v628_v30 }
  0xa8   : > { %631 = vst [vmem:[%s5387_s29 + $0x37c] sm:$0xf] %v630_v31  ;;  %v632_v32 = vld [vmem:[%s5383_s28 + $0x700] sm:$0xf]  ;;  %v634_v33 = vld [vmem:[%s5383_s28 + $0x708] sm:$0xf] }
  0xa9   : > { %v636_v34 = vld [vmem:[%s5383_s28 + $0x710] sm:$0xf]  ;;  %633 = vst [vmem:[%s5387_s29 + $0x380] sm:$0xf] %v632_v32  ;;  %635 = vst [vmem:[%s5387_s29 + $0x384] sm:$0xf] %v634_v33 }
  0xaa   : > { %637 = vst [vmem:[%s5387_s29 + $0x388] sm:$0xf] %v636_v34  ;;  %v638_v35 = vld [vmem:[%s5383_s28 + $0x718] sm:$0xf]  ;;  %v640_v36 = vld [vmem:[%s5383_s28 + $0x720] sm:$0xf] }
  0xab   : > { %v642_v37 = vld [vmem:[%s5383_s28 + $0x728] sm:$0xf]  ;;  %639 = vst [vmem:[%s5387_s29 + $0x38c] sm:$0xf] %v638_v35  ;;  %641 = vst [vmem:[%s5387_s29 + $0x390] sm:$0xf] %v640_v36 }
  0xac   : > { %643 = vst [vmem:[%s5387_s29 + $0x394] sm:$0xf] %v642_v37  ;;  %v644_v38 = vld [vmem:[%s5383_s28 + $0x730] sm:$0xf]  ;;  %v646_v39 = vld [vmem:[%s5383_s28 + $0x738] sm:$0xf] }
  0xad   : > { %v648_v40 = vld [vmem:[%s5383_s28 + $0x740] sm:$0xf]  ;;  %645 = vst [vmem:[%s5387_s29 + $0x398] sm:$0xf] %v644_v38  ;;  %647 = vst [vmem:[%s5387_s29 + $0x39c] sm:$0xf] %v646_v39 }
  0xae   : > { %649 = vst [vmem:[%s5387_s29 + $0x3a0] sm:$0xf] %v648_v40  ;;  %v650_v41 = vld [vmem:[%s5383_s28 + $0x748] sm:$0xf]  ;;  %v652_v42 = vld [vmem:[%s5383_s28 + $0x750] sm:$0xf] }
  0xaf   : > { %v654_v43 = vld [vmem:[%s5383_s28 + $0x758] sm:$0xf]  ;;  %651 = vst [vmem:[%s5387_s29 + $0x3a4] sm:$0xf] %v650_v41  ;;  %653 = vst [vmem:[%s5387_s29 + $0x3a8] sm:$0xf] %v652_v42 }
  0xb0   : > { %655 = vst [vmem:[%s5387_s29 + $0x3ac] sm:$0xf] %v654_v43  ;;  %v656_v44 = vld [vmem:[%s5383_s28 + $0x760] sm:$0xf]  ;;  %v658_v45 = vld [vmem:[%s5383_s28 + $0x768] sm:$0xf] }
  0xb1   : > { %v660_v46 = vld [vmem:[%s5383_s28 + $0x770] sm:$0xf]  ;;  %657 = vst [vmem:[%s5387_s29 + $0x3b0] sm:$0xf] %v656_v44  ;;  %659 = vst [vmem:[%s5387_s29 + $0x3b4] sm:$0xf] %v658_v45 }
  0xb2   : > { %661 = vst [vmem:[%s5387_s29 + $0x3b8] sm:$0xf] %v660_v46  ;;  %v662_v47 = vld [vmem:[%s5383_s28 + $0x778] sm:$0xf]  ;;  %v664_v48 = vld [vmem:[%s5383_s28 + $0x780] sm:$0xf] }
  0xb3   : > { %v666_v49 = vld [vmem:[%s5383_s28 + $0x788] sm:$0xf]  ;;  %663 = vst [vmem:[%s5387_s29 + $0x3bc] sm:$0xf] %v662_v47  ;;  %665 = vst [vmem:[%s5387_s29 + $0x3c0] sm:$0xf] %v664_v48 }
  0xb4   : > { %667 = vst [vmem:[%s5387_s29 + $0x3c4] sm:$0xf] %v666_v49  ;;  %v668_v50 = vld [vmem:[%s5383_s28 + $0x790] sm:$0xf]  ;;  %v670_v51 = vld [vmem:[%s5383_s28 + $0x798] sm:$0xf] }
  0xb5   : > { %v672_v52 = vld [vmem:[%s5383_s28 + $0x7a0] sm:$0xf]  ;;  %669 = vst [vmem:[%s5387_s29 + $0x3c8] sm:$0xf] %v668_v50  ;;  %671 = vst [vmem:[%s5387_s29 + $0x3cc] sm:$0xf] %v670_v51 }
  0xb6   : > { %673 = vst [vmem:[%s5387_s29 + $0x3d0] sm:$0xf] %v672_v52  ;;  %v674_v53 = vld [vmem:[%s5383_s28 + $0x7a8] sm:$0xf]  ;;  %v676_v54 = vld [vmem:[%s5383_s28 + $0x7b0] sm:$0xf] }
  0xb7   : > { %v678_v55 = vld [vmem:[%s5383_s28 + $0x7b8] sm:$0xf]  ;;  %675 = vst [vmem:[%s5387_s29 + $0x3d4] sm:$0xf] %v674_v53  ;;  %677 = vst [vmem:[%s5387_s29 + $0x3d8] sm:$0xf] %v676_v54 }
  0xb8   : > { %679 = vst [vmem:[%s5387_s29 + $0x3dc] sm:$0xf] %v678_v55  ;;  %v680_v56 = vld [vmem:[%s5383_s28 + $0x7c0] sm:$0xf]  ;;  %v682_v57 = vld [vmem:[%s5383_s28 + $0x7c8] sm:$0xf] }
  0xb9   : > { %v684_v58 = vld [vmem:[%s5383_s28 + $0x7d0] sm:$0xf]  ;;  %681 = vst [vmem:[%s5387_s29 + $0x3e0] sm:$0xf] %v680_v56  ;;  %683 = vst [vmem:[%s5387_s29 + $0x3e4] sm:$0xf] %v682_v57 }
  0xba   : > { %685 = vst [vmem:[%s5387_s29 + $0x3e8] sm:$0xf] %v684_v58  ;;  %v686_v59 = vld [vmem:[%s5383_s28 + $0x7d8] sm:$0xf]  ;;  %v688_v60 = vld [vmem:[%s5383_s28 + $0x7e0] sm:$0xf] }
  0xbb   : > { %v690_v61 = vld [vmem:[%s5383_s28 + $0x7e8] sm:$0xf]  ;;  %687 = vst [vmem:[%s5387_s29 + $0x3ec] sm:$0xf] %v686_v59  ;;  %689 = vst [vmem:[%s5387_s29 + $0x3f0] sm:$0xf] %v688_v60 }
  0xbc   : > { %691 = vst [vmem:[%s5387_s29 + $0x3f4] sm:$0xf] %v690_v61  ;;  %v692_v62 = vld [vmem:[%s5383_s28 + $0x7f0] sm:$0xf]  ;;  %v694_v63 = vld [vmem:[%s5383_s28 + $0x7f8] sm:$0xf] }
  0xbd   : > { %693 = vst [vmem:[%s5387_s29 + $0x3f8] sm:$0xf] %v692_v62  ;;  %695 = vst [vmem:[%s5387_s29 + $0x3fc] sm:$0xf] %v694_v63 }
  0xbe PF: > { %p4252_p8 = scmp.ge.s32.totalorder %s5313_s16, 1  ;;  %p1230_p9 = scmp.lt.s32.totalorder %s5313_s16, 3 }
  0xc0   : > { %p1231_p10 = pnand %p4252_p8, %p1230_p9 }
  0xc2   : > { %1234 = sbr.rel (%p1231_p10) target bundleno = 708 (0x2c4), region = 65 }
  0xc7   : > { %s1237_s30 = sand.u32 1, %s5297_s12   ;;  %v5905_v0 = vld [vmem:[%s6704_s0] sm:$0xff]  ;;  %v5915_v2 = vld [vmem:[%s6704_s0 + $0x8] sm:$0xff]  ;;  %p1283_p11 = scmp.lt.s32.totalorder %s5305_s14, 1 }
  0xc8   : > { %v5910_v1 = vld [vmem:[%s6704_s0 + $0x40] sm:$0xff]  ;;  %s4253_s10 = sshll.u32 %s1237_s30, 10  ;;  %v5924_v4 = vld [vmem:[%s6704_s0 + $0x48] sm:$0xff]  ;;  %s4254_s27 = sshll.u32 %s1237_s30, 6 }
  0xc9   : > { %v4257_v3 = vcombine.high %v5905_v0, %v5910_v1  ;;  %v4259_v5 = vcombine.high %v5915_v2, %v5924_v4  ;;  %s5928_s19 = scalar_lea.vmem [#allocation2], %s4253_s10  ;;  %v1306_v35 = vld [vmem:[%s6704_s0 + $0x80] sm:$0xff]  ;;  %v1307_v38 = vld [vmem:[%s6704_s0 + $0x88] sm:$0xff]  ;;  %v4256_v42 = vcombine.low %v5905_v0, %v5910_v1  ;;  %v4258_v43 = vcombine.low %v5915_v2, %v5924_v4  ;;  %s6618_s12 = scalar_lea.vmem [#allocation3], %s4254_s27 }
  0xca   : > { %v5147_v6 = vld [vmem:[%s5928_s19 + $0x78] sm:$0xff]   ;;  %v5151_v10 = vld [vmem:[%s5928_s19 + $0x70] sm:$0xff]   ;;  %v5155_v14 = vld [vmem:[%s5928_s19 + $0x68] sm:$0xff]   ;;  %s1284_s30 = scalar_select %p1283_p11, %s5305_s14, 1 }
  0xcb   : > { %3114 = vmatprep.mubr.bf16.mxu0 %v4257_v3  ;;  %v5148_v7 = vld [vmem:[%s5928_s19 + $0xf8] sm:$0xff]   ;;  %3211 = vmatprep.mubr.bf16.mxu1 %v4259_v5  ;;  %v5152_v11 = vld [vmem:[%s5928_s19 + $0xf0] sm:$0xff]   ;;  %v5156_v15 = vld [vmem:[%s5928_s19 + $0xe8] sm:$0xff]   ;;  %s4529_s6 = sshll.u32 (%p5370_p6), %s5305_s14, 2 }
  0xcc   : > { %4595 = vmatprep.subr.bf16.mxu0 %v5147_v6  ;;  %v5149_v8 = vld [vmem:[%s5928_s19 + $0x38] sm:$0xff]   ;;  %4659 = vmatprep.subr.bf16.mxu1 %v5148_v7  ;;  %v5153_v12 = vld [vmem:[%s5928_s19 + $0x30] sm:$0xff]   ;;  %v5157_v16 = vld [vmem:[%s5928_s19 + $0x28] sm:$0xff]   ;;  %s4255_s28 = sshll.u32 %s1284_s30, 3  ;;  %s4022_s9 = scalar_lea.vmem (%p5370_p6), %s6706_s2, %s4529_s6 }
  0xcd   : > { %v5150_v9 = vld [vmem:[%s5928_s19 + $0xb8] sm:$0xff]   ;;  %4596 = vmatpush3.bf16.msra.mxu0 %v5149_v8  ;;  %v5154_v13 = vld [vmem:[%s5928_s19 + $0xb0] sm:$0xff]   ;;  %v5158_v17 = vld [vmem:[%s5928_s19 + $0xa8] sm:$0xff]   ;;  %s1288_s5 = scalar_lea.vmem %s6707_s3, %s4255_s28 }
  0xce   : > { %4660 = vmatpush3.bf16.msra.mxu1 %v5150_v9  ;;  %4597 = vmatprep.subr.bf16.mxu0 %v5151_v10  ;;  %v5159_v18 = vld [vmem:[%s5928_s19 + $0x60] sm:$0xff]   ;;  %v5163_v22 = vld [vmem:[%s5928_s19 + $0x58] sm:$0xff]   ;;  %v5167_v26 = vld [vmem:[%s5928_s19 + $0x50] sm:$0xff]  }
  0xcf   : > { %4661 = vmatprep.subr.bf16.mxu1 %v5152_v11  ;;  %v5160_v19 = vld [vmem:[%s5928_s19 + $0xe0] sm:$0xff]   ;;  %v5164_v23 = vld [vmem:[%s5928_s19 + $0xd8] sm:$0xff]   ;;  %v5168_v27 = vld [vmem:[%s5928_s19 + $0xd0] sm:$0xff]  }
  0xd0   : > { %v5161_v20 = vld [vmem:[%s5928_s19 + $0x20] sm:$0xff]   ;;  %v5165_v24 = vld [vmem:[%s5928_s19 + $0x18] sm:$0xff]   ;;  %v5169_v28 = vld [vmem:[%s5928_s19 + $0x10] sm:$0xff]  }
  0xd1   : > { %4598 = vmatpush3.bf16.msra.mxu0 %v5153_v12  ;;  %v5162_v21 = vld [vmem:[%s5928_s19 + $0xa0] sm:$0xff]   ;;  %v5166_v25 = vld [vmem:[%s5928_s19 + $0x98] sm:$0xff]   ;;  %v5170_v29 = vld [vmem:[%s5928_s19 + $0x90] sm:$0xff]  }
  0xd2   : > { %4662 = vmatpush3.bf16.msra.mxu1 %v5154_v13  ;;  %4599 = vmatprep.subr.bf16.mxu0 %v5155_v14  ;;  %v5171_v30 = vld [vmem:[%s5928_s19 + $0x48] sm:$0xff]   ;;  %v5175_v34 = vld [vmem:[%s5928_s19 + $0x40] sm:$0xff]   ;;  %v5179_v44 = vld [vmem:[%s5928_s19 + $0x178] sm:$0xff]  }
  0xd3   : > { %4663 = vmatprep.subr.bf16.mxu1 %v5156_v15  ;;  %v5172_v31 = vld [vmem:[%s5928_s19 + $0xc8] sm:$0xff]   ;;  %v1314_v36 = vld [vmem:[%s6704_s0 + $0xc0] sm:$0xff]  ;;  %v5180_v45 = vld [vmem:[%s5928_s19 + $0x138] sm:$0xff]  }
  0xd4   : > { %v5173_v32 = vld [vmem:[%s5928_s19 + $0x8] sm:$0xff]   ;;  %v5176_v37 = vld [vmem:[%s5928_s19 + $0xc0] sm:$0xff]   ;;  %v4273_v46 = vcombine.high %v1306_v35, %v1314_v36  ;;  %v5181_v47 = vld [vmem:[%s5928_s19 + $0x1f8] sm:$0xff]   ;;  %v4272_v54 = vcombine.low %v1306_v35, %v1314_v36 }
  0xd5   : > { %4600 = vmatpush3.bf16.msra.mxu0 %v5157_v16  ;;  %v5174_v33 = vld [vmem:[%s5928_s19 + $0x88] sm:$0xff]   ;;  %v5177_v40 = vld [vmem:[%s5928_s19] sm:$0xff]   ;;  %v5182_v49 = vld [vmem:[%s5928_s19 + $0x1b8] sm:$0xff]  }
  0xd6   : > { %4664 = vmatpush3.bf16.msra.mxu1 %v5158_v17  ;;  %4601 = vmatprep.subr.bf16.mxu0 %v5159_v18  ;;  %v1315_v39 = vld [vmem:[%s6704_s0 + $0xc8] sm:$0xff]  ;;  %v5178_v41 = vld [vmem:[%s5928_s19 + $0x80] sm:$0xff]   ;;  %v5183_v50 = vld [vmem:[%s5928_s19 + $0x170] sm:$0xff]  }
  0xd7   : > { %4665 = vmatprep.subr.bf16.mxu1 %v5160_v19  ;;  %v4275_v48 = vcombine.high %v1307_v38, %v1315_v39  ;;  %v1322_v51 = vld [vmem:[%s6704_s0 + $0x100] sm:$0xff]  ;;  %v5184_v52 = vld [vmem:[%s5928_s19 + $0x130] sm:$0xff]   ;;  %v4274_v56 = vcombine.low %v1307_v38, %v1315_v39  ;;  %v1323_v58 = vld [vmem:[%s6704_s0 + $0x108] sm:$0xff] }
  0xd8   : > { %v5185_v53 = vld [vmem:[%s5928_s19 + $0x1f0] sm:$0xff]   ;;  %v1330_v57 = vld [vmem:[%s6704_s0 + $0x140] sm:$0xff]  ;;  %v1331_v59 = vld [vmem:[%s6704_s0 + $0x148] sm:$0xff] }
  0xd9   : > { %4602 = vmatpush3.bf16.msra.mxu0 %v5161_v20  ;;  %v5186_v55 = vld [vmem:[%s5928_s19 + $0x1b0] sm:$0xff]   ;;  %v4289_v60 = vcombine.high %v1322_v51, %v1330_v57  ;;  %v4291_v61 = vcombine.high %v1323_v58, %v1331_v59  ;;  %v5187_v62 = vld [vmem:[%s5928_s19 + $0x168] sm:$0xff]   ;;  %v1338_v2 = vld [vmem:[%s6704_s0 + $0x180] sm:$0xff]  ;;  %v4288_v6 = vcombine.low %v1322_v51, %v1330_v57  ;;  %v4290_v8 = vcombine.low %v1323_v58, %v1331_v59 }
  0xda   : > { %4666 = vmatpush3.bf16.msra.mxu1 %v5162_v21  ;;  %4603 = vmatprep.subr.bf16.mxu0 %v5163_v22  ;;  %v5188_v63 = vld [vmem:[%s5928_s19 + $0x128] sm:$0xff]   ;;  %v1346_v3 = vld [vmem:[%s6704_s0 + $0x1c0] sm:$0xff]  ;;  %v5195_v18 = vld [vmem:[%s5928_s19 + $0x158] sm:$0xff]  }
  0xdb   : > { %4667 = vmatprep.subr.bf16.mxu1 %v5164_v23  ;;  %v5189_v0 = vld [vmem:[%s5928_s19 + $0x1e8] sm:$0xff]   ;;  %v5191_v7 = vld [vmem:[%s5928_s19 + $0x160] sm:$0xff]   ;;  %v4305_v9 = vcombine.high %v1338_v2, %v1346_v3  ;;  %v5196_v19 = vld [vmem:[%s5928_s19 + $0x118] sm:$0xff]   ;;  %v4304_v21 = vcombine.low %v1338_v2, %v1346_v3 }
  0xdc   : > { %v5190_v1 = vld [vmem:[%s5928_s19 + $0x1a8] sm:$0xff]   ;;  %v5192_v10 = vld [vmem:[%s5928_s19 + $0x120] sm:$0xff]   ;;  %v5197_v20 = vld [vmem:[%s5928_s19 + $0x1d8] sm:$0xff]  }
  0xdd   : > { %4604 = vmatpush3.bf16.msra.mxu0 %v5165_v24  ;;  %v1339_v4 = vld [vmem:[%s6704_s0 + $0x188] sm:$0xff]  ;;  %v5193_v12 = vld [vmem:[%s5928_s19 + $0x1e0] sm:$0xff]   ;;  %v5198_v22 = vld [vmem:[%s5928_s19 + $0x198] sm:$0xff]  }
  0xde   : > { %4668 = vmatpush3.bf16.msra.mxu1 %v5166_v25  ;;  %4605 = vmatprep.subr.bf16.mxu0 %v5167_v26  ;;  %v1347_v5 = vld [vmem:[%s6704_s0 + $0x1c8] sm:$0xff]  ;;  %v5194_v13 = vld [vmem:[%s5928_s19 + $0x1a0] sm:$0xff]   ;;  %v5199_v26 = vld [vmem:[%s5928_s19 + $0x150] sm:$0xff]  }
  0xdf   : > { %4669 = vmatprep.subr.bf16.mxu1 %v5168_v27  ;;  %v4307_v11 = vcombine.high %v1339_v4, %v1347_v5  ;;  %v1354_v14 = vld [vmem:[%s6704_s0 + $0x200] sm:$0xff]  ;;  %v1355_v16 = vld [vmem:[%s6704_s0 + $0x208] sm:$0xff]  ;;  %v4306_v23 = vcombine.low %v1339_v4, %v1347_v5  ;;  %v5200_v27 = vld [vmem:[%s5928_s19 + $0x110] sm:$0xff]  }
  0xe0   : > { %v1362_v15 = vld [vmem:[%s6704_s0 + $0x240] sm:$0xff]  ;;  %v1363_v17 = vld [vmem:[%s6704_s0 + $0x248] sm:$0xff]  ;;  %v1293_v2 = vld [vmem:[%s6704_s0 + $0x18] sm:$0xff] }
  0xe1   : > { %4606 = vmatpush3.bf16.msra.mxu0 %v5169_v28  ;;  %v4321_v24 = vcombine.high %v1354_v14, %v1362_v15  ;;  %v4323_v25 = vcombine.high %v1355_v16, %v1363_v17  ;;  %v5201_v28 = vld [vmem:[%s5928_s19 + $0x1d0] sm:$0xff]   ;;  %v5203_v35 = vld [vmem:[%s5928_s19 + $0x148] sm:$0xff]   ;;  %v4322_v36 = vcombine.low %v1355_v16, %v1363_v17  ;;  %v1410_v57 = vld [vmem:[%s6704_s0 + $0x3c0] sm:$0xff] }
  0xe2   : > { %4670 = vmatpush3.bf16.msra.mxu1 %v5170_v29  ;;  %4607 = vmatprep.subr.bf16.mxu0 %v5171_v30  ;;  %v5202_v29 = vld [vmem:[%s5928_s19 + $0x190] sm:$0xff]   ;;  %v1370_v30 = vld [vmem:[%s6704_s0 + $0x280] sm:$0xff]  ;;  %v5204_v38 = vld [vmem:[%s5928_s19 + $0x108] sm:$0xff]  }
  0xe3   : > { %4671 = vmatprep.subr.bf16.mxu1 %v5172_v31  ;;  %v1378_v31 = vld [vmem:[%s6704_s0 + $0x2c0] sm:$0xff]  ;;  %v1403_v58 = vld [vmem:[%s6704_s0 + $0x388] sm:$0xff]  ;;  %v1301_v3 = vld [vmem:[%s6704_s0 + $0x58] sm:$0xff] }
  0xe4   : > { %v1411_v59 = vld [vmem:[%s6704_s0 + $0x3c8] sm:$0xff] }
  0xe5   : > { %4608 = vmatpush3.bf16.msra.mxu0 %v5173_v32  ;;  %v1371_v32 = vld [vmem:[%s6704_s0 + $0x288] sm:$0xff]  ;;  %v4370_v5 = vcombine.low %v1403_v58, %v1411_v59 }
  0xe6   : > { %4672 = vmatpush3.bf16.msra.mxu1 %v5174_v33  ;;  %4609 = vmatprep.subr.bf16.mxu0 %v5175_v34  ;;  %v1379_v33 = vld [vmem:[%s6704_s0 + $0x2c8] sm:$0xff]  ;;  %v4320_v34 = vcombine.low %v1354_v14, %v1362_v15  ;;  %v5212_v14 = vld [vmem:[%s5928_s19 + $0x238] sm:$0xff]  }
  0xe7   : > { %4673 = vmatprep.subr.bf16.mxu1 %v5176_v37  ;;  %v4337_v37 = vcombine.high %v1370_v30, %v1378_v31  ;;  %v4339_v39 = vcombine.high %v1371_v32, %v1379_v33  ;;  %v4338_v51 = vcombine.low %v1371_v32, %v1379_v33  ;;  %v5214_v15 = vld [vmem:[%s5928_s19 + $0x2b8] sm:$0xff]   ;;  %v5222_v33 = vld [vmem:[%s5928_s19 + $0x2a8] sm:$0xff]  }
  0xe9   : > { %4610 = vmatpush3.bf16.msra.mxu0 %v5177_v40  ;;  %v5205_v40 = vld [vmem:[%s5928_s19 + $0x1c8] sm:$0xff]  }
  0xea   : > { %4674 = vmatpush3.bf16.msra.mxu1 %v5178_v41  ;;  %4723 = vmatprep.subr.bf16.mxu0 %v5179_v44  ;;  %v5206_v41 = vld [vmem:[%s5928_s19 + $0x188] sm:$0xff]  }
  0xeb   : > { %4787 = vmatprep.subr.bf16.mxu1 %v5181_v47  ;;  %v1387_v44 = vld [vmem:[%s6704_s0 + $0x308] sm:$0xff]  ;;  %v5208_v47 = vld [vmem:[%s5928_s19 + $0x100] sm:$0xff]  }
  0xec   : > { %3115 = vmatmul.mubr.bf16.vlgmr.msra.gmra.mxu0 %v4256_v42  ;;  %v1386_v42 = vld [vmem:[%s6704_s0 + $0x300] sm:$0xff] }
  0xed   : > { %3212 = vmatmul.mubr.bf16.vlgmr.msra.gmra.mxu1 %v4258_v43  ;;  %4724 = vmatpush3.bf16.msra.mxu0 %v5180_v45  ;;  %v1394_v43 = vld [vmem:[%s6704_s0 + $0x340] sm:$0xff]  ;;  %v1395_v45 = vld [vmem:[%s6704_s0 + $0x348] sm:$0xff] }
  0xee   : > { %3122 = vmatprep.mubr.bf16.mxu0 %v4273_v46  ;;  %4788 = vmatpush3.bf16.msra.mxu1 %v5182_v49  ;;  %v5207_v46 = vld [vmem:[%s5928_s19 + $0x140] sm:$0xff]   ;;  %v4336_v49 = vcombine.low %v1370_v30, %v1378_v31  ;;  %v5220_v31 = vld [vmem:[%s5928_s19 + $0x228] sm:$0xff]  }
  0xef   : > { %3219 = vmatprep.mubr.bf16.mxu1 %v4275_v48  ;;  %4725 = vmatprep.subr.bf16.mxu0 %v5183_v50  ;;  %v5209_v48 = vld [vmem:[%s5928_s19 + $0x1c0] sm:$0xff]  }
  0xf0   : > { %4789 = vmatprep.subr.bf16.mxu1 %v5185_v53  ;;  %v5210_v50 = vld [vmem:[%s5928_s19 + $0x180] sm:$0xff]   ;;  %v4355_v53 = vcombine.high %v1387_v44, %v1395_v45 }
  0xf1   : > { %4726 = vmatpush3.bf16.msra.mxu0 %v5184_v52  ;;  %v4353_v52 = vcombine.high %v1386_v42, %v1394_v43 }
  0xf2   : > { %4790 = vmatpush3.bf16.msra.mxu1 %v5186_v55  ;;  %4727 = vmatprep.subr.bf16.mxu0 %v5187_v62  ;;  %v5213_v55 = vld [vmem:[%s5928_s19 + $0x2f8] sm:$0xff]  }
  0xf3   : > { %4791 = vmatprep.subr.bf16.mxu1 %v5189_v0  ;;  %v1292_v0 = vld [vmem:[%s6704_s0 + $0x10] sm:$0xff] }
  0xf4   : > { %3123 = vmatmul.mubr.bf16.gmra.mxu0 %v4272_v54  ;;  %v5211_v54 = vld [vmem:[%s5928_s19 + $0x278] sm:$0xff]  }
  0xf5   : > { %3220 = vmatmul.mubr.bf16.gmra.mxu1 %v4274_v56  ;;  %3130 = vmatprep.mubr.bf16.mxu0 %v4289_v60  ;;  %v1402_v56 = vld [vmem:[%s6704_s0 + $0x380] sm:$0xff]  ;;  %v4352_v60 = vcombine.low %v1386_v42, %v1394_v43  ;;  %v5227_v42 = vld [vmem:[%s5928_s19 + $0x258] sm:$0xff]  }
  0xf6   : > { %3227 = vmatprep.mubr.bf16.mxu1 %v4291_v61  ;;  %4728 = vmatpush3.bf16.msra.mxu0 %v5188_v63  ;;  %v4354_v61 = vcombine.low %v1387_v44, %v1395_v45  ;;  %v4369_v62 = vcombine.high %v1402_v56, %v1410_v57  ;;  %v4371_v63 = vcombine.high %v1403_v58, %v1411_v59  ;;  %v5229_v44 = vld [vmem:[%s5928_s19 + $0x2d8] sm:$0xff]   ;;  %v5235_v58 = vld [vmem:[%s5928_s19 + $0x248] sm:$0xff]  }
  0xf7   : > { %4792 = vmatpush3.bf16.msra.mxu1 %v5190_v1  ;;  %4729 = vmatprep.subr.bf16.mxu0 %v5191_v7  ;;  %v1300_v1 = vld [vmem:[%s6704_s0 + $0x50] sm:$0xff]  ;;  %v4368_v4 = vcombine.low %v1402_v56, %v1410_v57  ;;  %v4263_v7 = vcombine.high %v1293_v2, %v1301_v3 }
  0xf8   : > { %4793 = vmatprep.subr.bf16.mxu1 %v5193_v12  ;;  %v1317_v12 = vld [vmem:[%s6704_s0 + $0xd8] sm:$0xff]  ;;  %v5232_v56 = vld [vmem:[%s5928_s19 + $0x210] sm:$0xff]  }
  0xf9   : > { %v5234_v57 = vld [vmem:[%s5928_s19 + $0x290] sm:$0xff]  }
  0xfa   : > { %4730 = vmatpush3.bf16.msra.mxu0 %v5192_v10  ;;  %v1309_v10 = vld [vmem:[%s6704_s0 + $0x98] sm:$0xff] }
  0xfb   : > { %4794 = vmatpush3.bf16.msra.mxu1 %v5194_v13  ;;  %4731 = vmatprep.subr.bf16.mxu0 %v5195_v18  ;;  %v4262_v13 = vcombine.low %v1293_v2, %v1301_v3  ;;  %v4279_v17 = vcombine.high %v1309_v10, %v1317_v12  ;;  %v5215_v18 = vld [vmem:[%s5928_s19 + $0x270] sm:$0xff]   ;;  %v5239_v2 = vld [vmem:[%s5928_s19 + $0x240] sm:$0xff]  }
  0xfc   : > { %3131 = vmatmul.mubr.bf16.gmra.mxu0 %v4288_v6  ;;  %4795 = vmatprep.subr.bf16.mxu1 %v5197_v20  ;;  %v4261_v6 = vcombine.high %v1292_v0, %v1300_v1  ;;  %v5217_v20 = vld [vmem:[%s5928_s19 + $0x2f0] sm:$0xff]  }
  0xfd   : > { %3228 = vmatmul.mubr.bf16.gmra.mxu1 %v4290_v8  ;;  %3138 = vmatprep.mubr.bf16.mxu0 %v4305_v9  ;;  %v1308_v8 = vld [vmem:[%s6704_s0 + $0x90] sm:$0xff] }
  0xfe   : > { %3235 = vmatprep.mubr.bf16.mxu1 %v4307_v11  ;;  %4732 = vmatpush3.bf16.msra.mxu0 %v5196_v19  ;;  %v1316_v9 = vld [vmem:[%s6704_s0 + $0xd0] sm:$0xff]  ;;  %v4260_v11 = vcombine.low %v1292_v0, %v1300_v1  ;;  %v5238_v1 = vld [vmem:[%s5928_s19 + $0x288] sm:$0xff]  }
  0xff   : > { %4796 = vmatpush3.bf16.msra.mxu1 %v5198_v22  ;;  %4733 = vmatprep.subr.bf16.mxu0 %v5199_v26  ;;  %v4277_v16 = vcombine.high %v1308_v8, %v1316_v9  ;;  %v5216_v19 = vld [vmem:[%s5928_s19 + $0x230] sm:$0xff]   ;;  %v5219_v26 = vld [vmem:[%s5928_s19 + $0x268] sm:$0xff]  }
 0x100   : > { %4797 = vmatprep.subr.bf16.mxu1 %v5201_v28  ;;  %v1324_v22 = vld [vmem:[%s6704_s0 + $0x110] sm:$0xff]  ;;  %v4276_v28 = vcombine.low %v1308_v8, %v1316_v9  ;;  %v5240_v8 = vld [vmem:[%s5928_s19 + $0x200] sm:$0xff]  }
 0x101   : > { %v1372_v3 = vld [vmem:[%s6704_s0 + $0x290] sm:$0xff]  ;;  %v5242_v9 = vld [vmem:[%s5928_s19 + $0x280] sm:$0xff]  }
 0x102   : > { %4734 = vmatpush3.bf16.msra.mxu0 %v5200_v27  ;;  %v5221_v27 = vld [vmem:[%s5928_s19 + $0x2e8] sm:$0xff]  }
 0x103   : > { %4798 = vmatpush3.bf16.msra.mxu1 %v5202_v29  ;;  %4735 = vmatprep.subr.bf16.mxu0 %v5203_v35  ;;  %v4278_v29 = vcombine.low %v1309_v10, %v1317_v12  ;;  %v1340_v35 = vld [vmem:[%s6704_s0 + $0x190] sm:$0xff]  ;;  %v5243_v10 = vld [vmem:[%s5928_s19 + $0x378] sm:$0xff]  }
 0x104   : > { %3139 = vmatmul.mubr.bf16.gmra.mxu0 %v4304_v21  ;;  %4799 = vmatprep.subr.bf16.mxu1 %v5205_v40  ;;  %v5218_v21 = vld [vmem:[%s5928_s19 + $0x2b0] sm:$0xff]   ;;  %v5224_v40 = vld [vmem:[%s5928_s19 + $0x220] sm:$0xff]   ;;  %v5245_v12 = vld [vmem:[%s5928_s19 + $0x3f8] sm:$0xff]  }
 0x105   : > { %3236 = vmatmul.mubr.bf16.gmra.mxu1 %v4306_v23  ;;  %3146 = vmatprep.mubr.bf16.mxu0 %v4321_v24  ;;  %v1332_v23 = vld [vmem:[%s6704_s0 + $0x150] sm:$0xff]  ;;  %v1325_v24 = vld [vmem:[%s6704_s0 + $0x118] sm:$0xff] }
 0x106   : > { %3243 = vmatprep.mubr.bf16.mxu1 %v4323_v25  ;;  %4736 = vmatpush3.bf16.msra.mxu0 %v5204_v38  ;;  %v1333_v25 = vld [vmem:[%s6704_s0 + $0x158] sm:$0xff]  ;;  %v4293_v30 = vcombine.high %v1324_v22, %v1332_v23  ;;  %v4292_v43 = vcombine.low %v1324_v22, %v1332_v23 }
 0x107   : > { %4800 = vmatpush3.bf16.msra.mxu1 %v5206_v41  ;;  %4737 = vmatprep.subr.bf16.mxu0 %v5207_v46  ;;  %v4295_v32 = vcombine.high %v1325_v24, %v1333_v25  ;;  %v1341_v38 = vld [vmem:[%s6704_s0 + $0x198] sm:$0xff]  ;;  %v5226_v41 = vld [vmem:[%s5928_s19 + $0x2a0] sm:$0xff]   ;;  %v4294_v45 = vcombine.low %v1325_v24, %v1333_v25  ;;  %v1404_v24 = vld [vmem:[%s6704_s0 + $0x390] sm:$0xff] }
 0x108   : > { %4801 = vmatprep.subr.bf16.mxu1 %v5209_v48  ;;  %v5228_v48 = vld [vmem:[%s5928_s19 + $0x218] sm:$0xff]   ;;  %v1412_v25 = vld [vmem:[%s6704_s0 + $0x3d0] sm:$0xff] }
 0x10a   : > { %4738 = vmatpush3.bf16.msra.mxu0 %v5208_v47 }
 0x10b   : > { %4802 = vmatpush3.bf16.msra.mxu1 %v5210_v50  ;;  %4851 = vmatprep.subr.bf16.mxu0 %v5211_v54  ;;  %v5231_v50 = vld [vmem:[%s5928_s19 + $0x250] sm:$0xff]   ;;  %v1357_v54 = vld [vmem:[%s6704_s0 + $0x218] sm:$0xff] }
 0x10c   : > { %3147 = vmatmul.mubr.bf16.gmra.mxu0 %v4320_v34  ;;  %4915 = vmatprep.subr.bf16.mxu1 %v5213_v55  ;;  %v5223_v34 = vld [vmem:[%s5928_s19 + $0x260] sm:$0xff]   ;;  %v1365_v55 = vld [vmem:[%s6704_s0 + $0x258] sm:$0xff] }
 0x10d   : > { %3244 = vmatmul.mubr.bf16.gmra.mxu1 %v4322_v36  ;;  %3154 = vmatprep.mubr.bf16.mxu0 %v4337_v37  ;;  %v1348_v36 = vld [vmem:[%s6704_s0 + $0x1d0] sm:$0xff]  ;;  %v5225_v37 = vld [vmem:[%s5928_s19 + $0x2e0] sm:$0xff]   ;;  %v4327_v0 = vcombine.high %v1357_v54, %v1365_v55 }
 0x10e   : > { %3251 = vmatprep.mubr.bf16.mxu1 %v4339_v39  ;;  %v1349_v39 = vld [vmem:[%s6704_s0 + $0x1d8] sm:$0xff]  ;;  %v4309_v46 = vcombine.high %v1340_v35, %v1348_v36  ;;  %v4308_v59 = vcombine.low %v1340_v35, %v1348_v36  ;;  %v1303_v35 = vld [vmem:[%s6704_s0 + $0x68] sm:$0xff]  ;;  %v4372_v36 = vcombine.low %v1404_v24, %v1412_v25 }
 0x10f   : > { %v4311_v47 = vcombine.high %v1341_v38, %v1349_v39 }
 0x114   : > { %3155 = vmatmul.mubr.bf16.gmra.mxu0 %v4336_v49  ;;  %v5230_v49 = vld [vmem:[%s5928_s19 + $0x298] sm:$0xff]  }
 0x115   : > { %3252 = vmatmul.mubr.bf16.gmra.mxu1 %v4338_v51  ;;  %3162 = vmatprep.mubr.bf16.mxu0 %v4353_v52  ;;  %v1356_v51 = vld [vmem:[%s6704_s0 + $0x210] sm:$0xff] }
 0x116   : > { %3259 = vmatprep.mubr.bf16.mxu1 %v4355_v53  ;;  %v1364_v52 = vld [vmem:[%s6704_s0 + $0x250] sm:$0xff] }
 0x117   : > { %v5233_v53 = vld [vmem:[%s5928_s19 + $0x2d0] sm:$0xff]  }
 0x11c   : > { %3163 = vmatmul.mubr.bf16.gmra.mxu0 %v4352_v60  ;;  %v5237_v60 = vld [vmem:[%s5928_s19 + $0x2c8] sm:$0xff]  }
 0x11d   : > { %3260 = vmatmul.mubr.bf16.gmra.mxu1 %v4354_v61  ;;  %3170 = vmatprep.mubr.bf16.mxu0 %v4369_v62  ;;  %v4310_v61 = vcombine.low %v1341_v38, %v1349_v39  ;;  %v4325_v62 = vcombine.high %v1356_v51, %v1364_v52 }
 0x11e   : > { %3267 = vmatprep.mubr.bf16.mxu1 %v4371_v63  ;;  %v5236_v63 = vld [vmem:[%s5928_s19 + $0x208] sm:$0xff]  }
 0x124   : > { %3171 = vmatmul.mubr.bf16.gmra.mxu0 %v4368_v4  ;;  %v1380_v4 = vld [vmem:[%s6704_s0 + $0x2d0] sm:$0xff] }
 0x125   : > { %3268 = vmatmul.mubr.bf16.gmra.mxu1 %v4370_v5  ;;  %3308 = vmatprep.mubr.bf16.mxu0 %v4261_v6  ;;  %v5241_v5 = vld [vmem:[%s5928_s19 + $0x2c0] sm:$0xff]   ;;  %v1373_v6 = vld [vmem:[%s6704_s0 + $0x298] sm:$0xff] }
 0x126   : > { %3405 = vmatprep.mubr.bf16.mxu1 %v4263_v7  ;;  %v1381_v7 = vld [vmem:[%s6704_s0 + $0x2d8] sm:$0xff] }
 0x12c   : > { %3309 = vmatmul.mubr.bf16.vlgmr.msra.gmra.mxu0 %v4260_v11  ;;  %v4324_v11 = vcombine.low %v1356_v51, %v1364_v52  ;;  %v5249_v51 = vld [vmem:[%s5928_s19 + $0x3f0] sm:$0xff]  }
 0x12d   : > { %3406 = vmatmul.mubr.bf16.vlgmr.msra.gmra.mxu1 %v4262_v13  ;;  %4852 = vmatpush3.bf16.msra.mxu0 %v5212_v14  ;;  %v4326_v13 = vcombine.low %v1357_v54, %v1365_v55  ;;  %v4341_v14 = vcombine.high %v1372_v3, %v1380_v4  ;;  %v5248_v52 = vld [vmem:[%s5928_s19 + $0x330] sm:$0xff]   ;;  %v1326_v54 = vld [vmem:[%s6704_s0 + $0x120] sm:$0xff] }
 0x12e   : > { %4916 = vmatpush3.bf16.msra.mxu1 %v5214_v15  ;;  %3316 = vmatprep.mubr.bf16.mxu0 %v4277_v16  ;;  %v4343_v15 = vcombine.high %v1373_v6, %v1381_v7  ;;  %v1388_v16 = vld [vmem:[%s6704_s0 + $0x310] sm:$0xff]  ;;  %v1334_v55 = vld [vmem:[%s6704_s0 + $0x160] sm:$0xff] }
 0x12f   : > { %3413 = vmatprep.mubr.bf16.mxu1 %v4279_v17  ;;  %4853 = vmatprep.subr.bf16.mxu0 %v5215_v18  ;;  %v1396_v17 = vld [vmem:[%s6704_s0 + $0x350] sm:$0xff]  ;;  %v1389_v18 = vld [vmem:[%s6704_s0 + $0x318] sm:$0xff] }
 0x130   : > { %4917 = vmatprep.subr.bf16.mxu1 %v5217_v20  ;;  %v4340_v20 = vcombine.low %v1372_v3, %v1380_v4  ;;  %v4357_v22 = vcombine.high %v1388_v16, %v1396_v17  ;;  %v5257_v3 = vld [vmem:[%s5928_s19 + $0x3e0] sm:$0xff]  }
 0x131   : > { %4854 = vmatpush3.bf16.msra.mxu0 %v5216_v19  ;;  %v1397_v19 = vld [vmem:[%s6704_s0 + $0x358] sm:$0xff]  ;;  %v1342_v4 = vld [vmem:[%s6704_s0 + $0x1a0] sm:$0xff] }
 0x132   : > { %4918 = vmatpush3.bf16.msra.mxu1 %v5218_v21  ;;  %4855 = vmatprep.subr.bf16.mxu0 %v5219_v26  ;;  %v4342_v21 = vcombine.low %v1373_v6, %v1381_v7  ;;  %v4359_v23 = vcombine.high %v1389_v18, %v1397_v19  ;;  %v1405_v26 = vld [vmem:[%s6704_s0 + $0x398] sm:$0xff]  ;;  %v1343_v6 = vld [vmem:[%s6704_s0 + $0x1a8] sm:$0xff]  ;;  %v5256_v7 = vld [vmem:[%s5928_s19 + $0x320] sm:$0xff]  }
 0x133   : > { %4919 = vmatprep.subr.bf16.mxu1 %v5221_v27  ;;  %v1413_v27 = vld [vmem:[%s6704_s0 + $0x3d8] sm:$0xff] }
 0x134   : > { %3317 = vmatmul.mubr.bf16.gmra.mxu0 %v4276_v28  ;;  %v4356_v28 = vcombine.low %v1388_v16, %v1396_v17  ;;  %v5260_v16 = vld [vmem:[%s5928_s19 + $0x318] sm:$0xff]  }
 0x135   : > { %3414 = vmatmul.mubr.bf16.gmra.mxu1 %v4278_v29  ;;  %3324 = vmatprep.mubr.bf16.mxu0 %v4293_v30  ;;  %v4358_v29 = vcombine.low %v1389_v18, %v1397_v19  ;;  %v4373_v30 = vcombine.high %v1404_v24, %v1412_v25  ;;  %v5262_v17 = vld [vmem:[%s5928_s19 + $0x398] sm:$0xff]   ;;  %v5263_v18 = vld [vmem:[%s5928_s19 + $0x350] sm:$0xff]   ;;  %v1367_v24 = vld [vmem:[%s6704_s0 + $0x268] sm:$0xff] }
 0x136   : > { %3421 = vmatprep.mubr.bf16.mxu1 %v4295_v32  ;;  %4856 = vmatpush3.bf16.msra.mxu0 %v5220_v31  ;;  %v4375_v31 = vcombine.high %v1405_v26, %v1413_v27  ;;  %v1294_v32 = vld [vmem:[%s6704_s0 + $0x20] sm:$0xff]  ;;  %v5265_v19 = vld [vmem:[%s5928_s19 + $0x3d0] sm:$0xff]  }
 0x137   : > { %4920 = vmatpush3.bf16.msra.mxu1 %v5222_v33  ;;  %4857 = vmatprep.subr.bf16.mxu0 %v5223_v34  ;;  %v1302_v33 = vld [vmem:[%s6704_s0 + $0x60] sm:$0xff]  ;;  %v1295_v34 = vld [vmem:[%s6704_s0 + $0x28] sm:$0xff]  ;;  %v5266_v25 = vld [vmem:[%s5928_s19 + $0x390] sm:$0xff]  }
 0x138   : > { %4921 = vmatprep.subr.bf16.mxu1 %v5225_v37  ;;  %v4374_v37 = vcombine.low %v1405_v26, %v1413_v27  ;;  %v4265_v38 = vcombine.high %v1294_v32, %v1302_v33  ;;  %v4267_v39 = vcombine.high %v1295_v34, %v1303_v35  ;;  %v5267_v26 = vld [vmem:[%s5928_s19 + $0x348] sm:$0xff]  }
 0x13a   : > { %4858 = vmatpush3.bf16.msra.mxu0 %v5224_v40  ;;  %v1310_v40 = vld [vmem:[%s6704_s0 + $0xa0] sm:$0xff] }
 0x13b   : > { %4922 = vmatpush3.bf16.msra.mxu1 %v5226_v41  ;;  %4859 = vmatprep.subr.bf16.mxu0 %v5227_v42  ;;  %v1318_v41 = vld [vmem:[%s6704_s0 + $0xe0] sm:$0xff]  ;;  %v4264_v42 = vcombine.low %v1294_v32, %v1302_v33  ;;  %v5268_v32 = vld [vmem:[%s5928_s19 + $0x308] sm:$0xff]  }
 0x13c   : > { %3325 = vmatmul.mubr.bf16.gmra.mxu0 %v4292_v43  ;;  %4923 = vmatprep.subr.bf16.mxu1 %v5229_v44  ;;  %v1311_v43 = vld [vmem:[%s6704_s0 + $0xa8] sm:$0xff] }
 0x13d   : > { %3422 = vmatmul.mubr.bf16.gmra.mxu1 %v4294_v45  ;;  %3332 = vmatprep.mubr.bf16.mxu0 %v4309_v46  ;;  %v1319_v44 = vld [vmem:[%s6704_s0 + $0xe8] sm:$0xff]  ;;  %v4266_v45 = vcombine.low %v1295_v34, %v1303_v35  ;;  %v5244_v46 = vld [vmem:[%s5928_s19 + $0x338] sm:$0xff]   ;;  %v5271_v34 = vld [vmem:[%s5928_s19 + $0x340] sm:$0xff]  }
 0x13e   : > { %3429 = vmatprep.mubr.bf16.mxu1 %v4311_v47  ;;  %4860 = vmatpush3.bf16.msra.mxu0 %v5228_v48  ;;  %v5246_v47 = vld [vmem:[%s5928_s19 + $0x3b8] sm:$0xff]   ;;  %v4281_v48 = vcombine.high %v1310_v40, %v1318_v41  ;;  %v5270_v33 = vld [vmem:[%s5928_s19 + $0x388] sm:$0xff]   ;;  %v5273_v35 = vld [vmem:[%s5928_s19 + $0x3c0] sm:$0xff]  }
 0x13f   : > { %4924 = vmatpush3.bf16.msra.mxu1 %v5230_v49  ;;  %4861 = vmatprep.subr.bf16.mxu0 %v5231_v50  ;;  %v4283_v49 = vcombine.high %v1311_v43, %v1319_v44  ;;  %v5247_v50 = vld [vmem:[%s5928_s19 + $0x370] sm:$0xff]  }
 0x140   : > { %4925 = vmatprep.subr.bf16.mxu1 %v5233_v53  ;;  %v5250_v53 = vld [vmem:[%s5928_s19 + $0x3b0] sm:$0xff]  }
 0x142   : > { %4862 = vmatpush3.bf16.msra.mxu0 %v5232_v56  ;;  %v5251_v56 = vld [vmem:[%s5928_s19 + $0x368] sm:$0xff]  }
 0x143   : > { %4926 = vmatpush3.bf16.msra.mxu1 %v5234_v57  ;;  %4863 = vmatprep.subr.bf16.mxu0 %v5235_v58  ;;  %v1327_v57 = vld [vmem:[%s6704_s0 + $0x128] sm:$0xff] }
 0x144   : > { %3333 = vmatmul.mubr.bf16.gmra.mxu0 %v4308_v59  ;;  %4927 = vmatprep.subr.bf16.mxu1 %v5237_v60  ;;  %v1335_v58 = vld [vmem:[%s6704_s0 + $0x168] sm:$0xff]  ;;  %v4280_v60 = vcombine.low %v1310_v40, %v1318_v41  ;;  %v5274_v41 = vld [vmem:[%s5928_s19 + $0x380] sm:$0xff]  }
 0x145   : > { %3430 = vmatmul.mubr.bf16.gmra.mxu1 %v4310_v61  ;;  %3340 = vmatprep.mubr.bf16.mxu0 %v4325_v62  ;;  %v5253_v59 = vld [vmem:[%s5928_s19 + $0x3e8] sm:$0xff]   ;;  %v4282_v61 = vcombine.low %v1311_v43, %v1319_v44  ;;  %v4297_v62 = vcombine.high %v1326_v54, %v1334_v55 }
 0x146   : > { %3437 = vmatprep.mubr.bf16.mxu1 %v4327_v0  ;;  %4864 = vmatpush3.bf16.msra.mxu0 %v5236_v63  ;;  %v4299_v63 = vcombine.high %v1327_v57, %v1335_v58  ;;  %v5252_v0 = vld [vmem:[%s5928_s19 + $0x328] sm:$0xff]  }
 0x147   : > { %4928 = vmatpush3.bf16.msra.mxu1 %v5238_v1  ;;  %4865 = vmatprep.subr.bf16.mxu0 %v5239_v2  ;;  %v5254_v1 = vld [vmem:[%s5928_s19 + $0x3a8] sm:$0xff]   ;;  %v5255_v2 = vld [vmem:[%s5928_s19 + $0x360] sm:$0xff]  }
 0x148   : > { %4929 = vmatprep.subr.bf16.mxu1 %v5241_v5  ;;  %v1350_v5 = vld [vmem:[%s6704_s0 + $0x1e0] sm:$0xff]  ;;  %v1383_v40 = vld [vmem:[%s6704_s0 + $0x2e8] sm:$0xff] }
 0x149   : > { %v4312_v27 = vcombine.low %v1342_v4, %v1350_v5 }
 0x14a   : > { %4866 = vmatpush3.bf16.msra.mxu0 %v5240_v8  ;;  %v1351_v8 = vld [vmem:[%s6704_s0 + $0x1e8] sm:$0xff] }
 0x14b   : > { %4930 = vmatpush3.bf16.msra.mxu1 %v5242_v9  ;;  %4979 = vmatprep.subr.bf16.mxu0 %v5243_v10  ;;  %v5258_v9 = vld [vmem:[%s5928_s19 + $0x3a0] sm:$0xff]   ;;  %v5259_v10 = vld [vmem:[%s5928_s19 + $0x358] sm:$0xff]  }
 0x14c   : > { %3341 = vmatmul.mubr.bf16.gmra.mxu0 %v4324_v11  ;;  %5043 = vmatprep.subr.bf16.mxu1 %v5245_v12  ;;  %v4296_v11 = vcombine.low %v1326_v54, %v1334_v55  ;;  %v5261_v12 = vld [vmem:[%s5928_s19 + $0x3d8] sm:$0xff]   ;;  %v1406_v54 = vld [vmem:[%s6704_s0 + $0x3a0] sm:$0xff] }
 0x14d   : > { %3438 = vmatmul.mubr.bf16.gmra.mxu1 %v4326_v13  ;;  %3348 = vmatprep.mubr.bf16.mxu0 %v4341_v14  ;;  %v4298_v13 = vcombine.low %v1327_v57, %v1335_v58  ;;  %v4313_v14 = vcombine.high %v1342_v4, %v1350_v5  ;;  %v1414_v55 = vld [vmem:[%s6704_s0 + $0x3e0] sm:$0xff]  ;;  %v1415_v57 = vld [vmem:[%s6704_s0 + $0x3e8] sm:$0xff] }
 0x14e   : > { %3445 = vmatprep.mubr.bf16.mxu1 %v4343_v15  ;;  %v4315_v15 = vcombine.high %v1343_v6, %v1351_v8 }
 0x154   : > { %3349 = vmatmul.mubr.bf16.gmra.mxu0 %v4340_v20  ;;  %v1358_v20 = vld [vmem:[%s6704_s0 + $0x220] sm:$0xff] }
 0x155   : > { %3446 = vmatmul.mubr.bf16.gmra.mxu1 %v4342_v21  ;;  %3356 = vmatprep.mubr.bf16.mxu0 %v4357_v22  ;;  %v1366_v21 = vld [vmem:[%s6704_s0 + $0x260] sm:$0xff]  ;;  %v1359_v22 = vld [vmem:[%s6704_s0 + $0x228] sm:$0xff] }
 0x156   : > { %3453 = vmatprep.mubr.bf16.mxu1 %v4359_v23  ;;  %v5264_v23 = vld [vmem:[%s5928_s19 + $0x310] sm:$0xff]   ;;  %v4330_v43 = vcombine.low %v1359_v22, %v1367_v24 }
 0x15c   : > { %3357 = vmatmul.mubr.bf16.gmra.mxu0 %v4356_v28  ;;  %v5269_v28 = vld [vmem:[%s5928_s19 + $0x3c8] sm:$0xff]  }
 0x15d   : > { %3454 = vmatmul.mubr.bf16.gmra.mxu1 %v4358_v29  ;;  %3364 = vmatprep.mubr.bf16.mxu0 %v4373_v30  ;;  %v4314_v29 = vcombine.low %v1343_v6, %v1351_v8  ;;  %v4329_v30 = vcombine.high %v1358_v20, %v1366_v21  ;;  %v1312_v6 = vld [vmem:[%s6704_s0 + $0xb0] sm:$0xff]  ;;  %v1313_v8 = vld [vmem:[%s6704_s0 + $0xb8] sm:$0xff] }
 0x15e   : > { %3461 = vmatprep.mubr.bf16.mxu1 %v4375_v31  ;;  %v4331_v31 = vcombine.high %v1359_v22, %v1367_v24  ;;  %v1337_v22 = vld [vmem:[%s6704_s0 + $0x178] sm:$0xff] }
 0x164   : > { %3365 = vmatmul.mubr.bf16.gmra.mxu0 %v4372_v36  ;;  %v1374_v36 = vld [vmem:[%s6704_s0 + $0x2a0] sm:$0xff] }
 0x165   : > { %3462 = vmatmul.mubr.bf16.gmra.mxu1 %v4374_v37  ;;  %3502 = vmatprep.mubr.bf16.mxu0 %v4265_v38  ;;  %v1382_v37 = vld [vmem:[%s6704_s0 + $0x2e0] sm:$0xff] }
 0x166   : > { %3599 = vmatprep.mubr.bf16.mxu1 %v4267_v39  ;;  %v5272_v38 = vld [vmem:[%s5928_s19 + $0x300] sm:$0xff]   ;;  %v1375_v39 = vld [vmem:[%s6704_s0 + $0x2a8] sm:$0xff]  ;;  %v4345_v44 = vcombine.high %v1374_v36, %v1382_v37 }
 0x16c   : > { %3503 = vmatmul.mubr.bf16.vlgmr.msra.gmra.mxu0 %v4264_v42  ;;  %v4328_v42 = vcombine.low %v1358_v20, %v1366_v21  ;;  %v1329_v21 = vld [vmem:[%s6704_s0 + $0x138] sm:$0xff] }
 0x16d   : > { %3600 = vmatmul.mubr.bf16.vlgmr.msra.gmra.mxu1 %v4266_v45  ;;  %4980 = vmatpush3.bf16.msra.mxu0 %v5244_v46  ;;  %v4347_v45 = vcombine.high %v1375_v39, %v1383_v40  ;;  %v1390_v46 = vld [vmem:[%s6704_s0 + $0x320] sm:$0xff] }
 0x16e   : > { %5044 = vmatpush3.bf16.msra.mxu1 %v5246_v47  ;;  %3510 = vmatprep.mubr.bf16.mxu0 %v4281_v48  ;;  %v1398_v47 = vld [vmem:[%s6704_s0 + $0x360] sm:$0xff]  ;;  %v1391_v48 = vld [vmem:[%s6704_s0 + $0x328] sm:$0xff] }
 0x16f   : > { %3607 = vmatprep.mubr.bf16.mxu1 %v4283_v49  ;;  %4981 = vmatprep.subr.bf16.mxu0 %v5247_v50  ;;  %v1399_v49 = vld [vmem:[%s6704_s0 + $0x368] sm:$0xff]  ;;  %v4344_v50 = vcombine.low %v1374_v36, %v1382_v37  ;;  %v4360_v58 = vcombine.low %v1390_v46, %v1398_v47 }
 0x170   : > { %5045 = vmatprep.subr.bf16.mxu1 %v5249_v51  ;;  %v4346_v51 = vcombine.low %v1375_v39, %v1383_v40  ;;  %v1344_v39 = vld [vmem:[%s6704_s0 + $0x1b0] sm:$0xff] }
 0x171   : > { %4982 = vmatpush3.bf16.msra.mxu0 %v5248_v52  ;;  %v4361_v52 = vcombine.high %v1390_v46, %v1398_v47  ;;  %v1352_v40 = vld [vmem:[%s6704_s0 + $0x1f0] sm:$0xff] }
 0x172   : > { %5046 = vmatpush3.bf16.msra.mxu1 %v5250_v53  ;;  %4983 = vmatprep.subr.bf16.mxu0 %v5251_v56  ;;  %v4363_v53 = vcombine.high %v1391_v48, %v1399_v49  ;;  %v1407_v56 = vld [vmem:[%s6704_s0 + $0x3a8] sm:$0xff] }
 0x173   : > { %5047 = vmatprep.subr.bf16.mxu1 %v5253_v59  ;;  %v4362_v59 = vcombine.low %v1391_v48, %v1399_v49  ;;  %v4302_v49 = vcombine.low %v1329_v21, %v1337_v22 }
 0x174   : > { %3511 = vmatmul.mubr.bf16.gmra.mxu0 %v4280_v60  ;;  %v4377_v60 = vcombine.high %v1406_v54, %v1414_v55 }
 0x175   : > { %3608 = vmatmul.mubr.bf16.gmra.mxu1 %v4282_v61  ;;  %3518 = vmatprep.mubr.bf16.mxu0 %v4297_v62  ;;  %v4379_v61 = vcombine.high %v1407_v56, %v1415_v57  ;;  %v1296_v62 = vld [vmem:[%s6704_s0 + $0x30] sm:$0xff] }
 0x176   : > { %3615 = vmatprep.mubr.bf16.mxu1 %v4299_v63  ;;  %4984 = vmatpush3.bf16.msra.mxu0 %v5252_v0  ;;  %v1304_v63 = vld [vmem:[%s6704_s0 + $0x70] sm:$0xff]  ;;  %v1297_v0 = vld [vmem:[%s6704_s0 + $0x38] sm:$0xff] }
 0x177   : > { %5048 = vmatpush3.bf16.msra.mxu1 %v5254_v1  ;;  %4985 = vmatprep.subr.bf16.mxu0 %v5255_v2  ;;  %v1305_v1 = vld [vmem:[%s6704_s0 + $0x78] sm:$0xff]  ;;  %v4376_v2 = vcombine.low %v1406_v54, %v1414_v55  ;;  %v4269_v4 = vcombine.high %v1296_v62, %v1304_v63 }
 0x178   : > { %5049 = vmatprep.subr.bf16.mxu1 %v5257_v3  ;;  %v4378_v3 = vcombine.low %v1407_v56, %v1415_v57  ;;  %v4271_v5 = vcombine.high %v1297_v0, %v1305_v1 }
 0x17a   : > { %4986 = vmatpush3.bf16.msra.mxu0 %v5256_v7  ;;  %v1320_v7 = vld [vmem:[%s6704_s0 + $0xf0] sm:$0xff] }
 0x17b   : > { %5050 = vmatpush3.bf16.msra.mxu1 %v5258_v9  ;;  %4987 = vmatprep.subr.bf16.mxu0 %v5259_v10  ;;  %v1321_v9 = vld [vmem:[%s6704_s0 + $0xf8] sm:$0xff]  ;;  %v4268_v10 = vcombine.low %v1296_v62, %v1304_v63  ;;  %v1368_v62 = vld [vmem:[%s6704_s0 + $0x270] sm:$0xff] }
 0x17c   : > { %3519 = vmatmul.mubr.bf16.gmra.mxu0 %v4296_v11  ;;  %5051 = vmatprep.subr.bf16.mxu1 %v5261_v12  ;;  %v4270_v11 = vcombine.low %v1297_v0, %v1305_v1  ;;  %v4285_v12 = vcombine.high %v1312_v6, %v1320_v7  ;;  %v1361_v1 = vld [vmem:[%s6704_s0 + $0x238] sm:$0xff] }
 0x17d   : > { %3616 = vmatmul.mubr.bf16.gmra.mxu1 %v4298_v13  ;;  %3526 = vmatprep.mubr.bf16.mxu0 %v4313_v14  ;;  %v4287_v13 = vcombine.high %v1313_v8, %v1321_v9 }
 0x17e   : > { %3623 = vmatprep.mubr.bf16.mxu1 %v4315_v15  ;;  %4988 = vmatpush3.bf16.msra.mxu0 %v5260_v16 }
 0x17f   : > { %5052 = vmatpush3.bf16.msra.mxu1 %v5262_v17  ;;  %4989 = vmatprep.subr.bf16.mxu0 %v5263_v18  ;;  %v1328_v17 = vld [vmem:[%s6704_s0 + $0x130] sm:$0xff] }
 0x180   : > { %5053 = vmatprep.subr.bf16.mxu1 %v5265_v19  ;;  %v1336_v18 = vld [vmem:[%s6704_s0 + $0x170] sm:$0xff] }
 0x181   : > { %v4300_v47 = vcombine.low %v1328_v17, %v1336_v18 }
 0x182   : > { %4990 = vmatpush3.bf16.msra.mxu0 %v5264_v23 }
 0x183   : > { %5054 = vmatpush3.bf16.msra.mxu1 %v5266_v25  ;;  %4991 = vmatprep.subr.bf16.mxu0 %v5267_v26  ;;  %v4284_v25 = vcombine.low %v1312_v6, %v1320_v7 }
 0x184   : > { %3527 = vmatmul.mubr.bf16.gmra.mxu0 %v4312_v27  ;;  %5055 = vmatprep.subr.bf16.mxu1 %v5269_v28  ;;  %v4286_v27 = vcombine.low %v1313_v8, %v1321_v9  ;;  %v4301_v28 = vcombine.high %v1328_v17, %v1336_v18 }
 0x185   : > { %3624 = vmatmul.mubr.bf16.gmra.mxu1 %v4314_v29  ;;  %3534 = vmatprep.mubr.bf16.mxu0 %v4329_v30 }
 0x186   : > { %3631 = vmatprep.mubr.bf16.mxu1 %v4331_v31  ;;  %4992 = vmatpush3.bf16.msra.mxu0 %v5268_v32  ;;  %v4303_v31 = vcombine.high %v1329_v21, %v1337_v22 }
 0x187   : > { %5056 = vmatpush3.bf16.msra.mxu1 %v5270_v33  ;;  %4993 = vmatprep.subr.bf16.mxu0 %v5271_v34 }
 0x188   : > { %5057 = vmatprep.subr.bf16.mxu1 %v5273_v35 }
 0x18a   : > { %4994 = vmatpush3.bf16.msra.mxu0 %v5272_v38 }
 0x18b   : > { %5058 = vmatpush3.bf16.msra.mxu1 %v5274_v41 }
 0x18c   : > { %3535 = vmatmul.mubr.bf16.gmra.mxu0 %v4328_v42 }
 0x18d   : > { %3632 = vmatmul.mubr.bf16.gmra.mxu1 %v4330_v43  ;;  %3542 = vmatprep.mubr.bf16.mxu0 %v4345_v44  ;;  %v1345_v43 = vld [vmem:[%s6704_s0 + $0x1b8] sm:$0xff] }
 0x18e   : > { %3639 = vmatprep.mubr.bf16.mxu1 %v4347_v45  ;;  %v1353_v44 = vld [vmem:[%s6704_s0 + $0x1f8] sm:$0xff] }
 0x18f   : > { %v4318_v7 = vcombine.low %v1345_v43, %v1353_v44 }
 0x194   : > { %3543 = vmatmul.mubr.bf16.gmra.mxu0 %v4344_v50  ;;  %v4317_v50 = vcombine.high %v1344_v39, %v1352_v40 }
 0x195   : > { %3640 = vmatmul.mubr.bf16.gmra.mxu1 %v4346_v51  ;;  %3550 = vmatprep.mubr.bf16.mxu0 %v4361_v52 }
 0x196   : > { %3647 = vmatprep.mubr.bf16.mxu1 %v4363_v53  ;;  %v4319_v53 = vcombine.high %v1345_v43, %v1353_v44  ;;  %v1392_v43 = vld [vmem:[%s6704_s0 + $0x330] sm:$0xff] }
 0x197   : > { %v1400_v44 = vld [vmem:[%s6704_s0 + $0x370] sm:$0xff] }
 0x19c   : > { %3551 = vmatmul.mubr.bf16.gmra.mxu0 %v4360_v58 }
 0x19d   : > { %3648 = vmatmul.mubr.bf16.gmra.mxu1 %v4362_v59  ;;  %3558 = vmatprep.mubr.bf16.mxu0 %v4377_v60 }
 0x19e   : > { %3655 = vmatprep.mubr.bf16.mxu1 %v4379_v61  ;;  %v1360_v61 = vld [vmem:[%s6704_s0 + $0x230] sm:$0xff] }
 0x19f   : > { %v4333_v8 = vcombine.high %v1360_v61, %v1368_v62 }
 0x1a4   : > { %3559 = vmatmul.mubr.bf16.gmra.mxu0 %v4376_v2  ;;  %v1369_v2 = vld [vmem:[%s6704_s0 + $0x278] sm:$0xff] }
 0x1a5   : > { %3656 = vmatmul.mubr.bf16.gmra.mxu1 %v4378_v3  ;;  %3696 = vmatprep.mubr.bf16.mxu0 %v4269_v4 }
 0x1a6   : > { %3793 = vmatprep.mubr.bf16.mxu1 %v4271_v5  ;;  %v4316_v5 = vcombine.low %v1344_v39, %v1352_v40 }
 0x1ac   : > { %v4611_v14 = vpop.f32.mrf.mxu0  ;;  %3697 = vmatmul.mubr.bf16.vlgmr.msra.gmra.mxu0 %v4268_v10 }
 0x1ad   : > { %v4675_v15 = vpop.f32.mrf.mxu1  ;;  %3794 = vmatmul.mubr.bf16.vlgmr.msra.gmra.mxu1 %v4270_v11  ;;  %3704 = vmatprep.mubr.bf16.mxu0 %v4285_v12  ;;  %v4335_v11 = vcombine.high %v1361_v1, %v1369_v2 }
 0x1ae   : > { %v4612_v16 = vpop.f32.mrf.mxu0  ;;  %3801 = vmatprep.mubr.bf16.mxu1 %v4287_v13 }
 0x1af   : > { %v4613_v19 = vadd.f32 %v4612_v16, %v4611_v14  ;;  %v4676_v20 = vpop.f32.mrf.mxu1 }
 0x1b0   : > { %v4677_v23 = vadd.f32 %v4676_v20, %v4675_v15  ;;  %v4614_v24 = vpop.f32.mrf.mxu0  ;;  %v1384_v20 = vld [vmem:[%s6704_s0 + $0x2f0] sm:$0xff] }
 0x1b1   : > { %v4678_v26 = vpop.f32.mrf.mxu1 }
 0x1b2   : > { %v6374_v29 = vadd.f32 %v4677_v23, %v4613_v19  ;;  %v4615_v30 = vpop.f32.mrf.mxu0  ;;  %v1376_v19 = vld [vmem:[%s6704_s0 + $0x2b0] sm:$0xff]  ;;  %v1377_v23 = vld [vmem:[%s6704_s0 + $0x2b8] sm:$0xff] }
 0x1b3   : > { %v4616_v32 = vadd.f32 %v4615_v30, %v4614_v24  ;;  %v4679_v33 = vpop.f32.mrf.mxu1  ;;  %v1385_v24 = vld [vmem:[%s6704_s0 + $0x2f8] sm:$0xff]  ;;  %v4334_v30 = vcombine.low %v1361_v1, %v1369_v2 }
 0x1b4   : > { %v4680_v34 = vadd.f32 %v4679_v33, %v4678_v26  ;;  %v4617_v35 = vpop.f32.mrf.mxu0  ;;  %3705 = vmatmul.mubr.bf16.gmra.mxu0 %v4284_v25 }
 0x1b5   : > { %v4681_v36 = vpop.f32.mrf.mxu1  ;;  %3802 = vmatmul.mubr.bf16.gmra.mxu1 %v4286_v27  ;;  %3712 = vmatprep.mubr.bf16.mxu0 %v4301_v28  ;;  %v4332_v27 = vcombine.low %v1360_v61, %v1368_v62 }
 0x1b6   : > { %v6376_v37 = vadd.f32 %v4680_v34, %v4616_v32  ;;  %v4618_v38 = vpop.f32.mrf.mxu0  ;;  %3809 = vmatprep.mubr.bf16.mxu1 %v4303_v31  ;;  %v4349_v31 = vcombine.high %v1376_v19, %v1384_v20  ;;  %v4351_v34 = vcombine.high %v1377_v23, %v1385_v24 }
 0x1b7   : > { %v4619_v41 = vadd.f32 %v4618_v38, %v4617_v35  ;;  %v4682_v42 = vpop.f32.mrf.mxu1 }
 0x1b8   : > { %v4683_v45 = vadd.f32 %v4682_v42, %v4681_v36  ;;  %v4620_v46 = vpop.f32.mrf.mxu0 }
 0x1b9   : > { %v4684_v48 = vpop.f32.mrf.mxu1 }
 0x1ba   : > { %v6390_v51 = vadd.f32 %v4683_v45, %v4619_v41  ;;  %v4621_v52 = vpop.f32.mrf.mxu0 }
 0x1bb   : > { %v4622_v54 = vadd.f32 %v4621_v52, %v4620_v46  ;;  %v4685_v55 = vpop.f32.mrf.mxu1  ;;  %v4348_v52 = vcombine.low %v1376_v19, %v1384_v20 }
 0x1bc   : > { %v4686_v56 = vadd.f32 %v4685_v55, %v4684_v48  ;;  %v4623_v57 = vpop.f32.mrf.mxu0  ;;  %3713 = vmatmul.mubr.bf16.gmra.mxu0 %v4300_v47  ;;  %v1393_v47 = vld [vmem:[%s6704_s0 + $0x338] sm:$0xff]  ;;  %v4365_v55 = vcombine.high %v1392_v43, %v1400_v44 }
 0x1bd   : > { %v4687_v58 = vpop.f32.mrf.mxu1  ;;  %3810 = vmatmul.mubr.bf16.gmra.mxu1 %v4302_v49  ;;  %3720 = vmatprep.mubr.bf16.mxu0 %v4317_v50  ;;  %v1401_v48 = vld [vmem:[%s6704_s0 + $0x378] sm:$0xff] }
 0x1be   : > { %v6392_v59 = vadd.f32 %v4686_v56, %v4622_v54  ;;  %v4624_v60 = vpop.f32.mrf.mxu0  ;;  %3817 = vmatprep.mubr.bf16.mxu1 %v4319_v53  ;;  %v4350_v54 = vcombine.low %v1377_v23, %v1385_v24 }
 0x1bf   : > { %v4625_v63 = vadd.f32 %v4624_v60, %v4623_v57  ;;  %v4688_v0 = vpop.f32.mrf.mxu1 }
 0x1c0   : > { %v4689_v3 = vadd.f32 %v4688_v0, %v4687_v58  ;;  %v4626_v4 = vpop.f32.mrf.mxu0  ;;  %v4367_v58 = vcombine.high %v1393_v47, %v1401_v48 }
 0x1c1   : > { %v4690_v6 = vpop.f32.mrf.mxu1 }
 0x1c2   : > { %v6406_v9 = vadd.f32 %v4689_v3, %v4625_v63  ;;  %v4627_v10 = vpop.f32.mrf.mxu0  ;;  %v1408_v3 = vld [vmem:[%s6704_s0 + $0x3b0] sm:$0xff] }
 0x1c3   : > { %v4628_v12 = vadd.f32 %v4627_v10, %v4626_v4  ;;  %v4691_v13 = vpop.f32.mrf.mxu1  ;;  %v1416_v4 = vld [vmem:[%s6704_s0 + $0x3f0] sm:$0xff] }
 0x1c4   : > { %v4692_v14 = vadd.f32 %v4691_v13, %v4690_v6  ;;  %v4629_v15 = vpop.f32.mrf.mxu0  ;;  %3721 = vmatmul.mubr.bf16.gmra.mxu0 %v4316_v5 }
 0x1c5   : > { %v4693_v16 = vpop.f32.mrf.mxu1  ;;  %3818 = vmatmul.mubr.bf16.gmra.mxu1 %v4318_v7  ;;  %3728 = vmatprep.mubr.bf16.mxu0 %v4333_v8  ;;  %v1409_v7 = vld [vmem:[%s6704_s0 + $0x3b8] sm:$0xff] }
 0x1c6   : > { %v6408_v17 = vadd.f32 %v4692_v14, %v4628_v12  ;;  %v4630_v18 = vpop.f32.mrf.mxu0  ;;  %3825 = vmatprep.mubr.bf16.mxu1 %v4335_v11  ;;  %v1417_v8 = vld [vmem:[%s6704_s0 + $0x3f8] sm:$0xff]  ;;  %v4364_v12 = vcombine.low %v1392_v43, %v1400_v44  ;;  %v4366_v14 = vcombine.low %v1393_v47, %v1401_v48 }
 0x1c7   : > { %v4631_v21 = vadd.f32 %v4630_v18, %v4629_v15  ;;  %v4694_v22 = vpop.f32.mrf.mxu1  ;;  %v4381_v15 = vcombine.high %v1408_v3, %v1416_v4  ;;  %v4383_v19 = vcombine.high %v1409_v7, %v1417_v8 }
 0x1c8   : > { %v4695_v25 = vadd.f32 %v4694_v22, %v4693_v16  ;;  %v4632_v26 = vpop.f32.mrf.mxu0 }
 0x1c9   : > { %v4696_v28 = vpop.f32.mrf.mxu1 }
 0x1ca   : > { %v6422_v32 = vadd.f32 %v4695_v25, %v4631_v21  ;;  %v4633_v33 = vpop.f32.mrf.mxu0 }
 0x1cb   : > { %v4634_v35 = vadd.f32 %v4633_v33, %v4632_v26  ;;  %v4697_v36 = vpop.f32.mrf.mxu1  ;;  %v4380_v33 = vcombine.low %v1408_v3, %v1416_v4 }
 0x1cc   : > { %v4698_v38 = vadd.f32 %v4697_v36, %v4696_v28  ;;  %v4635_v39 = vpop.f32.mrf.mxu0  ;;  %3729 = vmatmul.mubr.bf16.gmra.mxu0 %v4332_v27 }
 0x1cd   : > { %v4699_v40 = vpop.f32.mrf.mxu1  ;;  %3826 = vmatmul.mubr.bf16.gmra.mxu1 %v4334_v30  ;;  %3736 = vmatprep.mubr.bf16.mxu0 %v4349_v31 }
 0x1ce   : > { %v6424_v41 = vadd.f32 %v4698_v38, %v4634_v35  ;;  %v4636_v42 = vpop.f32.mrf.mxu0  ;;  %3833 = vmatprep.mubr.bf16.mxu1 %v4351_v34  ;;  %v4382_v35 = vcombine.low %v1409_v7, %v1417_v8 }
 0x1cf   : > { %v4637_v45 = vadd.f32 %v4636_v42, %v4635_v39  ;;  %v4700_v46 = vpop.f32.mrf.mxu1 }
 0x1d0   : > { %v4701_v49 = vadd.f32 %v4700_v46, %v4699_v40  ;;  %v4638_v50 = vpop.f32.mrf.mxu0 }
 0x1d1   : > { %v4702_v53 = vpop.f32.mrf.mxu1 }
 0x1d2   : > { %v6438_v56 = vadd.f32 %v4701_v49, %v4637_v45  ;;  %v4639_v57 = vpop.f32.mrf.mxu0 }
 0x1d3   : > { %v4640_v60 = vadd.f32 %v4639_v57, %v4638_v50  ;;  %v4703_v61 = vpop.f32.mrf.mxu1 }
 0x1d4   : > { %v4704_v62 = vadd.f32 %v4703_v61, %v4702_v53  ;;  %v4641_v63 = vpop.f32.mrf.mxu0  ;;  %3737 = vmatmul.mubr.bf16.gmra.mxu0 %v4348_v52 }
 0x1d5   : > { %v4705_v0 = vpop.f32.mrf.mxu1  ;;  %3834 = vmatmul.mubr.bf16.gmra.mxu1 %v4350_v54  ;;  %3744 = vmatprep.mubr.bf16.mxu0 %v4365_v55 }
 0x1d6   : > { %v6440_v1 = vadd.f32 %v4704_v62, %v4640_v60  ;;  %v4642_v2 = vpop.f32.mrf.mxu0  ;;  %3841 = vmatprep.mubr.bf16.mxu1 %v4367_v58 }
 0x1d7   : > { %v4643_v5 = vadd.f32 %v4642_v2, %v4641_v63  ;;  %v4706_v6 = vpop.f32.mrf.mxu1 }
 0x1d8   : > { %v4707_v10 = vadd.f32 %v4706_v6, %v4705_v0  ;;  %v4644_v11 = vpop.f32.mrf.mxu0 }
 0x1d9   : > { %v4708_v13 = vpop.f32.mrf.mxu1 }
 0x1da   : > { %v6454_v16 = vadd.f32 %v4707_v10, %v4643_v5  ;;  %v4645_v18 = vpop.f32.mrf.mxu0 }
 0x1db   : > { %v4646_v20 = vadd.f32 %v4645_v18, %v4644_v11  ;;  %v4709_v21 = vpop.f32.mrf.mxu1 }
 0x1dc   : > { %v4710_v22 = vadd.f32 %v4709_v21, %v4708_v13  ;;  %v4647_v23 = vpop.f32.mrf.mxu0  ;;  %3745 = vmatmul.mubr.bf16.gmra.mxu0 %v4364_v12 }
 0x1dd   : > { %v4711_v24 = vpop.f32.mrf.mxu1  ;;  %3842 = vmatmul.mubr.bf16.gmra.mxu1 %v4366_v14  ;;  %3752 = vmatprep.mubr.bf16.mxu0 %v4381_v15 }
 0x1de   : > { %v6456_v25 = vadd.f32 %v4710_v22, %v4646_v20  ;;  %v4648_v26 = vpop.f32.mrf.mxu0  ;;  %3849 = vmatprep.mubr.bf16.mxu1 %v4383_v19 }
 0x1df   : > { %v4649_v27 = vadd.f32 %v4648_v26, %v4647_v23  ;;  %v4712_v28 = vpop.f32.mrf.mxu1 }
 0x1e0   : > { %v4713_v30 = vadd.f32 %v4712_v28, %v4711_v24  ;;  %v4650_v31 = vpop.f32.mrf.mxu0 }
 0x1e1   : > { %v4714_v34 = vpop.f32.mrf.mxu1 }
 0x1e2   : > { %v6458_v36 = vadd.f32 %v4713_v30, %v4649_v27  ;;  %v4651_v38 = vpop.f32.mrf.mxu0 }
 0x1e3   : > { %v4652_v39 = vadd.f32 %v4651_v38, %v4650_v31  ;;  %v4715_v40 = vpop.f32.mrf.mxu1 }
 0x1e4   : > { %v4716_v42 = vadd.f32 %v4715_v40, %v4714_v34  ;;  %v4653_v43 = vpop.f32.mrf.mxu0  ;;  %3753 = vmatmul.mubr.bf16.gmra.mxu0 %v4380_v33 }
 0x1e5   : > { %v4717_v44 = vpop.f32.mrf.mxu1  ;;  %3850 = vmatmul.mubr.bf16.gmra.mxu1 %v4382_v35 }
 0x1e6   : > { %v6460_v45 = vadd.f32 %v4716_v42, %v4652_v39  ;;  %v4654_v46 = vpop.f32.mrf.mxu0 }
 0x1e7   : > { %v4655_v47 = vadd.f32 %v4654_v46, %v4653_v43  ;;  %v4718_v48 = vpop.f32.mrf.mxu1 }
 0x1e8   : > { %v4719_v49 = vadd.f32 %v4718_v48, %v4717_v44  ;;  %v4656_v50 = vpop.f32.mrf.mxu0 }
 0x1e9   : > { %v4720_v52 = vpop.f32.mrf.mxu1 }
 0x1ea   : > { %v6462_v53 = vadd.f32 %v4719_v49, %v4655_v47  ;;  %v4657_v54 = vpop.f32.mrf.mxu0 }
 0x1eb   : > { %v4658_v55 = vadd.f32 %v4657_v54, %v4656_v50  ;;  %v4721_v57 = vpop.f32.mrf.mxu1 }
 0x1ec   : > { %v4722_v58 = vadd.f32 %v4721_v57, %v4720_v52  ;;  %v4739_v60 = vpop.f32.mrf.mxu0 }
 0x1ed   : > { %v4803_v61 = vpop.f32.mrf.mxu1 }
 0x1ee   : > { %v6464_v62 = vadd.f32 %v4722_v58, %v4658_v55  ;;  %v4740_v63 = vpop.f32.mrf.mxu0 }
 0x1ef   : > { %v4741_v0 = vadd.f32 %v4740_v63, %v4739_v60  ;;  %v4804_v2 = vpop.f32.mrf.mxu1 }
 0x1f0   : > { %v4805_v3 = vadd.f32 %v4804_v2, %v4803_v61  ;;  %v4742_v4 = vpop.f32.mrf.mxu0 }
 0x1f1   : > { %v3311_v5 = vadd.f32 %v4741_v0, %v6374_v29  ;;  %v4806_v6 = vpop.f32.mrf.mxu1 }
 0x1f2   : > { %v4743_v7 = vpop.f32.mrf.mxu0 }
 0x1f3   : > { %v6467_v8 = vadd.f32 %v4805_v3, %v3311_v5  ;;  %v4744_v10 = vadd.f32 %v4743_v7, %v4742_v4  ;;  %v4807_v11 = vpop.f32.mrf.mxu1 }
 0x1f4   : > { %v4808_v12 = vadd.f32 %v4807_v11, %v4806_v6  ;;  %v4745_v13 = vpop.f32.mrf.mxu0 }
 0x1f5   : > { %v3314_v14 = vadd.f32 %v4744_v10, %v6376_v37  ;;  %v4809_v15 = vpop.f32.mrf.mxu1 }
 0x1f6   : > { %v4746_v18 = vpop.f32.mrf.mxu0 }
 0x1f7   : > { %v6470_v19 = vadd.f32 %v4808_v12, %v3314_v14  ;;  %v4747_v20 = vadd.f32 %v4746_v18, %v4745_v13  ;;  %v4810_v21 = vpop.f32.mrf.mxu1 }
 0x1f8   : > { %v4811_v22 = vadd.f32 %v4810_v21, %v4809_v15  ;;  %v4748_v23 = vpop.f32.mrf.mxu0 }
 0x1f9   : > { %v3319_v29 = vadd.f32 %v4747_v20, %v6390_v51  ;;  %v4812_v24 = vpop.f32.mrf.mxu1 }
 0x1fa   : > { %v4749_v26 = vpop.f32.mrf.mxu0 }
 0x1fb   : > { %v6473_v27 = vadd.f32 %v4811_v22, %v3319_v29  ;;  %v4750_v28 = vadd.f32 %v4749_v26, %v4748_v23  ;;  %v4813_v30 = vpop.f32.mrf.mxu1 }
 0x1fc   : > { %v4814_v31 = vadd.f32 %v4813_v30, %v4812_v24  ;;  %v4751_v33 = vpop.f32.mrf.mxu0 }
 0x1fd   : > { %v3322_v37 = vadd.f32 %v4750_v28, %v6392_v59  ;;  %v4815_v34 = vpop.f32.mrf.mxu1 }
 0x1fe   : > { %v4752_v35 = vpop.f32.mrf.mxu0 }
 0x1ff   : > { %v6476_v38 = vadd.f32 %v4814_v31, %v3322_v37  ;;  %v4753_v39 = vadd.f32 %v4752_v35, %v4751_v33  ;;  %v4816_v40 = vpop.f32.mrf.mxu1 }
 0x200   : > { %v4817_v42 = vadd.f32 %v4816_v40, %v4815_v34  ;;  %v4754_v43 = vpop.f32.mrf.mxu0 }
 0x201   : > { %v3327_v51 = vadd.f32 %v4753_v39, %v6406_v9  ;;  %v4818_v44 = vpop.f32.mrf.mxu1 }
 0x202   : > { %v4755_v46 = vpop.f32.mrf.mxu0 }
 0x203   : > { %v6479_v47 = vadd.f32 %v4817_v42, %v3327_v51  ;;  %v4756_v48 = vadd.f32 %v4755_v46, %v4754_v43  ;;  %v4819_v49 = vpop.f32.mrf.mxu1 }
 0x204   : > { %v4820_v50 = vadd.f32 %v4819_v49, %v4818_v44  ;;  %v4757_v52 = vpop.f32.mrf.mxu0 }
 0x205   : > { %v3330_v59 = vadd.f32 %v4756_v48, %v6408_v17  ;;  %v4821_v54 = vpop.f32.mrf.mxu1 }
 0x206   : > { %v4758_v55 = vpop.f32.mrf.mxu0 }
 0x207   : > { %v6482_v57 = vadd.f32 %v4820_v50, %v3330_v59  ;;  %v4759_v58 = vadd.f32 %v4758_v55, %v4757_v52  ;;  %v4822_v60 = vpop.f32.mrf.mxu1 }
 0x208   : > { %v4823_v61 = vadd.f32 %v4822_v60, %v4821_v54  ;;  %v4760_v63 = vpop.f32.mrf.mxu0 }
 0x209   : > { %v3335_v9 = vadd.f32 %v4759_v58, %v6422_v32  ;;  %v4824_v0 = vpop.f32.mrf.mxu1 }
 0x20a   : > { %v4761_v2 = vpop.f32.mrf.mxu0 }
 0x20b   : > { %v6485_v3 = vadd.f32 %v4823_v61, %v3335_v9  ;;  %v4762_v4 = vadd.f32 %v4761_v2, %v4760_v63  ;;  %v4825_v5 = vpop.f32.mrf.mxu1 }
 0x20c   : > { %v4826_v6 = vadd.f32 %v4825_v5, %v4824_v0  ;;  %v4763_v7 = vpop.f32.mrf.mxu0 }
 0x20d   : > { %v3338_v17 = vadd.f32 %v4762_v4, %v6424_v41  ;;  %v4827_v10 = vpop.f32.mrf.mxu1 }
 0x20e   : > { %v4764_v11 = vpop.f32.mrf.mxu0 }
 0x20f   : > { %v6488_v12 = vadd.f32 %v4826_v6, %v3338_v17  ;;  %v4765_v13 = vadd.f32 %v4764_v11, %v4763_v7  ;;  %v4828_v14 = vpop.f32.mrf.mxu1 }
 0x210   : > { %v4829_v15 = vadd.f32 %v4828_v14, %v4827_v10  ;;  %v4766_v18 = vpop.f32.mrf.mxu0 }
 0x211   : > { %v3343_v32 = vadd.f32 %v4765_v13, %v6438_v56  ;;  %v4830_v20 = vpop.f32.mrf.mxu1 }
 0x212   : > { %v4767_v21 = vpop.f32.mrf.mxu0 }
 0x213   : > { %v6491_v22 = vadd.f32 %v4829_v15, %v3343_v32  ;;  %v4768_v23 = vadd.f32 %v4767_v21, %v4766_v18  ;;  %v4831_v29 = vpop.f32.mrf.mxu1 }
 0x214   : > { %v4832_v24 = vadd.f32 %v4831_v29, %v4830_v20  ;;  %v4769_v26 = vpop.f32.mrf.mxu0 }
 0x215   : > { %v3346_v41 = vadd.f32 %v4768_v23, %v6440_v1  ;;  %v4833_v28 = vpop.f32.mrf.mxu1 }
 0x216   : > { %v4770_v30 = vpop.f32.mrf.mxu0 }
 0x217   : > { %v6494_v31 = vadd.f32 %v4832_v24, %v3346_v41  ;;  %v4771_v33 = vadd.f32 %v4770_v30, %v4769_v26  ;;  %v4834_v37 = vpop.f32.mrf.mxu1 }
 0x218   : > { %v4835_v34 = vadd.f32 %v4834_v37, %v4833_v28  ;;  %v4772_v35 = vpop.f32.mrf.mxu0 }
 0x219   : > { %v3351_v56 = vadd.f32 %v4771_v33, %v6454_v16  ;;  %v4836_v39 = vpop.f32.mrf.mxu1 }
 0x21a   : > { %v4773_v40 = vpop.f32.mrf.mxu0 }
 0x21b   : > { %v6497_v42 = vadd.f32 %v4835_v34, %v3351_v56  ;;  %v4774_v43 = vadd.f32 %v4773_v40, %v4772_v35  ;;  %v4837_v51 = vpop.f32.mrf.mxu1 }
 0x21c   : > { %v4838_v44 = vadd.f32 %v4837_v51, %v4836_v39  ;;  %v4775_v46 = vpop.f32.mrf.mxu0 }
 0x21d   : > { %v3354_v1 = vadd.f32 %v4774_v43, %v6456_v25  ;;  %v4839_v48 = vpop.f32.mrf.mxu1 }
 0x21e   : > { %v4776_v49 = vpop.f32.mrf.mxu0 }
 0x21f   : > { %v6500_v50 = vadd.f32 %v4838_v44, %v3354_v1  ;;  %v4777_v52 = vadd.f32 %v4776_v49, %v4775_v46  ;;  %v4840_v59 = vpop.f32.mrf.mxu1 }
 0x220   : > { %v4841_v54 = vadd.f32 %v4840_v59, %v4839_v48  ;;  %v4778_v55 = vpop.f32.mrf.mxu0 }
 0x221   : > { %v3359_v16 = vadd.f32 %v4777_v52, %v6458_v36  ;;  %v4842_v58 = vpop.f32.mrf.mxu1 }
 0x222   : > { %v4779_v60 = vpop.f32.mrf.mxu0 }
 0x223   : > { %v6503_v61 = vadd.f32 %v4841_v54, %v3359_v16  ;;  %v4780_v63 = vadd.f32 %v4779_v60, %v4778_v55  ;;  %v4843_v9 = vpop.f32.mrf.mxu1 }
 0x224   : > { %v4844_v0 = vadd.f32 %v4843_v9, %v4842_v58  ;;  %v4781_v2 = vpop.f32.mrf.mxu0 }
 0x225   : > { %v3362_v25 = vadd.f32 %v4780_v63, %v6460_v45  ;;  %v4845_v4 = vpop.f32.mrf.mxu1 }
 0x226   : > { %v4782_v5 = vpop.f32.mrf.mxu0 }
 0x227   : > { %v6506_v6 = vadd.f32 %v4844_v0, %v3362_v25  ;;  %v4783_v7 = vadd.f32 %v4782_v5, %v4781_v2  ;;  %v4846_v17 = vpop.f32.mrf.mxu1 }
 0x228   : > { %v4847_v10 = vadd.f32 %v4846_v17, %v4845_v4  ;;  %v4784_v11 = vpop.f32.mrf.mxu0 }
 0x229   : > { %v3367_v36 = vadd.f32 %v4783_v7, %v6462_v53  ;;  %v4848_v13 = vpop.f32.mrf.mxu1 }
 0x22a   : > { %v4785_v14 = vpop.f32.mrf.mxu0 }
 0x22b   : > { %v6509_v15 = vadd.f32 %v4847_v10, %v3367_v36  ;;  %v4786_v18 = vadd.f32 %v4785_v14, %v4784_v11  ;;  %v4849_v32 = vpop.f32.mrf.mxu1 }
 0x22c   : > { %v4850_v20 = vadd.f32 %v4849_v32, %v4848_v13  ;;  %v4867_v21 = vpop.f32.mrf.mxu0 }
 0x22d   : > { %v3370_v45 = vadd.f32 %v4786_v18, %v6464_v62  ;;  %v4931_v23 = vpop.f32.mrf.mxu1 }
 0x22e   : > { %v4868_v29 = vpop.f32.mrf.mxu0 }
 0x22f   : > { %v6512_v24 = vadd.f32 %v4850_v20, %v3370_v45  ;;  %v4869_v26 = vadd.f32 %v4868_v29, %v4867_v21  ;;  %v4932_v41 = vpop.f32.mrf.mxu1 }
 0x230   : > { %v4933_v28 = vadd.f32 %v4932_v41, %v4931_v23  ;;  %v6514_v30 = vpop.f32.mrf.mxu0 }
 0x231   : > { %v3505_v53 = vadd.f32 %v4869_v26, %v6467_v8  ;;  %v6517_v33 = vpop.f32.mrf.mxu1 }
 0x232   : > { %v6519_v37 = vpop.f32.mrf.mxu0 }
 0x233   : > { %v6521_v34 = vadd.f32 %v4933_v28, %v3505_v53  ;;  %v6523_v35 = vpop.f32.mrf.mxu1 }
 0x234   : > { %v4873_v62 = vpop.f32.mrf.mxu0 }
 0x235   : > { %v4937_v56 = vpop.f32.mrf.mxu1 }
 0x236   : > { %v4874_v39 = vpop.f32.mrf.mxu0 }
 0x237   : > { %v4875_v40 = vadd.f32 %v4874_v39, %v4873_v62  ;;  %v4938_v43 = vpop.f32.mrf.mxu1 }
 0x238   : > { %v4939_v51 = vadd.f32 %v4938_v43, %v4937_v56  ;;  %v6525_v44 = vpop.f32.mrf.mxu0 }
 0x239   : > { %v3513_v46 = vadd.f32 %v4875_v40, %v6473_v27  ;;  %v6528_v1 = vpop.f32.mrf.mxu1 }
 0x23a   : > { %v6530_v8 = vpop.f32.mrf.mxu0 }
 0x23b   : > { %v6532_v48 = vadd.f32 %v4939_v51, %v3513_v46  ;;  %v6534_v49 = vpop.f32.mrf.mxu1 }
 0x23c   : > { %v4879_v52 = vpop.f32.mrf.mxu0 }
 0x23d   : > { %v4943_v59 = vpop.f32.mrf.mxu1 }
 0x23e   : > { %v4880_v54 = vpop.f32.mrf.mxu0 }
 0x23f   : > { %v4881_v55 = vadd.f32 %v4880_v54, %v4879_v52  ;;  %v4944_v16 = vpop.f32.mrf.mxu1 }
 0x240   : > { %v4945_v58 = vadd.f32 %v4944_v16, %v4943_v59  ;;  %v6536_v60 = vpop.f32.mrf.mxu0 }
 0x241   : > { %v3521_v63 = vadd.f32 %v4881_v55, %v6479_v47  ;;  %v6539_v9 = vpop.f32.mrf.mxu1 }
 0x242   : > { %v6541_v27 = vpop.f32.mrf.mxu0 }
 0x243   : > { %v6543_v0 = vadd.f32 %v4945_v58, %v3521_v63  ;;  %v6545_v2 = vpop.f32.mrf.mxu1 }
 0x244   : > { %v4885_v25 = vpop.f32.mrf.mxu0 }
 0x245   : > { %v4949_v4 = vpop.f32.mrf.mxu1 }
 0x246   : > { %v4886_v5 = vpop.f32.mrf.mxu0 }
 0x247   : > { %v4887_v7 = vadd.f32 %v4886_v5, %v4885_v25  ;;  %v4950_v17 = vpop.f32.mrf.mxu1 }
 0x248   : > { %v4951_v10 = vadd.f32 %v4950_v17, %v4949_v4  ;;  %v6547_v11 = vpop.f32.mrf.mxu0 }
 0x249   : > { %v3529_v36 = vadd.f32 %v4887_v7, %v6485_v3  ;;  %v6550_v13 = vpop.f32.mrf.mxu1 }
 0x24a   : > { %v6552_v47 = vpop.f32.mrf.mxu0 }
 0x24b   : > { %v6554_v14 = vadd.f32 %v4951_v10, %v3529_v36  ;;  %v6556_v18 = vpop.f32.mrf.mxu1 }
 0x24c   : > { %v4891_v32 = vpop.f32.mrf.mxu0 }
 0x24d   : > { %v4955_v20 = vpop.f32.mrf.mxu1 }
 0x24e   : > { %v4892_v21 = vpop.f32.mrf.mxu0 }
 0x24f   : > { %v4893_v45 = vadd.f32 %v4892_v21, %v4891_v32  ;;  %v4956_v23 = vpop.f32.mrf.mxu1 }
 0x250   : > { %v4957_v29 = vadd.f32 %v4956_v23, %v4955_v20  ;;  %v6558_v26 = vpop.f32.mrf.mxu0 }
 0x251   : > { %v3537_v41 = vadd.f32 %v4893_v45, %v6491_v22  ;;  %v6561_v28 = vpop.f32.mrf.mxu1 }
 0x252   : > { %v6563_v3 = vpop.f32.mrf.mxu0 }
 0x253   : > { %v6565_v53 = vadd.f32 %v4957_v29, %v3537_v41  ;;  %v6567_v62 = vpop.f32.mrf.mxu1 }
 0x254   : > { %v4897_v56 = vpop.f32.mrf.mxu0 }
 0x255   : > { %v4961_v39 = vpop.f32.mrf.mxu1 }
 0x256   : > { %v4898_v40 = vpop.f32.mrf.mxu0 }
 0x257   : > { %v4899_v43 = vadd.f32 %v4898_v40, %v4897_v56  ;;  %v4962_v51 = vpop.f32.mrf.mxu1 }
 0x258   : > { %v4963_v46 = vadd.f32 %v4962_v51, %v4961_v39  ;;  %v6569_v52 = vpop.f32.mrf.mxu0  ;;  %v4872_v51 = vadd.f32 %v6519_v37, %v6514_v30 }
 0x259   : > { %v3545_v59 = vadd.f32 %v4899_v43, %v6497_v42  ;;  %v6572_v54 = vpop.f32.mrf.mxu1 }
 0x25a   : > { %v6574_v22 = vpop.f32.mrf.mxu0 }
 0x25b   : > { %v6576_v55 = vadd.f32 %v4963_v46, %v3545_v59  ;;  %v6578_v16 = vpop.f32.mrf.mxu1 }
 0x25c   : > { %v4903_v58 = vpop.f32.mrf.mxu0 }
 0x25d   : > { %v4967_v63 = vpop.f32.mrf.mxu1 }
 0x25e   : > { %v4904_v25 = vpop.f32.mrf.mxu0 }
 0x25f   : > { %v4905_v4 = vadd.f32 %v4904_v25, %v4903_v58  ;;  %v4968_v5 = vpop.f32.mrf.mxu1 }
 0x260   : > { %v4969_v7 = vadd.f32 %v4968_v5, %v4967_v63  ;;  %v6580_v17 = vpop.f32.mrf.mxu0 }
 0x261   : > { %v3553_v10 = vadd.f32 %v4905_v4, %v6503_v61  ;;  %v6583_v36 = vpop.f32.mrf.mxu1  ;;  %v3508_v4 = vadd.f32 %v4872_v51, %v6470_v19 }
 0x262   : > { %v6585_v42 = vpop.f32.mrf.mxu0 }
 0x263   : > { %v6587_v32 = vadd.f32 %v4969_v7, %v3553_v10  ;;  %v6589_v20 = vpop.f32.mrf.mxu1  ;;  %v4936_v10 = vadd.f32 %v6523_v35, %v6517_v33 }
 0x264   : > { %v4909_v21 = vpop.f32.mrf.mxu0 }
 0x265   : > { %v4973_v45 = vpop.f32.mrf.mxu1 }
 0x266   : > { %v4910_v23 = vpop.f32.mrf.mxu0 }
 0x267   : > { %v4911_v29 = vadd.f32 %v4910_v23, %v4909_v21  ;;  %v4974_v41 = vpop.f32.mrf.mxu1  ;;  %v3605_v23 = vadd.f32 %v4936_v10, %v3508_v4  ;;  %v4942_v4 = vadd.f32 %v6534_v49, %v6528_v1 }
 0x268   : > { %v6591_v56 = vpop.f32.mrf.mxu0  ;;  %v4975_v40 = vadd.f32 %v4974_v41, %v4973_v45 }
 0x269   : > { %v3561_v39 = vadd.f32 %v4911_v29, %v6509_v15  ;;  %v6594_v43 = vpop.f32.mrf.mxu1  ;;  %v4878_v29 = vadd.f32 %v6530_v8, %v6525_v44 }
 0x26a   : > { %v6596_v61 = vpop.f32.mrf.mxu0 }
 0x26b   : > { %v6600_v46 = vadd.f32 %v4975_v40, %v3561_v39  ;;  %v6602_v59 = vpop.f32.mrf.mxu1  ;;  %v3516_v33 = vadd.f32 %v4878_v29, %v6476_v38 }
 0x26c   : > { %v4995_v58 = vpop.f32.mrf.mxu0 }
 0x26d   : > { %6709 = vst [vmem:[#allocation4_spill] sm:$0xff] %v6600_v46  ;;  %v5059_v63 = vpop.f32.mrf.mxu1  ;;  %v3613_v38 = vadd.f32 %v4942_v4, %v3516_v33 }
 0x26e   : > { %v4996_v25 = vpop.f32.mrf.mxu0 }
 0x26f   : > { %v4997_v5 = vadd.f32 %v4996_v25, %v4995_v58  ;;  %v5060_v15 = vpop.f32.mrf.mxu1 }
 0x270   : > { %v4998_v7 = vpop.f32.mrf.mxu0  ;;  %v5061_v30 = vadd.f32 %v5060_v15, %v5059_v63 }
 0x271   : > { %v3699_v21 = vadd.f32 %v4997_v5, %v6521_v34  ;;  %v5062_v45 = vpop.f32.mrf.mxu1 }
 0x272   : > { %v4999_v37 = vpop.f32.mrf.mxu0 }
 0x273   : > { %v5000_v41 = vadd.f32 %v4999_v37, %v4998_v7  ;;  %v5063_v39 = vpop.f32.mrf.mxu1  ;;  %v3796_v40 = vadd.f32 %v5061_v30, %v3699_v21 }
 0x274   : > { %v5001_v19 = vpop.f32.mrf.mxu0  ;;  %v5064_v58 = vadd.f32 %v5063_v39, %v5062_v45  ;;  %v4884_v45 = vadd.f32 %v6541_v27, %v6536_v60 }
 0x275   : > { %v3702_v51 = vadd.f32 %v5000_v41, %v3605_v23  ;;  %v5065_v25 = vpop.f32.mrf.mxu1  ;;  %v3959_v5 = vmul.f32 %v3796_v40, %v3796_v40 }
 0x276   : > { %v5002_v46 = vpop.f32.mrf.mxu0 }
 0x277   : > { %v3799_v34 = vadd.f32 %v5064_v58, %v3702_v51  ;;  %v5003_v35 = vadd.f32 %v5002_v46, %v5001_v19  ;;  %v5066_v63 = vpop.f32.mrf.mxu1  ;;  %v3524_v51 = vadd.f32 %v4884_v45, %v6482_v57  ;;  %v4890_v57 = vadd.f32 %v6552_v47, %v6547_v11 }
 0x278   : > { %v5067_v44 = vadd.f32 %v5066_v63, %v5065_v25  ;;  %v5004_v8 = vpop.f32.mrf.mxu0  ;;  %v4954_v11 = vadd.f32 %v6556_v18, %v6550_v13 }
 0x279   : > { %v4551_v15 = vpack.c.bf16 %v3799_v34, %v3796_v40  ;;  %v3938_v7 = vadd.f32 %v3799_v34, %v3796_v40  ;;  %v3960_v10 = vmul.f32 %v3799_v34, %v3799_v34  ;;  %v3707_v21 = vadd.f32 %v5003_v35, %v6532_v48  ;;  %v5068_v30 = vpop.f32.mrf.mxu1 }
 0x27a   : > { %v5005_v37 = vpop.f32.mrf.mxu0  ;;  %v4948_v34 = vadd.f32 %v6545_v2, %v6539_v9 }
 0x27b   : > { %4552 = vst [vmem:[%s6618_s12] sm:$0xff] %v4551_v15   ;;  %v3975_v46 = vadd.f32 %v3960_v10, %v3959_v5  ;;  %v3804_v1 = vadd.f32 %v5067_v44, %v3707_v21  ;;  %v5006_v49 = vadd.f32 %v5005_v37, %v5004_v8  ;;  %v5069_v23 = vpop.f32.mrf.mxu1 }
 0x27c   : > { %v5007_v29 = vpop.f32.mrf.mxu0  ;;  %v5070_v19 = vadd.f32 %v5069_v23, %v5068_v30 }
 0x27d   : > { %v3939_v41 = vadd.f32 %v3938_v7, %v3804_v1  ;;  %v3961_v39 = vmul.f32 %v3804_v1, %v3804_v1  ;;  %v3710_v40 = vadd.f32 %v5006_v49, %v3613_v38  ;;  %v5071_v48 = vpop.f32.mrf.mxu1  ;;  %v3621_v7 = vadd.f32 %v4948_v34, %v3524_v51 }
 0x27e   : > { %v5008_v58 = vpop.f32.mrf.mxu0 }
 0x27f   : > { %v3976_v60 = vadd.f32 %v3975_v46, %v3961_v39  ;;  %v3807_v27 = vadd.f32 %v5070_v19, %v3710_v40  ;;  %v5009_v25 = vadd.f32 %v5008_v58, %v5007_v29  ;;  %v5072_v33 = vpop.f32.mrf.mxu1 }
 0x280   : > { %v5073_v35 = vadd.f32 %v5072_v33, %v5071_v48  ;;  %v5010_v63 = vpop.f32.mrf.mxu0 }
 0x281   : > { %v4556_v4 = vpack.c.bf16 %v3807_v27, %v3804_v1  ;;  %v3940_v5 = vadd.f32 %v3939_v41, %v3807_v27  ;;  %v3962_v44 = vmul.f32 %v3807_v27, %v3807_v27  ;;  %v3715_v8 = vadd.f32 %v5009_v25, %v6543_v0  ;;  %v5074_v15 = vpop.f32.mrf.mxu1 }
 0x282   : > { %v5011_v10 = vpop.f32.mrf.mxu0  ;;  %v3532_v0 = vadd.f32 %v4890_v57, %v6488_v12  ;;  %v4896_v25 = vadd.f32 %v6563_v3, %v6558_v26 }
 0x283   : > { %4588 = vst [vmem:[%s6618_s12 + $0x8] sm:$0xff] %v4556_v4   ;;  %v3977_v21 = vadd.f32 %v3976_v60, %v3962_v44  ;;  %v3812_v30 = vadd.f32 %v5073_v35, %v3715_v8  ;;  %v5012_v45 = vadd.f32 %v5011_v10, %v5010_v63  ;;  %v5075_v37 = vpop.f32.mrf.mxu1 }
 0x284   : > { %v5013_v38 = vpop.f32.mrf.mxu0  ;;  %v5076_v1 = vadd.f32 %v5075_v37, %v5074_v15  ;;  %v3629_v33 = vadd.f32 %v4954_v11, %v3532_v0 }
 0x285   : > { %v3941_v9 = vadd.f32 %v3940_v5, %v3812_v30  ;;  %v3963_v2 = vmul.f32 %v3812_v30, %v3812_v30  ;;  %v3718_v46 = vadd.f32 %v5012_v45, %v3621_v7  ;;  %v5077_v49 = vpop.f32.mrf.mxu1  ;;  %v3540_v7 = vadd.f32 %v4896_v25, %v6494_v31 }
 0x286   : > { %v5014_v23 = vpop.f32.mrf.mxu0  ;;  %v4902_v31 = vadd.f32 %v6574_v22, %v6569_v52  ;;  %v4966_v52 = vadd.f32 %v6578_v16, %v6572_v54 }
 0x287   : > { %v3978_v29 = vadd.f32 %v3977_v21, %v3963_v2  ;;  %v3815_v41 = vadd.f32 %v5076_v1, %v3718_v46  ;;  %v5015_v39 = vadd.f32 %v5014_v23, %v5013_v38  ;;  %v5078_v40 = vpop.f32.mrf.mxu1  ;;  %v4960_v21 = vadd.f32 %v6567_v62, %v6561_v28 }
 0x288   : > { %v5079_v47 = vadd.f32 %v5078_v40, %v5077_v49  ;;  %v5016_v19 = vpop.f32.mrf.mxu0 }
 0x289   : > { %v4561_v48 = vpack.c.bf16 %v3815_v41, %v3812_v30  ;;  %v3942_v51 = vadd.f32 %v3941_v9, %v3815_v41  ;;  %v3964_v58 = vmul.f32 %v3815_v41, %v3815_v41  ;;  %v3723_v60 = vadd.f32 %v5015_v39, %v6554_v14  ;;  %v5080_v27 = vpop.f32.mrf.mxu1 }
 0x28a   : > { %v5017_v12 = vpop.f32.mrf.mxu0  ;;  %v3637_v1 = vadd.f32 %v4960_v21, %v3540_v7 }
 0x28b   : > { %4589 = vst [vmem:[%s6618_s12 + $0x10] sm:$0xff] %v4561_v48   ;;  %v3979_v34 = vadd.f32 %v3978_v29, %v3964_v58  ;;  %v3820_v35 = vadd.f32 %v5079_v47, %v3723_v60  ;;  %v5018_v63 = vadd.f32 %v5017_v12, %v5016_v19  ;;  %v5081_v4 = vpop.f32.mrf.mxu1 }
 0x28c   : > { %v5019_v5 = vpop.f32.mrf.mxu0  ;;  %v5082_v8 = vadd.f32 %v5081_v4, %v5080_v27 }
 0x28d   : > { %v3943_v13 = vadd.f32 %v3942_v51, %v3820_v35  ;;  %v3965_v18 = vmul.f32 %v3820_v35, %v3820_v35  ;;  %v3726_v44 = vadd.f32 %v5018_v63, %v3629_v33  ;;  %v5083_v15 = vpop.f32.mrf.mxu1  ;;  %v4908_v63 = vadd.f32 %v6585_v42, %v6580_v17 }
 0x28e   : > { %v5020_v14 = vpop.f32.mrf.mxu0 }
 0x28f   : > { %v3980_v10 = vadd.f32 %v3979_v34, %v3965_v18  ;;  %v3823_v57 = vadd.f32 %v5082_v8, %v3726_v44  ;;  %v5021_v26 = vadd.f32 %v5020_v14, %v5019_v5  ;;  %v5084_v3 = vpop.f32.mrf.mxu1 }
 0x290   : > { %v5085_v30 = vadd.f32 %v5084_v3, %v5083_v15  ;;  %v5022_v45 = vpop.f32.mrf.mxu0  ;;  %v4972_v3 = vadd.f32 %v6589_v20, %v6583_v36 }
 0x291   : > { %v4566_v37 = vpack.c.bf16 %v3823_v57, %v3820_v35  ;;  %v3944_v38 = vadd.f32 %v3943_v13, %v3823_v57  ;;  %v3966_v9 = vmul.f32 %v3823_v57, %v3823_v57  ;;  %v3731_v2 = vadd.f32 %v5021_v26, %v6565_v53  ;;  %v5086_v46 = vpop.f32.mrf.mxu1 }
 0x292   : > { %v5023_v49 = vpop.f32.mrf.mxu0  ;;  %v3548_v53 = vadd.f32 %v4902_v31, %v6500_v50 }
 0x293   : > { %4590 = vst [vmem:[%s6618_s12 + $0x18] sm:$0xff] %v4566_v37   ;;  %v3981_v23 = vadd.f32 %v3980_v10, %v3966_v9  ;;  %v3828_v0 = vadd.f32 %v5085_v30, %v3731_v2  ;;  %v5024_v29 = vadd.f32 %v5023_v49, %v5022_v45  ;;  %v5087_v41 = vpop.f32.mrf.mxu1  ;;  %v3556_v10 = vadd.f32 %v4908_v63, %v6506_v6 }
 0x294   : > { %v5025_v39 = vpop.f32.mrf.mxu0  ;;  %v5088_v11 = vadd.f32 %v5087_v41, %v5086_v46  ;;  %v3645_v4 = vadd.f32 %v4966_v52, %v3548_v53  ;;  %v4914_v6 = vadd.f32 %v6596_v61, %v6591_v56  ;;  %v4978_v56 = vadd.f32 %v6602_v59, %v6594_v43 }
 0x295   : > { %v3945_v28 = vadd.f32 %v3944_v38, %v3828_v0  ;;  %v3967_v62 = vmul.f32 %v3828_v0, %v3828_v0  ;;  %v3734_v40 = vadd.f32 %v5024_v29, %v3637_v1  ;;  %v5089_v47 = vpop.f32.mrf.mxu1  ;;  %v3653_v46 = vadd.f32 %v4972_v3, %v3556_v10 }
 0x296   : > { %v5026_v19 = vpop.f32.mrf.mxu0 }
 0x297   : > { %v3982_v48 = vadd.f32 %v3981_v23, %v3967_v62  ;;  %v3831_v51 = vadd.f32 %v5088_v11, %v3734_v40  ;;  %v5027_v58 = vadd.f32 %v5026_v19, %v5025_v39  ;;  %v5090_v60 = vpop.f32.mrf.mxu1 }
 0x298   : > { %v5091_v22 = vadd.f32 %v5090_v60, %v5089_v47  ;;  %v5028_v27 = vpop.f32.mrf.mxu0  ;;  %v6710_v60 = vld [vmem:[#allocation4_spill] sm:$0xff] }
 0x299   : > { %v4571_v25 = vpack.c.bf16 %v3831_v51, %v3828_v0  ;;  %v3946_v12 = vadd.f32 %v3945_v28, %v3831_v51  ;;  %v3968_v33 = vmul.f32 %v3831_v51, %v3831_v51  ;;  %v3739_v34 = vadd.f32 %v5027_v58, %v6576_v55  ;;  %v5092_v35 = vpop.f32.mrf.mxu1 }
 0x29a   : > { %v5029_v50 = vpop.f32.mrf.mxu0 }
 0x29b   : > { %4591 = vst [vmem:[%s6618_s12 + $0x20] sm:$0xff] %v4571_v25   ;;  %v3983_v5 = vadd.f32 %v3982_v48, %v3968_v33  ;;  %v3836_v13 = vadd.f32 %v5091_v22, %v3739_v34  ;;  %v5030_v18 = vadd.f32 %v5029_v50, %v5028_v27  ;;  %v5093_v44 = vpop.f32.mrf.mxu1 }
 0x29c   : > { %v5031_v8 = vpop.f32.mrf.mxu0  ;;  %v5094_v7 = vadd.f32 %v5093_v44, %v5092_v35 }
 0x29d   : > { %v3947_v54 = vadd.f32 %v3946_v12, %v3836_v13  ;;  %v3969_v16 = vmul.f32 %v3836_v13, %v3836_v13  ;;  %v3742_v15 = vadd.f32 %v5030_v18, %v3645_v4  ;;  %v5095_v14 = vpop.f32.mrf.mxu1 }
 0x29e   : > { %v5032_v55 = vpop.f32.mrf.mxu0 }
 0x29f   : > { %v3984_v57 = vadd.f32 %v3983_v5, %v3969_v16  ;;  %v3839_v26 = vadd.f32 %v5094_v7, %v3742_v15  ;;  %v5033_v17 = vadd.f32 %v5032_v55, %v5031_v8  ;;  %v5096_v42 = vpop.f32.mrf.mxu1  ;;  %v3996_v15 = vlaneseq }
 0x2a0   : > { %v5097_v21 = vadd.f32 %v5096_v42, %v5095_v14  ;;  %v5034_v30 = vpop.f32.mrf.mxu0 }
 0x2a1   : > { %v4576_v45 = vpack.c.bf16 %v3839_v26, %v3836_v13  ;;  %v3948_v37 = vadd.f32 %v3947_v54, %v3839_v26  ;;  %v3970_v38 = vmul.f32 %v3839_v26, %v3839_v26  ;;  %v3747_v9 = vadd.f32 %v5033_v17, %v6587_v32  ;;  %v5098_v2 = vpop.f32.mrf.mxu1 }
 0x2a2   : > { %v5035_v1 = vpop.f32.mrf.mxu0  ;;  %v3564_v32 = vadd.f32 %v4914_v6, %v6512_v24  ;;  %v4051_v6 = vld [vmem:[%s6618_s12 + $0x18] sm:$0xf] (%p5370_p6) }
 0x2a3   : > { %4592 = vst [vmem:[%s6618_s12 + $0x28] sm:$0xff] %v4576_v45   ;;  %v3985_v49 = vadd.f32 %v3984_v57, %v3970_v38  ;;  %v3844_v31 = vadd.f32 %v5097_v21, %v3747_v9  ;;  %v5036_v23 = vadd.f32 %v5035_v1, %v5034_v30  ;;  %v5099_v0 = vpop.f32.mrf.mxu1  ;;  %v3997_v57 = vshrl.u32 %v3996_v15, 7  ;;  %v4041_v38 = vld [vmem:[%s6618_s12 + $0x4] sm:$0xf] (%p5370_p6)  ;;  %v4043_v9 = vld [vmem:[%s6618_s12 + $0x8] sm:$0xf] (%p5370_p6) }
 0x2a4   : > { %v5037_v29 = vpop.f32.mrf.mxu0  ;;  %v5100_v39 = vadd.f32 %v5099_v0, %v5098_v2  ;;  %v3661_v25 = vadd.f32 %v4978_v56, %v3564_v32  ;;  %v4045_v2 = vld [vmem:[%s6618_s12 + $0xc] sm:$0xf] (%p5370_p6)  ;;  %4042 = vst [vmem:[%s4022_s9 + $0x8] sm:$0xf] (%p5370_p6), %v4041_v38  ;;  %4044 = vst [vmem:[%s4022_s9 + $0x10] sm:$0xf] (%p5370_p6), %v4043_v9 }
 0x2a5   : > { %v3949_v36 = vadd.f32 %v3948_v37, %v3844_v31  ;;  %v3971_v20 = vmul.f32 %v3844_v31, %v3844_v31  ;;  %v3750_v41 = vadd.f32 %v5036_v23, %v3653_v46  ;;  %v5101_v28 = vpop.f32.mrf.mxu1  ;;  %vm3999_vm0 = vcmp.eq.s32.totalorder %v3997_v57, 1  ;;  %v4039_v37 = vld [vmem:[%s6618_s12] sm:$0xf] (%p5370_p6)  ;;  %v4047_v46 = vld [vmem:[%s6618_s12 + $0x10] sm:$0xf] (%p5370_p6) }
 0x2a6   : > { %v5038_v62 = vpop.f32.mrf.mxu0  ;;  %vm3998_vm1 = vcmp.eq.s32.totalorder %v3997_v57, 0  ;;  %4040 = vst [vmem:[%s4022_s9] sm:$0xf] (%p5370_p6), %v4039_v37  ;;  %4046 = vst [vmem:[%s4022_s9 + $0x18] sm:$0xf] (%p5370_p6), %v4045_v2  ;;  %v4049_v1 = vld [vmem:[%s6618_s12 + $0x14] sm:$0xf] (%p5370_p6) }
 0x2a7   : > { %v3986_v40 = vadd.f32 %v3985_v49, %v3971_v20  ;;  %v3847_v11 = vadd.f32 %v5100_v39, %v3750_v41  ;;  %v5039_v47 = vadd.f32 %v5038_v62, %v5037_v29  ;;  %v5102_v19 = vpop.f32.mrf.mxu1  ;;  %4048 = vst [vmem:[%s4022_s9 + $0x20] sm:$0xf] (%p5370_p6), %v4047_v46  ;;  %v4053_v49 = vld [vmem:[%s6618_s12 + $0x1c] sm:$0xf] (%p5370_p6)  ;;  %4050 = vst [vmem:[%s4022_s9 + $0x28] sm:$0xf] (%p5370_p6), %v4049_v1 }
 0x2a8   : > { %v5103_v61 = vadd.f32 %v5102_v19, %v5101_v28  ;;  %v5040_v53 = vpop.f32.mrf.mxu0  ;;  %4052 = vst [vmem:[%s4022_s9 + $0x30] sm:$0xf] (%p5370_p6), %v4051_v6  ;;  %4054 = vst [vmem:[%s4022_s9 + $0x38] sm:$0xf] (%p5370_p6), %v4053_v49  ;;  %v4057_v23 = vld [vmem:[%s6618_s12 + $0x24] sm:$0xf] (%p5370_p6) }
 0x2a9   : > { %v4581_v48 = vpack.c.bf16 %v3847_v11, %v3844_v31  ;;  %v3950_v51 = vadd.f32 %v3949_v36, %v3847_v11  ;;  %v3972_v58 = vmul.f32 %v3847_v11, %v3847_v11  ;;  %v3755_v52 = vadd.f32 %v5039_v47, %v6710_v60  ;;  %v5104_v22 = vpop.f32.mrf.mxu1  ;;  %v4055_v31 = vld [vmem:[%s6618_s12 + $0x20] sm:$0xf] (%p5370_p6)  ;;  %4058 = vst [vmem:[%s4022_s9 + $0x48] sm:$0xf] (%p5370_p6), %v4057_v23 }
 0x2aa   : > { %v5041_v27 = vpop.f32.mrf.mxu0  ;;  %v4059_v0 = vld [vmem:[%s6618_s12 + $0x28] sm:$0xf] (%p5370_p6)  ;;  %4056 = vst [vmem:[%s4022_s9 + $0x40] sm:$0xf] (%p5370_p6), %v4055_v31  ;;  %v4061_v29 = vld [vmem:[%s6618_s12 + $0x2c] sm:$0xf] (%p5370_p6) }
 0x2ab   : > { %4593 = vst [vmem:[%s6618_s12 + $0x30] sm:$0xff] %v4581_v48   ;;  %v3987_v24 = vadd.f32 %v3986_v40, %v3972_v58  ;;  %v3852_v12 = vadd.f32 %v5103_v61, %v3755_v52  ;;  %v5042_v33 = vadd.f32 %v5041_v27, %v5040_v53  ;;  %v5105_v34 = vpop.f32.mrf.mxu1  ;;  %4060 = vst [vmem:[%s4022_s9 + $0x50] sm:$0xf] (%p5370_p6), %v4059_v0 }
 0x2ac   : > { %v5106_v59 = vadd.f32 %v5105_v34, %v5104_v22  ;;  %4062 = vst [vmem:[%s4022_s9 + $0x58] sm:$0xf] (%p5370_p6), %v4061_v29 }
 0x2ad   : > { %v3951_v35 = vadd.f32 %v3950_v51, %v3852_v12  ;;  %v3973_v63 = vmul.f32 %v3852_v12, %v3852_v12  ;;  %v3758_v43 = vadd.f32 %v5042_v33, %v3661_v25 }
 0x2af   : > { %v3988_v50 = vadd.f32 %v3987_v24, %v3973_v63  ;;  %v3855_v4 = vadd.f32 %v5106_v59, %v3758_v43 }
 0x2b1   : > { %v4586_v5 = vpack.c.bf16 %v3855_v4, %v3852_v12  ;;  %v3952_v13 = vadd.f32 %v3951_v35, %v3855_v4  ;;  %v3974_v18 = vmul.f32 %v3855_v4, %v3855_v4 }
 0x2b2   : > { %v4063_v36 = vld [vmem:[%s6618_s12 + $0x30] sm:$0xf] (%p5370_p6)  ;;  %v4065_v20 = vld [vmem:[%s6618_s12 + $0x34] sm:$0xf] (%p5370_p6) }
 0x2b3   : > { %4594 = vst [vmem:[%s6618_s12 + $0x38] sm:$0xff] %v4586_v5   ;;  %v3953_v44 = vrot.slane %v3952_v13, 4  ;;  %v3989_v8 = vadd.f32 %v3988_v50, %v3974_v18  ;;  %4064 = vst [vmem:[%s4022_s9 + $0x60] sm:$0xf] (%p5370_p6), %v4063_v36 }
 0x2b4   : > { %4066 = vst [vmem:[%s4022_s9 + $0x68] sm:$0xf] (%p5370_p6), %v4065_v20 }
 0x2b5   : > { %v3954_v54 = vadd.f32 %v3953_v44, %v3952_v13  ;;  %v3990_v16 = vrot.slane %v3989_v8, 4 }
 0x2b7   : > { %v3955_v7 = vrot.slane %v3954_v54, 2  ;;  %v3991_v14 = vadd.f32 %v3990_v16, %v3989_v8 }
 0x2b9   : > { %v3956_v10 = vadd.f32 %v3955_v7, %v3954_v54  ;;  %v3992_v55 = vrot.slane %v3991_v14, 2 }
 0x2ba   : > { %v4067_v41 = vld [vmem:[%s6618_s12 + $0x38] sm:$0xf] (%p5370_p6)  ;;  %v4069_v39 = vld [vmem:[%s6618_s12 + $0x3c] sm:$0xf] (%p5370_p6) }
 0x2bb   : > { %v3993_v26 = vadd.f32 %v3992_v55, %v3991_v14  ;;  %v3957_v17 = vrot.slane %v3956_v10, 1  ;;  %4068 = vst [vmem:[%s4022_s9 + $0x70] sm:$0xf] (%p5370_p6), %v4067_v41  ;;  %4070 = vst [vmem:[%s4022_s9 + $0x78] sm:$0xf] (%p5370_p6), %v4069_v39 }
 0x2bd   : > { %v3994_v42 = vrot.slane %v3993_v26, 1  ;;  %v3958_v21 = vadd.f32 %v3957_v17, %v3956_v10 }
 0x2bf   : > { %v3995_v3 = vadd.f32 %v3994_v42, %v3993_v26  ;;  %4017 = sbr.rel (!%p5370_p6) target bundleno = 708 (0x2c4), region = 73 }
 0x2c1   : > { %v4000_v30 = vsel %vm3999_vm0, %v3995_v3, 0.0 }
 0x2c2   : > { %v4001_v45 = vsel %vm3998_vm1, %v3958_v21, %v4000_v30 }
 0x2c3   : > { %4002 = vst [vmem:[%s1288_s5] sm:$0xff] %v4001_v45 }
 0x2c4 PF: > { %s14_s16 = sadd.s32 1, %s5313_s16   ;;  %s6711_s12 = smov %s5301_s13 }
 0x2c5   : > { %p11_p12 = scmp.ge.s32.totalorder %s14_s16, 4   ;;  %s6712_s13 = smov %s5375_s22 }
 0x2c6   : > { %s6713_s14 = smov %s5309_s15  ;;  %s6714_s15 = smov %s6716_s17 }
 0x2c7   :  { %13 = sbr.rel (!%p11_p12) target bundleno = 3 (0x3), region = 160 }

// kernel: discriminator_forward.8
= control target key start
LH: loop header
LB: loop body
LE: loop exit
PB: predicated region body
PF: predicated region fallthrough
CT: control target
= control target key end

     0   :  { %s9017_s12 = smov 0   ;;  %s9019_s13 = smov 0   ;;  %s10735_s0 = inlined_call_operand.vmem [shape: bf16[32,4096], index: 0, kind: input, shape index: {}]   ;;  %s10736_s1 = inlined_call_operand.vmem [shape: bf16[4096,512], index: 1, kind: input, shape index: {}]   ;;  %s10737_s2 = inlined_call_operand.vmem [shape: bf16[32,512], index: 2, kind: output, shape index: {0}]   ;;  %s10738_s3 = inlined_call_operand.vmem [shape: f32[8,512], index: 3, kind: output, shape index: {1}]  }
   0x1   :  { %s9021_s14 = smov 0   ;;  %s9023_s15 = smov 0  }
   0x2   :  { %s9025_s16 = smov 0  }
   0x3 LB: > { %s23_s17 = sadd.s32 1, %s8991_s15  ;;  %s7859_s18 = sadd.s32 4294967295, %s8995_s16   ;;  %s8995_s16 = sphi %s9025_s16, %s14_s16   ;;  %s8991_s15 = sphi %s9023_s15, %s10767_s15   ;;  %s8987_s14 = sphi %s9021_s14, %s10766_s14   ;;  %s8983_s13 = sphi %s9019_s13, %s10765_s13   ;;  %s8979_s12 = sphi %s9017_s12, %s10764_s12  }
   0x4   : > { %p24_p0 = scmp.ge.s32.totalorder %s23_s17, 4  ;;  %p66_p1 = scmp.ne.s32.totalorder %s8983_s13, %s8979_s12 }
   0x5   : > { %p67_p2 = scmp.eq.s32.totalorder %s8995_s16, 0  ;;  %p98_p4 = scmp.eq.s32.totalorder %s7859_s18, 3 }
   0x6   : > { %s10769_s17 = smov (%p24_p0, %s23_s17), 0  ;;  %s59_s20 = sadd.s32 1, %s8983_s13 }
   0x7   : > { %p68_p3 = por %p67_p2, %p66_p1  ;;  %s56_s19 = ssub.s32 %s8991_s15, %s10769_s17 }
   0x8   : > { %p57_p5 = scmp.eq.s32.totalorder %s56_s19, 0  ;;  %p9052_p6 = por %p98_p4, %p66_p1 }
   0x9   : > { %p7863_p7 = scmp.ge.s32.totalorder %s8995_s16, 4 }
   0xa   : > { %s9057_s22 = scalar_select %p57_p5, %s8983_s13, %s59_s20  }
   0xb   : > { %158 = sbr.rel (%p7863_p7) target bundleno = 361 (0x169), region = 20 }
  0x10   : > { %161 = sbr.rel (!%p68_p3) target bundleno = 361 (0x169), region = 24  ;;  %s163_s23 = sand.u32 (%p68_p3), 1, %s8983_s13  }
  0x11   : > { %s7865_s24 = sshll.u32 (%p68_p3), %s8991_s15, 2  ;;  %s7864_s25 = sshll.u32 (%p68_p3), %s163_s23, 11 }
  0x12   : > { %s9065_s28 = scalar_lea.vmem (%p68_p3), %s10736_s1, %s7865_s24  ;;  %s9069_s29 = scalar_lea.vmem (%p68_p3), [#allocation2], %s7864_s25 }
  0x13   : > { %v184_v0 = vld [vmem:[%s9065_s28] sm:$0xf] (%p68_p3)  ;;  %v186_v1 = vld [vmem:[%s9065_s28 + $0x10] sm:$0xf] (%p68_p3) }
  0x14   : > { %185 = vst [vmem:[%s9069_s29] sm:$0xf] (%p68_p3), %v184_v0  ;;  %187 = vst [vmem:[%s9069_s29 + $0x4] sm:$0xf] (%p68_p3), %v186_v1  ;;  %v188_v2 = vld [vmem:[%s9065_s28 + $0x20] sm:$0xf] (%p68_p3) }
  0x15   : > { %v190_v3 = vld [vmem:[%s9065_s28 + $0x30] sm:$0xf]  ;;  %v192_v4 = vld [vmem:[%s9065_s28 + $0x40] sm:$0xf]  ;;  %189 = vst [vmem:[%s9069_s29 + $0x8] sm:$0xf] %v188_v2 }
  0x16   : > { %191 = vst [vmem:[%s9069_s29 + $0xc] sm:$0xf] %v190_v3  ;;  %193 = vst [vmem:[%s9069_s29 + $0x10] sm:$0xf] %v192_v4  ;;  %v194_v5 = vld [vmem:[%s9065_s28 + $0x50] sm:$0xf] }
  0x17   : > { %v196_v6 = vld [vmem:[%s9065_s28 + $0x60] sm:$0xf]  ;;  %v198_v7 = vld [vmem:[%s9065_s28 + $0x70] sm:$0xf]  ;;  %195 = vst [vmem:[%s9069_s29 + $0x14] sm:$0xf] %v194_v5 }
  0x18   : > { %197 = vst [vmem:[%s9069_s29 + $0x18] sm:$0xf] %v196_v6  ;;  %199 = vst [vmem:[%s9069_s29 + $0x1c] sm:$0xf] %v198_v7  ;;  %v200_v8 = vld [vmem:[%s9065_s28 + $0x80] sm:$0xf] }
  0x19   : > { %v202_v9 = vld [vmem:[%s9065_s28 + $0x90] sm:$0xf]  ;;  %v204_v10 = vld [vmem:[%s9065_s28 + $0xa0] sm:$0xf]  ;;  %201 = vst [vmem:[%s9069_s29 + $0x20] sm:$0xf] %v200_v8 }
  0x1a   : > { %203 = vst [vmem:[%s9069_s29 + $0x24] sm:$0xf] %v202_v9  ;;  %205 = vst [vmem:[%s9069_s29 + $0x28] sm:$0xf] %v204_v10  ;;  %v206_v11 = vld [vmem:[%s9065_s28 + $0xb0] sm:$0xf] }
  0x1b   : > { %v208_v12 = vld [vmem:[%s9065_s28 + $0xc0] sm:$0xf]  ;;  %v210_v13 = vld [vmem:[%s9065_s28 + $0xd0] sm:$0xf]  ;;  %207 = vst [vmem:[%s9069_s29 + $0x2c] sm:$0xf] %v206_v11 }
  0x1c   : > { %209 = vst [vmem:[%s9069_s29 + $0x30] sm:$0xf] %v208_v12  ;;  %211 = vst [vmem:[%s9069_s29 + $0x34] sm:$0xf] %v210_v13  ;;  %v212_v14 = vld [vmem:[%s9065_s28 + $0xe0] sm:$0xf] }
  0x1d   : > { %v214_v15 = vld [vmem:[%s9065_s28 + $0xf0] sm:$0xf]  ;;  %v216_v16 = vld [vmem:[%s9065_s28 + $0x100] sm:$0xf]  ;;  %213 = vst [vmem:[%s9069_s29 + $0x38] sm:$0xf] %v212_v14 }
  0x1e   : > { %215 = vst [vmem:[%s9069_s29 + $0x3c] sm:$0xf] %v214_v15  ;;  %217 = vst [vmem:[%s9069_s29 + $0x40] sm:$0xf] %v216_v16  ;;  %v218_v17 = vld [vmem:[%s9065_s28 + $0x110] sm:$0xf] }
  0x1f   : > { %v220_v18 = vld [vmem:[%s9065_s28 + $0x120] sm:$0xf]  ;;  %v222_v19 = vld [vmem:[%s9065_s28 + $0x130] sm:$0xf]  ;;  %219 = vst [vmem:[%s9069_s29 + $0x44] sm:$0xf] %v218_v17 }
  0x20   : > { %221 = vst [vmem:[%s9069_s29 + $0x48] sm:$0xf] %v220_v18  ;;  %223 = vst [vmem:[%s9069_s29 + $0x4c] sm:$0xf] %v222_v19  ;;  %v224_v20 = vld [vmem:[%s9065_s28 + $0x140] sm:$0xf] }
  0x21   : > { %v226_v21 = vld [vmem:[%s9065_s28 + $0x150] sm:$0xf]  ;;  %v228_v22 = vld [vmem:[%s9065_s28 + $0x160] sm:$0xf]  ;;  %225 = vst [vmem:[%s9069_s29 + $0x50] sm:$0xf] %v224_v20 }
  0x22   : > { %227 = vst [vmem:[%s9069_s29 + $0x54] sm:$0xf] %v226_v21  ;;  %229 = vst [vmem:[%s9069_s29 + $0x58] sm:$0xf] %v228_v22  ;;  %v230_v23 = vld [vmem:[%s9065_s28 + $0x170] sm:$0xf] }
  0x23   : > { %v232_v24 = vld [vmem:[%s9065_s28 + $0x180] sm:$0xf]  ;;  %v234_v25 = vld [vmem:[%s9065_s28 + $0x190] sm:$0xf]  ;;  %231 = vst [vmem:[%s9069_s29 + $0x5c] sm:$0xf] %v230_v23 }
  0x24   : > { %233 = vst [vmem:[%s9069_s29 + $0x60] sm:$0xf] %v232_v24  ;;  %235 = vst [vmem:[%s9069_s29 + $0x64] sm:$0xf] %v234_v25  ;;  %v236_v26 = vld [vmem:[%s9065_s28 + $0x1a0] sm:$0xf] }
  0x25   : > { %v238_v27 = vld [vmem:[%s9065_s28 + $0x1b0] sm:$0xf]  ;;  %v240_v28 = vld [vmem:[%s9065_s28 + $0x1c0] sm:$0xf]  ;;  %237 = vst [vmem:[%s9069_s29 + $0x68] sm:$0xf] %v236_v26 }
  0x26   : > { %239 = vst [vmem:[%s9069_s29 + $0x6c] sm:$0xf] %v238_v27  ;;  %241 = vst [vmem:[%s9069_s29 + $0x70] sm:$0xf] %v240_v28  ;;  %v242_v29 = vld [vmem:[%s9065_s28 + $0x1d0] sm:$0xf] }
  0x27   : > { %v244_v30 = vld [vmem:[%s9065_s28 + $0x1e0] sm:$0xf]  ;;  %v246_v31 = vld [vmem:[%s9065_s28 + $0x1f0] sm:$0xf]  ;;  %243 = vst [vmem:[%s9069_s29 + $0x74] sm:$0xf] %v242_v29 }
  0x28   : > { %245 = vst [vmem:[%s9069_s29 + $0x78] sm:$0xf] %v244_v30  ;;  %247 = vst [vmem:[%s9069_s29 + $0x7c] sm:$0xf] %v246_v31  ;;  %v248_v32 = vld [vmem:[%s9065_s28 + $0x200] sm:$0xf] }
  0x29   : > { %v250_v33 = vld [vmem:[%s9065_s28 + $0x210] sm:$0xf]  ;;  %v252_v34 = vld [vmem:[%s9065_s28 + $0x220] sm:$0xf]  ;;  %249 = vst [vmem:[%s9069_s29 + $0x80] sm:$0xf] %v248_v32 }
  0x2a   : > { %251 = vst [vmem:[%s9069_s29 + $0x84] sm:$0xf] %v250_v33  ;;  %253 = vst [vmem:[%s9069_s29 + $0x88] sm:$0xf] %v252_v34  ;;  %v254_v35 = vld [vmem:[%s9065_s28 + $0x230] sm:$0xf] }
  0x2b   : > { %v256_v36 = vld [vmem:[%s9065_s28 + $0x240] sm:$0xf]  ;;  %v258_v37 = vld [vmem:[%s9065_s28 + $0x250] sm:$0xf]  ;;  %255 = vst [vmem:[%s9069_s29 + $0x8c] sm:$0xf] %v254_v35 }
  0x2c   : > { %257 = vst [vmem:[%s9069_s29 + $0x90] sm:$0xf] %v256_v36  ;;  %259 = vst [vmem:[%s9069_s29 + $0x94] sm:$0xf] %v258_v37  ;;  %v260_v38 = vld [vmem:[%s9065_s28 + $0x260] sm:$0xf] }
  0x2d   : > { %v262_v39 = vld [vmem:[%s9065_s28 + $0x270] sm:$0xf]  ;;  %v264_v40 = vld [vmem:[%s9065_s28 + $0x280] sm:$0xf]  ;;  %261 = vst [vmem:[%s9069_s29 + $0x98] sm:$0xf] %v260_v38 }
  0x2e   : > { %263 = vst [vmem:[%s9069_s29 + $0x9c] sm:$0xf] %v262_v39  ;;  %265 = vst [vmem:[%s9069_s29 + $0xa0] sm:$0xf] %v264_v40  ;;  %v266_v41 = vld [vmem:[%s9065_s28 + $0x290] sm:$0xf] }
  0x2f   : > { %v268_v42 = vld [vmem:[%s9065_s28 + $0x2a0] sm:$0xf]  ;;  %v270_v43 = vld [vmem:[%s9065_s28 + $0x2b0] sm:$0xf]  ;;  %267 = vst [vmem:[%s9069_s29 + $0xa4] sm:$0xf] %v266_v41 }
  0x30   : > { %269 = vst [vmem:[%s9069_s29 + $0xa8] sm:$0xf] %v268_v42  ;;  %271 = vst [vmem:[%s9069_s29 + $0xac] sm:$0xf] %v270_v43  ;;  %v272_v44 = vld [vmem:[%s9065_s28 + $0x2c0] sm:$0xf] }
  0x31   : > { %v274_v45 = vld [vmem:[%s9065_s28 + $0x2d0] sm:$0xf]  ;;  %v276_v46 = vld [vmem:[%s9065_s28 + $0x2e0] sm:$0xf]  ;;  %273 = vst [vmem:[%s9069_s29 + $0xb0] sm:$0xf] %v272_v44 }
  0x32   : > { %275 = vst [vmem:[%s9069_s29 + $0xb4] sm:$0xf] %v274_v45  ;;  %277 = vst [vmem:[%s9069_s29 + $0xb8] sm:$0xf] %v276_v46  ;;  %v278_v47 = vld [vmem:[%s9065_s28 + $0x2f0] sm:$0xf] }
  0x33   : > { %v280_v48 = vld [vmem:[%s9065_s28 + $0x300] sm:$0xf]  ;;  %v282_v49 = vld [vmem:[%s9065_s28 + $0x310] sm:$0xf]  ;;  %279 = vst [vmem:[%s9069_s29 + $0xbc] sm:$0xf] %v278_v47 }
  0x34   : > { %281 = vst [vmem:[%s9069_s29 + $0xc0] sm:$0xf] %v280_v48  ;;  %283 = vst [vmem:[%s9069_s29 + $0xc4] sm:$0xf] %v282_v49  ;;  %v284_v50 = vld [vmem:[%s9065_s28 + $0x320] sm:$0xf] }
  0x35   : > { %v286_v51 = vld [vmem:[%s9065_s28 + $0x330] sm:$0xf]  ;;  %v288_v52 = vld [vmem:[%s9065_s28 + $0x340] sm:$0xf]  ;;  %285 = vst [vmem:[%s9069_s29 + $0xc8] sm:$0xf] %v284_v50 }
  0x36   : > { %287 = vst [vmem:[%s9069_s29 + $0xcc] sm:$0xf] %v286_v51  ;;  %289 = vst [vmem:[%s9069_s29 + $0xd0] sm:$0xf] %v288_v52  ;;  %v290_v53 = vld [vmem:[%s9065_s28 + $0x350] sm:$0xf] }
  0x37   : > { %v292_v54 = vld [vmem:[%s9065_s28 + $0x360] sm:$0xf]  ;;  %v294_v55 = vld [vmem:[%s9065_s28 + $0x370] sm:$0xf]  ;;  %291 = vst [vmem:[%s9069_s29 + $0xd4] sm:$0xf] %v290_v53 }
  0x38   : > { %293 = vst [vmem:[%s9069_s29 + $0xd8] sm:$0xf] %v292_v54  ;;  %295 = vst [vmem:[%s9069_s29 + $0xdc] sm:$0xf] %v294_v55  ;;  %v296_v56 = vld [vmem:[%s9065_s28 + $0x380] sm:$0xf] }
  0x39   : > { %v298_v57 = vld [vmem:[%s9065_s28 + $0x390] sm:$0xf]  ;;  %v300_v58 = vld [vmem:[%s9065_s28 + $0x3a0] sm:$0xf]  ;;  %297 = vst [vmem:[%s9069_s29 + $0xe0] sm:$0xf] %v296_v56 }
  0x3a   : > { %299 = vst [vmem:[%s9069_s29 + $0xe4] sm:$0xf] %v298_v57  ;;  %301 = vst [vmem:[%s9069_s29 + $0xe8] sm:$0xf] %v300_v58  ;;  %v302_v59 = vld [vmem:[%s9065_s28 + $0x3b0] sm:$0xf] }
  0x3b   : > { %v304_v60 = vld [vmem:[%s9065_s28 + $0x3c0] sm:$0xf]  ;;  %v306_v61 = vld [vmem:[%s9065_s28 + $0x3d0] sm:$0xf]  ;;  %303 = vst [vmem:[%s9069_s29 + $0xec] sm:$0xf] %v302_v59 }
  0x3c   : > { %305 = vst [vmem:[%s9069_s29 + $0xf0] sm:$0xf] %v304_v60  ;;  %307 = vst [vmem:[%s9069_s29 + $0xf4] sm:$0xf] %v306_v61  ;;  %v308_v62 = vld [vmem:[%s9065_s28 + $0x3e0] sm:$0xf] }
  0x3d   : > { %v310_v63 = vld [vmem:[%s9065_s28 + $0x3f0] sm:$0xf]  ;;  %v312_v0 = vld [vmem:[%s9065_s28 + $0x400] sm:$0xf]  ;;  %309 = vst [vmem:[%s9069_s29 + $0xf8] sm:$0xf] %v308_v62 }
  0x3e   : > { %311 = vst [vmem:[%s9069_s29 + $0xfc] sm:$0xf] %v310_v63  ;;  %313 = vst [vmem:[%s9069_s29 + $0x100] sm:$0xf] %v312_v0  ;;  %v314_v1 = vld [vmem:[%s9065_s28 + $0x410] sm:$0xf] }
  0x3f   : > { %v316_v2 = vld [vmem:[%s9065_s28 + $0x420] sm:$0xf]  ;;  %v318_v3 = vld [vmem:[%s9065_s28 + $0x430] sm:$0xf]  ;;  %315 = vst [vmem:[%s9069_s29 + $0x104] sm:$0xf] %v314_v1 }
  0x40   : > { %317 = vst [vmem:[%s9069_s29 + $0x108] sm:$0xf] %v316_v2  ;;  %319 = vst [vmem:[%s9069_s29 + $0x10c] sm:$0xf] %v318_v3  ;;  %v320_v4 = vld [vmem:[%s9065_s28 + $0x440] sm:$0xf] }
  0x41   : > { %v322_v5 = vld [vmem:[%s9065_s28 + $0x450] sm:$0xf]  ;;  %v324_v6 = vld [vmem:[%s9065_s28 + $0x460] sm:$0xf]  ;;  %321 = vst [vmem:[%s9069_s29 + $0x110] sm:$0xf] %v320_v4 }
  0x42   : > { %323 = vst [vmem:[%s9069_s29 + $0x114] sm:$0xf] %v322_v5  ;;  %325 = vst [vmem:[%s9069_s29 + $0x118] sm:$0xf] %v324_v6  ;;  %v326_v7 = vld [vmem:[%s9065_s28 + $0x470] sm:$0xf] }
  0x43   : > { %v328_v8 = vld [vmem:[%s9065_s28 + $0x480] sm:$0xf]  ;;  %v330_v9 = vld [vmem:[%s9065_s28 + $0x490] sm:$0xf]  ;;  %327 = vst [vmem:[%s9069_s29 + $0x11c] sm:$0xf] %v326_v7 }
  0x44   : > { %329 = vst [vmem:[%s9069_s29 + $0x120] sm:$0xf] %v328_v8  ;;  %331 = vst [vmem:[%s9069_s29 + $0x124] sm:$0xf] %v330_v9  ;;  %v332_v10 = vld [vmem:[%s9065_s28 + $0x4a0] sm:$0xf] }
  0x45   : > { %v334_v11 = vld [vmem:[%s9065_s28 + $0x4b0] sm:$0xf]  ;;  %v336_v12 = vld [vmem:[%s9065_s28 + $0x4c0] sm:$0xf]  ;;  %333 = vst [vmem:[%s9069_s29 + $0x128] sm:$0xf] %v332_v10 }
  0x46   : > { %335 = vst [vmem:[%s9069_s29 + $0x12c] sm:$0xf] %v334_v11  ;;  %337 = vst [vmem:[%s9069_s29 + $0x130] sm:$0xf] %v336_v12  ;;  %v338_v13 = vld [vmem:[%s9065_s28 + $0x4d0] sm:$0xf] }
  0x47   : > { %v340_v14 = vld [vmem:[%s9065_s28 + $0x4e0] sm:$0xf]  ;;  %v342_v15 = vld [vmem:[%s9065_s28 + $0x4f0] sm:$0xf]  ;;  %339 = vst [vmem:[%s9069_s29 + $0x134] sm:$0xf] %v338_v13 }
  0x48   : > { %341 = vst [vmem:[%s9069_s29 + $0x138] sm:$0xf] %v340_v14  ;;  %343 = vst [vmem:[%s9069_s29 + $0x13c] sm:$0xf] %v342_v15  ;;  %v344_v16 = vld [vmem:[%s9065_s28 + $0x500] sm:$0xf] }
  0x49   : > { %v346_v17 = vld [vmem:[%s9065_s28 + $0x510] sm:$0xf]  ;;  %v348_v18 = vld [vmem:[%s9065_s28 + $0x520] sm:$0xf]  ;;  %345 = vst [vmem:[%s9069_s29 + $0x140] sm:$0xf] %v344_v16 }
  0x4a   : > { %347 = vst [vmem:[%s9069_s29 + $0x144] sm:$0xf] %v346_v17  ;;  %349 = vst [vmem:[%s9069_s29 + $0x148] sm:$0xf] %v348_v18  ;;  %v350_v19 = vld [vmem:[%s9065_s28 + $0x530] sm:$0xf] }
  0x4b   : > { %v352_v20 = vld [vmem:[%s9065_s28 + $0x540] sm:$0xf]  ;;  %v354_v21 = vld [vmem:[%s9065_s28 + $0x550] sm:$0xf]  ;;  %351 = vst [vmem:[%s9069_s29 + $0x14c] sm:$0xf] %v350_v19 }
  0x4c   : > { %353 = vst [vmem:[%s9069_s29 + $0x150] sm:$0xf] %v352_v20  ;;  %355 = vst [vmem:[%s9069_s29 + $0x154] sm:$0xf] %v354_v21  ;;  %v356_v22 = vld [vmem:[%s9065_s28 + $0x560] sm:$0xf] }
  0x4d   : > { %v358_v23 = vld [vmem:[%s9065_s28 + $0x570] sm:$0xf]  ;;  %v360_v24 = vld [vmem:[%s9065_s28 + $0x580] sm:$0xf]  ;;  %357 = vst [vmem:[%s9069_s29 + $0x158] sm:$0xf] %v356_v22 }
  0x4e   : > { %359 = vst [vmem:[%s9069_s29 + $0x15c] sm:$0xf] %v358_v23  ;;  %361 = vst [vmem:[%s9069_s29 + $0x160] sm:$0xf] %v360_v24  ;;  %v362_v25 = vld [vmem:[%s9065_s28 + $0x590] sm:$0xf] }
  0x4f   : > { %v364_v26 = vld [vmem:[%s9065_s28 + $0x5a0] sm:$0xf]  ;;  %v366_v27 = vld [vmem:[%s9065_s28 + $0x5b0] sm:$0xf]  ;;  %363 = vst [vmem:[%s9069_s29 + $0x164] sm:$0xf] %v362_v25 }
  0x50   : > { %365 = vst [vmem:[%s9069_s29 + $0x168] sm:$0xf] %v364_v26  ;;  %367 = vst [vmem:[%s9069_s29 + $0x16c] sm:$0xf] %v366_v27  ;;  %v368_v28 = vld [vmem:[%s9065_s28 + $0x5c0] sm:$0xf] }
  0x51   : > { %v370_v29 = vld [vmem:[%s9065_s28 + $0x5d0] sm:$0xf]  ;;  %v372_v30 = vld [vmem:[%s9065_s28 + $0x5e0] sm:$0xf]  ;;  %369 = vst [vmem:[%s9069_s29 + $0x170] sm:$0xf] %v368_v28 }
  0x52   : > { %371 = vst [vmem:[%s9069_s29 + $0x174] sm:$0xf] %v370_v29  ;;  %373 = vst [vmem:[%s9069_s29 + $0x178] sm:$0xf] %v372_v30  ;;  %v374_v31 = vld [vmem:[%s9065_s28 + $0x5f0] sm:$0xf] }
  0x53   : > { %v376_v32 = vld [vmem:[%s9065_s28 + $0x600] sm:$0xf]  ;;  %v378_v33 = vld [vmem:[%s9065_s28 + $0x610] sm:$0xf]  ;;  %375 = vst [vmem:[%s9069_s29 + $0x17c] sm:$0xf] %v374_v31 }
  0x54   : > { %377 = vst [vmem:[%s9069_s29 + $0x180] sm:$0xf] %v376_v32  ;;  %379 = vst [vmem:[%s9069_s29 + $0x184] sm:$0xf] %v378_v33  ;;  %v380_v34 = vld [vmem:[%s9065_s28 + $0x620] sm:$0xf] }
  0x55   : > { %v382_v35 = vld [vmem:[%s9065_s28 + $0x630] sm:$0xf]  ;;  %v384_v36 = vld [vmem:[%s9065_s28 + $0x640] sm:$0xf]  ;;  %381 = vst [vmem:[%s9069_s29 + $0x188] sm:$0xf] %v380_v34 }
  0x56   : > { %383 = vst [vmem:[%s9069_s29 + $0x18c] sm:$0xf] %v382_v35  ;;  %385 = vst [vmem:[%s9069_s29 + $0x190] sm:$0xf] %v384_v36  ;;  %v386_v37 = vld [vmem:[%s9065_s28 + $0x650] sm:$0xf] }
  0x57   : > { %v388_v38 = vld [vmem:[%s9065_s28 + $0x660] sm:$0xf]  ;;  %v390_v39 = vld [vmem:[%s9065_s28 + $0x670] sm:$0xf]  ;;  %387 = vst [vmem:[%s9069_s29 + $0x194] sm:$0xf] %v386_v37 }
  0x58   : > { %389 = vst [vmem:[%s9069_s29 + $0x198] sm:$0xf] %v388_v38  ;;  %391 = vst [vmem:[%s9069_s29 + $0x19c] sm:$0xf] %v390_v39  ;;  %v392_v40 = vld [vmem:[%s9065_s28 + $0x680] sm:$0xf] }
  0x59   : > { %v394_v41 = vld [vmem:[%s9065_s28 + $0x690] sm:$0xf]  ;;  %v396_v42 = vld [vmem:[%s9065_s28 + $0x6a0] sm:$0xf]  ;;  %393 = vst [vmem:[%s9069_s29 + $0x1a0] sm:$0xf] %v392_v40 }
  0x5a   : > { %395 = vst [vmem:[%s9069_s29 + $0x1a4] sm:$0xf] %v394_v41  ;;  %397 = vst [vmem:[%s9069_s29 + $0x1a8] sm:$0xf] %v396_v42  ;;  %v398_v43 = vld [vmem:[%s9065_s28 + $0x6b0] sm:$0xf] }
  0x5b   : > { %v400_v44 = vld [vmem:[%s9065_s28 + $0x6c0] sm:$0xf]  ;;  %v402_v45 = vld [vmem:[%s9065_s28 + $0x6d0] sm:$0xf]  ;;  %399 = vst [vmem:[%s9069_s29 + $0x1ac] sm:$0xf] %v398_v43 }
  0x5c   : > { %401 = vst [vmem:[%s9069_s29 + $0x1b0] sm:$0xf] %v400_v44  ;;  %403 = vst [vmem:[%s9069_s29 + $0x1b4] sm:$0xf] %v402_v45  ;;  %v404_v46 = vld [vmem:[%s9065_s28 + $0x6e0] sm:$0xf] }
  0x5d   : > { %v406_v47 = vld [vmem:[%s9065_s28 + $0x6f0] sm:$0xf]  ;;  %v408_v48 = vld [vmem:[%s9065_s28 + $0x700] sm:$0xf]  ;;  %405 = vst [vmem:[%s9069_s29 + $0x1b8] sm:$0xf] %v404_v46 }
  0x5e   : > { %407 = vst [vmem:[%s9069_s29 + $0x1bc] sm:$0xf] %v406_v47  ;;  %409 = vst [vmem:[%s9069_s29 + $0x1c0] sm:$0xf] %v408_v48  ;;  %v410_v49 = vld [vmem:[%s9065_s28 + $0x710] sm:$0xf] }
  0x5f   : > { %v412_v50 = vld [vmem:[%s9065_s28 + $0x720] sm:$0xf]  ;;  %v414_v51 = vld [vmem:[%s9065_s28 + $0x730] sm:$0xf]  ;;  %411 = vst [vmem:[%s9069_s29 + $0x1c4] sm:$0xf] %v410_v49 }
  0x60   : > { %413 = vst [vmem:[%s9069_s29 + $0x1c8] sm:$0xf] %v412_v50  ;;  %415 = vst [vmem:[%s9069_s29 + $0x1cc] sm:$0xf] %v414_v51  ;;  %v416_v52 = vld [vmem:[%s9065_s28 + $0x740] sm:$0xf] }
  0x61   : > { %v418_v53 = vld [vmem:[%s9065_s28 + $0x750] sm:$0xf]  ;;  %v420_v54 = vld [vmem:[%s9065_s28 + $0x760] sm:$0xf]  ;;  %417 = vst [vmem:[%s9069_s29 + $0x1d0] sm:$0xf] %v416_v52 }
  0x62   : > { %419 = vst [vmem:[%s9069_s29 + $0x1d4] sm:$0xf] %v418_v53  ;;  %421 = vst [vmem:[%s9069_s29 + $0x1d8] sm:$0xf] %v420_v54  ;;  %v422_v55 = vld [vmem:[%s9065_s28 + $0x770] sm:$0xf] }
  0x63   : > { %v424_v56 = vld [vmem:[%s9065_s28 + $0x780] sm:$0xf]  ;;  %v426_v57 = vld [vmem:[%s9065_s28 + $0x790] sm:$0xf]  ;;  %423 = vst [vmem:[%s9069_s29 + $0x1dc] sm:$0xf] %v422_v55 }
  0x64   : > { %425 = vst [vmem:[%s9069_s29 + $0x1e0] sm:$0xf] %v424_v56  ;;  %427 = vst [vmem:[%s9069_s29 + $0x1e4] sm:$0xf] %v426_v57  ;;  %v428_v58 = vld [vmem:[%s9065_s28 + $0x7a0] sm:$0xf] }
  0x65   : > { %v430_v59 = vld [vmem:[%s9065_s28 + $0x7b0] sm:$0xf]  ;;  %v432_v60 = vld [vmem:[%s9065_s28 + $0x7c0] sm:$0xf]  ;;  %429 = vst [vmem:[%s9069_s29 + $0x1e8] sm:$0xf] %v428_v58 }
  0x66   : > { %431 = vst [vmem:[%s9069_s29 + $0x1ec] sm:$0xf] %v430_v59  ;;  %433 = vst [vmem:[%s9069_s29 + $0x1f0] sm:$0xf] %v432_v60  ;;  %v434_v61 = vld [vmem:[%s9065_s28 + $0x7d0] sm:$0xf] }
  0x67   : > { %v436_v62 = vld [vmem:[%s9065_s28 + $0x7e0] sm:$0xf]  ;;  %v438_v63 = vld [vmem:[%s9065_s28 + $0x7f0] sm:$0xf]  ;;  %435 = vst [vmem:[%s9069_s29 + $0x1f4] sm:$0xf] %v434_v61 }
  0x68   : > { %437 = vst [vmem:[%s9069_s29 + $0x1f8] sm:$0xf] %v436_v62  ;;  %439 = vst [vmem:[%s9069_s29 + $0x1fc] sm:$0xf] %v438_v63  ;;  %v440_v0 = vld [vmem:[%s9065_s28 + $0x800] sm:$0xf] }
  0x69   : > { %v442_v1 = vld [vmem:[%s9065_s28 + $0x810] sm:$0xf]  ;;  %v444_v2 = vld [vmem:[%s9065_s28 + $0x820] sm:$0xf]  ;;  %441 = vst [vmem:[%s9069_s29 + $0x200] sm:$0xf] %v440_v0 }
  0x6a   : > { %443 = vst [vmem:[%s9069_s29 + $0x204] sm:$0xf] %v442_v1  ;;  %445 = vst [vmem:[%s9069_s29 + $0x208] sm:$0xf] %v444_v2  ;;  %v446_v3 = vld [vmem:[%s9065_s28 + $0x830] sm:$0xf] }
  0x6b   : > { %v448_v4 = vld [vmem:[%s9065_s28 + $0x840] sm:$0xf]  ;;  %v450_v5 = vld [vmem:[%s9065_s28 + $0x850] sm:$0xf]  ;;  %447 = vst [vmem:[%s9069_s29 + $0x20c] sm:$0xf] %v446_v3 }
  0x6c   : > { %449 = vst [vmem:[%s9069_s29 + $0x210] sm:$0xf] %v448_v4  ;;  %451 = vst [vmem:[%s9069_s29 + $0x214] sm:$0xf] %v450_v5  ;;  %v452_v6 = vld [vmem:[%s9065_s28 + $0x860] sm:$0xf] }
  0x6d   : > { %v454_v7 = vld [vmem:[%s9065_s28 + $0x870] sm:$0xf]  ;;  %v456_v8 = vld [vmem:[%s9065_s28 + $0x880] sm:$0xf]  ;;  %453 = vst [vmem:[%s9069_s29 + $0x218] sm:$0xf] %v452_v6 }
  0x6e   : > { %455 = vst [vmem:[%s9069_s29 + $0x21c] sm:$0xf] %v454_v7  ;;  %457 = vst [vmem:[%s9069_s29 + $0x220] sm:$0xf] %v456_v8  ;;  %v458_v9 = vld [vmem:[%s9065_s28 + $0x890] sm:$0xf] }
  0x6f   : > { %v460_v10 = vld [vmem:[%s9065_s28 + $0x8a0] sm:$0xf]  ;;  %v462_v11 = vld [vmem:[%s9065_s28 + $0x8b0] sm:$0xf]  ;;  %459 = vst [vmem:[%s9069_s29 + $0x224] sm:$0xf] %v458_v9 }
  0x70   : > { %461 = vst [vmem:[%s9069_s29 + $0x228] sm:$0xf] %v460_v10  ;;  %463 = vst [vmem:[%s9069_s29 + $0x22c] sm:$0xf] %v462_v11  ;;  %v464_v12 = vld [vmem:[%s9065_s28 + $0x8c0] sm:$0xf] }
  0x71   : > { %v466_v13 = vld [vmem:[%s9065_s28 + $0x8d0] sm:$0xf]  ;;  %v468_v14 = vld [vmem:[%s9065_s28 + $0x8e0] sm:$0xf]  ;;  %465 = vst [vmem:[%s9069_s29 + $0x230] sm:$0xf] %v464_v12 }
  0x72   : > { %467 = vst [vmem:[%s9069_s29 + $0x234] sm:$0xf] %v466_v13  ;;  %469 = vst [vmem:[%s9069_s29 + $0x238] sm:$0xf] %v468_v14  ;;  %v470_v15 = vld [vmem:[%s9065_s28 + $0x8f0] sm:$0xf] }
  0x73   : > { %v472_v16 = vld [vmem:[%s9065_s28 + $0x900] sm:$0xf]  ;;  %v474_v17 = vld [vmem:[%s9065_s28 + $0x910] sm:$0xf]  ;;  %471 = vst [vmem:[%s9069_s29 + $0x23c] sm:$0xf] %v470_v15 }
  0x74   : > { %473 = vst [vmem:[%s9069_s29 + $0x240] sm:$0xf] %v472_v16  ;;  %475 = vst [vmem:[%s9069_s29 + $0x244] sm:$0xf] %v474_v17  ;;  %v476_v18 = vld [vmem:[%s9065_s28 + $0x920] sm:$0xf] }
  0x75   : > { %v478_v19 = vld [vmem:[%s9065_s28 + $0x930] sm:$0xf]  ;;  %v480_v20 = vld [vmem:[%s9065_s28 + $0x940] sm:$0xf]  ;;  %477 = vst [vmem:[%s9069_s29 + $0x248] sm:$0xf] %v476_v18 }
  0x76   : > { %479 = vst [vmem:[%s9069_s29 + $0x24c] sm:$0xf] %v478_v19  ;;  %481 = vst [vmem:[%s9069_s29 + $0x250] sm:$0xf] %v480_v20  ;;  %v482_v21 = vld [vmem:[%s9065_s28 + $0x950] sm:$0xf] }
  0x77   : > { %v484_v22 = vld [vmem:[%s9065_s28 + $0x960] sm:$0xf]  ;;  %v486_v23 = vld [vmem:[%s9065_s28 + $0x970] sm:$0xf]  ;;  %483 = vst [vmem:[%s9069_s29 + $0x254] sm:$0xf] %v482_v21 }
  0x78   : > { %485 = vst [vmem:[%s9069_s29 + $0x258] sm:$0xf] %v484_v22  ;;  %487 = vst [vmem:[%s9069_s29 + $0x25c] sm:$0xf] %v486_v23  ;;  %v488_v24 = vld [vmem:[%s9065_s28 + $0x980] sm:$0xf] }
  0x79   : > { %v490_v25 = vld [vmem:[%s9065_s28 + $0x990] sm:$0xf]  ;;  %v492_v26 = vld [vmem:[%s9065_s28 + $0x9a0] sm:$0xf]  ;;  %489 = vst [vmem:[%s9069_s29 + $0x260] sm:$0xf] %v488_v24 }
  0x7a   : > { %491 = vst [vmem:[%s9069_s29 + $0x264] sm:$0xf] %v490_v25  ;;  %493 = vst [vmem:[%s9069_s29 + $0x268] sm:$0xf] %v492_v26  ;;  %v494_v27 = vld [vmem:[%s9065_s28 + $0x9b0] sm:$0xf] }
  0x7b   : > { %v496_v28 = vld [vmem:[%s9065_s28 + $0x9c0] sm:$0xf]  ;;  %v498_v29 = vld [vmem:[%s9065_s28 + $0x9d0] sm:$0xf]  ;;  %495 = vst [vmem:[%s9069_s29 + $0x26c] sm:$0xf] %v494_v27 }
  0x7c   : > { %497 = vst [vmem:[%s9069_s29 + $0x270] sm:$0xf] %v496_v28  ;;  %499 = vst [vmem:[%s9069_s29 + $0x274] sm:$0xf] %v498_v29  ;;  %v500_v30 = vld [vmem:[%s9065_s28 + $0x9e0] sm:$0xf] }
  0x7d   : > { %v502_v31 = vld [vmem:[%s9065_s28 + $0x9f0] sm:$0xf]  ;;  %v504_v32 = vld [vmem:[%s9065_s28 + $0xa00] sm:$0xf]  ;;  %501 = vst [vmem:[%s9069_s29 + $0x278] sm:$0xf] %v500_v30 }
  0x7e   : > { %503 = vst [vmem:[%s9069_s29 + $0x27c] sm:$0xf] %v502_v31  ;;  %505 = vst [vmem:[%s9069_s29 + $0x280] sm:$0xf] %v504_v32  ;;  %v506_v33 = vld [vmem:[%s9065_s28 + $0xa10] sm:$0xf] }
  0x7f   : > { %v508_v34 = vld [vmem:[%s9065_s28 + $0xa20] sm:$0xf]  ;;  %v510_v35 = vld [vmem:[%s9065_s28 + $0xa30] sm:$0xf]  ;;  %507 = vst [vmem:[%s9069_s29 + $0x284] sm:$0xf] %v506_v33 }
  0x80   : > { %509 = vst [vmem:[%s9069_s29 + $0x288] sm:$0xf] %v508_v34  ;;  %511 = vst [vmem:[%s9069_s29 + $0x28c] sm:$0xf] %v510_v35  ;;  %v512_v36 = vld [vmem:[%s9065_s28 + $0xa40] sm:$0xf] }
  0x81   : > { %v514_v37 = vld [vmem:[%s9065_s28 + $0xa50] sm:$0xf]  ;;  %v516_v38 = vld [vmem:[%s9065_s28 + $0xa60] sm:$0xf]  ;;  %513 = vst [vmem:[%s9069_s29 + $0x290] sm:$0xf] %v512_v36 }
  0x82   : > { %515 = vst [vmem:[%s9069_s29 + $0x294] sm:$0xf] %v514_v37  ;;  %517 = vst [vmem:[%s9069_s29 + $0x298] sm:$0xf] %v516_v38  ;;  %v518_v39 = vld [vmem:[%s9065_s28 + $0xa70] sm:$0xf] }
  0x83   : > { %v520_v40 = vld [vmem:[%s9065_s28 + $0xa80] sm:$0xf]  ;;  %v522_v41 = vld [vmem:[%s9065_s28 + $0xa90] sm:$0xf]  ;;  %519 = vst [vmem:[%s9069_s29 + $0x29c] sm:$0xf] %v518_v39 }
  0x84   : > { %521 = vst [vmem:[%s9069_s29 + $0x2a0] sm:$0xf] %v520_v40  ;;  %523 = vst [vmem:[%s9069_s29 + $0x2a4] sm:$0xf] %v522_v41  ;;  %v524_v42 = vld [vmem:[%s9065_s28 + $0xaa0] sm:$0xf] }
  0x85   : > { %v526_v43 = vld [vmem:[%s9065_s28 + $0xab0] sm:$0xf]  ;;  %v528_v44 = vld [vmem:[%s9065_s28 + $0xac0] sm:$0xf]  ;;  %525 = vst [vmem:[%s9069_s29 + $0x2a8] sm:$0xf] %v524_v42 }
  0x86   : > { %527 = vst [vmem:[%s9069_s29 + $0x2ac] sm:$0xf] %v526_v43  ;;  %529 = vst [vmem:[%s9069_s29 + $0x2b0] sm:$0xf] %v528_v44  ;;  %v530_v45 = vld [vmem:[%s9065_s28 + $0xad0] sm:$0xf] }
  0x87   : > { %v532_v46 = vld [vmem:[%s9065_s28 + $0xae0] sm:$0xf]  ;;  %v534_v47 = vld [vmem:[%s9065_s28 + $0xaf0] sm:$0xf]  ;;  %531 = vst [vmem:[%s9069_s29 + $0x2b4] sm:$0xf] %v530_v45 }
  0x88   : > { %533 = vst [vmem:[%s9069_s29 + $0x2b8] sm:$0xf] %v532_v46  ;;  %535 = vst [vmem:[%s9069_s29 + $0x2bc] sm:$0xf] %v534_v47  ;;  %v536_v48 = vld [vmem:[%s9065_s28 + $0xb00] sm:$0xf] }
  0x89   : > { %v538_v49 = vld [vmem:[%s9065_s28 + $0xb10] sm:$0xf]  ;;  %v540_v50 = vld [vmem:[%s9065_s28 + $0xb20] sm:$0xf]  ;;  %537 = vst [vmem:[%s9069_s29 + $0x2c0] sm:$0xf] %v536_v48 }
  0x8a   : > { %539 = vst [vmem:[%s9069_s29 + $0x2c4] sm:$0xf] %v538_v49  ;;  %541 = vst [vmem:[%s9069_s29 + $0x2c8] sm:$0xf] %v540_v50  ;;  %v542_v51 = vld [vmem:[%s9065_s28 + $0xb30] sm:$0xf] }
  0x8b   : > { %v544_v52 = vld [vmem:[%s9065_s28 + $0xb40] sm:$0xf]  ;;  %v546_v53 = vld [vmem:[%s9065_s28 + $0xb50] sm:$0xf]  ;;  %543 = vst [vmem:[%s9069_s29 + $0x2cc] sm:$0xf] %v542_v51 }
  0x8c   : > { %545 = vst [vmem:[%s9069_s29 + $0x2d0] sm:$0xf] %v544_v52  ;;  %547 = vst [vmem:[%s9069_s29 + $0x2d4] sm:$0xf] %v546_v53  ;;  %v548_v54 = vld [vmem:[%s9065_s28 + $0xb60] sm:$0xf] }
  0x8d   : > { %v550_v55 = vld [vmem:[%s9065_s28 + $0xb70] sm:$0xf]  ;;  %v552_v56 = vld [vmem:[%s9065_s28 + $0xb80] sm:$0xf]  ;;  %549 = vst [vmem:[%s9069_s29 + $0x2d8] sm:$0xf] %v548_v54 }
  0x8e   : > { %551 = vst [vmem:[%s9069_s29 + $0x2dc] sm:$0xf] %v550_v55  ;;  %553 = vst [vmem:[%s9069_s29 + $0x2e0] sm:$0xf] %v552_v56  ;;  %v554_v57 = vld [vmem:[%s9065_s28 + $0xb90] sm:$0xf] }
  0x8f   : > { %v556_v58 = vld [vmem:[%s9065_s28 + $0xba0] sm:$0xf]  ;;  %v558_v59 = vld [vmem:[%s9065_s28 + $0xbb0] sm:$0xf]  ;;  %555 = vst [vmem:[%s9069_s29 + $0x2e4] sm:$0xf] %v554_v57 }
  0x90   : > { %557 = vst [vmem:[%s9069_s29 + $0x2e8] sm:$0xf] %v556_v58  ;;  %559 = vst [vmem:[%s9069_s29 + $0x2ec] sm:$0xf] %v558_v59  ;;  %v560_v60 = vld [vmem:[%s9065_s28 + $0xbc0] sm:$0xf] }
  0x91   : > { %v562_v61 = vld [vmem:[%s9065_s28 + $0xbd0] sm:$0xf]  ;;  %v564_v62 = vld [vmem:[%s9065_s28 + $0xbe0] sm:$0xf]  ;;  %561 = vst [vmem:[%s9069_s29 + $0x2f0] sm:$0xf] %v560_v60 }
  0x92   : > { %563 = vst [vmem:[%s9069_s29 + $0x2f4] sm:$0xf] %v562_v61  ;;  %565 = vst [vmem:[%s9069_s29 + $0x2f8] sm:$0xf] %v564_v62  ;;  %v566_v63 = vld [vmem:[%s9065_s28 + $0xbf0] sm:$0xf] }
  0x93   : > { %v568_v0 = vld [vmem:[%s9065_s28 + $0xc00] sm:$0xf]  ;;  %v570_v1 = vld [vmem:[%s9065_s28 + $0xc10] sm:$0xf]  ;;  %567 = vst [vmem:[%s9069_s29 + $0x2fc] sm:$0xf] %v566_v63 }
  0x94   : > { %569 = vst [vmem:[%s9069_s29 + $0x300] sm:$0xf] %v568_v0  ;;  %571 = vst [vmem:[%s9069_s29 + $0x304] sm:$0xf] %v570_v1  ;;  %v572_v2 = vld [vmem:[%s9065_s28 + $0xc20] sm:$0xf] }
  0x95   : > { %v574_v3 = vld [vmem:[%s9065_s28 + $0xc30] sm:$0xf]  ;;  %v576_v4 = vld [vmem:[%s9065_s28 + $0xc40] sm:$0xf]  ;;  %573 = vst [vmem:[%s9069_s29 + $0x308] sm:$0xf] %v572_v2 }
  0x96   : > { %575 = vst [vmem:[%s9069_s29 + $0x30c] sm:$0xf] %v574_v3  ;;  %577 = vst [vmem:[%s9069_s29 + $0x310] sm:$0xf] %v576_v4  ;;  %v578_v5 = vld [vmem:[%s9065_s28 + $0xc50] sm:$0xf] }
  0x97   : > { %v580_v6 = vld [vmem:[%s9065_s28 + $0xc60] sm:$0xf]  ;;  %v582_v7 = vld [vmem:[%s9065_s28 + $0xc70] sm:$0xf]  ;;  %579 = vst [vmem:[%s9069_s29 + $0x314] sm:$0xf] %v578_v5 }
  0x98   : > { %581 = vst [vmem:[%s9069_s29 + $0x318] sm:$0xf] %v580_v6  ;;  %583 = vst [vmem:[%s9069_s29 + $0x31c] sm:$0xf] %v582_v7  ;;  %v584_v8 = vld [vmem:[%s9065_s28 + $0xc80] sm:$0xf] }
  0x99   : > { %v586_v9 = vld [vmem:[%s9065_s28 + $0xc90] sm:$0xf]  ;;  %v588_v10 = vld [vmem:[%s9065_s28 + $0xca0] sm:$0xf]  ;;  %585 = vst [vmem:[%s9069_s29 + $0x320] sm:$0xf] %v584_v8 }
  0x9a   : > { %587 = vst [vmem:[%s9069_s29 + $0x324] sm:$0xf] %v586_v9  ;;  %589 = vst [vmem:[%s9069_s29 + $0x328] sm:$0xf] %v588_v10  ;;  %v590_v11 = vld [vmem:[%s9065_s28 + $0xcb0] sm:$0xf] }
  0x9b   : > { %v592_v12 = vld [vmem:[%s9065_s28 + $0xcc0] sm:$0xf]  ;;  %v594_v13 = vld [vmem:[%s9065_s28 + $0xcd0] sm:$0xf]  ;;  %591 = vst [vmem:[%s9069_s29 + $0x32c] sm:$0xf] %v590_v11 }
  0x9c   : > { %593 = vst [vmem:[%s9069_s29 + $0x330] sm:$0xf] %v592_v12  ;;  %595 = vst [vmem:[%s9069_s29 + $0x334] sm:$0xf] %v594_v13  ;;  %v596_v14 = vld [vmem:[%s9065_s28 + $0xce0] sm:$0xf] }
  0x9d   : > { %v598_v15 = vld [vmem:[%s9065_s28 + $0xcf0] sm:$0xf]  ;;  %v600_v16 = vld [vmem:[%s9065_s28 + $0xd00] sm:$0xf]  ;;  %597 = vst [vmem:[%s9069_s29 + $0x338] sm:$0xf] %v596_v14 }
  0x9e   : > { %599 = vst [vmem:[%s9069_s29 + $0x33c] sm:$0xf] %v598_v15  ;;  %601 = vst [vmem:[%s9069_s29 + $0x340] sm:$0xf] %v600_v16  ;;  %v602_v17 = vld [vmem:[%s9065_s28 + $0xd10] sm:$0xf] }
  0x9f   : > { %v604_v18 = vld [vmem:[%s9065_s28 + $0xd20] sm:$0xf]  ;;  %v606_v19 = vld [vmem:[%s9065_s28 + $0xd30] sm:$0xf]  ;;  %603 = vst [vmem:[%s9069_s29 + $0x344] sm:$0xf] %v602_v17 }
  0xa0   : > { %605 = vst [vmem:[%s9069_s29 + $0x348] sm:$0xf] %v604_v18  ;;  %607 = vst [vmem:[%s9069_s29 + $0x34c] sm:$0xf] %v606_v19  ;;  %v608_v20 = vld [vmem:[%s9065_s28 + $0xd40] sm:$0xf] }
  0xa1   : > { %v610_v21 = vld [vmem:[%s9065_s28 + $0xd50] sm:$0xf]  ;;  %v612_v22 = vld [vmem:[%s9065_s28 + $0xd60] sm:$0xf]  ;;  %609 = vst [vmem:[%s9069_s29 + $0x350] sm:$0xf] %v608_v20 }
  0xa2   : > { %611 = vst [vmem:[%s9069_s29 + $0x354] sm:$0xf] %v610_v21  ;;  %613 = vst [vmem:[%s9069_s29 + $0x358] sm:$0xf] %v612_v22  ;;  %v614_v23 = vld [vmem:[%s9065_s28 + $0xd70] sm:$0xf] }
  0xa3   : > { %v616_v24 = vld [vmem:[%s9065_s28 + $0xd80] sm:$0xf]  ;;  %v618_v25 = vld [vmem:[%s9065_s28 + $0xd90] sm:$0xf]  ;;  %615 = vst [vmem:[%s9069_s29 + $0x35c] sm:$0xf] %v614_v23 }
  0xa4   : > { %617 = vst [vmem:[%s9069_s29 + $0x360] sm:$0xf] %v616_v24  ;;  %619 = vst [vmem:[%s9069_s29 + $0x364] sm:$0xf] %v618_v25  ;;  %v620_v26 = vld [vmem:[%s9065_s28 + $0xda0] sm:$0xf] }
  0xa5   : > { %v622_v27 = vld [vmem:[%s9065_s28 + $0xdb0] sm:$0xf]  ;;  %v624_v28 = vld [vmem:[%s9065_s28 + $0xdc0] sm:$0xf]  ;;  %621 = vst [vmem:[%s9069_s29 + $0x368] sm:$0xf] %v620_v26 }
  0xa6   : > { %623 = vst [vmem:[%s9069_s29 + $0x36c] sm:$0xf] %v622_v27  ;;  %625 = vst [vmem:[%s9069_s29 + $0x370] sm:$0xf] %v624_v28  ;;  %v626_v29 = vld [vmem:[%s9065_s28 + $0xdd0] sm:$0xf] }
  0xa7   : > { %v628_v30 = vld [vmem:[%s9065_s28 + $0xde0] sm:$0xf]  ;;  %v630_v31 = vld [vmem:[%s9065_s28 + $0xdf0] sm:$0xf]  ;;  %627 = vst [vmem:[%s9069_s29 + $0x374] sm:$0xf] %v626_v29 }
  0xa8   : > { %629 = vst [vmem:[%s9069_s29 + $0x378] sm:$0xf] %v628_v30  ;;  %631 = vst [vmem:[%s9069_s29 + $0x37c] sm:$0xf] %v630_v31  ;;  %v632_v32 = vld [vmem:[%s9065_s28 + $0xe00] sm:$0xf] }
  0xa9   : > { %v634_v33 = vld [vmem:[%s9065_s28 + $0xe10] sm:$0xf]  ;;  %v636_v34 = vld [vmem:[%s9065_s28 + $0xe20] sm:$0xf]  ;;  %633 = vst [vmem:[%s9069_s29 + $0x380] sm:$0xf] %v632_v32 }
  0xaa   : > { %635 = vst [vmem:[%s9069_s29 + $0x384] sm:$0xf] %v634_v33  ;;  %637 = vst [vmem:[%s9069_s29 + $0x388] sm:$0xf] %v636_v34  ;;  %v638_v35 = vld [vmem:[%s9065_s28 + $0xe30] sm:$0xf] }
  0xab   : > { %v640_v36 = vld [vmem:[%s9065_s28 + $0xe40] sm:$0xf]  ;;  %v642_v37 = vld [vmem:[%s9065_s28 + $0xe50] sm:$0xf]  ;;  %639 = vst [vmem:[%s9069_s29 + $0x38c] sm:$0xf] %v638_v35 }
  0xac   : > { %641 = vst [vmem:[%s9069_s29 + $0x390] sm:$0xf] %v640_v36  ;;  %643 = vst [vmem:[%s9069_s29 + $0x394] sm:$0xf] %v642_v37  ;;  %v644_v38 = vld [vmem:[%s9065_s28 + $0xe60] sm:$0xf] }
  0xad   : > { %v646_v39 = vld [vmem:[%s9065_s28 + $0xe70] sm:$0xf]  ;;  %v648_v40 = vld [vmem:[%s9065_s28 + $0xe80] sm:$0xf]  ;;  %645 = vst [vmem:[%s9069_s29 + $0x398] sm:$0xf] %v644_v38 }
  0xae   : > { %647 = vst [vmem:[%s9069_s29 + $0x39c] sm:$0xf] %v646_v39  ;;  %649 = vst [vmem:[%s9069_s29 + $0x3a0] sm:$0xf] %v648_v40  ;;  %v650_v41 = vld [vmem:[%s9065_s28 + $0xe90] sm:$0xf] }
  0xaf   : > { %v652_v42 = vld [vmem:[%s9065_s28 + $0xea0] sm:$0xf]  ;;  %v654_v43 = vld [vmem:[%s9065_s28 + $0xeb0] sm:$0xf]  ;;  %651 = vst [vmem:[%s9069_s29 + $0x3a4] sm:$0xf] %v650_v41 }
  0xb0   : > { %653 = vst [vmem:[%s9069_s29 + $0x3a8] sm:$0xf] %v652_v42  ;;  %655 = vst [vmem:[%s9069_s29 + $0x3ac] sm:$0xf] %v654_v43  ;;  %v656_v44 = vld [vmem:[%s9065_s28 + $0xec0] sm:$0xf] }
  0xb1   : > { %v658_v45 = vld [vmem:[%s9065_s28 + $0xed0] sm:$0xf]  ;;  %v660_v46 = vld [vmem:[%s9065_s28 + $0xee0] sm:$0xf]  ;;  %657 = vst [vmem:[%s9069_s29 + $0x3b0] sm:$0xf] %v656_v44 }
  0xb2   : > { %659 = vst [vmem:[%s9069_s29 + $0x3b4] sm:$0xf] %v658_v45  ;;  %661 = vst [vmem:[%s9069_s29 + $0x3b8] sm:$0xf] %v660_v46  ;;  %v662_v47 = vld [vmem:[%s9065_s28 + $0xef0] sm:$0xf] }
  0xb3   : > { %v664_v48 = vld [vmem:[%s9065_s28 + $0xf00] sm:$0xf]  ;;  %v666_v49 = vld [vmem:[%s9065_s28 + $0xf10] sm:$0xf]  ;;  %663 = vst [vmem:[%s9069_s29 + $0x3bc] sm:$0xf] %v662_v47 }
  0xb4   : > { %665 = vst [vmem:[%s9069_s29 + $0x3c0] sm:$0xf] %v664_v48  ;;  %667 = vst [vmem:[%s9069_s29 + $0x3c4] sm:$0xf] %v666_v49  ;;  %v668_v50 = vld [vmem:[%s9065_s28 + $0xf20] sm:$0xf] }
  0xb5   : > { %v670_v51 = vld [vmem:[%s9065_s28 + $0xf30] sm:$0xf]  ;;  %v672_v52 = vld [vmem:[%s9065_s28 + $0xf40] sm:$0xf]  ;;  %669 = vst [vmem:[%s9069_s29 + $0x3c8] sm:$0xf] %v668_v50 }
  0xb6   : > { %671 = vst [vmem:[%s9069_s29 + $0x3cc] sm:$0xf] %v670_v51  ;;  %673 = vst [vmem:[%s9069_s29 + $0x3d0] sm:$0xf] %v672_v52  ;;  %v674_v53 = vld [vmem:[%s9065_s28 + $0xf50] sm:$0xf] }
  0xb7   : > { %v676_v54 = vld [vmem:[%s9065_s28 + $0xf60] sm:$0xf]  ;;  %v678_v55 = vld [vmem:[%s9065_s28 + $0xf70] sm:$0xf]  ;;  %675 = vst [vmem:[%s9069_s29 + $0x3d4] sm:$0xf] %v674_v53 }
  0xb8   : > { %677 = vst [vmem:[%s9069_s29 + $0x3d8] sm:$0xf] %v676_v54  ;;  %679 = vst [vmem:[%s9069_s29 + $0x3dc] sm:$0xf] %v678_v55  ;;  %v680_v56 = vld [vmem:[%s9065_s28 + $0xf80] sm:$0xf] }
  0xb9   : > { %v682_v57 = vld [vmem:[%s9065_s28 + $0xf90] sm:$0xf]  ;;  %v684_v58 = vld [vmem:[%s9065_s28 + $0xfa0] sm:$0xf]  ;;  %681 = vst [vmem:[%s9069_s29 + $0x3e0] sm:$0xf] %v680_v56 }
  0xba   : > { %683 = vst [vmem:[%s9069_s29 + $0x3e4] sm:$0xf] %v682_v57  ;;  %685 = vst [vmem:[%s9069_s29 + $0x3e8] sm:$0xf] %v684_v58  ;;  %v686_v59 = vld [vmem:[%s9065_s28 + $0xfb0] sm:$0xf] }
  0xbb   : > { %v688_v60 = vld [vmem:[%s9065_s28 + $0xfc0] sm:$0xf]  ;;  %v690_v61 = vld [vmem:[%s9065_s28 + $0xfd0] sm:$0xf]  ;;  %687 = vst [vmem:[%s9069_s29 + $0x3ec] sm:$0xf] %v686_v59 }
  0xbc   : > { %689 = vst [vmem:[%s9069_s29 + $0x3f0] sm:$0xf] %v688_v60  ;;  %691 = vst [vmem:[%s9069_s29 + $0x3f4] sm:$0xf] %v690_v61  ;;  %v692_v62 = vld [vmem:[%s9065_s28 + $0xfe0] sm:$0xf] }
  0xbd   : > { %v694_v63 = vld [vmem:[%s9065_s28 + $0xff0] sm:$0xf]  ;;  %v696_v0 = vld [vmem:[%s9065_s28 + $0x1000] sm:$0xf]  ;;  %693 = vst [vmem:[%s9069_s29 + $0x3f8] sm:$0xf] %v692_v62 }
  0xbe   : > { %695 = vst [vmem:[%s9069_s29 + $0x3fc] sm:$0xf] %v694_v63  ;;  %697 = vst [vmem:[%s9069_s29 + $0x400] sm:$0xf] %v696_v0  ;;  %v698_v1 = vld [vmem:[%s9065_s28 + $0x1010] sm:$0xf] }
  0xbf   : > { %v700_v2 = vld [vmem:[%s9065_s28 + $0x1020] sm:$0xf]  ;;  %v702_v3 = vld [vmem:[%s9065_s28 + $0x1030] sm:$0xf]  ;;  %699 = vst [vmem:[%s9069_s29 + $0x404] sm:$0xf] %v698_v1 }
  0xc0   : > { %701 = vst [vmem:[%s9069_s29 + $0x408] sm:$0xf] %v700_v2  ;;  %703 = vst [vmem:[%s9069_s29 + $0x40c] sm:$0xf] %v702_v3  ;;  %v704_v4 = vld [vmem:[%s9065_s28 + $0x1040] sm:$0xf] }
  0xc1   : > { %v706_v5 = vld [vmem:[%s9065_s28 + $0x1050] sm:$0xf]  ;;  %v708_v6 = vld [vmem:[%s9065_s28 + $0x1060] sm:$0xf]  ;;  %705 = vst [vmem:[%s9069_s29 + $0x410] sm:$0xf] %v704_v4 }
  0xc2   : > { %707 = vst [vmem:[%s9069_s29 + $0x414] sm:$0xf] %v706_v5  ;;  %709 = vst [vmem:[%s9069_s29 + $0x418] sm:$0xf] %v708_v6  ;;  %v710_v7 = vld [vmem:[%s9065_s28 + $0x1070] sm:$0xf] }
  0xc3   : > { %v712_v8 = vld [vmem:[%s9065_s28 + $0x1080] sm:$0xf]  ;;  %v714_v9 = vld [vmem:[%s9065_s28 + $0x1090] sm:$0xf]  ;;  %711 = vst [vmem:[%s9069_s29 + $0x41c] sm:$0xf] %v710_v7 }
  0xc4   : > { %713 = vst [vmem:[%s9069_s29 + $0x420] sm:$0xf] %v712_v8  ;;  %715 = vst [vmem:[%s9069_s29 + $0x424] sm:$0xf] %v714_v9  ;;  %v716_v10 = vld [vmem:[%s9065_s28 + $0x10a0] sm:$0xf] }
  0xc5   : > { %v718_v11 = vld [vmem:[%s9065_s28 + $0x10b0] sm:$0xf]  ;;  %v720_v12 = vld [vmem:[%s9065_s28 + $0x10c0] sm:$0xf]  ;;  %717 = vst [vmem:[%s9069_s29 + $0x428] sm:$0xf] %v716_v10 }
  0xc6   : > { %719 = vst [vmem:[%s9069_s29 + $0x42c] sm:$0xf] %v718_v11  ;;  %721 = vst [vmem:[%s9069_s29 + $0x430] sm:$0xf] %v720_v12  ;;  %v722_v13 = vld [vmem:[%s9065_s28 + $0x10d0] sm:$0xf] }
  0xc7   : > { %v724_v14 = vld [vmem:[%s9065_s28 + $0x10e0] sm:$0xf]  ;;  %v726_v15 = vld [vmem:[%s9065_s28 + $0x10f0] sm:$0xf]  ;;  %723 = vst [vmem:[%s9069_s29 + $0x434] sm:$0xf] %v722_v13 }
  0xc8   : > { %725 = vst [vmem:[%s9069_s29 + $0x438] sm:$0xf] %v724_v14  ;;  %727 = vst [vmem:[%s9069_s29 + $0x43c] sm:$0xf] %v726_v15  ;;  %v728_v16 = vld [vmem:[%s9065_s28 + $0x1100] sm:$0xf] }
  0xc9   : > { %v730_v17 = vld [vmem:[%s9065_s28 + $0x1110] sm:$0xf]  ;;  %v732_v18 = vld [vmem:[%s9065_s28 + $0x1120] sm:$0xf]  ;;  %729 = vst [vmem:[%s9069_s29 + $0x440] sm:$0xf] %v728_v16 }
  0xca   : > { %731 = vst [vmem:[%s9069_s29 + $0x444] sm:$0xf] %v730_v17  ;;  %733 = vst [vmem:[%s9069_s29 + $0x448] sm:$0xf] %v732_v18  ;;  %v734_v19 = vld [vmem:[%s9065_s28 + $0x1130] sm:$0xf] }
  0xcb   : > { %v736_v20 = vld [vmem:[%s9065_s28 + $0x1140] sm:$0xf]  ;;  %v738_v21 = vld [vmem:[%s9065_s28 + $0x1150] sm:$0xf]  ;;  %735 = vst [vmem:[%s9069_s29 + $0x44c] sm:$0xf] %v734_v19 }
  0xcc   : > { %737 = vst [vmem:[%s9069_s29 + $0x450] sm:$0xf] %v736_v20  ;;  %739 = vst [vmem:[%s9069_s29 + $0x454] sm:$0xf] %v738_v21  ;;  %v740_v22 = vld [vmem:[%s9065_s28 + $0x1160] sm:$0xf] }
  0xcd   : > { %v742_v23 = vld [vmem:[%s9065_s28 + $0x1170] sm:$0xf]  ;;  %v744_v24 = vld [vmem:[%s9065_s28 + $0x1180] sm:$0xf]  ;;  %741 = vst [vmem:[%s9069_s29 + $0x458] sm:$0xf] %v740_v22 }
  0xce   : > { %743 = vst [vmem:[%s9069_s29 + $0x45c] sm:$0xf] %v742_v23  ;;  %745 = vst [vmem:[%s9069_s29 + $0x460] sm:$0xf] %v744_v24  ;;  %v746_v25 = vld [vmem:[%s9065_s28 + $0x1190] sm:$0xf] }
  0xcf   : > { %v748_v26 = vld [vmem:[%s9065_s28 + $0x11a0] sm:$0xf]  ;;  %v750_v27 = vld [vmem:[%s9065_s28 + $0x11b0] sm:$0xf]  ;;  %747 = vst [vmem:[%s9069_s29 + $0x464] sm:$0xf] %v746_v25 }
  0xd0   : > { %749 = vst [vmem:[%s9069_s29 + $0x468] sm:$0xf] %v748_v26  ;;  %751 = vst [vmem:[%s9069_s29 + $0x46c] sm:$0xf] %v750_v27  ;;  %v752_v28 = vld [vmem:[%s9065_s28 + $0x11c0] sm:$0xf] }
  0xd1   : > { %v754_v29 = vld [vmem:[%s9065_s28 + $0x11d0] sm:$0xf]  ;;  %v756_v30 = vld [vmem:[%s9065_s28 + $0x11e0] sm:$0xf]  ;;  %753 = vst [vmem:[%s9069_s29 + $0x470] sm:$0xf] %v752_v28 }
  0xd2   : > { %755 = vst [vmem:[%s9069_s29 + $0x474] sm:$0xf] %v754_v29  ;;  %757 = vst [vmem:[%s9069_s29 + $0x478] sm:$0xf] %v756_v30  ;;  %v758_v31 = vld [vmem:[%s9065_s28 + $0x11f0] sm:$0xf] }
  0xd3   : > { %v760_v32 = vld [vmem:[%s9065_s28 + $0x1200] sm:$0xf]  ;;  %v762_v33 = vld [vmem:[%s9065_s28 + $0x1210] sm:$0xf]  ;;  %759 = vst [vmem:[%s9069_s29 + $0x47c] sm:$0xf] %v758_v31 }
  0xd4   : > { %761 = vst [vmem:[%s9069_s29 + $0x480] sm:$0xf] %v760_v32  ;;  %763 = vst [vmem:[%s9069_s29 + $0x484] sm:$0xf] %v762_v33  ;;  %v764_v34 = vld [vmem:[%s9065_s28 + $0x1220] sm:$0xf] }
  0xd5   : > { %v766_v35 = vld [vmem:[%s9065_s28 + $0x1230] sm:$0xf]  ;;  %v768_v36 = vld [vmem:[%s9065_s28 + $0x1240] sm:$0xf]  ;;  %765 = vst [vmem:[%s9069_s29 + $0x488] sm:$0xf] %v764_v34 }
  0xd6   : > { %767 = vst [vmem:[%s9069_s29 + $0x48c] sm:$0xf] %v766_v35  ;;  %769 = vst [vmem:[%s9069_s29 + $0x490] sm:$0xf] %v768_v36  ;;  %v770_v37 = vld [vmem:[%s9065_s28 + $0x1250] sm:$0xf] }
  0xd7   : > { %v772_v38 = vld [vmem:[%s9065_s28 + $0x1260] sm:$0xf]  ;;  %v774_v39 = vld [vmem:[%s9065_s28 + $0x1270] sm:$0xf]  ;;  %771 = vst [vmem:[%s9069_s29 + $0x494] sm:$0xf] %v770_v37 }
  0xd8   : > { %773 = vst [vmem:[%s9069_s29 + $0x498] sm:$0xf] %v772_v38  ;;  %775 = vst [vmem:[%s9069_s29 + $0x49c] sm:$0xf] %v774_v39  ;;  %v776_v40 = vld [vmem:[%s9065_s28 + $0x1280] sm:$0xf] }
  0xd9   : > { %v778_v41 = vld [vmem:[%s9065_s28 + $0x1290] sm:$0xf]  ;;  %v780_v42 = vld [vmem:[%s9065_s28 + $0x12a0] sm:$0xf]  ;;  %777 = vst [vmem:[%s9069_s29 + $0x4a0] sm:$0xf] %v776_v40 }
  0xda   : > { %779 = vst [vmem:[%s9069_s29 + $0x4a4] sm:$0xf] %v778_v41  ;;  %781 = vst [vmem:[%s9069_s29 + $0x4a8] sm:$0xf] %v780_v42  ;;  %v782_v43 = vld [vmem:[%s9065_s28 + $0x12b0] sm:$0xf] }
  0xdb   : > { %v784_v44 = vld [vmem:[%s9065_s28 + $0x12c0] sm:$0xf]  ;;  %v786_v45 = vld [vmem:[%s9065_s28 + $0x12d0] sm:$0xf]  ;;  %783 = vst [vmem:[%s9069_s29 + $0x4ac] sm:$0xf] %v782_v43 }
  0xdc   : > { %785 = vst [vmem:[%s9069_s29 + $0x4b0] sm:$0xf] %v784_v44  ;;  %787 = vst [vmem:[%s9069_s29 + $0x4b4] sm:$0xf] %v786_v45  ;;  %v788_v46 = vld [vmem:[%s9065_s28 + $0x12e0] sm:$0xf] }
  0xdd   : > { %v790_v47 = vld [vmem:[%s9065_s28 + $0x12f0] sm:$0xf]  ;;  %v792_v48 = vld [vmem:[%s9065_s28 + $0x1300] sm:$0xf]  ;;  %789 = vst [vmem:[%s9069_s29 + $0x4b8] sm:$0xf] %v788_v46 }
  0xde   : > { %791 = vst [vmem:[%s9069_s29 + $0x4bc] sm:$0xf] %v790_v47  ;;  %793 = vst [vmem:[%s9069_s29 + $0x4c0] sm:$0xf] %v792_v48  ;;  %v794_v49 = vld [vmem:[%s9065_s28 + $0x1310] sm:$0xf] }
  0xdf   : > { %v796_v50 = vld [vmem:[%s9065_s28 + $0x1320] sm:$0xf]  ;;  %v798_v51 = vld [vmem:[%s9065_s28 + $0x1330] sm:$0xf]  ;;  %795 = vst [vmem:[%s9069_s29 + $0x4c4] sm:$0xf] %v794_v49 }
  0xe0   : > { %797 = vst [vmem:[%s9069_s29 + $0x4c8] sm:$0xf] %v796_v50  ;;  %799 = vst [vmem:[%s9069_s29 + $0x4cc] sm:$0xf] %v798_v51  ;;  %v800_v52 = vld [vmem:[%s9065_s28 + $0x1340] sm:$0xf] }
  0xe1   : > { %v802_v53 = vld [vmem:[%s9065_s28 + $0x1350] sm:$0xf]  ;;  %v804_v54 = vld [vmem:[%s9065_s28 + $0x1360] sm:$0xf]  ;;  %801 = vst [vmem:[%s9069_s29 + $0x4d0] sm:$0xf] %v800_v52 }
  0xe2   : > { %803 = vst [vmem:[%s9069_s29 + $0x4d4] sm:$0xf] %v802_v53  ;;  %805 = vst [vmem:[%s9069_s29 + $0x4d8] sm:$0xf] %v804_v54  ;;  %v806_v55 = vld [vmem:[%s9065_s28 + $0x1370] sm:$0xf] }
  0xe3   : > { %v808_v56 = vld [vmem:[%s9065_s28 + $0x1380] sm:$0xf]  ;;  %v810_v57 = vld [vmem:[%s9065_s28 + $0x1390] sm:$0xf]  ;;  %807 = vst [vmem:[%s9069_s29 + $0x4dc] sm:$0xf] %v806_v55 }
  0xe4   : > { %809 = vst [vmem:[%s9069_s29 + $0x4e0] sm:$0xf] %v808_v56  ;;  %811 = vst [vmem:[%s9069_s29 + $0x4e4] sm:$0xf] %v810_v57  ;;  %v812_v58 = vld [vmem:[%s9065_s28 + $0x13a0] sm:$0xf] }
  0xe5   : > { %v814_v59 = vld [vmem:[%s9065_s28 + $0x13b0] sm:$0xf]  ;;  %v816_v60 = vld [vmem:[%s9065_s28 + $0x13c0] sm:$0xf]  ;;  %813 = vst [vmem:[%s9069_s29 + $0x4e8] sm:$0xf] %v812_v58 }
  0xe6   : > { %815 = vst [vmem:[%s9069_s29 + $0x4ec] sm:$0xf] %v814_v59  ;;  %817 = vst [vmem:[%s9069_s29 + $0x4f0] sm:$0xf] %v816_v60  ;;  %v818_v61 = vld [vmem:[%s9065_s28 + $0x13d0] sm:$0xf] }
  0xe7   : > { %v820_v62 = vld [vmem:[%s9065_s28 + $0x13e0] sm:$0xf]  ;;  %v822_v63 = vld [vmem:[%s9065_s28 + $0x13f0] sm:$0xf]  ;;  %819 = vst [vmem:[%s9069_s29 + $0x4f4] sm:$0xf] %v818_v61 }
  0xe8   : > { %821 = vst [vmem:[%s9069_s29 + $0x4f8] sm:$0xf] %v820_v62  ;;  %823 = vst [vmem:[%s9069_s29 + $0x4fc] sm:$0xf] %v822_v63  ;;  %v824_v0 = vld [vmem:[%s9065_s28 + $0x1400] sm:$0xf] }
  0xe9   : > { %v826_v1 = vld [vmem:[%s9065_s28 + $0x1410] sm:$0xf]  ;;  %v828_v2 = vld [vmem:[%s9065_s28 + $0x1420] sm:$0xf]  ;;  %825 = vst [vmem:[%s9069_s29 + $0x500] sm:$0xf] %v824_v0 }
  0xea   : > { %827 = vst [vmem:[%s9069_s29 + $0x504] sm:$0xf] %v826_v1  ;;  %829 = vst [vmem:[%s9069_s29 + $0x508] sm:$0xf] %v828_v2  ;;  %v830_v3 = vld [vmem:[%s9065_s28 + $0x1430] sm:$0xf] }
  0xeb   : > { %v832_v4 = vld [vmem:[%s9065_s28 + $0x1440] sm:$0xf]  ;;  %v834_v5 = vld [vmem:[%s9065_s28 + $0x1450] sm:$0xf]  ;;  %831 = vst [vmem:[%s9069_s29 + $0x50c] sm:$0xf] %v830_v3 }
  0xec   : > { %833 = vst [vmem:[%s9069_s29 + $0x510] sm:$0xf] %v832_v4  ;;  %835 = vst [vmem:[%s9069_s29 + $0x514] sm:$0xf] %v834_v5  ;;  %v836_v6 = vld [vmem:[%s9065_s28 + $0x1460] sm:$0xf] }
  0xed   : > { %v838_v7 = vld [vmem:[%s9065_s28 + $0x1470] sm:$0xf]  ;;  %v840_v8 = vld [vmem:[%s9065_s28 + $0x1480] sm:$0xf]  ;;  %837 = vst [vmem:[%s9069_s29 + $0x518] sm:$0xf] %v836_v6 }
  0xee   : > { %839 = vst [vmem:[%s9069_s29 + $0x51c] sm:$0xf] %v838_v7  ;;  %841 = vst [vmem:[%s9069_s29 + $0x520] sm:$0xf] %v840_v8  ;;  %v842_v9 = vld [vmem:[%s9065_s28 + $0x1490] sm:$0xf] }
  0xef   : > { %v844_v10 = vld [vmem:[%s9065_s28 + $0x14a0] sm:$0xf]  ;;  %v846_v11 = vld [vmem:[%s9065_s28 + $0x14b0] sm:$0xf]  ;;  %843 = vst [vmem:[%s9069_s29 + $0x524] sm:$0xf] %v842_v9 }
  0xf0   : > { %845 = vst [vmem:[%s9069_s29 + $0x528] sm:$0xf] %v844_v10  ;;  %847 = vst [vmem:[%s9069_s29 + $0x52c] sm:$0xf] %v846_v11  ;;  %v848_v12 = vld [vmem:[%s9065_s28 + $0x14c0] sm:$0xf] }
  0xf1   : > { %v850_v13 = vld [vmem:[%s9065_s28 + $0x14d0] sm:$0xf]  ;;  %v852_v14 = vld [vmem:[%s9065_s28 + $0x14e0] sm:$0xf]  ;;  %849 = vst [vmem:[%s9069_s29 + $0x530] sm:$0xf] %v848_v12 }
  0xf2   : > { %851 = vst [vmem:[%s9069_s29 + $0x534] sm:$0xf] %v850_v13  ;;  %853 = vst [vmem:[%s9069_s29 + $0x538] sm:$0xf] %v852_v14  ;;  %v854_v15 = vld [vmem:[%s9065_s28 + $0x14f0] sm:$0xf] }
  0xf3   : > { %v856_v16 = vld [vmem:[%s9065_s28 + $0x1500] sm:$0xf]  ;;  %v858_v17 = vld [vmem:[%s9065_s28 + $0x1510] sm:$0xf]  ;;  %855 = vst [vmem:[%s9069_s29 + $0x53c] sm:$0xf] %v854_v15 }
  0xf4   : > { %857 = vst [vmem:[%s9069_s29 + $0x540] sm:$0xf] %v856_v16  ;;  %859 = vst [vmem:[%s9069_s29 + $0x544] sm:$0xf] %v858_v17  ;;  %v860_v18 = vld [vmem:[%s9065_s28 + $0x1520] sm:$0xf] }
  0xf5   : > { %v862_v19 = vld [vmem:[%s9065_s28 + $0x1530] sm:$0xf]  ;;  %v864_v20 = vld [vmem:[%s9065_s28 + $0x1540] sm:$0xf]  ;;  %861 = vst [vmem:[%s9069_s29 + $0x548] sm:$0xf] %v860_v18 }
  0xf6   : > { %863 = vst [vmem:[%s9069_s29 + $0x54c] sm:$0xf] %v862_v19  ;;  %865 = vst [vmem:[%s9069_s29 + $0x550] sm:$0xf] %v864_v20  ;;  %v866_v21 = vld [vmem:[%s9065_s28 + $0x1550] sm:$0xf] }
  0xf7   : > { %v868_v22 = vld [vmem:[%s9065_s28 + $0x1560] sm:$0xf]  ;;  %v870_v23 = vld [vmem:[%s9065_s28 + $0x1570] sm:$0xf]  ;;  %867 = vst [vmem:[%s9069_s29 + $0x554] sm:$0xf] %v866_v21 }
  0xf8   : > { %869 = vst [vmem:[%s9069_s29 + $0x558] sm:$0xf] %v868_v22  ;;  %871 = vst [vmem:[%s9069_s29 + $0x55c] sm:$0xf] %v870_v23  ;;  %v872_v24 = vld [vmem:[%s9065_s28 + $0x1580] sm:$0xf] }
  0xf9   : > { %v874_v25 = vld [vmem:[%s9065_s28 + $0x1590] sm:$0xf]  ;;  %v876_v26 = vld [vmem:[%s9065_s28 + $0x15a0] sm:$0xf]  ;;  %873 = vst [vmem:[%s9069_s29 + $0x560] sm:$0xf] %v872_v24 }
  0xfa   : > { %875 = vst [vmem:[%s9069_s29 + $0x564] sm:$0xf] %v874_v25  ;;  %877 = vst [vmem:[%s9069_s29 + $0x568] sm:$0xf] %v876_v26  ;;  %v878_v27 = vld [vmem:[%s9065_s28 + $0x15b0] sm:$0xf] }
  0xfb   : > { %v880_v28 = vld [vmem:[%s9065_s28 + $0x15c0] sm:$0xf]  ;;  %v882_v29 = vld [vmem:[%s9065_s28 + $0x15d0] sm:$0xf]  ;;  %879 = vst [vmem:[%s9069_s29 + $0x56c] sm:$0xf] %v878_v27 }
  0xfc   : > { %881 = vst [vmem:[%s9069_s29 + $0x570] sm:$0xf] %v880_v28  ;;  %883 = vst [vmem:[%s9069_s29 + $0x574] sm:$0xf] %v882_v29  ;;  %v884_v30 = vld [vmem:[%s9065_s28 + $0x15e0] sm:$0xf] }
  0xfd   : > { %v886_v31 = vld [vmem:[%s9065_s28 + $0x15f0] sm:$0xf]  ;;  %v888_v32 = vld [vmem:[%s9065_s28 + $0x1600] sm:$0xf]  ;;  %885 = vst [vmem:[%s9069_s29 + $0x578] sm:$0xf] %v884_v30 }
  0xfe   : > { %887 = vst [vmem:[%s9069_s29 + $0x57c] sm:$0xf] %v886_v31  ;;  %889 = vst [vmem:[%s9069_s29 + $0x580] sm:$0xf] %v888_v32  ;;  %v890_v33 = vld [vmem:[%s9065_s28 + $0x1610] sm:$0xf] }
  0xff   : > { %v892_v34 = vld [vmem:[%s9065_s28 + $0x1620] sm:$0xf]  ;;  %v894_v35 = vld [vmem:[%s9065_s28 + $0x1630] sm:$0xf]  ;;  %891 = vst [vmem:[%s9069_s29 + $0x584] sm:$0xf] %v890_v33 }
 0x100   : > { %893 = vst [vmem:[%s9069_s29 + $0x588] sm:$0xf] %v892_v34  ;;  %895 = vst [vmem:[%s9069_s29 + $0x58c] sm:$0xf] %v894_v35  ;;  %v896_v36 = vld [vmem:[%s9065_s28 + $0x1640] sm:$0xf] }
 0x101   : > { %v898_v37 = vld [vmem:[%s9065_s28 + $0x1650] sm:$0xf]  ;;  %v900_v38 = vld [vmem:[%s9065_s28 + $0x1660] sm:$0xf]  ;;  %897 = vst [vmem:[%s9069_s29 + $0x590] sm:$0xf] %v896_v36 }
 0x102   : > { %899 = vst [vmem:[%s9069_s29 + $0x594] sm:$0xf] %v898_v37  ;;  %901 = vst [vmem:[%s9069_s29 + $0x598] sm:$0xf] %v900_v38  ;;  %v902_v39 = vld [vmem:[%s9065_s28 + $0x1670] sm:$0xf] }
 0x103   : > { %v904_v40 = vld [vmem:[%s9065_s28 + $0x1680] sm:$0xf]  ;;  %v906_v41 = vld [vmem:[%s9065_s28 + $0x1690] sm:$0xf]  ;;  %903 = vst [vmem:[%s9069_s29 + $0x59c] sm:$0xf] %v902_v39 }
 0x104   : > { %905 = vst [vmem:[%s9069_s29 + $0x5a0] sm:$0xf] %v904_v40  ;;  %907 = vst [vmem:[%s9069_s29 + $0x5a4] sm:$0xf] %v906_v41  ;;  %v908_v42 = vld [vmem:[%s9065_s28 + $0x16a0] sm:$0xf] }
 0x105   : > { %v910_v43 = vld [vmem:[%s9065_s28 + $0x16b0] sm:$0xf]  ;;  %v912_v44 = vld [vmem:[%s9065_s28 + $0x16c0] sm:$0xf]  ;;  %909 = vst [vmem:[%s9069_s29 + $0x5a8] sm:$0xf] %v908_v42 }
 0x106   : > { %911 = vst [vmem:[%s9069_s29 + $0x5ac] sm:$0xf] %v910_v43  ;;  %913 = vst [vmem:[%s9069_s29 + $0x5b0] sm:$0xf] %v912_v44  ;;  %v914_v45 = vld [vmem:[%s9065_s28 + $0x16d0] sm:$0xf] }
 0x107   : > { %v916_v46 = vld [vmem:[%s9065_s28 + $0x16e0] sm:$0xf]  ;;  %v918_v47 = vld [vmem:[%s9065_s28 + $0x16f0] sm:$0xf]  ;;  %915 = vst [vmem:[%s9069_s29 + $0x5b4] sm:$0xf] %v914_v45 }
 0x108   : > { %917 = vst [vmem:[%s9069_s29 + $0x5b8] sm:$0xf] %v916_v46  ;;  %919 = vst [vmem:[%s9069_s29 + $0x5bc] sm:$0xf] %v918_v47  ;;  %v920_v48 = vld [vmem:[%s9065_s28 + $0x1700] sm:$0xf] }
 0x109   : > { %v922_v49 = vld [vmem:[%s9065_s28 + $0x1710] sm:$0xf]  ;;  %v924_v50 = vld [vmem:[%s9065_s28 + $0x1720] sm:$0xf]  ;;  %921 = vst [vmem:[%s9069_s29 + $0x5c0] sm:$0xf] %v920_v48 }
 0x10a   : > { %923 = vst [vmem:[%s9069_s29 + $0x5c4] sm:$0xf] %v922_v49  ;;  %925 = vst [vmem:[%s9069_s29 + $0x5c8] sm:$0xf] %v924_v50  ;;  %v926_v51 = vld [vmem:[%s9065_s28 + $0x1730] sm:$0xf] }
 0x10b   : > { %v928_v52 = vld [vmem:[%s9065_s28 + $0x1740] sm:$0xf]  ;;  %v930_v53 = vld [vmem:[%s9065_s28 + $0x1750] sm:$0xf]  ;;  %927 = vst [vmem:[%s9069_s29 + $0x5cc] sm:$0xf] %v926_v51 }
 0x10c   : > { %929 = vst [vmem:[%s9069_s29 + $0x5d0] sm:$0xf] %v928_v52  ;;  %931 = vst [vmem:[%s9069_s29 + $0x5d4] sm:$0xf] %v930_v53  ;;  %v932_v54 = vld [vmem:[%s9065_s28 + $0x1760] sm:$0xf] }
 0x10d   : > { %v934_v55 = vld [vmem:[%s9065_s28 + $0x1770] sm:$0xf]  ;;  %v936_v56 = vld [vmem:[%s9065_s28 + $0x1780] sm:$0xf]  ;;  %933 = vst [vmem:[%s9069_s29 + $0x5d8] sm:$0xf] %v932_v54 }
 0x10e   : > { %935 = vst [vmem:[%s9069_s29 + $0x5dc] sm:$0xf] %v934_v55  ;;  %937 = vst [vmem:[%s9069_s29 + $0x5e0] sm:$0xf] %v936_v56  ;;  %v938_v57 = vld [vmem:[%s9065_s28 + $0x1790] sm:$0xf] }
 0x10f   : > { %v940_v58 = vld [vmem:[%s9065_s28 + $0x17a0] sm:$0xf]  ;;  %v942_v59 = vld [vmem:[%s9065_s28 + $0x17b0] sm:$0xf]  ;;  %939 = vst [vmem:[%s9069_s29 + $0x5e4] sm:$0xf] %v938_v57 }
 0x110   : > { %941 = vst [vmem:[%s9069_s29 + $0x5e8] sm:$0xf] %v940_v58  ;;  %943 = vst [vmem:[%s9069_s29 + $0x5ec] sm:$0xf] %v942_v59  ;;  %v944_v60 = vld [vmem:[%s9065_s28 + $0x17c0] sm:$0xf] }
 0x111   : > { %v946_v61 = vld [vmem:[%s9065_s28 + $0x17d0] sm:$0xf]  ;;  %v948_v62 = vld [vmem:[%s9065_s28 + $0x17e0] sm:$0xf]  ;;  %945 = vst [vmem:[%s9069_s29 + $0x5f0] sm:$0xf] %v944_v60 }
 0x112   : > { %947 = vst [vmem:[%s9069_s29 + $0x5f4] sm:$0xf] %v946_v61  ;;  %949 = vst [vmem:[%s9069_s29 + $0x5f8] sm:$0xf] %v948_v62  ;;  %v950_v63 = vld [vmem:[%s9065_s28 + $0x17f0] sm:$0xf] }
 0x113   : > { %v952_v0 = vld [vmem:[%s9065_s28 + $0x1800] sm:$0xf]  ;;  %v954_v1 = vld [vmem:[%s9065_s28 + $0x1810] sm:$0xf]  ;;  %951 = vst [vmem:[%s9069_s29 + $0x5fc] sm:$0xf] %v950_v63 }
 0x114   : > { %953 = vst [vmem:[%s9069_s29 + $0x600] sm:$0xf] %v952_v0  ;;  %955 = vst [vmem:[%s9069_s29 + $0x604] sm:$0xf] %v954_v1  ;;  %v956_v2 = vld [vmem:[%s9065_s28 + $0x1820] sm:$0xf] }
 0x115   : > { %v958_v3 = vld [vmem:[%s9065_s28 + $0x1830] sm:$0xf]  ;;  %v960_v4 = vld [vmem:[%s9065_s28 + $0x1840] sm:$0xf]  ;;  %957 = vst [vmem:[%s9069_s29 + $0x608] sm:$0xf] %v956_v2 }
 0x116   : > { %959 = vst [vmem:[%s9069_s29 + $0x60c] sm:$0xf] %v958_v3  ;;  %961 = vst [vmem:[%s9069_s29 + $0x610] sm:$0xf] %v960_v4  ;;  %v962_v5 = vld [vmem:[%s9065_s28 + $0x1850] sm:$0xf] }
 0x117   : > { %v964_v6 = vld [vmem:[%s9065_s28 + $0x1860] sm:$0xf]  ;;  %v966_v7 = vld [vmem:[%s9065_s28 + $0x1870] sm:$0xf]  ;;  %963 = vst [vmem:[%s9069_s29 + $0x614] sm:$0xf] %v962_v5 }
 0x118   : > { %965 = vst [vmem:[%s9069_s29 + $0x618] sm:$0xf] %v964_v6  ;;  %967 = vst [vmem:[%s9069_s29 + $0x61c] sm:$0xf] %v966_v7  ;;  %v968_v8 = vld [vmem:[%s9065_s28 + $0x1880] sm:$0xf] }
 0x119   : > { %v970_v9 = vld [vmem:[%s9065_s28 + $0x1890] sm:$0xf]  ;;  %v972_v10 = vld [vmem:[%s9065_s28 + $0x18a0] sm:$0xf]  ;;  %969 = vst [vmem:[%s9069_s29 + $0x620] sm:$0xf] %v968_v8 }
 0x11a   : > { %971 = vst [vmem:[%s9069_s29 + $0x624] sm:$0xf] %v970_v9  ;;  %973 = vst [vmem:[%s9069_s29 + $0x628] sm:$0xf] %v972_v10  ;;  %v974_v11 = vld [vmem:[%s9065_s28 + $0x18b0] sm:$0xf] }
 0x11b   : > { %v976_v12 = vld [vmem:[%s9065_s28 + $0x18c0] sm:$0xf]  ;;  %v978_v13 = vld [vmem:[%s9065_s28 + $0x18d0] sm:$0xf]  ;;  %975 = vst [vmem:[%s9069_s29 + $0x62c] sm:$0xf] %v974_v11 }
 0x11c   : > { %977 = vst [vmem:[%s9069_s29 + $0x630] sm:$0xf] %v976_v12  ;;  %979 = vst [vmem:[%s9069_s29 + $0x634] sm:$0xf] %v978_v13  ;;  %v980_v14 = vld [vmem:[%s9065_s28 + $0x18e0] sm:$0xf] }
 0x11d   : > { %v982_v15 = vld [vmem:[%s9065_s28 + $0x18f0] sm:$0xf]  ;;  %v984_v16 = vld [vmem:[%s9065_s28 + $0x1900] sm:$0xf]  ;;  %981 = vst [vmem:[%s9069_s29 + $0x638] sm:$0xf] %v980_v14 }
 0x11e   : > { %983 = vst [vmem:[%s9069_s29 + $0x63c] sm:$0xf] %v982_v15  ;;  %985 = vst [vmem:[%s9069_s29 + $0x640] sm:$0xf] %v984_v16  ;;  %v986_v17 = vld [vmem:[%s9065_s28 + $0x1910] sm:$0xf] }
 0x11f   : > { %v988_v18 = vld [vmem:[%s9065_s28 + $0x1920] sm:$0xf]  ;;  %v990_v19 = vld [vmem:[%s9065_s28 + $0x1930] sm:$0xf]  ;;  %987 = vst [vmem:[%s9069_s29 + $0x644] sm:$0xf] %v986_v17 }
 0x120   : > { %989 = vst [vmem:[%s9069_s29 + $0x648] sm:$0xf] %v988_v18  ;;  %991 = vst [vmem:[%s9069_s29 + $0x64c] sm:$0xf] %v990_v19  ;;  %v992_v20 = vld [vmem:[%s9065_s28 + $0x1940] sm:$0xf] }
 0x121   : > { %v994_v21 = vld [vmem:[%s9065_s28 + $0x1950] sm:$0xf]  ;;  %v996_v22 = vld [vmem:[%s9065_s28 + $0x1960] sm:$0xf]  ;;  %993 = vst [vmem:[%s9069_s29 + $0x650] sm:$0xf] %v992_v20 }
 0x122   : > { %995 = vst [vmem:[%s9069_s29 + $0x654] sm:$0xf] %v994_v21  ;;  %997 = vst [vmem:[%s9069_s29 + $0x658] sm:$0xf] %v996_v22  ;;  %v998_v23 = vld [vmem:[%s9065_s28 + $0x1970] sm:$0xf] }
 0x123   : > { %v1000_v24 = vld [vmem:[%s9065_s28 + $0x1980] sm:$0xf]  ;;  %v1002_v25 = vld [vmem:[%s9065_s28 + $0x1990] sm:$0xf]  ;;  %999 = vst [vmem:[%s9069_s29 + $0x65c] sm:$0xf] %v998_v23 }
 0x124   : > { %1001 = vst [vmem:[%s9069_s29 + $0x660] sm:$0xf] %v1000_v24  ;;  %1003 = vst [vmem:[%s9069_s29 + $0x664] sm:$0xf] %v1002_v25  ;;  %v1004_v26 = vld [vmem:[%s9065_s28 + $0x19a0] sm:$0xf] }
 0x125   : > { %v1006_v27 = vld [vmem:[%s9065_s28 + $0x19b0] sm:$0xf]  ;;  %v1008_v28 = vld [vmem:[%s9065_s28 + $0x19c0] sm:$0xf]  ;;  %1005 = vst [vmem:[%s9069_s29 + $0x668] sm:$0xf] %v1004_v26 }
 0x126   : > { %1007 = vst [vmem:[%s9069_s29 + $0x66c] sm:$0xf] %v1006_v27  ;;  %1009 = vst [vmem:[%s9069_s29 + $0x670] sm:$0xf] %v1008_v28  ;;  %v1010_v29 = vld [vmem:[%s9065_s28 + $0x19d0] sm:$0xf] }
 0x127   : > { %v1012_v30 = vld [vmem:[%s9065_s28 + $0x19e0] sm:$0xf]  ;;  %v1014_v31 = vld [vmem:[%s9065_s28 + $0x19f0] sm:$0xf]  ;;  %1011 = vst [vmem:[%s9069_s29 + $0x674] sm:$0xf] %v1010_v29 }
 0x128   : > { %1013 = vst [vmem:[%s9069_s29 + $0x678] sm:$0xf] %v1012_v30  ;;  %1015 = vst [vmem:[%s9069_s29 + $0x67c] sm:$0xf] %v1014_v31  ;;  %v1016_v32 = vld [vmem:[%s9065_s28 + $0x1a00] sm:$0xf] }
 0x129   : > { %v1018_v33 = vld [vmem:[%s9065_s28 + $0x1a10] sm:$0xf]  ;;  %v1020_v34 = vld [vmem:[%s9065_s28 + $0x1a20] sm:$0xf]  ;;  %1017 = vst [vmem:[%s9069_s29 + $0x680] sm:$0xf] %v1016_v32 }
 0x12a   : > { %1019 = vst [vmem:[%s9069_s29 + $0x684] sm:$0xf] %v1018_v33  ;;  %1021 = vst [vmem:[%s9069_s29 + $0x688] sm:$0xf] %v1020_v34  ;;  %v1022_v35 = vld [vmem:[%s9065_s28 + $0x1a30] sm:$0xf] }
 0x12b   : > { %v1024_v36 = vld [vmem:[%s9065_s28 + $0x1a40] sm:$0xf]  ;;  %v1026_v37 = vld [vmem:[%s9065_s28 + $0x1a50] sm:$0xf]  ;;  %1023 = vst [vmem:[%s9069_s29 + $0x68c] sm:$0xf] %v1022_v35 }
 0x12c   : > { %1025 = vst [vmem:[%s9069_s29 + $0x690] sm:$0xf] %v1024_v36  ;;  %1027 = vst [vmem:[%s9069_s29 + $0x694] sm:$0xf] %v1026_v37  ;;  %v1028_v38 = vld [vmem:[%s9065_s28 + $0x1a60] sm:$0xf] }
 0x12d   : > { %v1030_v39 = vld [vmem:[%s9065_s28 + $0x1a70] sm:$0xf]  ;;  %v1032_v40 = vld [vmem:[%s9065_s28 + $0x1a80] sm:$0xf]  ;;  %1029 = vst [vmem:[%s9069_s29 + $0x698] sm:$0xf] %v1028_v38 }
 0x12e   : > { %1031 = vst [vmem:[%s9069_s29 + $0x69c] sm:$0xf] %v1030_v39  ;;  %1033 = vst [vmem:[%s9069_s29 + $0x6a0] sm:$0xf] %v1032_v40  ;;  %v1034_v41 = vld [vmem:[%s9065_s28 + $0x1a90] sm:$0xf] }
 0x12f   : > { %v1036_v42 = vld [vmem:[%s9065_s28 + $0x1aa0] sm:$0xf]  ;;  %v1038_v43 = vld [vmem:[%s9065_s28 + $0x1ab0] sm:$0xf]  ;;  %1035 = vst [vmem:[%s9069_s29 + $0x6a4] sm:$0xf] %v1034_v41 }
 0x130   : > { %1037 = vst [vmem:[%s9069_s29 + $0x6a8] sm:$0xf] %v1036_v42  ;;  %1039 = vst [vmem:[%s9069_s29 + $0x6ac] sm:$0xf] %v1038_v43  ;;  %v1040_v44 = vld [vmem:[%s9065_s28 + $0x1ac0] sm:$0xf] }
 0x131   : > { %v1042_v45 = vld [vmem:[%s9065_s28 + $0x1ad0] sm:$0xf]  ;;  %v1044_v46 = vld [vmem:[%s9065_s28 + $0x1ae0] sm:$0xf]  ;;  %1041 = vst [vmem:[%s9069_s29 + $0x6b0] sm:$0xf] %v1040_v44 }
 0x132   : > { %1043 = vst [vmem:[%s9069_s29 + $0x6b4] sm:$0xf] %v1042_v45  ;;  %1045 = vst [vmem:[%s9069_s29 + $0x6b8] sm:$0xf] %v1044_v46  ;;  %v1046_v47 = vld [vmem:[%s9065_s28 + $0x1af0] sm:$0xf] }
 0x133   : > { %v1048_v48 = vld [vmem:[%s9065_s28 + $0x1b00] sm:$0xf]  ;;  %v1050_v49 = vld [vmem:[%s9065_s28 + $0x1b10] sm:$0xf]  ;;  %1047 = vst [vmem:[%s9069_s29 + $0x6bc] sm:$0xf] %v1046_v47 }
 0x134   : > { %1049 = vst [vmem:[%s9069_s29 + $0x6c0] sm:$0xf] %v1048_v48  ;;  %1051 = vst [vmem:[%s9069_s29 + $0x6c4] sm:$0xf] %v1050_v49  ;;  %v1052_v50 = vld [vmem:[%s9065_s28 + $0x1b20] sm:$0xf] }
 0x135   : > { %v1054_v51 = vld [vmem:[%s9065_s28 + $0x1b30] sm:$0xf]  ;;  %v1056_v52 = vld [vmem:[%s9065_s28 + $0x1b40] sm:$0xf]  ;;  %1053 = vst [vmem:[%s9069_s29 + $0x6c8] sm:$0xf] %v1052_v50 }
 0x136   : > { %1055 = vst [vmem:[%s9069_s29 + $0x6cc] sm:$0xf] %v1054_v51  ;;  %1057 = vst [vmem:[%s9069_s29 + $0x6d0] sm:$0xf] %v1056_v52  ;;  %v1058_v53 = vld [vmem:[%s9065_s28 + $0x1b50] sm:$0xf] }
 0x137   : > { %v1060_v54 = vld [vmem:[%s9065_s28 + $0x1b60] sm:$0xf]  ;;  %v1062_v55 = vld [vmem:[%s9065_s28 + $0x1b70] sm:$0xf]  ;;  %1059 = vst [vmem:[%s9069_s29 + $0x6d4] sm:$0xf] %v1058_v53 }
 0x138   : > { %1061 = vst [vmem:[%s9069_s29 + $0x6d8] sm:$0xf] %v1060_v54  ;;  %1063 = vst [vmem:[%s9069_s29 + $0x6dc] sm:$0xf] %v1062_v55  ;;  %v1064_v56 = vld [vmem:[%s9065_s28 + $0x1b80] sm:$0xf] }
 0x139   : > { %v1066_v57 = vld [vmem:[%s9065_s28 + $0x1b90] sm:$0xf]  ;;  %v1068_v58 = vld [vmem:[%s9065_s28 + $0x1ba0] sm:$0xf]  ;;  %1065 = vst [vmem:[%s9069_s29 + $0x6e0] sm:$0xf] %v1064_v56 }
 0x13a   : > { %1067 = vst [vmem:[%s9069_s29 + $0x6e4] sm:$0xf] %v1066_v57  ;;  %1069 = vst [vmem:[%s9069_s29 + $0x6e8] sm:$0xf] %v1068_v58  ;;  %v1070_v59 = vld [vmem:[%s9065_s28 + $0x1bb0] sm:$0xf] }
 0x13b   : > { %v1072_v60 = vld [vmem:[%s9065_s28 + $0x1bc0] sm:$0xf]  ;;  %v1074_v61 = vld [vmem:[%s9065_s28 + $0x1bd0] sm:$0xf]  ;;  %1071 = vst [vmem:[%s9069_s29 + $0x6ec] sm:$0xf] %v1070_v59 }
 0x13c   : > { %1073 = vst [vmem:[%s9069_s29 + $0x6f0] sm:$0xf] %v1072_v60  ;;  %1075 = vst [vmem:[%s9069_s29 + $0x6f4] sm:$0xf] %v1074_v61  ;;  %v1076_v62 = vld [vmem:[%s9065_s28 + $0x1be0] sm:$0xf] }
 0x13d   : > { %v1078_v63 = vld [vmem:[%s9065_s28 + $0x1bf0] sm:$0xf]  ;;  %v1080_v0 = vld [vmem:[%s9065_s28 + $0x1c00] sm:$0xf]  ;;  %1077 = vst [vmem:[%s9069_s29 + $0x6f8] sm:$0xf] %v1076_v62 }
 0x13e   : > { %1079 = vst [vmem:[%s9069_s29 + $0x6fc] sm:$0xf] %v1078_v63  ;;  %1081 = vst [vmem:[%s9069_s29 + $0x700] sm:$0xf] %v1080_v0  ;;  %v1082_v1 = vld [vmem:[%s9065_s28 + $0x1c10] sm:$0xf] }
 0x13f   : > { %v1084_v2 = vld [vmem:[%s9065_s28 + $0x1c20] sm:$0xf]  ;;  %v1086_v3 = vld [vmem:[%s9065_s28 + $0x1c30] sm:$0xf]  ;;  %1083 = vst [vmem:[%s9069_s29 + $0x704] sm:$0xf] %v1082_v1 }
 0x140   : > { %1085 = vst [vmem:[%s9069_s29 + $0x708] sm:$0xf] %v1084_v2  ;;  %1087 = vst [vmem:[%s9069_s29 + $0x70c] sm:$0xf] %v1086_v3  ;;  %v1088_v4 = vld [vmem:[%s9065_s28 + $0x1c40] sm:$0xf] }
 0x141   : > { %v1090_v5 = vld [vmem:[%s9065_s28 + $0x1c50] sm:$0xf]  ;;  %v1092_v6 = vld [vmem:[%s9065_s28 + $0x1c60] sm:$0xf]  ;;  %1089 = vst [vmem:[%s9069_s29 + $0x710] sm:$0xf] %v1088_v4 }
 0x142   : > { %1091 = vst [vmem:[%s9069_s29 + $0x714] sm:$0xf] %v1090_v5  ;;  %1093 = vst [vmem:[%s9069_s29 + $0x718] sm:$0xf] %v1092_v6  ;;  %v1094_v7 = vld [vmem:[%s9065_s28 + $0x1c70] sm:$0xf] }
 0x143   : > { %v1096_v8 = vld [vmem:[%s9065_s28 + $0x1c80] sm:$0xf]  ;;  %v1098_v9 = vld [vmem:[%s9065_s28 + $0x1c90] sm:$0xf]  ;;  %1095 = vst [vmem:[%s9069_s29 + $0x71c] sm:$0xf] %v1094_v7 }
 0x144   : > { %1097 = vst [vmem:[%s9069_s29 + $0x720] sm:$0xf] %v1096_v8  ;;  %1099 = vst [vmem:[%s9069_s29 + $0x724] sm:$0xf] %v1098_v9  ;;  %v1100_v10 = vld [vmem:[%s9065_s28 + $0x1ca0] sm:$0xf] }
 0x145   : > { %v1102_v11 = vld [vmem:[%s9065_s28 + $0x1cb0] sm:$0xf]  ;;  %v1104_v12 = vld [vmem:[%s9065_s28 + $0x1cc0] sm:$0xf]  ;;  %1101 = vst [vmem:[%s9069_s29 + $0x728] sm:$0xf] %v1100_v10 }
 0x146   : > { %1103 = vst [vmem:[%s9069_s29 + $0x72c] sm:$0xf] %v1102_v11  ;;  %1105 = vst [vmem:[%s9069_s29 + $0x730] sm:$0xf] %v1104_v12  ;;  %v1106_v13 = vld [vmem:[%s9065_s28 + $0x1cd0] sm:$0xf] }
 0x147   : > { %v1108_v14 = vld [vmem:[%s9065_s28 + $0x1ce0] sm:$0xf]  ;;  %v1110_v15 = vld [vmem:[%s9065_s28 + $0x1cf0] sm:$0xf]  ;;  %1107 = vst [vmem:[%s9069_s29 + $0x734] sm:$0xf] %v1106_v13 }
 0x148   : > { %1109 = vst [vmem:[%s9069_s29 + $0x738] sm:$0xf] %v1108_v14  ;;  %1111 = vst [vmem:[%s9069_s29 + $0x73c] sm:$0xf] %v1110_v15  ;;  %v1112_v16 = vld [vmem:[%s9065_s28 + $0x1d00] sm:$0xf] }
 0x149   : > { %v1114_v17 = vld [vmem:[%s9065_s28 + $0x1d10] sm:$0xf]  ;;  %v1116_v18 = vld [vmem:[%s9065_s28 + $0x1d20] sm:$0xf]  ;;  %1113 = vst [vmem:[%s9069_s29 + $0x740] sm:$0xf] %v1112_v16 }
 0x14a   : > { %1115 = vst [vmem:[%s9069_s29 + $0x744] sm:$0xf] %v1114_v17  ;;  %1117 = vst [vmem:[%s9069_s29 + $0x748] sm:$0xf] %v1116_v18  ;;  %v1118_v19 = vld [vmem:[%s9065_s28 + $0x1d30] sm:$0xf] }
 0x14b   : > { %v1120_v20 = vld [vmem:[%s9065_s28 + $0x1d40] sm:$0xf]  ;;  %v1122_v21 = vld [vmem:[%s9065_s28 + $0x1d50] sm:$0xf]  ;;  %1119 = vst [vmem:[%s9069_s29 + $0x74c] sm:$0xf] %v1118_v19 }
 0x14c   : > { %1121 = vst [vmem:[%s9069_s29 + $0x750] sm:$0xf] %v1120_v20  ;;  %1123 = vst [vmem:[%s9069_s29 + $0x754] sm:$0xf] %v1122_v21  ;;  %v1124_v22 = vld [vmem:[%s9065_s28 + $0x1d60] sm:$0xf] }
 0x14d   : > { %v1126_v23 = vld [vmem:[%s9065_s28 + $0x1d70] sm:$0xf]  ;;  %v1128_v24 = vld [vmem:[%s9065_s28 + $0x1d80] sm:$0xf]  ;;  %1125 = vst [vmem:[%s9069_s29 + $0x758] sm:$0xf] %v1124_v22 }
 0x14e   : > { %1127 = vst [vmem:[%s9069_s29 + $0x75c] sm:$0xf] %v1126_v23  ;;  %1129 = vst [vmem:[%s9069_s29 + $0x760] sm:$0xf] %v1128_v24  ;;  %v1130_v25 = vld [vmem:[%s9065_s28 + $0x1d90] sm:$0xf] }
 0x14f   : > { %v1132_v26 = vld [vmem:[%s9065_s28 + $0x1da0] sm:$0xf]  ;;  %v1134_v27 = vld [vmem:[%s9065_s28 + $0x1db0] sm:$0xf]  ;;  %1131 = vst [vmem:[%s9069_s29 + $0x764] sm:$0xf] %v1130_v25 }
 0x150   : > { %1133 = vst [vmem:[%s9069_s29 + $0x768] sm:$0xf] %v1132_v26  ;;  %1135 = vst [vmem:[%s9069_s29 + $0x76c] sm:$0xf] %v1134_v27  ;;  %v1136_v28 = vld [vmem:[%s9065_s28 + $0x1dc0] sm:$0xf] }
 0x151   : > { %v1138_v29 = vld [vmem:[%s9065_s28 + $0x1dd0] sm:$0xf]  ;;  %v1140_v30 = vld [vmem:[%s9065_s28 + $0x1de0] sm:$0xf]  ;;  %1137 = vst [vmem:[%s9069_s29 + $0x770] sm:$0xf] %v1136_v28 }
 0x152   : > { %1139 = vst [vmem:[%s9069_s29 + $0x774] sm:$0xf] %v1138_v29  ;;  %1141 = vst [vmem:[%s9069_s29 + $0x778] sm:$0xf] %v1140_v30  ;;  %v1142_v31 = vld [vmem:[%s9065_s28 + $0x1df0] sm:$0xf] }
 0x153   : > { %v1144_v32 = vld [vmem:[%s9065_s28 + $0x1e00] sm:$0xf]  ;;  %v1146_v33 = vld [vmem:[%s9065_s28 + $0x1e10] sm:$0xf]  ;;  %1143 = vst [vmem:[%s9069_s29 + $0x77c] sm:$0xf] %v1142_v31 }
 0x154   : > { %1145 = vst [vmem:[%s9069_s29 + $0x780] sm:$0xf] %v1144_v32  ;;  %1147 = vst [vmem:[%s9069_s29 + $0x784] sm:$0xf] %v1146_v33  ;;  %v1148_v34 = vld [vmem:[%s9065_s28 + $0x1e20] sm:$0xf] }
 0x155   : > { %v1150_v35 = vld [vmem:[%s9065_s28 + $0x1e30] sm:$0xf]  ;;  %v1152_v36 = vld [vmem:[%s9065_s28 + $0x1e40] sm:$0xf]  ;;  %1149 = vst [vmem:[%s9069_s29 + $0x788] sm:$0xf] %v1148_v34 }
 0x156   : > { %1151 = vst [vmem:[%s9069_s29 + $0x78c] sm:$0xf] %v1150_v35  ;;  %1153 = vst [vmem:[%s9069_s29 + $0x790] sm:$0xf] %v1152_v36  ;;  %v1154_v37 = vld [vmem:[%s9065_s28 + $0x1e50] sm:$0xf] }
 0x157   : > { %v1156_v38 = vld [vmem:[%s9065_s28 + $0x1e60] sm:$0xf]  ;;  %v1158_v39 = vld [vmem:[%s9065_s28 + $0x1e70] sm:$0xf]  ;;  %1155 = vst [vmem:[%s9069_s29 + $0x794] sm:$0xf] %v1154_v37 }
 0x158   : > { %1157 = vst [vmem:[%s9069_s29 + $0x798] sm:$0xf] %v1156_v38  ;;  %1159 = vst [vmem:[%s9069_s29 + $0x79c] sm:$0xf] %v1158_v39  ;;  %v1160_v40 = vld [vmem:[%s9065_s28 + $0x1e80] sm:$0xf] }
 0x159   : > { %v1162_v41 = vld [vmem:[%s9065_s28 + $0x1e90] sm:$0xf]  ;;  %v1164_v42 = vld [vmem:[%s9065_s28 + $0x1ea0] sm:$0xf]  ;;  %1161 = vst [vmem:[%s9069_s29 + $0x7a0] sm:$0xf] %v1160_v40 }
 0x15a   : > { %1163 = vst [vmem:[%s9069_s29 + $0x7a4] sm:$0xf] %v1162_v41  ;;  %1165 = vst [vmem:[%s9069_s29 + $0x7a8] sm:$0xf] %v1164_v42  ;;  %v1166_v43 = vld [vmem:[%s9065_s28 + $0x1eb0] sm:$0xf] }
 0x15b   : > { %v1168_v44 = vld [vmem:[%s9065_s28 + $0x1ec0] sm:$0xf]  ;;  %v1170_v45 = vld [vmem:[%s9065_s28 + $0x1ed0] sm:$0xf]  ;;  %1167 = vst [vmem:[%s9069_s29 + $0x7ac] sm:$0xf] %v1166_v43 }
 0x15c   : > { %1169 = vst [vmem:[%s9069_s29 + $0x7b0] sm:$0xf] %v1168_v44  ;;  %1171 = vst [vmem:[%s9069_s29 + $0x7b4] sm:$0xf] %v1170_v45  ;;  %v1172_v46 = vld [vmem:[%s9065_s28 + $0x1ee0] sm:$0xf] }
 0x15d   : > { %v1174_v47 = vld [vmem:[%s9065_s28 + $0x1ef0] sm:$0xf]  ;;  %v1176_v48 = vld [vmem:[%s9065_s28 + $0x1f00] sm:$0xf]  ;;  %1173 = vst [vmem:[%s9069_s29 + $0x7b8] sm:$0xf] %v1172_v46 }
 0x15e   : > { %1175 = vst [vmem:[%s9069_s29 + $0x7bc] sm:$0xf] %v1174_v47  ;;  %1177 = vst [vmem:[%s9069_s29 + $0x7c0] sm:$0xf] %v1176_v48  ;;  %v1178_v49 = vld [vmem:[%s9065_s28 + $0x1f10] sm:$0xf] }
 0x15f   : > { %v1180_v50 = vld [vmem:[%s9065_s28 + $0x1f20] sm:$0xf]  ;;  %v1182_v51 = vld [vmem:[%s9065_s28 + $0x1f30] sm:$0xf]  ;;  %1179 = vst [vmem:[%s9069_s29 + $0x7c4] sm:$0xf] %v1178_v49 }
 0x160   : > { %1181 = vst [vmem:[%s9069_s29 + $0x7c8] sm:$0xf] %v1180_v50  ;;  %1183 = vst [vmem:[%s9069_s29 + $0x7cc] sm:$0xf] %v1182_v51  ;;  %v1184_v52 = vld [vmem:[%s9065_s28 + $0x1f40] sm:$0xf] }
 0x161   : > { %v1186_v53 = vld [vmem:[%s9065_s28 + $0x1f50] sm:$0xf]  ;;  %v1188_v54 = vld [vmem:[%s9065_s28 + $0x1f60] sm:$0xf]  ;;  %1185 = vst [vmem:[%s9069_s29 + $0x7d0] sm:$0xf] %v1184_v52 }
 0x162   : > { %1187 = vst [vmem:[%s9069_s29 + $0x7d4] sm:$0xf] %v1186_v53  ;;  %1189 = vst [vmem:[%s9069_s29 + $0x7d8] sm:$0xf] %v1188_v54  ;;  %v1190_v55 = vld [vmem:[%s9065_s28 + $0x1f70] sm:$0xf] }
 0x163   : > { %v1192_v56 = vld [vmem:[%s9065_s28 + $0x1f80] sm:$0xf]  ;;  %v1194_v57 = vld [vmem:[%s9065_s28 + $0x1f90] sm:$0xf]  ;;  %1191 = vst [vmem:[%s9069_s29 + $0x7dc] sm:$0xf] %v1190_v55 }
 0x164   : > { %1193 = vst [vmem:[%s9069_s29 + $0x7e0] sm:$0xf] %v1192_v56  ;;  %1195 = vst [vmem:[%s9069_s29 + $0x7e4] sm:$0xf] %v1194_v57  ;;  %v1196_v58 = vld [vmem:[%s9065_s28 + $0x1fa0] sm:$0xf] }
 0x165   : > { %v1198_v59 = vld [vmem:[%s9065_s28 + $0x1fb0] sm:$0xf]  ;;  %v1200_v60 = vld [vmem:[%s9065_s28 + $0x1fc0] sm:$0xf]  ;;  %1197 = vst [vmem:[%s9069_s29 + $0x7e8] sm:$0xf] %v1196_v58 }
 0x166   : > { %1199 = vst [vmem:[%s9069_s29 + $0x7ec] sm:$0xf] %v1198_v59  ;;  %1201 = vst [vmem:[%s9069_s29 + $0x7f0] sm:$0xf] %v1200_v60  ;;  %v1202_v61 = vld [vmem:[%s9065_s28 + $0x1fd0] sm:$0xf] }
 0x167   : > { %v1204_v62 = vld [vmem:[%s9065_s28 + $0x1fe0] sm:$0xf]  ;;  %v1206_v63 = vld [vmem:[%s9065_s28 + $0x1ff0] sm:$0xf]  ;;  %1203 = vst [vmem:[%s9069_s29 + $0x7f4] sm:$0xf] %v1202_v61 }
 0x168   : > { %1205 = vst [vmem:[%s9069_s29 + $0x7f8] sm:$0xf] %v1204_v62  ;;  %1207 = vst [vmem:[%s9069_s29 + $0x7fc] sm:$0xf] %v1206_v63 }
 0x169 PF: > { %p7866_p8 = scmp.ge.s32.totalorder %s8995_s16, 1  ;;  %p4332_p9 = scmp.lt.s32.totalorder %s8995_s16, 5 }
 0x16b   : > { %p4333_p10 = pnand %p7866_p8, %p4332_p9 }
 0x16d   : > { %4336 = sbr.rel (%p4333_p10) target bundleno = 874 (0x36a), region = 76 }
 0x172   : > { %s4339_s30 = sand.u32 1, %s8979_s12   ;;  %v10099_v0 = vld [vmem:[%s10735_s0] sm:$0xff]  ;;  %v10109_v2 = vld [vmem:[%s10735_s0 + $0x8] sm:$0xff]  ;;  %p4385_p11 = scmp.lt.s32.totalorder %s8987_s14, 3 }
 0x173   : > { %v10104_v1 = vld [vmem:[%s10735_s0 + $0x80] sm:$0xff]  ;;  %s7867_s10 = sshll.u32 %s4339_s30, 11  ;;  %v10118_v4 = vld [vmem:[%s10735_s0 + $0x88] sm:$0xff]  ;;  %s7868_s20 = sshll.u32 %s4339_s30, 4 }
 0x174   : > { %v7871_v3 = vcombine.high %v10099_v0, %v10104_v1  ;;  %v7873_v5 = vcombine.high %v10109_v2, %v10118_v4  ;;  %s10122_s19 = scalar_lea.vmem [#allocation2], %s7867_s10  ;;  %v4424_v35 = vld [vmem:[%s10735_s0 + $0x100] sm:$0xff]  ;;  %v4425_v38 = vld [vmem:[%s10735_s0 + $0x108] sm:$0xff]  ;;  %v7870_v42 = vcombine.low %v10099_v0, %v10104_v1  ;;  %v7872_v43 = vcombine.low %v10109_v2, %v10118_v4  ;;  %s10701_s12 = scalar_lea.vmem [#allocation3], %s7868_s20 }
 0x175   : > { %v8701_v6 = vld [vmem:[%s10122_s19 + $0x78] sm:$0xff]   ;;  %v8705_v10 = vld [vmem:[%s10122_s19 + $0x70] sm:$0xff]   ;;  %v8709_v14 = vld [vmem:[%s10122_s19 + $0x68] sm:$0xff]   ;;  %s4386_s30 = scalar_select %p4385_p11, %s8987_s14, 3 }
 0x176   : > { %6856 = vmatprep.mubr.bf16.mxu0 %v7871_v3  ;;  %v8702_v7 = vld [vmem:[%s10122_s19 + $0xf8] sm:$0xff]   ;;  %6905 = vmatprep.mubr.bf16.mxu1 %v7873_v5  ;;  %v8706_v11 = vld [vmem:[%s10122_s19 + $0xf0] sm:$0xff]   ;;  %v8710_v15 = vld [vmem:[%s10122_s19 + $0xe8] sm:$0xff]   ;;  %s8195_s27 = sshll.u32 (%p9052_p6), %s8987_s14, 2 }
 0x177   : > { %8213 = vmatprep.subr.bf16.mxu0 %v8701_v6  ;;  %v8703_v8 = vld [vmem:[%s10122_s19 + $0x38] sm:$0xff]   ;;  %8241 = vmatprep.subr.bf16.mxu1 %v8702_v7  ;;  %v8707_v12 = vld [vmem:[%s10122_s19 + $0x30] sm:$0xff]   ;;  %v8711_v16 = vld [vmem:[%s10122_s19 + $0x28] sm:$0xff]   ;;  %s7869_s23 = sshll.u32 %s4386_s30, 3  ;;  %s7676_s4 = scalar_lea.vmem (%p9052_p6), %s10737_s2, %s8195_s27 }
 0x178   : > { %v8704_v9 = vld [vmem:[%s10122_s19 + $0xb8] sm:$0xff]   ;;  %8214 = vmatpush3.bf16.msra.mxu0 %v8703_v8  ;;  %v8708_v13 = vld [vmem:[%s10122_s19 + $0xb0] sm:$0xff]   ;;  %v8712_v17 = vld [vmem:[%s10122_s19 + $0xa8] sm:$0xff]   ;;  %s4390_s26 = scalar_lea.vmem %s10738_s3, %s7869_s23 }
 0x179   : > { %8242 = vmatpush3.bf16.msra.mxu1 %v8704_v9  ;;  %8215 = vmatprep.subr.bf16.mxu0 %v8705_v10  ;;  %v8713_v18 = vld [vmem:[%s10122_s19 + $0x60] sm:$0xff]   ;;  %v8717_v22 = vld [vmem:[%s10122_s19 + $0x58] sm:$0xff]   ;;  %v8721_v26 = vld [vmem:[%s10122_s19 + $0x50] sm:$0xff]  }
 0x17a   : > { %8243 = vmatprep.subr.bf16.mxu1 %v8706_v11  ;;  %v8714_v19 = vld [vmem:[%s10122_s19 + $0xe0] sm:$0xff]   ;;  %v8718_v23 = vld [vmem:[%s10122_s19 + $0xd8] sm:$0xff]   ;;  %v8722_v27 = vld [vmem:[%s10122_s19 + $0xd0] sm:$0xff]  }
 0x17b   : > { %v8715_v20 = vld [vmem:[%s10122_s19 + $0x20] sm:$0xff]   ;;  %v8719_v24 = vld [vmem:[%s10122_s19 + $0x18] sm:$0xff]   ;;  %v8723_v28 = vld [vmem:[%s10122_s19 + $0x10] sm:$0xff]  }
 0x17c   : > { %8216 = vmatpush3.bf16.msra.mxu0 %v8707_v12  ;;  %v8716_v21 = vld [vmem:[%s10122_s19 + $0xa0] sm:$0xff]   ;;  %v8720_v25 = vld [vmem:[%s10122_s19 + $0x98] sm:$0xff]   ;;  %v8724_v29 = vld [vmem:[%s10122_s19 + $0x90] sm:$0xff]  }
 0x17d   : > { %8244 = vmatpush3.bf16.msra.mxu1 %v8708_v13  ;;  %8217 = vmatprep.subr.bf16.mxu0 %v8709_v14  ;;  %v8725_v30 = vld [vmem:[%s10122_s19 + $0x48] sm:$0xff]   ;;  %v8729_v34 = vld [vmem:[%s10122_s19 + $0x40] sm:$0xff]   ;;  %v8733_v44 = vld [vmem:[%s10122_s19 + $0x178] sm:$0xff]  }
 0x17e   : > { %8245 = vmatprep.subr.bf16.mxu1 %v8710_v15  ;;  %v8726_v31 = vld [vmem:[%s10122_s19 + $0xc8] sm:$0xff]   ;;  %v4440_v36 = vld [vmem:[%s10735_s0 + $0x180] sm:$0xff]  ;;  %v8734_v45 = vld [vmem:[%s10122_s19 + $0x1f8] sm:$0xff]  }
 0x17f   : > { %v8727_v32 = vld [vmem:[%s10122_s19 + $0x8] sm:$0xff]   ;;  %v8730_v37 = vld [vmem:[%s10122_s19 + $0xc0] sm:$0xff]   ;;  %v7903_v46 = vcombine.high %v4424_v35, %v4440_v36  ;;  %v8735_v47 = vld [vmem:[%s10122_s19 + $0x138] sm:$0xff]   ;;  %v7902_v54 = vcombine.low %v4424_v35, %v4440_v36 }
 0x180   : > { %8218 = vmatpush3.bf16.msra.mxu0 %v8711_v16  ;;  %v8728_v33 = vld [vmem:[%s10122_s19 + $0x88] sm:$0xff]   ;;  %v8731_v40 = vld [vmem:[%s10122_s19] sm:$0xff]   ;;  %v8736_v49 = vld [vmem:[%s10122_s19 + $0x1b8] sm:$0xff]  }
 0x181   : > { %8246 = vmatpush3.bf16.msra.mxu1 %v8712_v17  ;;  %8219 = vmatprep.subr.bf16.mxu0 %v8713_v18  ;;  %v4441_v39 = vld [vmem:[%s10735_s0 + $0x188] sm:$0xff]  ;;  %v8732_v41 = vld [vmem:[%s10122_s19 + $0x80] sm:$0xff]   ;;  %v8737_v50 = vld [vmem:[%s10122_s19 + $0x170] sm:$0xff]  }
 0x182   : > { %8247 = vmatprep.subr.bf16.mxu1 %v8714_v19  ;;  %v7905_v48 = vcombine.high %v4425_v38, %v4441_v39  ;;  %v8738_v51 = vld [vmem:[%s10122_s19 + $0x1f0] sm:$0xff]   ;;  %v8741_v55 = vld [vmem:[%s10122_s19 + $0x168] sm:$0xff]   ;;  %v7904_v56 = vcombine.low %v4425_v38, %v4441_v39  ;;  %v8745_v60 = vld [vmem:[%s10122_s19 + $0x160] sm:$0xff]  }
 0x183   : > { %v8739_v52 = vld [vmem:[%s10122_s19 + $0x130] sm:$0xff]   ;;  %v8742_v57 = vld [vmem:[%s10122_s19 + $0x1e8] sm:$0xff]   ;;  %v8746_v61 = vld [vmem:[%s10122_s19 + $0x1e0] sm:$0xff]  }
 0x184   : > { %8220 = vmatpush3.bf16.msra.mxu0 %v8715_v20  ;;  %v8740_v53 = vld [vmem:[%s10122_s19 + $0x1b0] sm:$0xff]   ;;  %v8743_v58 = vld [vmem:[%s10122_s19 + $0x128] sm:$0xff]   ;;  %v8747_v62 = vld [vmem:[%s10122_s19 + $0x120] sm:$0xff]  }
 0x185   : > { %8248 = vmatpush3.bf16.msra.mxu1 %v8716_v21  ;;  %8221 = vmatprep.subr.bf16.mxu0 %v8717_v22  ;;  %v8744_v59 = vld [vmem:[%s10122_s19 + $0x1a8] sm:$0xff]   ;;  %v8748_v63 = vld [vmem:[%s10122_s19 + $0x1a0] sm:$0xff]   ;;  %v8749_v0 = vld [vmem:[%s10122_s19 + $0x158] sm:$0xff]  }
 0x186   : > { %8249 = vmatprep.subr.bf16.mxu1 %v8718_v23  ;;  %v8750_v1 = vld [vmem:[%s10122_s19 + $0x1d8] sm:$0xff]   ;;  %v8753_v4 = vld [vmem:[%s10122_s19 + $0x150] sm:$0xff]   ;;  %v8757_v8 = vld [vmem:[%s10122_s19 + $0x148] sm:$0xff]  }
 0x187   : > { %v8751_v2 = vld [vmem:[%s10122_s19 + $0x118] sm:$0xff]   ;;  %v8754_v5 = vld [vmem:[%s10122_s19 + $0x1d0] sm:$0xff]   ;;  %v8758_v9 = vld [vmem:[%s10122_s19 + $0x1c8] sm:$0xff]  }
 0x188   : > { %8222 = vmatpush3.bf16.msra.mxu0 %v8719_v24  ;;  %v8752_v3 = vld [vmem:[%s10122_s19 + $0x198] sm:$0xff]   ;;  %v8755_v6 = vld [vmem:[%s10122_s19 + $0x110] sm:$0xff]   ;;  %v8759_v10 = vld [vmem:[%s10122_s19 + $0x108] sm:$0xff]  }
 0x189   : > { %8250 = vmatpush3.bf16.msra.mxu1 %v8720_v25  ;;  %8223 = vmatprep.subr.bf16.mxu0 %v8721_v26  ;;  %v8756_v7 = vld [vmem:[%s10122_s19 + $0x190] sm:$0xff]   ;;  %v8760_v11 = vld [vmem:[%s10122_s19 + $0x188] sm:$0xff]   ;;  %v8761_v12 = vld [vmem:[%s10122_s19 + $0x140] sm:$0xff]  }
 0x18a   : > { %8251 = vmatprep.subr.bf16.mxu1 %v8722_v27  ;;  %v4394_v13 = vld [vmem:[%s10735_s0 + $0x10] sm:$0xff]  ;;  %v8762_v14 = vld [vmem:[%s10122_s19 + $0x1c0] sm:$0xff]   ;;  %v4395_v18 = vld [vmem:[%s10735_s0 + $0x18] sm:$0xff] }
 0x18b   : > { %v8763_v15 = vld [vmem:[%s10122_s19 + $0x100] sm:$0xff]   ;;  %v4410_v17 = vld [vmem:[%s10735_s0 + $0x90] sm:$0xff]  ;;  %v4411_v19 = vld [vmem:[%s10735_s0 + $0x98] sm:$0xff] }
 0x18c   : > { %8224 = vmatpush3.bf16.msra.mxu0 %v8723_v28  ;;  %v8764_v16 = vld [vmem:[%s10122_s19 + $0x180] sm:$0xff]   ;;  %v7874_v20 = vcombine.low %v4394_v13, %v4410_v17  ;;  %v7875_v21 = vcombine.high %v4394_v13, %v4410_v17  ;;  %v7876_v22 = vcombine.low %v4395_v18, %v4411_v19  ;;  %v7877_v23 = vcombine.high %v4395_v18, %v4411_v19  ;;  %v8765_v24 = vld [vmem:[%s10122_s19 + $0x278] sm:$0xff]   ;;  %v8769_v28 = vld [vmem:[%s10122_s19 + $0x270] sm:$0xff]  }
 0x18d   : > { %8252 = vmatpush3.bf16.msra.mxu1 %v8724_v29  ;;  %8225 = vmatprep.subr.bf16.mxu0 %v8725_v30  ;;  %v8766_v25 = vld [vmem:[%s10122_s19 + $0x2f8] sm:$0xff]   ;;  %v8770_v29 = vld [vmem:[%s10122_s19 + $0x2f0] sm:$0xff]   ;;  %v8773_v36 = vld [vmem:[%s10122_s19 + $0x268] sm:$0xff]  }
 0x18e   : > { %8253 = vmatprep.subr.bf16.mxu1 %v8726_v31  ;;  %v8767_v26 = vld [vmem:[%s10122_s19 + $0x238] sm:$0xff]   ;;  %v8771_v30 = vld [vmem:[%s10122_s19 + $0x230] sm:$0xff]   ;;  %v4444_v17 = vld [vmem:[%s10735_s0 + $0x1a0] sm:$0xff] }
 0x18f   : > { %v8768_v27 = vld [vmem:[%s10122_s19 + $0x2b8] sm:$0xff]   ;;  %v8772_v31 = vld [vmem:[%s10122_s19 + $0x2b0] sm:$0xff]  }
 0x190   : > { %8226 = vmatpush3.bf16.msra.mxu0 %v8727_v32  ;;  %v4426_v32 = vld [vmem:[%s10735_s0 + $0x110] sm:$0xff]  ;;  %v4427_v38 = vld [vmem:[%s10735_s0 + $0x118] sm:$0xff] }
 0x191   : > { %8254 = vmatpush3.bf16.msra.mxu1 %v8728_v33  ;;  %8227 = vmatprep.subr.bf16.mxu0 %v8729_v34  ;;  %v4442_v33 = vld [vmem:[%s10735_s0 + $0x190] sm:$0xff]  ;;  %v4443_v39 = vld [vmem:[%s10735_s0 + $0x198] sm:$0xff] }
 0x192   : > { %8255 = vmatprep.subr.bf16.mxu1 %v8730_v37  ;;  %v7907_v34 = vcombine.high %v4426_v32, %v4442_v33  ;;  %v7906_v35 = vcombine.low %v4426_v32, %v4442_v33  ;;  %v8774_v37 = vld [vmem:[%s10122_s19 + $0x2e8] sm:$0xff]   ;;  %v8802_v13 = vld [vmem:[%s10122_s19 + $0x3f0] sm:$0xff]   ;;  %v8813_v32 = vld [vmem:[%s10122_s19 + $0x358] sm:$0xff]  }
 0x193   : > { %v8814_v33 = vld [vmem:[%s10122_s19 + $0x3d8] sm:$0xff]  }
 0x194   : > { %8228 = vmatpush3.bf16.msra.mxu0 %v8731_v40  ;;  %v7909_v40 = vcombine.high %v4427_v38, %v4443_v39 }
 0x195   : > { %8256 = vmatpush3.bf16.msra.mxu1 %v8732_v41  ;;  %8269 = vmatprep.subr.bf16.mxu0 %v8733_v44  ;;  %v8775_v41 = vld [vmem:[%s10122_s19 + $0x228] sm:$0xff]   ;;  %v8777_v44 = vld [vmem:[%s10122_s19 + $0x260] sm:$0xff]  }
 0x196   : > { %8297 = vmatprep.subr.bf16.mxu1 %v8734_v45  ;;  %v8778_v45 = vld [vmem:[%s10122_s19 + $0x2e0] sm:$0xff]  }
 0x197   : > { %6857 = vmatmul.mubr.bf16.vlgmr.msra.gmra.mxu0 %v7870_v42  ;;  %v7908_v42 = vcombine.low %v4427_v38, %v4443_v39  ;;  %v8819_v38 = vld [vmem:[%s10122_s19 + $0x310] sm:$0xff]  }
 0x198   : > { %6906 = vmatmul.mubr.bf16.vlgmr.msra.gmra.mxu1 %v7872_v43  ;;  %8270 = vmatpush3.bf16.msra.mxu0 %v8735_v47  ;;  %v8776_v43 = vld [vmem:[%s10122_s19 + $0x2a8] sm:$0xff]   ;;  %v8780_v47 = vld [vmem:[%s10122_s19 + $0x2a0] sm:$0xff]   ;;  %v8820_v39 = vld [vmem:[%s10122_s19 + $0x390] sm:$0xff]  }
 0x199   : > { %8298 = vmatpush3.bf16.msra.mxu1 %v8736_v49  ;;  %6864 = vmatprep.mubr.bf16.mxu0 %v7903_v46  ;;  %v8779_v46 = vld [vmem:[%s10122_s19 + $0x220] sm:$0xff]   ;;  %v8782_v49 = vld [vmem:[%s10122_s19 + $0x2d8] sm:$0xff]  }
 0x19a   : > { %8271 = vmatprep.subr.bf16.mxu0 %v8737_v50  ;;  %6913 = vmatprep.mubr.bf16.mxu1 %v7905_v48  ;;  %v8781_v48 = vld [vmem:[%s10122_s19 + $0x258] sm:$0xff]  }
 0x19b   : > { %8299 = vmatprep.subr.bf16.mxu1 %v8738_v51  ;;  %v8783_v50 = vld [vmem:[%s10122_s19 + $0x218] sm:$0xff]  }
 0x19c   : > { %8272 = vmatpush3.bf16.msra.mxu0 %v8739_v52  ;;  %v8784_v51 = vld [vmem:[%s10122_s19 + $0x298] sm:$0xff]   ;;  %v8785_v52 = vld [vmem:[%s10122_s19 + $0x250] sm:$0xff]  }
 0x19d   : > { %8300 = vmatpush3.bf16.msra.mxu1 %v8740_v53  ;;  %8273 = vmatprep.subr.bf16.mxu0 %v8741_v55  ;;  %v8786_v53 = vld [vmem:[%s10122_s19 + $0x2d0] sm:$0xff]  }
 0x19e   : > { %8301 = vmatprep.subr.bf16.mxu1 %v8742_v57  ;;  %v8788_v55 = vld [vmem:[%s10122_s19 + $0x290] sm:$0xff]   ;;  %v8790_v57 = vld [vmem:[%s10122_s19 + $0x2c8] sm:$0xff]  }
 0x19f   : > { %6865 = vmatmul.mubr.bf16.gmra.mxu0 %v7902_v54  ;;  %v8787_v54 = vld [vmem:[%s10122_s19 + $0x210] sm:$0xff]  }
 0x1a0   : > { %8274 = vmatpush3.bf16.msra.mxu0 %v8743_v58  ;;  %6914 = vmatmul.mubr.bf16.gmra.mxu1 %v7904_v56  ;;  %v8789_v56 = vld [vmem:[%s10122_s19 + $0x248] sm:$0xff]  }
 0x1a1   : > { %8302 = vmatpush3.bf16.msra.mxu1 %v8744_v59  ;;  %8275 = vmatprep.subr.bf16.mxu0 %v8745_v60  ;;  %v8791_v58 = vld [vmem:[%s10122_s19 + $0x208] sm:$0xff]   ;;  %v8793_v60 = vld [vmem:[%s10122_s19 + $0x240] sm:$0xff]  }
 0x1a2   : > { %8303 = vmatprep.subr.bf16.mxu1 %v8746_v61  ;;  %6954 = vmatprep.mubr.bf16.mxu0 %v7875_v21  ;;  %v8792_v59 = vld [vmem:[%s10122_s19 + $0x288] sm:$0xff]   ;;  %v8794_v61 = vld [vmem:[%s10122_s19 + $0x2c0] sm:$0xff]  }
 0x1a3   : > { %7003 = vmatprep.mubr.bf16.mxu1 %v7877_v23  ;;  %v8806_v21 = vld [vmem:[%s10122_s19 + $0x3e8] sm:$0xff]  }
 0x1a4   : > { %8276 = vmatpush3.bf16.msra.mxu0 %v8747_v62  ;;  %v8795_v62 = vld [vmem:[%s10122_s19 + $0x200] sm:$0xff]   ;;  %v4445_v23 = vld [vmem:[%s10735_s0 + $0x1a8] sm:$0xff] }
 0x1a5   : > { %8304 = vmatpush3.bf16.msra.mxu1 %v8748_v63  ;;  %8277 = vmatprep.subr.bf16.mxu0 %v8749_v0  ;;  %v8796_v63 = vld [vmem:[%s10122_s19 + $0x280] sm:$0xff]  }
 0x1a6   : > { %8305 = vmatprep.subr.bf16.mxu1 %v8750_v1  ;;  %v4396_v0 = vld [vmem:[%s10735_s0 + $0x20] sm:$0xff] }
 0x1a7   : > { %v4412_v1 = vld [vmem:[%s10735_s0 + $0xa0] sm:$0xff] }
 0x1a8   : > { %8278 = vmatpush3.bf16.msra.mxu0 %v8751_v2  ;;  %v7878_v2 = vcombine.low %v4396_v0, %v4412_v1 }
 0x1a9   : > { %8306 = vmatpush3.bf16.msra.mxu1 %v8752_v3  ;;  %8279 = vmatprep.subr.bf16.mxu0 %v8753_v4  ;;  %v7879_v3 = vcombine.high %v4396_v0, %v4412_v1  ;;  %v4397_v4 = vld [vmem:[%s10735_s0 + $0x28] sm:$0xff]  ;;  %v4430_v0 = vld [vmem:[%s10735_s0 + $0x130] sm:$0xff] }
 0x1aa   : > { %8307 = vmatprep.subr.bf16.mxu1 %v8754_v5  ;;  %v4413_v5 = vld [vmem:[%s10735_s0 + $0xa8] sm:$0xff]  ;;  %v4446_v1 = vld [vmem:[%s10735_s0 + $0x1b0] sm:$0xff] }
 0x1ac   : > { %8280 = vmatpush3.bf16.msra.mxu0 %v8755_v6  ;;  %v7880_v6 = vcombine.low %v4397_v4, %v4413_v5 }
 0x1ad   : > { %8308 = vmatpush3.bf16.msra.mxu1 %v8756_v7  ;;  %8281 = vmatprep.subr.bf16.mxu0 %v8757_v8  ;;  %v7881_v7 = vcombine.high %v4397_v4, %v4413_v5  ;;  %v8797_v8 = vld [vmem:[%s10122_s19 + $0x378] sm:$0xff]   ;;  %v8837_v4 = vld [vmem:[%s10122_s19 + $0x468] sm:$0xff]  }
 0x1ae   : > { %8309 = vmatprep.subr.bf16.mxu1 %v8758_v9  ;;  %v8798_v9 = vld [vmem:[%s10122_s19 + $0x3f8] sm:$0xff]   ;;  %v8838_v5 = vld [vmem:[%s10122_s19 + $0x4e8] sm:$0xff]  }
 0x1b0   : > { %8282 = vmatpush3.bf16.msra.mxu0 %v8759_v10  ;;  %v8799_v10 = vld [vmem:[%s10122_s19 + $0x338] sm:$0xff]  }
 0x1b1   : > { %8310 = vmatpush3.bf16.msra.mxu1 %v8760_v11  ;;  %8283 = vmatprep.subr.bf16.mxu0 %v8761_v12  ;;  %v8800_v11 = vld [vmem:[%s10122_s19 + $0x3b8] sm:$0xff]   ;;  %v8801_v12 = vld [vmem:[%s10122_s19 + $0x370] sm:$0xff]  }
 0x1b2   : > { %8311 = vmatprep.subr.bf16.mxu1 %v8762_v14  ;;  %v8803_v14 = vld [vmem:[%s10122_s19 + $0x330] sm:$0xff]  }
 0x1b4   : > { %8284 = vmatpush3.bf16.msra.mxu0 %v8763_v15  ;;  %v8804_v15 = vld [vmem:[%s10122_s19 + $0x3b0] sm:$0xff]  }
 0x1b5   : > { %8312 = vmatpush3.bf16.msra.mxu1 %v8764_v16  ;;  %8325 = vmatprep.subr.bf16.mxu0 %v8765_v24  ;;  %v4428_v16 = vld [vmem:[%s10735_s0 + $0x120] sm:$0xff] }
 0x1b6   : > { %8353 = vmatprep.subr.bf16.mxu1 %v8766_v25  ;;  %v7911_v18 = vcombine.high %v4428_v16, %v4444_v17  ;;  %v7910_v19 = vcombine.low %v4428_v16, %v4444_v17  ;;  %v8807_v25 = vld [vmem:[%s10122_s19 + $0x328] sm:$0xff]   ;;  %v8845_v16 = vld [vmem:[%s10122_s19 + $0x458] sm:$0xff]  }
 0x1b7   : > { %6955 = vmatmul.mubr.bf16.vlgmr.msra.gmra.mxu0 %v7874_v20  ;;  %v8805_v20 = vld [vmem:[%s10122_s19 + $0x368] sm:$0xff]   ;;  %v8846_v17 = vld [vmem:[%s10122_s19 + $0x4d8] sm:$0xff]  }
 0x1b8   : > { %7004 = vmatmul.mubr.bf16.vlgmr.msra.gmra.mxu1 %v7876_v22  ;;  %8326 = vmatpush3.bf16.msra.mxu0 %v8767_v26  ;;  %v4429_v22 = vld [vmem:[%s10735_s0 + $0x128] sm:$0xff] }
 0x1b9   : > { %8354 = vmatpush3.bf16.msra.mxu1 %v8768_v27  ;;  %8327 = vmatprep.subr.bf16.mxu0 %v8769_v28  ;;  %v7913_v24 = vcombine.high %v4429_v22, %v4445_v23  ;;  %v7912_v26 = vcombine.low %v4429_v22, %v4445_v23  ;;  %v8808_v27 = vld [vmem:[%s10122_s19 + $0x3a8] sm:$0xff]   ;;  %v8809_v28 = vld [vmem:[%s10122_s19 + $0x360] sm:$0xff]   ;;  %v8851_v22 = vld [vmem:[%s10122_s19 + $0x410] sm:$0xff]  }
 0x1ba   : > { %8355 = vmatprep.subr.bf16.mxu1 %v8770_v29  ;;  %6962 = vmatprep.mubr.bf16.mxu0 %v7907_v34  ;;  %v8810_v29 = vld [vmem:[%s10122_s19 + $0x3e0] sm:$0xff]   ;;  %v8815_v34 = vld [vmem:[%s10122_s19 + $0x318] sm:$0xff]   ;;  %v8852_v23 = vld [vmem:[%s10122_s19 + $0x490] sm:$0xff]  }
 0x1bb   : > { %7011 = vmatprep.mubr.bf16.mxu1 %v7909_v40  ;;  %v8821_v40 = vld [vmem:[%s10122_s19 + $0x348] sm:$0xff]  }
 0x1bc   : > { %8328 = vmatpush3.bf16.msra.mxu0 %v8771_v30  ;;  %v8811_v30 = vld [vmem:[%s10122_s19 + $0x320] sm:$0xff]  }
 0x1bd   : > { %8356 = vmatpush3.bf16.msra.mxu1 %v8772_v31  ;;  %8329 = vmatprep.subr.bf16.mxu0 %v8773_v36  ;;  %v8812_v31 = vld [vmem:[%s10122_s19 + $0x3a0] sm:$0xff]   ;;  %v8817_v36 = vld [vmem:[%s10122_s19 + $0x350] sm:$0xff]  }
 0x1be   : > { %8357 = vmatprep.subr.bf16.mxu1 %v8774_v37  ;;  %v8818_v37 = vld [vmem:[%s10122_s19 + $0x3d0] sm:$0xff]  }
 0x1bf   : > { %6963 = vmatmul.mubr.bf16.gmra.mxu0 %v7906_v35  ;;  %v8816_v35 = vld [vmem:[%s10122_s19 + $0x398] sm:$0xff]  }
 0x1c0   : > { %8330 = vmatpush3.bf16.msra.mxu0 %v8775_v41  ;;  %7012 = vmatmul.mubr.bf16.gmra.mxu1 %v7908_v42  ;;  %v8822_v41 = vld [vmem:[%s10122_s19 + $0x3c8] sm:$0xff]  }
 0x1c1   : > { %8358 = vmatpush3.bf16.msra.mxu1 %v8776_v43  ;;  %8331 = vmatprep.subr.bf16.mxu0 %v8777_v44  ;;  %v8823_v42 = vld [vmem:[%s10122_s19 + $0x308] sm:$0xff]   ;;  %v8825_v44 = vld [vmem:[%s10122_s19 + $0x340] sm:$0xff]  }
 0x1c2   : > { %8359 = vmatprep.subr.bf16.mxu1 %v8778_v45  ;;  %7052 = vmatprep.mubr.bf16.mxu0 %v7879_v3  ;;  %v8824_v43 = vld [vmem:[%s10122_s19 + $0x388] sm:$0xff]   ;;  %v8826_v45 = vld [vmem:[%s10122_s19 + $0x3c0] sm:$0xff]   ;;  %v7914_v3 = vcombine.low %v4430_v0, %v4446_v1 }
 0x1c3   : > { %7101 = vmatprep.mubr.bf16.mxu1 %v7881_v7  ;;  %v4447_v7 = vld [vmem:[%s10735_s0 + $0x1b8] sm:$0xff] }
 0x1c4   : > { %8332 = vmatpush3.bf16.msra.mxu0 %v8779_v46  ;;  %v8827_v46 = vld [vmem:[%s10122_s19 + $0x300] sm:$0xff]  }
 0x1c5   : > { %8360 = vmatpush3.bf16.msra.mxu1 %v8780_v47  ;;  %8333 = vmatprep.subr.bf16.mxu0 %v8781_v48  ;;  %v8828_v47 = vld [vmem:[%s10122_s19 + $0x380] sm:$0xff]   ;;  %v4398_v48 = vld [vmem:[%s10735_s0 + $0x30] sm:$0xff] }
 0x1c6   : > { %8361 = vmatprep.subr.bf16.mxu1 %v8782_v49  ;;  %v4414_v49 = vld [vmem:[%s10735_s0 + $0xb0] sm:$0xff] }
 0x1c8   : > { %8334 = vmatpush3.bf16.msra.mxu0 %v8783_v50  ;;  %v4399_v50 = vld [vmem:[%s10735_s0 + $0x38] sm:$0xff] }
 0x1c9   : > { %8362 = vmatpush3.bf16.msra.mxu1 %v8784_v51  ;;  %8335 = vmatprep.subr.bf16.mxu0 %v8785_v52  ;;  %v7882_v51 = vcombine.low %v4398_v48, %v4414_v49  ;;  %v7883_v52 = vcombine.high %v4398_v48, %v4414_v49  ;;  %v4432_v48 = vld [vmem:[%s10735_s0 + $0x140] sm:$0xff] }
 0x1ca   : > { %8363 = vmatprep.subr.bf16.mxu1 %v8786_v53  ;;  %v4415_v53 = vld [vmem:[%s10735_s0 + $0xb8] sm:$0xff]  ;;  %v4448_v49 = vld [vmem:[%s10735_s0 + $0x1c0] sm:$0xff] }
 0x1cc   : > { %8336 = vmatpush3.bf16.msra.mxu0 %v8787_v54  ;;  %v7884_v54 = vcombine.low %v4399_v50, %v4415_v53 }
 0x1cd   : > { %8364 = vmatpush3.bf16.msra.mxu1 %v8788_v55  ;;  %8337 = vmatprep.subr.bf16.mxu0 %v8789_v56  ;;  %v7885_v55 = vcombine.high %v4399_v50, %v4415_v53  ;;  %v8829_v56 = vld [vmem:[%s10122_s19 + $0x478] sm:$0xff]   ;;  %v7919_v50 = vcombine.high %v4432_v48, %v4448_v49  ;;  %v8870_v53 = vld [vmem:[%s10122_s19 + $0x5e8] sm:$0xff]  }
 0x1ce   : > { %8365 = vmatprep.subr.bf16.mxu1 %v8790_v57  ;;  %v8830_v57 = vld [vmem:[%s10122_s19 + $0x4f8] sm:$0xff]  }
 0x1d0   : > { %8338 = vmatpush3.bf16.msra.mxu0 %v8791_v58  ;;  %v8831_v58 = vld [vmem:[%s10122_s19 + $0x438] sm:$0xff]  }
 0x1d1   : > { %8366 = vmatpush3.bf16.msra.mxu1 %v8792_v59  ;;  %8339 = vmatprep.subr.bf16.mxu0 %v8793_v60  ;;  %v8832_v59 = vld [vmem:[%s10122_s19 + $0x4b8] sm:$0xff]   ;;  %v8833_v60 = vld [vmem:[%s10122_s19 + $0x470] sm:$0xff]  }
 0x1d2   : > { %8367 = vmatprep.subr.bf16.mxu1 %v8794_v61  ;;  %v8834_v61 = vld [vmem:[%s10122_s19 + $0x4f0] sm:$0xff]  }
 0x1d4   : > { %8340 = vmatpush3.bf16.msra.mxu0 %v8795_v62  ;;  %v8835_v62 = vld [vmem:[%s10122_s19 + $0x430] sm:$0xff]  }
 0x1d5   : > { %8368 = vmatpush3.bf16.msra.mxu1 %v8796_v63  ;;  %8381 = vmatprep.subr.bf16.mxu0 %v8797_v8  ;;  %v8836_v63 = vld [vmem:[%s10122_s19 + $0x4b0] sm:$0xff]  }
 0x1d6   : > { %8409 = vmatprep.subr.bf16.mxu1 %v8798_v9  ;;  %v8839_v9 = vld [vmem:[%s10122_s19 + $0x428] sm:$0xff]  }
 0x1d7   : > { %7053 = vmatmul.mubr.bf16.vlgmr.msra.gmra.mxu0 %v7878_v2  ;;  %v7915_v2 = vcombine.high %v4430_v0, %v4446_v1  ;;  %v8877_v0 = vld [vmem:[%s10122_s19 + $0x558] sm:$0xff]  }
 0x1d8   : > { %7102 = vmatmul.mubr.bf16.vlgmr.msra.gmra.mxu1 %v7880_v6  ;;  %8382 = vmatpush3.bf16.msra.mxu0 %v8799_v10  ;;  %v4431_v6 = vld [vmem:[%s10735_s0 + $0x138] sm:$0xff] }
 0x1d9   : > { %8410 = vmatpush3.bf16.msra.mxu1 %v8800_v11  ;;  %8383 = vmatprep.subr.bf16.mxu0 %v8801_v12  ;;  %v7917_v8 = vcombine.high %v4431_v6, %v4447_v7  ;;  %v7916_v10 = vcombine.low %v4431_v6, %v4447_v7  ;;  %v8840_v11 = vld [vmem:[%s10122_s19 + $0x4a8] sm:$0xff]   ;;  %v8841_v12 = vld [vmem:[%s10122_s19 + $0x460] sm:$0xff]   ;;  %v8878_v1 = vld [vmem:[%s10122_s19 + $0x5d8] sm:$0xff]  }
 0x1da   : > { %8411 = vmatprep.subr.bf16.mxu1 %v8802_v13  ;;  %7060 = vmatprep.mubr.bf16.mxu0 %v7911_v18  ;;  %v8842_v13 = vld [vmem:[%s10122_s19 + $0x4e0] sm:$0xff]   ;;  %v8847_v18 = vld [vmem:[%s10122_s19 + $0x418] sm:$0xff]   ;;  %v8883_v6 = vld [vmem:[%s10122_s19 + $0x510] sm:$0xff]  }
 0x1db   : > { %7109 = vmatprep.mubr.bf16.mxu1 %v7913_v24  ;;  %v8853_v24 = vld [vmem:[%s10122_s19 + $0x448] sm:$0xff]   ;;  %v8884_v7 = vld [vmem:[%s10122_s19 + $0x590] sm:$0xff]  }
 0x1dc   : > { %8384 = vmatpush3.bf16.msra.mxu0 %v8803_v14  ;;  %v8843_v14 = vld [vmem:[%s10122_s19 + $0x420] sm:$0xff]  }
 0x1dd   : > { %8412 = vmatpush3.bf16.msra.mxu1 %v8804_v15  ;;  %8385 = vmatprep.subr.bf16.mxu0 %v8805_v20  ;;  %v8844_v15 = vld [vmem:[%s10122_s19 + $0x4a0] sm:$0xff]   ;;  %v8849_v20 = vld [vmem:[%s10122_s19 + $0x450] sm:$0xff]  }
 0x1de   : > { %8413 = vmatprep.subr.bf16.mxu1 %v8806_v21  ;;  %v8850_v21 = vld [vmem:[%s10122_s19 + $0x4d0] sm:$0xff]  }
 0x1df   : > { %7061 = vmatmul.mubr.bf16.gmra.mxu0 %v7910_v19  ;;  %v8848_v19 = vld [vmem:[%s10122_s19 + $0x498] sm:$0xff]  }
 0x1e0   : > { %8386 = vmatpush3.bf16.msra.mxu0 %v8807_v25  ;;  %7110 = vmatmul.mubr.bf16.gmra.mxu1 %v7912_v26  ;;  %v8854_v25 = vld [vmem:[%s10122_s19 + $0x4c8] sm:$0xff]  }
 0x1e1   : > { %8414 = vmatpush3.bf16.msra.mxu1 %v8808_v27  ;;  %8387 = vmatprep.subr.bf16.mxu0 %v8809_v28  ;;  %v8855_v26 = vld [vmem:[%s10122_s19 + $0x408] sm:$0xff]   ;;  %v8857_v28 = vld [vmem:[%s10122_s19 + $0x440] sm:$0xff]  }
 0x1e2   : > { %8415 = vmatprep.subr.bf16.mxu1 %v8810_v29  ;;  %7150 = vmatprep.mubr.bf16.mxu0 %v7883_v52  ;;  %v8856_v27 = vld [vmem:[%s10122_s19 + $0x488] sm:$0xff]   ;;  %v8858_v29 = vld [vmem:[%s10122_s19 + $0x4c0] sm:$0xff]  }
 0x1e3   : > { %7199 = vmatprep.mubr.bf16.mxu1 %v7885_v55  ;;  %v8869_v52 = vld [vmem:[%s10122_s19 + $0x568] sm:$0xff]  }
 0x1e4   : > { %8388 = vmatpush3.bf16.msra.mxu0 %v8811_v30  ;;  %v8859_v30 = vld [vmem:[%s10122_s19 + $0x400] sm:$0xff]   ;;  %v4449_v55 = vld [vmem:[%s10735_s0 + $0x1c8] sm:$0xff] }
 0x1e5   : > { %8416 = vmatpush3.bf16.msra.mxu1 %v8812_v31  ;;  %8389 = vmatprep.subr.bf16.mxu0 %v8813_v32  ;;  %v8860_v31 = vld [vmem:[%s10122_s19 + $0x480] sm:$0xff]  }
 0x1e6   : > { %8417 = vmatprep.subr.bf16.mxu1 %v8814_v33  ;;  %v4400_v32 = vld [vmem:[%s10735_s0 + $0x40] sm:$0xff] }
 0x1e7   : > { %v4416_v33 = vld [vmem:[%s10735_s0 + $0xc0] sm:$0xff] }
 0x1e8   : > { %8390 = vmatpush3.bf16.msra.mxu0 %v8815_v34  ;;  %v4401_v34 = vld [vmem:[%s10735_s0 + $0x48] sm:$0xff] }
 0x1e9   : > { %8418 = vmatpush3.bf16.msra.mxu1 %v8816_v35  ;;  %8391 = vmatprep.subr.bf16.mxu0 %v8817_v36  ;;  %v4417_v35 = vld [vmem:[%s10735_s0 + $0xc8] sm:$0xff]  ;;  %v7886_v36 = vcombine.low %v4400_v32, %v4416_v33 }
 0x1ea   : > { %8419 = vmatprep.subr.bf16.mxu1 %v8818_v37  ;;  %v7887_v37 = vcombine.high %v4400_v32, %v4416_v33  ;;  %v4434_v32 = vld [vmem:[%s10735_s0 + $0x150] sm:$0xff] }
 0x1eb   : > { %v4450_v33 = vld [vmem:[%s10735_s0 + $0x1d0] sm:$0xff] }
 0x1ec   : > { %8392 = vmatpush3.bf16.msra.mxu0 %v8819_v38  ;;  %v7888_v38 = vcombine.low %v4401_v34, %v4417_v35 }
 0x1ed   : > { %8420 = vmatpush3.bf16.msra.mxu1 %v8820_v39  ;;  %8393 = vmatprep.subr.bf16.mxu0 %v8821_v40  ;;  %v7889_v39 = vcombine.high %v4401_v34, %v4417_v35  ;;  %v8861_v40 = vld [vmem:[%s10122_s19 + $0x578] sm:$0xff]   ;;  %v7923_v34 = vcombine.high %v4434_v32, %v4450_v33  ;;  %v7922_v35 = vcombine.low %v4434_v32, %v4450_v33 }
 0x1ee   : > { %8421 = vmatprep.subr.bf16.mxu1 %v8822_v41  ;;  %v8862_v41 = vld [vmem:[%s10122_s19 + $0x5f8] sm:$0xff]  }
 0x1ef   : > { %v8927_v32 = vld [vmem:[%s10122_s19 + $0x738] sm:$0xff]  }
 0x1f0   : > { %8394 = vmatpush3.bf16.msra.mxu0 %v8823_v42  ;;  %v8863_v42 = vld [vmem:[%s10122_s19 + $0x538] sm:$0xff]  }
 0x1f1   : > { %8422 = vmatpush3.bf16.msra.mxu1 %v8824_v43  ;;  %8395 = vmatprep.subr.bf16.mxu0 %v8825_v44  ;;  %v8864_v43 = vld [vmem:[%s10122_s19 + $0x5b8] sm:$0xff]   ;;  %v8865_v44 = vld [vmem:[%s10122_s19 + $0x570] sm:$0xff]  }
 0x1f2   : > { %8423 = vmatprep.subr.bf16.mxu1 %v8826_v45  ;;  %v8866_v45 = vld [vmem:[%s10122_s19 + $0x5f0] sm:$0xff]  }
 0x1f4   : > { %8396 = vmatpush3.bf16.msra.mxu0 %v8827_v46  ;;  %v8867_v46 = vld [vmem:[%s10122_s19 + $0x530] sm:$0xff]  }
 0x1f5   : > { %8424 = vmatpush3.bf16.msra.mxu1 %v8828_v47  ;;  %8437 = vmatprep.subr.bf16.mxu0 %v8829_v56  ;;  %v8868_v47 = vld [vmem:[%s10122_s19 + $0x5b0] sm:$0xff]  }
 0x1f6   : > { %8465 = vmatprep.subr.bf16.mxu1 %v8830_v57  ;;  %v8871_v57 = vld [vmem:[%s10122_s19 + $0x528] sm:$0xff]  }
 0x1f7   : > { %7151 = vmatmul.mubr.bf16.vlgmr.msra.gmra.mxu0 %v7882_v51  ;;  %v7918_v51 = vcombine.low %v4432_v48, %v4448_v49  ;;  %v8909_v48 = vld [vmem:[%s10122_s19 + $0x658] sm:$0xff]  }
 0x1f8   : > { %7200 = vmatmul.mubr.bf16.vlgmr.msra.gmra.mxu1 %v7884_v54  ;;  %8438 = vmatpush3.bf16.msra.mxu0 %v8831_v58  ;;  %v4433_v54 = vld [vmem:[%s10735_s0 + $0x148] sm:$0xff]  ;;  %v8910_v49 = vld [vmem:[%s10122_s19 + $0x6d8] sm:$0xff]  }
 0x1f9   : > { %8466 = vmatpush3.bf16.msra.mxu1 %v8832_v59  ;;  %8439 = vmatprep.subr.bf16.mxu0 %v8833_v60  ;;  %v7921_v56 = vcombine.high %v4433_v54, %v4449_v55  ;;  %v7920_v58 = vcombine.low %v4433_v54, %v4449_v55  ;;  %v8872_v59 = vld [vmem:[%s10122_s19 + $0x5a8] sm:$0xff]   ;;  %v8873_v60 = vld [vmem:[%s10122_s19 + $0x560] sm:$0xff]   ;;  %v8915_v54 = vld [vmem:[%s10122_s19 + $0x610] sm:$0xff]  }
 0x1fa   : > { %8467 = vmatprep.subr.bf16.mxu1 %v8834_v61  ;;  %7158 = vmatprep.mubr.bf16.mxu0 %v7915_v2  ;;  %v8874_v61 = vld [vmem:[%s10122_s19 + $0x5e0] sm:$0xff]   ;;  %v8879_v2 = vld [vmem:[%s10122_s19 + $0x518] sm:$0xff]  }
 0x1fb   : > { %7207 = vmatprep.mubr.bf16.mxu1 %v7917_v8  ;;  %v8885_v8 = vld [vmem:[%s10122_s19 + $0x548] sm:$0xff]  }
 0x1fc   : > { %8440 = vmatpush3.bf16.msra.mxu0 %v8835_v62  ;;  %v8875_v62 = vld [vmem:[%s10122_s19 + $0x520] sm:$0xff]  }
 0x1fd   : > { %8468 = vmatpush3.bf16.msra.mxu1 %v8836_v63  ;;  %8441 = vmatprep.subr.bf16.mxu0 %v8837_v4  ;;  %v8876_v63 = vld [vmem:[%s10122_s19 + $0x5a0] sm:$0xff]   ;;  %v8881_v4 = vld [vmem:[%s10122_s19 + $0x550] sm:$0xff]  }
 0x1fe   : > { %8469 = vmatprep.subr.bf16.mxu1 %v8838_v5  ;;  %v8882_v5 = vld [vmem:[%s10122_s19 + $0x5d0] sm:$0xff]  }
 0x1ff   : > { %7159 = vmatmul.mubr.bf16.gmra.mxu0 %v7914_v3  ;;  %v8880_v3 = vld [vmem:[%s10122_s19 + $0x598] sm:$0xff]  }
 0x200   : > { %8442 = vmatpush3.bf16.msra.mxu0 %v8839_v9  ;;  %7208 = vmatmul.mubr.bf16.gmra.mxu1 %v7916_v10  ;;  %v8886_v9 = vld [vmem:[%s10122_s19 + $0x5c8] sm:$0xff]  }
 0x201   : > { %8470 = vmatpush3.bf16.msra.mxu1 %v8840_v11  ;;  %8443 = vmatprep.subr.bf16.mxu0 %v8841_v12  ;;  %v8887_v10 = vld [vmem:[%s10122_s19 + $0x508] sm:$0xff]   ;;  %v8889_v12 = vld [vmem:[%s10122_s19 + $0x540] sm:$0xff]  }
 0x202   : > { %8471 = vmatprep.subr.bf16.mxu1 %v8842_v13  ;;  %7248 = vmatprep.mubr.bf16.mxu0 %v7887_v37  ;;  %v8888_v11 = vld [vmem:[%s10122_s19 + $0x588] sm:$0xff]   ;;  %v8890_v13 = vld [vmem:[%s10122_s19 + $0x5c0] sm:$0xff]  }
 0x203   : > { %7297 = vmatprep.mubr.bf16.mxu1 %v7889_v39  ;;  %v8902_v37 = vld [vmem:[%s10122_s19 + $0x6e8] sm:$0xff]   ;;  %v4451_v39 = vld [vmem:[%s10735_s0 + $0x1d8] sm:$0xff] }
 0x204   : > { %8444 = vmatpush3.bf16.msra.mxu0 %v8843_v14  ;;  %v8891_v14 = vld [vmem:[%s10122_s19 + $0x500] sm:$0xff]  }
 0x205   : > { %8472 = vmatpush3.bf16.msra.mxu1 %v8844_v15  ;;  %8445 = vmatprep.subr.bf16.mxu0 %v8845_v16  ;;  %v8892_v15 = vld [vmem:[%s10122_s19 + $0x580] sm:$0xff]   ;;  %v4402_v16 = vld [vmem:[%s10735_s0 + $0x50] sm:$0xff] }
 0x206   : > { %8473 = vmatprep.subr.bf16.mxu1 %v8846_v17  ;;  %v4418_v17 = vld [vmem:[%s10735_s0 + $0xd0] sm:$0xff] }
 0x208   : > { %8446 = vmatpush3.bf16.msra.mxu0 %v8847_v18  ;;  %v7890_v18 = vcombine.low %v4402_v16, %v4418_v17 }
 0x209   : > { %8474 = vmatpush3.bf16.msra.mxu1 %v8848_v19  ;;  %8447 = vmatprep.subr.bf16.mxu0 %v8849_v20  ;;  %v7891_v19 = vcombine.high %v4402_v16, %v4418_v17  ;;  %v4403_v20 = vld [vmem:[%s10735_s0 + $0x58] sm:$0xff]  ;;  %v4420_v16 = vld [vmem:[%s10735_s0 + $0xe0] sm:$0xff]  ;;  %v4405_v17 = vld [vmem:[%s10735_s0 + $0x68] sm:$0xff] }
 0x20a   : > { %8475 = vmatprep.subr.bf16.mxu1 %v8850_v21  ;;  %v4419_v21 = vld [vmem:[%s10735_s0 + $0xd8] sm:$0xff] }
 0x20c   : > { %8448 = vmatpush3.bf16.msra.mxu0 %v8851_v22  ;;  %v7892_v22 = vcombine.low %v4403_v20, %v4419_v21 }
 0x20d   : > { %8476 = vmatpush3.bf16.msra.mxu1 %v8852_v23  ;;  %8449 = vmatprep.subr.bf16.mxu0 %v8853_v24  ;;  %v7893_v23 = vcombine.high %v4403_v20, %v4419_v21  ;;  %v8893_v24 = vld [vmem:[%s10122_s19 + $0x678] sm:$0xff]  }
 0x20e   : > { %8477 = vmatprep.subr.bf16.mxu1 %v8854_v25  ;;  %v8894_v25 = vld [vmem:[%s10122_s19 + $0x6f8] sm:$0xff]  }
 0x210   : > { %8450 = vmatpush3.bf16.msra.mxu0 %v8855_v26  ;;  %v8895_v26 = vld [vmem:[%s10122_s19 + $0x638] sm:$0xff]  }
 0x211   : > { %8478 = vmatpush3.bf16.msra.mxu1 %v8856_v27  ;;  %8451 = vmatprep.subr.bf16.mxu0 %v8857_v28  ;;  %v8896_v27 = vld [vmem:[%s10122_s19 + $0x6b8] sm:$0xff]   ;;  %v8897_v28 = vld [vmem:[%s10122_s19 + $0x670] sm:$0xff]  }
 0x212   : > { %8479 = vmatprep.subr.bf16.mxu1 %v8858_v29  ;;  %v8898_v29 = vld [vmem:[%s10122_s19 + $0x6f0] sm:$0xff]  }
 0x214   : > { %8452 = vmatpush3.bf16.msra.mxu0 %v8859_v30  ;;  %v8899_v30 = vld [vmem:[%s10122_s19 + $0x630] sm:$0xff]  }
 0x215   : > { %8480 = vmatpush3.bf16.msra.mxu1 %v8860_v31  ;;  %8493 = vmatprep.subr.bf16.mxu0 %v8861_v40  ;;  %v8900_v31 = vld [vmem:[%s10122_s19 + $0x6b0] sm:$0xff]  }
 0x216   : > { %8521 = vmatprep.subr.bf16.mxu1 %v8862_v41  ;;  %v8903_v41 = vld [vmem:[%s10122_s19 + $0x628] sm:$0xff]  }
 0x217   : > { %7249 = vmatmul.mubr.bf16.vlgmr.msra.gmra.mxu0 %v7886_v36  ;;  %v8901_v36 = vld [vmem:[%s10122_s19 + $0x668] sm:$0xff]  }
 0x218   : > { %7298 = vmatmul.mubr.bf16.vlgmr.msra.gmra.mxu1 %v7888_v38  ;;  %8494 = vmatpush3.bf16.msra.mxu0 %v8863_v42  ;;  %v4435_v38 = vld [vmem:[%s10735_s0 + $0x158] sm:$0xff] }
 0x219   : > { %8522 = vmatpush3.bf16.msra.mxu1 %v8864_v43  ;;  %8495 = vmatprep.subr.bf16.mxu0 %v8865_v44  ;;  %v7925_v40 = vcombine.high %v4435_v38, %v4451_v39  ;;  %v7924_v42 = vcombine.low %v4435_v38, %v4451_v39  ;;  %v8904_v43 = vld [vmem:[%s10122_s19 + $0x6a8] sm:$0xff]   ;;  %v8905_v44 = vld [vmem:[%s10122_s19 + $0x660] sm:$0xff]   ;;  %v8929_v38 = vld [vmem:[%s10122_s19 + $0x770] sm:$0xff]  }
 0x21a   : > { %8523 = vmatprep.subr.bf16.mxu1 %v8866_v45  ;;  %7256 = vmatprep.mubr.bf16.mxu0 %v7919_v50  ;;  %v8906_v45 = vld [vmem:[%s10122_s19 + $0x6e0] sm:$0xff]   ;;  %v8911_v50 = vld [vmem:[%s10122_s19 + $0x618] sm:$0xff]  }
 0x21b   : > { %7305 = vmatprep.mubr.bf16.mxu1 %v7921_v56  ;;  %v8916_v56 = vld [vmem:[%s10122_s19 + $0x690] sm:$0xff]  }
 0x21c   : > { %8496 = vmatpush3.bf16.msra.mxu0 %v8867_v46  ;;  %v8907_v46 = vld [vmem:[%s10122_s19 + $0x620] sm:$0xff]  }
 0x21d   : > { %8524 = vmatpush3.bf16.msra.mxu1 %v8868_v47  ;;  %8497 = vmatprep.subr.bf16.mxu0 %v8869_v52  ;;  %v8908_v47 = vld [vmem:[%s10122_s19 + $0x6a0] sm:$0xff]   ;;  %v8913_v52 = vld [vmem:[%s10122_s19 + $0x650] sm:$0xff]  }
 0x21e   : > { %8525 = vmatprep.subr.bf16.mxu1 %v8870_v53  ;;  %v8914_v53 = vld [vmem:[%s10122_s19 + $0x6d0] sm:$0xff]  }
 0x21f   : > { %7257 = vmatmul.mubr.bf16.gmra.mxu0 %v7918_v51  ;;  %v8912_v51 = vld [vmem:[%s10122_s19 + $0x698] sm:$0xff]  }
 0x220   : > { %8498 = vmatpush3.bf16.msra.mxu0 %v8871_v57  ;;  %7306 = vmatmul.mubr.bf16.gmra.mxu1 %v7920_v58  ;;  %v8917_v58 = vld [vmem:[%s10122_s19 + $0x648] sm:$0xff]  }
 0x221   : > { %8526 = vmatpush3.bf16.msra.mxu1 %v8872_v59  ;;  %8499 = vmatprep.subr.bf16.mxu0 %v8873_v60  ;;  %v8918_v60 = vld [vmem:[%s10122_s19 + $0x6c8] sm:$0xff]  }
 0x222   : > { %8527 = vmatprep.subr.bf16.mxu1 %v8874_v61  ;;  %7346 = vmatprep.mubr.bf16.mxu0 %v7891_v19 }
 0x223   : > { %7395 = vmatprep.mubr.bf16.mxu1 %v7893_v23 }
 0x224   : > { %8500 = vmatpush3.bf16.msra.mxu0 %v8875_v62 }
 0x225   : > { %8528 = vmatpush3.bf16.msra.mxu1 %v8876_v63  ;;  %8501 = vmatprep.subr.bf16.mxu0 %v8877_v0  ;;  %v8919_v63 = vld [vmem:[%s10122_s19 + $0x608] sm:$0xff]  }
 0x226   : > { %8529 = vmatprep.subr.bf16.mxu1 %v8878_v1 }
 0x228   : > { %8502 = vmatpush3.bf16.msra.mxu0 %v8879_v2  ;;  %v8920_v2 = vld [vmem:[%s10122_s19 + $0x688] sm:$0xff]  }
 0x229   : > { %8530 = vmatpush3.bf16.msra.mxu1 %v8880_v3  ;;  %8503 = vmatprep.subr.bf16.mxu0 %v8881_v4  ;;  %v8921_v4 = vld [vmem:[%s10122_s19 + $0x640] sm:$0xff]  }
 0x22a   : > { %8531 = vmatprep.subr.bf16.mxu1 %v8882_v5 }
 0x22c   : > { %8504 = vmatpush3.bf16.msra.mxu0 %v8883_v6 }
 0x22d   : > { %8532 = vmatpush3.bf16.msra.mxu1 %v8884_v7  ;;  %8505 = vmatprep.subr.bf16.mxu0 %v8885_v8  ;;  %v8922_v7 = vld [vmem:[%s10122_s19 + $0x6c0] sm:$0xff]  }
 0x22e   : > { %8533 = vmatprep.subr.bf16.mxu1 %v8886_v9 }
 0x230   : > { %8506 = vmatpush3.bf16.msra.mxu0 %v8887_v10  ;;  %v8923_v10 = vld [vmem:[%s10122_s19 + $0x600] sm:$0xff]  }
 0x231   : > { %8534 = vmatpush3.bf16.msra.mxu1 %v8888_v11  ;;  %8507 = vmatprep.subr.bf16.mxu0 %v8889_v12 }
 0x232   : > { %8535 = vmatprep.subr.bf16.mxu1 %v8890_v13  ;;  %v8924_v13 = vld [vmem:[%s10122_s19 + $0x680] sm:$0xff]  }
 0x234   : > { %8508 = vmatpush3.bf16.msra.mxu0 %v8891_v14 }
 0x235   : > { %8536 = vmatpush3.bf16.msra.mxu1 %v8892_v15  ;;  %8549 = vmatprep.subr.bf16.mxu0 %v8893_v24  ;;  %v4404_v15 = vld [vmem:[%s10735_s0 + $0x60] sm:$0xff] }
 0x236   : > { %8577 = vmatprep.subr.bf16.mxu1 %v8894_v25  ;;  %v7894_v20 = vcombine.low %v4404_v15, %v4420_v16  ;;  %v7895_v21 = vcombine.high %v4404_v15, %v4420_v16  ;;  %v8951_v16 = vld [vmem:[%s10122_s19 + $0x708] sm:$0xff]  }
 0x237   : > { %7347 = vmatmul.mubr.bf16.vlgmr.msra.gmra.mxu0 %v7890_v18 }
 0x238   : > { %7396 = vmatmul.mubr.bf16.vlgmr.msra.gmra.mxu1 %v7892_v22  ;;  %8550 = vmatpush3.bf16.msra.mxu0 %v8895_v26  ;;  %v4421_v22 = vld [vmem:[%s10735_s0 + $0xe8] sm:$0xff] }
 0x239   : > { %8578 = vmatpush3.bf16.msra.mxu1 %v8896_v27  ;;  %8551 = vmatprep.subr.bf16.mxu0 %v8897_v28  ;;  %v7896_v25 = vcombine.low %v4405_v17, %v4421_v22  ;;  %v7897_v26 = vcombine.high %v4405_v17, %v4421_v22  ;;  %v8925_v27 = vld [vmem:[%s10122_s19 + $0x778] sm:$0xff]  }
 0x23a   : > { %8579 = vmatprep.subr.bf16.mxu1 %v8898_v29  ;;  %7354 = vmatprep.mubr.bf16.mxu0 %v7923_v34 }
 0x23b   : > { %7403 = vmatprep.mubr.bf16.mxu1 %v7925_v40  ;;  %v8930_v40 = vld [vmem:[%s10122_s19 + $0x7f0] sm:$0xff]  }
 0x23c   : > { %8552 = vmatpush3.bf16.msra.mxu0 %v8899_v30  ;;  %v8926_v30 = vld [vmem:[%s10122_s19 + $0x7f8] sm:$0xff]  }
 0x23d   : > { %8580 = vmatpush3.bf16.msra.mxu1 %v8900_v31  ;;  %8553 = vmatprep.subr.bf16.mxu0 %v8901_v36 }
 0x23e   : > { %8581 = vmatprep.subr.bf16.mxu1 %v8902_v37 }
 0x23f   : > { %7355 = vmatmul.mubr.bf16.gmra.mxu0 %v7922_v35  ;;  %v8928_v35 = vld [vmem:[%s10122_s19 + $0x7b8] sm:$0xff]  }
 0x240   : > { %8554 = vmatpush3.bf16.msra.mxu0 %v8903_v41  ;;  %7404 = vmatmul.mubr.bf16.gmra.mxu1 %v7924_v42  ;;  %v8931_v41 = vld [vmem:[%s10122_s19 + $0x730] sm:$0xff]  }
 0x241   : > { %8582 = vmatpush3.bf16.msra.mxu1 %v8904_v43  ;;  %8555 = vmatprep.subr.bf16.mxu0 %v8905_v44  ;;  %v8932_v43 = vld [vmem:[%s10122_s19 + $0x7b0] sm:$0xff]   ;;  %v4436_v44 = vld [vmem:[%s10735_s0 + $0x160] sm:$0xff] }
 0x242   : > { %8583 = vmatprep.subr.bf16.mxu1 %v8906_v45  ;;  %7444 = vmatprep.mubr.bf16.mxu0 %v7895_v21  ;;  %v4452_v45 = vld [vmem:[%s10735_s0 + $0x1e0] sm:$0xff] }
 0x243   : > { %7493 = vmatprep.mubr.bf16.mxu1 %v7897_v26 }
 0x244   : > { %8556 = vmatpush3.bf16.msra.mxu0 %v8907_v46  ;;  %v7927_v46 = vcombine.high %v4436_v44, %v4452_v45 }
 0x245   : > { %8584 = vmatpush3.bf16.msra.mxu1 %v8908_v47  ;;  %8557 = vmatprep.subr.bf16.mxu0 %v8909_v48  ;;  %v7926_v47 = vcombine.low %v4436_v44, %v4452_v45  ;;  %v8933_v48 = vld [vmem:[%s10122_s19 + $0x768] sm:$0xff]  }
 0x246   : > { %8585 = vmatprep.subr.bf16.mxu1 %v8910_v49  ;;  %v8934_v49 = vld [vmem:[%s10122_s19 + $0x7e8] sm:$0xff]  }
 0x248   : > { %8558 = vmatpush3.bf16.msra.mxu0 %v8911_v50  ;;  %v4437_v50 = vld [vmem:[%s10735_s0 + $0x168] sm:$0xff] }
 0x249   : > { %8586 = vmatpush3.bf16.msra.mxu1 %v8912_v51  ;;  %8559 = vmatprep.subr.bf16.mxu0 %v8913_v52  ;;  %v4453_v51 = vld [vmem:[%s10735_s0 + $0x1e8] sm:$0xff] }
 0x24a   : > { %8587 = vmatprep.subr.bf16.mxu1 %v8914_v53  ;;  %v7929_v52 = vcombine.high %v4437_v50, %v4453_v51  ;;  %v8935_v53 = vld [vmem:[%s10122_s19 + $0x728] sm:$0xff]  }
 0x24c   : > { %8560 = vmatpush3.bf16.msra.mxu0 %v8915_v54  ;;  %v7928_v54 = vcombine.low %v4437_v50, %v4453_v51 }
 0x24d   : > { %8588 = vmatpush3.bf16.msra.mxu1 %v8916_v56  ;;  %8561 = vmatprep.subr.bf16.mxu0 %v8917_v58  ;;  %v8937_v56 = vld [vmem:[%s10122_s19 + $0x760] sm:$0xff]  }
 0x24e   : > { %8589 = vmatprep.subr.bf16.mxu1 %v8918_v60  ;;  %v8939_v58 = vld [vmem:[%s10122_s19 + $0x720] sm:$0xff]   ;;  %v8941_v60 = vld [vmem:[%s10122_s19 + $0x758] sm:$0xff]  }
 0x250   : > { %8562 = vmatpush3.bf16.msra.mxu0 %v8919_v63  ;;  %v8944_v63 = vld [vmem:[%s10122_s19 + $0x798] sm:$0xff]  }
 0x251   : > { %8590 = vmatpush3.bf16.msra.mxu1 %v8920_v2  ;;  %8563 = vmatprep.subr.bf16.mxu0 %v8921_v4  ;;  %v8947_v4 = vld [vmem:[%s10122_s19 + $0x710] sm:$0xff]  }
 0x252   : > { %8591 = vmatprep.subr.bf16.mxu1 %v8922_v7 }
 0x254   : > { %8564 = vmatpush3.bf16.msra.mxu0 %v8923_v10 }
 0x255   : > { %8592 = vmatpush3.bf16.msra.mxu1 %v8924_v13  ;;  %8605 = vmatprep.subr.bf16.mxu0 %v8925_v27 }
 0x256   : > { %8633 = vmatprep.subr.bf16.mxu1 %v8926_v30 }
 0x257   : > { %v8229_v55 = vpop.f32.mrf.mxu0  ;;  %7445 = vmatmul.mubr.bf16.vlgmr.msra.gmra.mxu0 %v7894_v20  ;;  %v8952_v20 = vld [vmem:[%s10122_s19 + $0x788] sm:$0xff]  }
 0x258   : > { %v8257_v57 = vpop.f32.mrf.mxu1  ;;  %7494 = vmatmul.mubr.bf16.vlgmr.msra.gmra.mxu1 %v7896_v25  ;;  %8606 = vmatpush3.bf16.msra.mxu0 %v8927_v32  ;;  %v8954_v25 = vld [vmem:[%s10122_s19 + $0x7c0] sm:$0xff]   ;;  %v4422_v32 = vld [vmem:[%s10735_s0 + $0xf0] sm:$0xff] }
 0x259   : > { %v8230_v59 = vpop.f32.mrf.mxu0  ;;  %8634 = vmatpush3.bf16.msra.mxu1 %v8928_v35  ;;  %8607 = vmatprep.subr.bf16.mxu0 %v8929_v38 }
 0x25a   : > { %v8231_v61 = vadd.f32 %v8230_v59, %v8229_v55  ;;  %v8258_v62 = vpop.f32.mrf.mxu1  ;;  %8635 = vmatprep.subr.bf16.mxu1 %v8930_v40  ;;  %7452 = vmatprep.mubr.bf16.mxu0 %v7927_v46  ;;  %v8936_v55 = vld [vmem:[%s10122_s19 + $0x7a8] sm:$0xff]   ;;  %v8940_v59 = vld [vmem:[%s10122_s19 + $0x7a0] sm:$0xff]   ;;  %v4438_v40 = vld [vmem:[%s10735_s0 + $0x170] sm:$0xff] }
 0x25b   : > { %v8259_v0 = vadd.f32 %v8258_v62, %v8257_v57  ;;  %v8232_v1 = vpop.f32.mrf.mxu0  ;;  %7501 = vmatprep.mubr.bf16.mxu1 %v7929_v52  ;;  %v8938_v57 = vld [vmem:[%s10122_s19 + $0x7e0] sm:$0xff]   ;;  %v8943_v62 = vld [vmem:[%s10122_s19 + $0x718] sm:$0xff]  }
 0x25c   : > { %v8260_v3 = vpop.f32.mrf.mxu1  ;;  %8608 = vmatpush3.bf16.msra.mxu0 %v8931_v41  ;;  %v4454_v41 = vld [vmem:[%s10735_s0 + $0x1f0] sm:$0xff] }
 0x25d   : > { %v10481_v5 = vadd.f32 %v8259_v0, %v8231_v61  ;;  %v8233_v6 = vpop.f32.mrf.mxu0  ;;  %8636 = vmatpush3.bf16.msra.mxu1 %v8932_v43  ;;  %8609 = vmatprep.subr.bf16.mxu0 %v8933_v48  ;;  %v8942_v61 = vld [vmem:[%s10122_s19 + $0x7d8] sm:$0xff]   ;;  %v8945_v0 = vld [vmem:[%s10122_s19 + $0x750] sm:$0xff]   ;;  %v7931_v46 = vcombine.high %v4438_v40, %v4454_v41 }
 0x25e   : > { %v8234_v8 = vadd.f32 %v8233_v6, %v8232_v1  ;;  %v8261_v9 = vpop.f32.mrf.mxu1  ;;  %8637 = vmatprep.subr.bf16.mxu1 %v8934_v49  ;;  %v4439_v43 = vld [vmem:[%s10735_s0 + $0x178] sm:$0xff] }
 0x25f   : > { %v8262_v11 = vadd.f32 %v8261_v9, %v8260_v3  ;;  %v8235_v12 = vpop.f32.mrf.mxu0  ;;  %7453 = vmatmul.mubr.bf16.gmra.mxu0 %v7926_v47  ;;  %v8946_v3 = vld [vmem:[%s10122_s19 + $0x7d0] sm:$0xff]   ;;  %v4455_v47 = vld [vmem:[%s10735_s0 + $0x1f8] sm:$0xff] }
 0x260   : > { %v8263_v14 = vpop.f32.mrf.mxu1  ;;  %8610 = vmatpush3.bf16.msra.mxu0 %v8935_v53  ;;  %7502 = vmatmul.mubr.bf16.gmra.mxu1 %v7928_v54  ;;  %v7933_v49 = vcombine.high %v4439_v43, %v4455_v47 }
 0x261   : > { %v10495_v18 = vadd.f32 %v8262_v11, %v8234_v8  ;;  %v8236_v19 = vpop.f32.mrf.mxu0  ;;  %8638 = vmatpush3.bf16.msra.mxu1 %v8936_v55  ;;  %8611 = vmatprep.subr.bf16.mxu0 %v8937_v56  ;;  %v8948_v8 = vld [vmem:[%s10122_s19 + $0x790] sm:$0xff]   ;;  %v8949_v11 = vld [vmem:[%s10122_s19 + $0x748] sm:$0xff]  }
 0x262   : > { %v8237_v23 = vadd.f32 %v8236_v19, %v8235_v12  ;;  %v8264_v24 = vpop.f32.mrf.mxu1  ;;  %8639 = vmatprep.subr.bf16.mxu1 %v8938_v57 }
 0x263   : > { %v8265_v28 = vadd.f32 %v8264_v24, %v8263_v14  ;;  %v8238_v29 = vpop.f32.mrf.mxu0  ;;  %v8950_v14 = vld [vmem:[%s10122_s19 + $0x7c8] sm:$0xff]   ;;  %v8953_v24 = vld [vmem:[%s10122_s19 + $0x740] sm:$0xff]  }
 0x264   : > { %v8266_v31 = vpop.f32.mrf.mxu1  ;;  %8612 = vmatpush3.bf16.msra.mxu0 %v8939_v58  ;;  %v7930_v58 = vcombine.low %v4438_v40, %v4454_v41 }
 0x265   : > { %v10503_v33 = vadd.f32 %v8265_v28, %v8237_v23  ;;  %v8239_v34 = vpop.f32.mrf.mxu0  ;;  %8640 = vmatpush3.bf16.msra.mxu1 %v8940_v59  ;;  %8613 = vmatprep.subr.bf16.mxu0 %v8941_v60  ;;  %v8956_v28 = vld [vmem:[%s10122_s19 + $0x780] sm:$0xff]   ;;  %v7932_v59 = vcombine.low %v4439_v43, %v4455_v47 }
 0x266   : > { %v8240_v36 = vadd.f32 %v8239_v34, %v8238_v29  ;;  %v8267_v37 = vpop.f32.mrf.mxu1  ;;  %8641 = vmatprep.subr.bf16.mxu1 %v8942_v61  ;;  %v4406_v29 = vld [vmem:[%s10735_s0 + $0x70] sm:$0xff]  ;;  %v4423_v34 = vld [vmem:[%s10735_s0 + $0xf8] sm:$0xff] }
 0x267   : > { %v8268_v39 = vadd.f32 %v8267_v37, %v8266_v31  ;;  %v7899_v37 = vcombine.high %v4406_v29, %v4422_v32 }
 0x268   : > { %8614 = vmatpush3.bf16.msra.mxu0 %v8943_v62 }
 0x269   : > { %v10509_v42 = vadd.f32 %v8268_v39, %v8240_v36  ;;  %8642 = vmatpush3.bf16.msra.mxu1 %v8944_v63  ;;  %8615 = vmatprep.subr.bf16.mxu0 %v8945_v0  ;;  %v7898_v36 = vcombine.low %v4406_v29, %v4422_v32 }
 0x26a   : > { %8643 = vmatprep.subr.bf16.mxu1 %v8946_v3  ;;  %7542 = vmatprep.mubr.bf16.mxu0 %v7899_v37 }
 0x26c   : > { %8616 = vmatpush3.bf16.msra.mxu0 %v8947_v4 }
 0x26d   : > { %8644 = vmatpush3.bf16.msra.mxu1 %v8948_v8  ;;  %8617 = vmatprep.subr.bf16.mxu0 %v8949_v11 }
 0x26e   : > { %8645 = vmatprep.subr.bf16.mxu1 %v8950_v14 }
 0x270   : > { %8618 = vmatpush3.bf16.msra.mxu0 %v8951_v16 }
 0x271   : > { %8646 = vmatpush3.bf16.msra.mxu1 %v8952_v20  ;;  %8619 = vmatprep.subr.bf16.mxu0 %v8953_v24 }
 0x272   : > { %8647 = vmatprep.subr.bf16.mxu1 %v8954_v25 }
 0x275   : > { %8648 = vmatpush3.bf16.msra.mxu1 %v8956_v28 }
 0x277   : > { %v8285_v1 = vpop.f32.mrf.mxu0 }
 0x278   : > { %v8313_v2 = vpop.f32.mrf.mxu1 }
 0x279   : > { %v8286_v6 = vpop.f32.mrf.mxu0 }
 0x27a   : > { %v8314_v7 = vpop.f32.mrf.mxu1  ;;  %v8287_v9 = vadd.f32 %v8286_v6, %v8285_v1 }
 0x27b   : > { %v8315_v10 = vadd.f32 %v8314_v7, %v8313_v2  ;;  %v8288_v12 = vpop.f32.mrf.mxu0 }
 0x27c   : > { %v8316_v13 = vpop.f32.mrf.mxu1  ;;  %v6957_v15 = vadd.f32 %v8287_v9, %v10481_v5  ;;  %v8955_v5 = vld [vmem:[%s10122_s19 + $0x700] sm:$0xff]  }
 0x27d   : > { %v8289_v17 = vpop.f32.mrf.mxu0  ;;  %8620 = vmatpush3.bf16.msra.mxu0 %v8955_v5 }
 0x27e   : > { %v8317_v19 = vpop.f32.mrf.mxu1  ;;  %v7006_v21 = vadd.f32 %v8315_v10, %v6957_v15  ;;  %v8290_v22 = vadd.f32 %v8289_v17, %v8288_v12 }
 0x27f   : > { %v8318_v23 = vadd.f32 %v8317_v19, %v8316_v13  ;;  %v8291_v27 = vpop.f32.mrf.mxu0 }
 0x280   : > { %v6960_v26 = vadd.f32 %v8290_v22, %v10495_v18  ;;  %v4407_v18 = vld [vmem:[%s10735_s0 + $0x78] sm:$0xff]  ;;  %v8319_v44 = vpop.f32.mrf.mxu1  ;;  %7543 = vmatmul.mubr.bf16.vlgmr.msra.gmra.mxu0 %v7898_v36 }
 0x281   : > { %v8292_v31 = vpop.f32.mrf.mxu0  ;;  %v7900_v38 = vcombine.low %v4407_v18, %v4423_v34  ;;  %v7901_v39 = vcombine.high %v4407_v18, %v4423_v34  ;;  %7550 = vmatprep.mubr.bf16.mxu0 %v7931_v46 }
 0x282   : > { %v10553_v30 = vadd.f32 %v8318_v23, %v6960_v26  ;;  %v8293_v35 = vadd.f32 %v8292_v31, %v8291_v27  ;;  %v8320_v50 = vpop.f32.mrf.mxu1 }
 0x283   : > { %v8294_v45 = vpop.f32.mrf.mxu0  ;;  %7591 = vmatprep.mubr.bf16.mxu1 %v7901_v39  ;;  %v8321_v52 = vadd.f32 %v8320_v50, %v8319_v44 }
 0x284   : > { %v6965_v48 = vadd.f32 %v8293_v35, %v10503_v33  ;;  %7592 = vmatmul.mubr.bf16.vlgmr.msra.gmra.mxu1 %v7900_v38  ;;  %v8322_v54 = vpop.f32.mrf.mxu1 }
 0x285   : > { %v8295_v51 = vpop.f32.mrf.mxu0  ;;  %7599 = vmatprep.mubr.bf16.mxu1 %v7933_v49 }
 0x286   : > { %v8296_v53 = vadd.f32 %v8295_v51, %v8294_v45  ;;  %v7014_v55 = vadd.f32 %v8321_v52, %v6965_v48  ;;  %v8323_v57 = vpop.f32.mrf.mxu1 }
 0x287   : > { %v8324_v60 = vadd.f32 %v8323_v57, %v8322_v54 }
 0x288   : > { %v6968_v56 = vadd.f32 %v8296_v53, %v10509_v42  ;;  %7551 = vmatmul.mubr.bf16.gmra.mxu0 %v7930_v58 }
 0x28a   : > { %v10578_v33 = vadd.f32 %v8324_v60, %v6968_v56 }
 0x28c   : > { %7600 = vmatmul.mubr.bf16.gmra.mxu1 %v7932_v59 }
 0x297   : > { %v8341_v61 = vpop.f32.mrf.mxu0 }
 0x298   : > { %v8369_v62 = vpop.f32.mrf.mxu1 }
 0x299   : > { %v8342_v63 = vpop.f32.mrf.mxu0 }
 0x29a   : > { %v8343_v0 = vadd.f32 %v8342_v63, %v8341_v61  ;;  %v8370_v1 = vpop.f32.mrf.mxu1 }
 0x29b   : > { %v8371_v2 = vadd.f32 %v8370_v1, %v8369_v62  ;;  %v10580_v3 = vpop.f32.mrf.mxu0 }
 0x29c   : > { %v7055_v4 = vadd.f32 %v8343_v0, %v7006_v21  ;;  %v10586_v7 = vpop.f32.mrf.mxu1 }
 0x29d   : > { %v10582_v6 = vpop.f32.mrf.mxu0 }
 0x29e   : > { %v10584_v42 = vadd.f32 %v8371_v2, %v7055_v4  ;;  %v10588_v9 = vpop.f32.mrf.mxu1 }
 0x29f   : > { %v8347_v8 = vpop.f32.mrf.mxu0 }
 0x2a0   : > { %v8375_v12 = vpop.f32.mrf.mxu1 }
 0x2a1   : > { %v8348_v10 = vpop.f32.mrf.mxu0 }
 0x2a2   : > { %v8349_v11 = vadd.f32 %v8348_v10, %v8347_v8  ;;  %v8376_v14 = vpop.f32.mrf.mxu1 }
 0x2a3   : > { %v8377_v15 = vadd.f32 %v8376_v14, %v8375_v12  ;;  %v10592_v17 = vpop.f32.mrf.mxu0 }
 0x2a4   : > { %v7063_v13 = vadd.f32 %v8349_v11, %v7014_v55  ;;  %v10596_v21 = vpop.f32.mrf.mxu1 }
 0x2a5   : > { %v10594_v19 = vpop.f32.mrf.mxu0 }
 0x2a6   : > { %v10590_v16 = vadd.f32 %v8377_v15, %v7063_v13  ;;  %v10598_v23 = vpop.f32.mrf.mxu1  ;;  %v8346_v15 = vadd.f32 %v10582_v6, %v10580_v3 }
 0x2b7   : > { %v8397_v20 = vpop.f32.mrf.mxu0 }
 0x2b8   : > { %v8425_v24 = vpop.f32.mrf.mxu1 }
 0x2b9   : > { %v8398_v22 = vpop.f32.mrf.mxu0 }
 0x2ba   : > { %v8426_v26 = vpop.f32.mrf.mxu1 }
 0x2bb   : > { %v8400_v25 = vpop.f32.mrf.mxu0 }
 0x2bc   : > { %v10600_v5 = vpop.f32.mrf.mxu1 }
 0x2bd   : > { %v8401_v27 = vpop.f32.mrf.mxu0 }
 0x2be   : > { %v10602_v29 = vpop.f32.mrf.mxu1 }
 0x2bf   : > { %v8403_v28 = vpop.f32.mrf.mxu0 }
 0x2c0   : > { %v10604_v32 = vpop.f32.mrf.mxu1 }
 0x2c1   : > { %v8404_v31 = vpop.f32.mrf.mxu0 }
 0x2c2   : > { %v10608_v34 = vpop.f32.mrf.mxu1  ;;  %v8405_v6 = vadd.f32 %v8404_v31, %v8403_v28 }
 0x2c3   : > { %v10606_v18 = vpop.f32.mrf.mxu0 }
 0x2c4   : > { %v10612_v36 = vpop.f32.mrf.mxu1 }
 0x2c5   : > { %v10610_v35 = vpop.f32.mrf.mxu0 }
 0x2c6   : > { %v10614_v38 = vpop.f32.mrf.mxu1 }
 0x2d7   : > { %v8453_v37 = vpop.f32.mrf.mxu0 }
 0x2d8   : > { %v8481_v40 = vpop.f32.mrf.mxu1 }
 0x2d9   : > { %v8454_v39 = vpop.f32.mrf.mxu0 }
 0x2da   : > { %v8482_v43 = vpop.f32.mrf.mxu1  ;;  %v8455_v3 = vadd.f32 %v8454_v39, %v8453_v37 }
 0x2db   : > { %v8456_v41 = vpop.f32.mrf.mxu0 }
 0x2dc   : > { %v10616_v45 = vpop.f32.mrf.mxu1 }
 0x2dd   : > { %v8457_v44 = vpop.f32.mrf.mxu0 }
 0x2de   : > { %v10618_v47 = vpop.f32.mrf.mxu1 }
 0x2df   : > { %v8459_v46 = vpop.f32.mrf.mxu0 }
 0x2e0   : > { %v10620_v49 = vpop.f32.mrf.mxu1 }
 0x2e1   : > { %v8460_v48 = vpop.f32.mrf.mxu0 }
 0x2e2   : > { %v10624_v51 = vpop.f32.mrf.mxu1 }
 0x2e3   : > { %v10622_v50 = vpop.f32.mrf.mxu0 }
 0x2e4   : > { %v10628_v53 = vpop.f32.mrf.mxu1 }
 0x2e5   : > { %v10626_v52 = vpop.f32.mrf.mxu0  ;;  %10740 = vst [vmem:[#allocation4_spill] sm:$0xff] %v10628_v53 }
 0x2e6   : > { %v10630_v55 = vpop.f32.mrf.mxu1 }
 0x2e7   : > { %10741 = vst [vmem:[#allocation5_spill] sm:$0xff] %v10630_v55 }
 0x2f7   : > { %v8509_v54 = vpop.f32.mrf.mxu0 }
 0x2f8   : > { %v8537_v56 = vpop.f32.mrf.mxu1 }
 0x2f9   : > { %v8510_v57 = vpop.f32.mrf.mxu0 }
 0x2fa   : > { %v8538_v58 = vpop.f32.mrf.mxu1  ;;  %v8511_v31 = vadd.f32 %v8510_v57, %v8509_v54 }
 0x2fb   : > { %v8512_v59 = vpop.f32.mrf.mxu0 }
 0x2fc   : > { %v10632_v60 = vpop.f32.mrf.mxu1 }
 0x2fd   : > { %10742 = vst [vmem:[#allocation6_spill] sm:$0xff] %v10632_v60  ;;  %v8513_v61 = vpop.f32.mrf.mxu0 }
 0x2fe   : > { %v10634_v62 = vpop.f32.mrf.mxu1 }
 0x2ff   : > { %10743 = vst [vmem:[#allocation7_spill] sm:$0xff] %v10634_v62  ;;  %v10636_v63 = vpop.f32.mrf.mxu0 }
 0x300   : > { %10744 = vst [vmem:[#allocation8_spill] sm:$0xff] %v10636_v63  ;;  %v10638_v0 = vpop.f32.mrf.mxu1 }
 0x301   : > { %10745 = vst [vmem:[#allocation9_spill] sm:$0xff] %v10638_v0  ;;  %v8516_v1 = vpop.f32.mrf.mxu0  ;;  %v8399_v0 = vadd.f32 %v8398_v22, %v8397_v20 }
 0x302   : > { %v10640_v2 = vpop.f32.mrf.mxu1 }
 0x303   : > { %10746 = vst [vmem:[#allocation10_spill] sm:$0xff] %v10640_v2  ;;  %v10642_v4 = vpop.f32.mrf.mxu0  ;;  %v7058_v2 = vadd.f32 %v8346_v15, %v10553_v30 }
 0x304   : > { %10747 = vst [vmem:[#allocation11_spill] sm:$0xff] %v10642_v4  ;;  %v10644_v8 = vpop.f32.mrf.mxu1  ;;  %v8402_v4 = vadd.f32 %v8401_v27, %v8400_v25  ;;  %v8458_v25 = vadd.f32 %v8457_v44, %v8456_v41  ;;  %v8433_v27 = vadd.f32 %v10608_v34, %v10604_v32  ;;  %v8539_v34 = vadd.f32 %v8538_v58, %v8537_v56  ;;  %v10753_v56 = vld [vmem:[#allocation4_spill] sm:$0xff]  ;;  %v10754_v58 = vld [vmem:[#allocation5_spill] sm:$0xff] }
 0x305   : > { %10748 = vst [vmem:[#allocation12_spill] sm:$0xff] %v10644_v8  ;;  %v10646_v10 = vpop.f32.mrf.mxu0  ;;  %v8374_v8 = vadd.f32 %v10588_v9, %v10586_v7  ;;  %v8380_v7 = vadd.f32 %v10598_v23, %v10596_v21  ;;  %v8461_v23 = vadd.f32 %v8460_v48, %v8459_v46  ;;  %v8514_v41 = vadd.f32 %v8513_v61, %v8512_v59 }
 0x306   : > { %10749 = vst [vmem:[#allocation13_spill] sm:$0xff] %v10646_v10  ;;  %v10648_v11 = vpop.f32.mrf.mxu1  ;;  %v7153_v10 = vadd.f32 %v8399_v0, %v10584_v42  ;;  %v8492_v59 = vadd.f32 %v10754_v58, %v10753_v56 }
 0x307   : > { %10750 = vst [vmem:[#allocation14_spill] sm:$0xff] %v10648_v11  ;;  %v8427_v11 = vadd.f32 %v8426_v26, %v8425_v24  ;;  %v7107_v63 = vadd.f32 %v8374_v8, %v7058_v2  ;;  %v8430_v24 = vadd.f32 %v10602_v29, %v10600_v5  ;;  %v7161_v26 = vadd.f32 %v8405_v6, %v10590_v16  ;;  %v10752_v2 = vld [vmem:[#allocation8_spill] sm:$0xff] }
 0x308   : > { %v8486_v16 = vadd.f32 %v10618_v47, %v10616_v45 }
 0x309   : > { %v7202_v22 = vadd.f32 %v8427_v11, %v7153_v10  ;;  %v7156_v30 = vadd.f32 %v8402_v4, %v7107_v63  ;;  %v7210_v5 = vadd.f32 %v8433_v27, %v7161_v26 }
 0x30b   : > { %v7205_v28 = vadd.f32 %v8430_v24, %v7156_v30 }
 0x30d   : > { %v7254_v0 = vadd.f32 %v8458_v25, %v7205_v28 }
 0x30f   : > { %v7303_v48 = vadd.f32 %v8486_v16, %v7254_v0 }
 0x311   : > { %v7352_v4 = vadd.f32 %v8514_v41, %v7303_v48 }
 0x317   : > { %v8565_v12 = vpop.f32.mrf.mxu0 }
 0x318   : > { %v10650_v13 = vpop.f32.mrf.mxu1 }
 0x319   : > { %10751 = vst [vmem:[#allocation15_spill] sm:$0xff] %v10650_v13  ;;  %v8566_v14 = vpop.f32.mrf.mxu0  ;;  %v8352_v13 = vadd.f32 %v10594_v19, %v10592_v17  ;;  %v7251_v17 = vadd.f32 %v8455_v3, %v7202_v22  ;;  %v8483_v19 = vadd.f32 %v8482_v43, %v8481_v40  ;;  %v8436_v40 = vadd.f32 %v10614_v38, %v10612_v36  ;;  %v10759_v3 = vld [vmem:[#allocation10_spill] sm:$0xff] }
 0x31a   : > { %v8594_v62 = vpop.f32.mrf.mxu1  ;;  %v8464_v43 = vadd.f32 %v10626_v52, %v10622_v50  ;;  %v8567_v54 = vadd.f32 %v8566_v14, %v8565_v12  ;;  %v8517_v36 = vadd.f32 %v8516_v1, %v10752_v2  ;;  %v10758_v14 = vld [vmem:[#allocation9_spill] sm:$0xff] }
 0x31b   : > { %v8568_v60 = vpop.f32.mrf.mxu0  ;;  %v7066_v15 = vadd.f32 %v8352_v13, %v10578_v33  ;;  %v8408_v33 = vadd.f32 %v10610_v35, %v10606_v18  ;;  %v7300_v63 = vadd.f32 %v8483_v19, %v7251_v17  ;;  %v7259_v18 = vadd.f32 %v8461_v23, %v7210_v5  ;;  %v10763_v23 = vld [vmem:[#allocation14_spill] sm:$0xff] }
 0x31c   : > { %v10655_v55 = vpop.f32.mrf.mxu1  ;;  %v8489_v35 = vadd.f32 %v10624_v51, %v10620_v49  ;;  %v10755_v49 = vld [vmem:[#allocation6_spill] sm:$0xff]  ;;  %v10756_v51 = vld [vmem:[#allocation7_spill] sm:$0xff]  ;;  %v8545_v1 = vadd.f32 %v10759_v3, %v10758_v14 }
 0x31d   : > { %v8569_v53 = vpop.f32.mrf.mxu0  ;;  %v7115_v21 = vadd.f32 %v8380_v7, %v7066_v15  ;;  %v7349_v32 = vadd.f32 %v8511_v31, %v7300_v63  ;;  %v8542_v10 = vadd.f32 %v10756_v51, %v10755_v49  ;;  %v10760_v15 = vld [vmem:[#allocation11_spill] sm:$0xff]  ;;  %v10761_v7 = vld [vmem:[#allocation13_spill] sm:$0xff] }
 0x31e   : > { %v10662_v20 = vpop.f32.mrf.mxu1  ;;  %v7308_v45 = vadd.f32 %v8489_v35, %v7259_v18  ;;  %v8570_v13 = vadd.f32 %v8569_v53, %v8568_v60  ;;  %v8520_v24 = vadd.f32 %v10761_v7, %v10760_v15 }
 0x31f   : > { %v8571_v9 = vpop.f32.mrf.mxu0  ;;  %v7164_v29 = vadd.f32 %v8408_v33, %v7115_v21  ;;  %v7398_v38 = vadd.f32 %v8539_v34, %v7349_v32  ;;  %v7401_v30 = vadd.f32 %v8542_v10, %v7352_v4  ;;  %v10762_v21 = vld [vmem:[#allocation12_spill] sm:$0xff]  ;;  %v8598_v0 = vadd.f32 %v10662_v20, %v10655_v55 }
 0x320   : > { %v10667_v42 = vpop.f32.mrf.mxu1  ;;  %v10757_v52 = vld [vmem:[#allocation15_spill] sm:$0xff]  ;;  %v7357_v12 = vadd.f32 %v8517_v36, %v7308_v45  ;;  %v8548_v63 = vadd.f32 %v10763_v23, %v10762_v21 }
 0x321   : > { %v8572_v37 = vpop.f32.mrf.mxu0  ;;  %v7213_v57 = vadd.f32 %v8436_v40, %v7164_v29  ;;  %v7447_v50 = vadd.f32 %v8567_v54, %v7398_v38  ;;  %v8595_v11 = vadd.f32 %v8594_v62, %v10757_v52  ;;  %v7450_v33 = vadd.f32 %v8570_v13, %v7401_v30 }
 0x322   : > { %v8600_v39 = vpop.f32.mrf.mxu1  ;;  %v8573_v17 = vadd.f32 %v8572_v37, %v8571_v9  ;;  %v7406_v31 = vadd.f32 %v8545_v1, %v7357_v12 }
 0x323   : > { %v8574_v44 = vpop.f32.mrf.mxu0  ;;  %v7262_v47 = vadd.f32 %v8464_v43, %v7213_v57  ;;  %v7496_v27 = vadd.f32 %v8595_v11, %v7447_v50  ;;  %v8601_v9 = vadd.f32 %v8600_v39, %v10667_v42  ;;  %v7499_v32 = vadd.f32 %v8598_v0, %v7450_v33 }
 0x324   : > { %v8602_v46 = vpop.f32.mrf.mxu1  ;;  %v7455_v29 = vadd.f32 %v8573_v17, %v7406_v31  ;;  %v7650_v17 = vlaneseq }
 0x325   : > { %v8575_v61 = vpop.f32.mrf.mxu0  ;;  %v7311_v26 = vadd.f32 %v8492_v59, %v7262_v47 }
 0x326   : > { %v8603_v8 = vpop.f32.mrf.mxu1  ;;  %v8576_v34 = vadd.f32 %v8575_v61, %v8574_v44  ;;  %v7504_v2 = vadd.f32 %v8601_v9, %v7455_v29  ;;  %v7651_v33 = vshrl.u32 %v7650_v17, 7 }
 0x327   : > { %v7360_v60 = vadd.f32 %v8520_v24, %v7311_v26  ;;  %v8604_v38 = vadd.f32 %v8603_v8, %v8602_v46 }
 0x328   : > { %vm7653_vm0 = vcmp.eq.s32.totalorder %v7651_v33, 1  ;;  %vm7652_vm1 = vcmp.eq.s32.totalorder %v7651_v33, 0 }
 0x329   : > { %v7409_v48 = vadd.f32 %v8548_v63, %v7360_v60 }
 0x32b   : > { %v7458_v36 = vadd.f32 %v8576_v34, %v7409_v48 }
 0x32d   : > { %v7507_v10 = vadd.f32 %v8604_v38, %v7458_v36 }
 0x340   : > { %v8621_v6 = vpop.f32.mrf.mxu0 }
 0x342   : > { %v8622_v19 = vpop.f32.mrf.mxu0 }
 0x343   : > { %v8623_v28 = vadd.f32 %v8622_v19, %v8621_v6 }
 0x344   : > { %v8649_v22 = vpop.f32.mrf.mxu1  ;;  %v8624_v62 = vpop.f32.mrf.mxu0 }
 0x345   : > { %v7545_v5 = vadd.f32 %v8623_v28, %v7496_v27 }
 0x346   : > { %v8650_v25 = vpop.f32.mrf.mxu1  ;;  %v8625_v40 = vpop.f32.mrf.mxu0 }
 0x347   : > { %v8651_v37 = vadd.f32 %v8650_v25, %v8649_v22  ;;  %v8626_v41 = vadd.f32 %v8625_v40, %v8624_v62 }
 0x348   : > { %v8652_v53 = vpop.f32.mrf.mxu1  ;;  %v8627_v35 = vpop.f32.mrf.mxu0 }
 0x349   : > { %v7594_v18 = vadd.f32 %v8651_v37, %v7545_v5  ;;  %v7548_v54 = vadd.f32 %v8626_v41, %v7499_v32 }
 0x34a   : > { %v8653_v16 = vpop.f32.mrf.mxu1  ;;  %v8628_v55 = vpop.f32.mrf.mxu0 }
 0x34b   : > { %v8654_v57 = vadd.f32 %v8653_v16, %v8652_v53  ;;  %v8629_v39 = vadd.f32 %v8628_v55, %v8627_v35  ;;  %v7637_v4 = vmul.f32 %v7594_v18, %v7594_v18 }
 0x34c   : > { %v8655_v43 = vpop.f32.mrf.mxu1  ;;  %v8630_v47 = vpop.f32.mrf.mxu0 }
 0x34d   : > { %v7597_v42 = vadd.f32 %v8654_v57, %v7548_v54  ;;  %v7553_v61 = vadd.f32 %v8629_v39, %v7504_v2 }
 0x34e   : > { %v8656_v20 = vpop.f32.mrf.mxu1  ;;  %v8631_v49 = vpop.f32.mrf.mxu0 }
 0x34f   : > { %v8657_v45 = vadd.f32 %v8656_v20, %v8655_v43  ;;  %v8205_v56 = vpack.c.bf16 %v7597_v42, %v7594_v18  ;;  %v7628_v58 = vadd.f32 %v7597_v42, %v7594_v18  ;;  %v7638_v59 = vmul.f32 %v7597_v42, %v7597_v42 }
 0x350   : > { %v8658_v44 = vpop.f32.mrf.mxu1  ;;  %v8632_v50 = vadd.f32 %v8631_v49, %v8630_v47 }
 0x351   : > { %8206 = vst [vmem:[%s10701_s12] sm:$0xff] %v8205_v56   ;;  %v7641_v46 = vadd.f32 %v7638_v59, %v7637_v4  ;;  %v7602_v8 = vadd.f32 %v8657_v45, %v7553_v61 }
 0x352   : > { %v8659_v51 = vpop.f32.mrf.mxu1  ;;  %v7556_v13 = vadd.f32 %v8632_v50, %v7507_v10 }
 0x353   : > { %v7629_v52 = vadd.f32 %v7628_v58, %v7602_v8  ;;  %v7639_v11 = vmul.f32 %v7602_v8, %v7602_v8  ;;  %v8660_v12 = vadd.f32 %v8659_v51, %v8658_v44 }
 0x355   : > { %v7642_v14 = vadd.f32 %v7641_v46, %v7639_v11  ;;  %v7605_v3 = vadd.f32 %v8660_v12, %v7556_v13 }
 0x357   : > { %v8210_v1 = vpack.c.bf16 %v7605_v3, %v7602_v8  ;;  %v7630_v6 = vadd.f32 %v7629_v52, %v7605_v3  ;;  %v7640_v22 = vmul.f32 %v7605_v3, %v7605_v3 }
 0x358   : > { %v7693_v63 = vld [vmem:[%s10701_s12] sm:$0xf] (%p9052_p6)  ;;  %v7695_v0 = vld [vmem:[%s10701_s12 + $0x4] sm:$0xf] (%p9052_p6) }
 0x359   : > { %8212 = vst [vmem:[%s10701_s12 + $0x8] sm:$0xff] %v8210_v1   ;;  %v7631_v30 = vrot.slane %v7630_v6, 4  ;;  %v7643_v15 = vadd.f32 %v7642_v14, %v7640_v22  ;;  %7694 = vst [vmem:[%s7676_s4] sm:$0xf] (%p9052_p6), %v7693_v63 }
 0x35a   : > { %7696 = vst [vmem:[%s7676_s4 + $0x10] sm:$0xf] (%p9052_p6), %v7695_v0 }
 0x35b   : > { %v7632_v7 = vadd.f32 %v7631_v30, %v7630_v6  ;;  %v7644_v24 = vrot.slane %v7643_v15, 4 }
 0x35d   : > { %v7633_v19 = vrot.slane %v7632_v7, 2  ;;  %v7645_v25 = vadd.f32 %v7644_v24, %v7643_v15 }
 0x35f   : > { %v7634_v26 = vadd.f32 %v7633_v19, %v7632_v7  ;;  %v7646_v27 = vrot.slane %v7645_v25, 2 }
 0x360   : > { %v7697_v5 = vld [vmem:[%s10701_s12 + $0x8] sm:$0xf] (%p9052_p6)  ;;  %v7699_v29 = vld [vmem:[%s10701_s12 + $0xc] sm:$0xf] (%p9052_p6) }
 0x361   : > { %v7647_v28 = vadd.f32 %v7646_v27, %v7645_v25  ;;  %v7635_v31 = vrot.slane %v7634_v26, 1  ;;  %7698 = vst [vmem:[%s7676_s4 + $0x20] sm:$0xf] (%p9052_p6), %v7697_v5  ;;  %7700 = vst [vmem:[%s7676_s4 + $0x30] sm:$0xf] (%p9052_p6), %v7699_v29 }
 0x363   : > { %v7648_v62 = vrot.slane %v7647_v28, 1  ;;  %v7636_v60 = vadd.f32 %v7635_v31, %v7634_v26 }
 0x365   : > { %v7649_v53 = vadd.f32 %v7648_v62, %v7647_v28  ;;  %7671 = sbr.rel (!%p9052_p6) target bundleno = 874 (0x36a), region = 84 }
 0x367   : > { %v7654_v21 = vsel %vm7653_vm0, %v7649_v53, 0.0 }
 0x368   : > { %v7655_v23 = vsel %vm7652_vm1, %v7636_v60, %v7654_v21 }
 0x369   : > { %7656 = vst [vmem:[%s4390_s26] sm:$0xff] %v7655_v23 }
 0x36a PF: > { %s14_s16 = sadd.s32 1, %s8995_s16   ;;  %s10764_s12 = smov %s8983_s13 }
 0x36b   : > { %p11_p12 = scmp.ge.s32.totalorder %s14_s16, 6   ;;  %s10765_s13 = smov %s9057_s22 }
 0x36c   : > { %s10766_s14 = smov %s8991_s15  ;;  %s10767_s15 = smov %s10769_s17 }
 0x36d   :  { %13 = sbr.rel (!%p11_p12) target bundleno = 3 (0x3), region = 175 }

// kernel: discriminator_forward.9
= control target key start
LH: loop header
LB: loop body
LE: loop exit
PB: predicated region body
PF: predicated region fallthrough
CT: control target
= control target key end

     0   :  { %v7612_v22 = vmov 1966171168   ;;  %v1056_v24 = vlaneseq  ;;  %s9305_s1 = inlined_call_operand.vmem [shape: bf16[8192,128], index: 1, kind: input, shape index: {}]   ;;  %s9306_s0 = inlined_call_operand.vmem [shape: bf16[2,8192], index: 0, kind: input, shape index: {}]   ;;  %s9307_s2 = inlined_call_operand.vmem [shape: f32[2,128], index: 2, kind: output, shape index: {}]  }
   0x1   :  { %v7088_v0 = vld [vmem:[%s9305_s1 + $0x78] sm:$0xff]   ;;  %v7092_v4 = vld [vmem:[%s9305_s1 + $0x70] sm:$0xff]   ;;  %v7096_v8 = vld [vmem:[%s9305_s1 + $0x68] sm:$0xff]   ;;  %v1054_v23 = vunpack.c.l.s4 %v7612_v22 }
   0x2   :  { %v7089_v1 = vld [vmem:[%s9305_s1 + $0xf8] sm:$0xff]   ;;  %6383 = vmatprep.subr.bf16.mxu0 %v7088_v0  ;;  %v7093_v5 = vld [vmem:[%s9305_s1 + $0xf0] sm:$0xff]   ;;  %v7097_v9 = vld [vmem:[%s9305_s1 + $0xe8] sm:$0xff]   ;;  %v1057_v30 = vshrl.u32 %v1056_v24, 7 }
   0x3   :  { %v7090_v2 = vld [vmem:[%s9305_s1 + $0x38] sm:$0xff]   ;;  %6405 = vmatprep.subr.bf16.mxu1 %v7089_v1  ;;  %v7094_v6 = vld [vmem:[%s9305_s1 + $0x30] sm:$0xff]   ;;  %v7098_v10 = vld [vmem:[%s9305_s1 + $0x28] sm:$0xff]   ;;  %v1055_v29 = vunpack.c.0.s8 %v1054_v23 }
   0x4   :  { %v7091_v3 = vld [vmem:[%s9305_s1 + $0xb8] sm:$0xff]   ;;  %6384 = vmatpush3.bf16.msra.mxu0 %v7090_v2  ;;  %v7095_v7 = vld [vmem:[%s9305_s1 + $0xb0] sm:$0xff]   ;;  %v7099_v11 = vld [vmem:[%s9305_s1 + $0xa8] sm:$0xff]  }
   0x5   :  { %6406 = vmatpush3.bf16.msra.mxu1 %v7091_v3  ;;  %6385 = vmatprep.subr.bf16.mxu0 %v7092_v4  ;;  %v7100_v12 = vld [vmem:[%s9305_s1 + $0x60] sm:$0xff]   ;;  %v7104_v16 = vld [vmem:[%s9305_s1 + $0x58] sm:$0xff]   ;;  %v7108_v20 = vld [vmem:[%s9305_s1 + $0x50] sm:$0xff]   ;;  %v7718_v35 = vsub.s32 %v1055_v29, %v1057_v30 }
   0x6   :  { %6407 = vmatprep.subr.bf16.mxu1 %v7093_v5  ;;  %v7101_v13 = vld [vmem:[%s9305_s1 + $0xe0] sm:$0xff]   ;;  %v7105_v17 = vld [vmem:[%s9305_s1 + $0xd8] sm:$0xff]   ;;  %v7109_v21 = vld [vmem:[%s9305_s1 + $0xd0] sm:$0xff]  }
   0x7   :  { %v7102_v14 = vld [vmem:[%s9305_s1 + $0x20] sm:$0xff]   ;;  %v7106_v18 = vld [vmem:[%s9305_s1 + $0x18] sm:$0xff]   ;;  %v7110_v25 = vld [vmem:[%s9305_s1 + $0x10] sm:$0xff]  }
   0x8   :  { %6386 = vmatpush3.bf16.msra.mxu0 %v7094_v6  ;;  %v7103_v15 = vld [vmem:[%s9305_s1 + $0xa0] sm:$0xff]   ;;  %v7107_v19 = vld [vmem:[%s9305_s1 + $0x98] sm:$0xff]   ;;  %v7111_v26 = vld [vmem:[%s9305_s1 + $0x90] sm:$0xff]  }
   0x9   :  { %6408 = vmatpush3.bf16.msra.mxu1 %v7095_v7  ;;  %6387 = vmatprep.subr.bf16.mxu0 %v7096_v8  ;;  %v7112_v27 = vld [vmem:[%s9305_s1 + $0x48] sm:$0xff]   ;;  %v7116_v33 = vld [vmem:[%s9305_s1 + $0x40] sm:$0xff]   ;;  %v7121_v41 = vld [vmem:[%s9305_s1 + $0x178] sm:$0xff]  }
   0xa   :  { %6409 = vmatprep.subr.bf16.mxu1 %v7097_v9  ;;  %v7113_v28 = vld [vmem:[%s9305_s1 + $0xc8] sm:$0xff]   ;;  %v7117_v34 = vld [vmem:[%s9305_s1 + $0xc0] sm:$0xff]   ;;  %v7122_v42 = vld [vmem:[%s9305_s1 + $0x1f8] sm:$0xff]  }
   0xb   :  { %v7114_v31 = vld [vmem:[%s9305_s1 + $0x8] sm:$0xff]   ;;  %v7118_v36 = vld [vmem:[%s9305_s1] sm:$0xff]   ;;  %v7123_v46 = vld [vmem:[%s9305_s1 + $0x138] sm:$0xff]  }
   0xc   :  { %6388 = vmatpush3.bf16.msra.mxu0 %v7098_v10  ;;  %v7115_v32 = vld [vmem:[%s9305_s1 + $0x88] sm:$0xff]   ;;  %v7119_v37 = vld [vmem:[%s9305_s1 + $0x80] sm:$0xff]   ;;  %v7124_v48 = vld [vmem:[%s9305_s1 + $0x1b8] sm:$0xff]  }
   0xd   :  { %6410 = vmatpush3.bf16.msra.mxu1 %v7099_v11  ;;  %6389 = vmatprep.subr.bf16.mxu0 %v7100_v12  ;;  %v12_v38 = vld [vmem:[%s9306_s0] sm:$0xff]  ;;  %v7125_v51 = vld [vmem:[%s9305_s1 + $0x170] sm:$0xff]   ;;  %v7129_v58 = vld [vmem:[%s9305_s1 + $0x168] sm:$0xff]  }
   0xe   :  { %6411 = vmatprep.subr.bf16.mxu1 %v7101_v13  ;;  %v1052_v39 = vcombine.high %v12_v38, %v12_v38  ;;  %v1059_v40 = vrot.slane %v12_v38, %v7718_v35  ;;  %v7126_v53 = vld [vmem:[%s9305_s1 + $0x1f0] sm:$0xff]   ;;  %v7130_v59 = vld [vmem:[%s9305_s1 + $0x1e8] sm:$0xff]   ;;  %v7133_v62 = vld [vmem:[%s9305_s1 + $0x160] sm:$0xff]  }
   0xf   :  { %v7127_v55 = vld [vmem:[%s9305_s1 + $0x130] sm:$0xff]   ;;  %v7131_v60 = vld [vmem:[%s9305_s1 + $0x128] sm:$0xff]   ;;  %v7134_v63 = vld [vmem:[%s9305_s1 + $0x1e0] sm:$0xff]  }
  0x10   :  { %6390 = vmatpush3.bf16.msra.mxu0 %v7102_v14  ;;  %v1067_v43 = vcombine.high %v1059_v40, %v1059_v40  ;;  %v1075_v44 = vrot.slane %v1059_v40, %v7718_v35  ;;  %v7738_v45 = vrot.slane %v1052_v39, %v7718_v35  ;;  %v7128_v56 = vld [vmem:[%s9305_s1 + $0x1b0] sm:$0xff]   ;;  %v7132_v61 = vld [vmem:[%s9305_s1 + $0x1a8] sm:$0xff]   ;;  %v7135_v0 = vld [vmem:[%s9305_s1 + $0x120] sm:$0xff]  }
  0x11   :  { %6412 = vmatpush3.bf16.msra.mxu1 %v7103_v15  ;;  %6391 = vmatprep.subr.bf16.mxu0 %v7104_v16  ;;  %v7136_v1 = vld [vmem:[%s9305_s1 + $0x1a0] sm:$0xff]   ;;  %v7137_v2 = vld [vmem:[%s9305_s1 + $0x158] sm:$0xff]   ;;  %v7141_v6 = vld [vmem:[%s9305_s1 + $0x150] sm:$0xff]  }
  0x12   :  { %6413 = vmatprep.subr.bf16.mxu1 %v7105_v17  ;;  %v1089_v47 = vrot.slane %v1067_v43, %v7718_v35  ;;  %v1068_v49 = vcombine.high %v7738_v45, %v7738_v45  ;;  %v1097_v50 = vcombine.high %v1075_v44, %v1075_v44  ;;  %v7138_v3 = vld [vmem:[%s9305_s1 + $0x1d8] sm:$0xff]   ;;  %v7142_v7 = vld [vmem:[%s9305_s1 + $0x1d0] sm:$0xff]   ;;  %v7145_v10 = vld [vmem:[%s9305_s1 + $0x148] sm:$0xff]  }
  0x13   :  { %v7139_v4 = vld [vmem:[%s9305_s1 + $0x118] sm:$0xff]   ;;  %v7143_v8 = vld [vmem:[%s9305_s1 + $0x110] sm:$0xff]   ;;  %v7146_v11 = vld [vmem:[%s9305_s1 + $0x1c8] sm:$0xff]  }
  0x14   :  { %6392 = vmatpush3.bf16.msra.mxu0 %v7106_v18  ;;  %4612 = vmatprep.mubr.bf16.mxu0 %v1089_v47  ;;  %v1099_v52 = vcombine.high %v1089_v47, %v1089_v47  ;;  %v1096_v54 = vrot.slane %v1068_v49, %v7718_v35  ;;  %v7140_v5 = vld [vmem:[%s9305_s1 + $0x198] sm:$0xff]   ;;  %v7144_v9 = vld [vmem:[%s9305_s1 + $0x190] sm:$0xff]   ;;  %v7147_v12 = vld [vmem:[%s9305_s1 + $0x108] sm:$0xff]   ;;  %v1082_v18 = vrot.slane %v7738_v45, %v7718_v35 }
  0x15   :  { %6414 = vmatpush3.bf16.msra.mxu1 %v7107_v19  ;;  %6393 = vmatprep.subr.bf16.mxu0 %v7108_v20  ;;  %v7148_v13 = vld [vmem:[%s9305_s1 + $0x188] sm:$0xff]   ;;  %v7149_v14 = vld [vmem:[%s9305_s1 + $0x140] sm:$0xff]   ;;  %v7153_v19 = vld [vmem:[%s9305_s1 + $0x278] sm:$0xff]  }
  0x16   :  { %6415 = vmatprep.subr.bf16.mxu1 %v7109_v21  ;;  %4652 = vmatprep.mubr.bf16.mxu1 %v1099_v52  ;;  %v1100_v57 = vcombine.high %v1096_v54, %v1096_v54  ;;  %v7150_v15 = vld [vmem:[%s9305_s1 + $0x1c0] sm:$0xff]   ;;  %v7154_v20 = vld [vmem:[%s9305_s1 + $0x2f8] sm:$0xff]   ;;  %v1098_v23 = vcombine.high %v1082_v18, %v1082_v18  ;;  %v7157_v24 = vld [vmem:[%s9305_s1 + $0x270] sm:$0xff]  }
  0x17   :  { %v7151_v16 = vld [vmem:[%s9305_s1 + $0x100] sm:$0xff]   ;;  %v7155_v21 = vld [vmem:[%s9305_s1 + $0x238] sm:$0xff]   ;;  %v7162_v29 = vld [vmem:[%s9305_s1 + $0x2e8] sm:$0xff]  }
  0x18   :  { %6394 = vmatpush3.bf16.msra.mxu0 %v7110_v25  ;;  %v7152_v17 = vld [vmem:[%s9305_s1 + $0x180] sm:$0xff]   ;;  %v7156_v22 = vld [vmem:[%s9305_s1 + $0x2b8] sm:$0xff]   ;;  %v7158_v25 = vld [vmem:[%s9305_s1 + $0x2f0] sm:$0xff]  }
  0x19   :  { %6416 = vmatpush3.bf16.msra.mxu1 %v7111_v26  ;;  %6395 = vmatprep.subr.bf16.mxu0 %v7112_v27  ;;  %v7159_v26 = vld [vmem:[%s9305_s1 + $0x230] sm:$0xff]   ;;  %v7163_v30 = vld [vmem:[%s9305_s1 + $0x228] sm:$0xff]   ;;  %v7170_v38 = vld [vmem:[%s9305_s1 + $0x2d8] sm:$0xff]  }
  0x1a   :  { %6417 = vmatprep.subr.bf16.mxu1 %v7113_v28  ;;  %v7160_v27 = vld [vmem:[%s9305_s1 + $0x2b0] sm:$0xff]   ;;  %v7161_v28 = vld [vmem:[%s9305_s1 + $0x268] sm:$0xff]   ;;  %v7171_v39 = vld [vmem:[%s9305_s1 + $0x218] sm:$0xff]  }
  0x1b   :  { %v7172_v40 = vld [vmem:[%s9305_s1 + $0x298] sm:$0xff]   ;;  %v7175_v43 = vld [vmem:[%s9305_s1 + $0x210] sm:$0xff]   ;;  %v7177_v45 = vld [vmem:[%s9305_s1 + $0x248] sm:$0xff]  }
  0x1c   :  { %6396 = vmatpush3.bf16.msra.mxu0 %v7114_v31  ;;  %v7164_v31 = vld [vmem:[%s9305_s1 + $0x2a8] sm:$0xff]   ;;  %v7181_v49 = vld [vmem:[%s9305_s1 + $0x240] sm:$0xff]  }
  0x1d   :  { %6418 = vmatpush3.bf16.msra.mxu1 %v7115_v32  ;;  %6397 = vmatprep.subr.bf16.mxu0 %v7116_v33  ;;  %v7165_v32 = vld [vmem:[%s9305_s1 + $0x260] sm:$0xff]   ;;  %v7179_v47 = vld [vmem:[%s9305_s1 + $0x208] sm:$0xff]  }
  0x1e   :  { %6419 = vmatprep.subr.bf16.mxu1 %v7117_v34  ;;  %v7166_v33 = vld [vmem:[%s9305_s1 + $0x2e0] sm:$0xff]   ;;  %v13_v52 = vld [vmem:[%s9306_s0 + $0x8] sm:$0xff] }
  0x1f   :  { %v7167_v34 = vld [vmem:[%s9305_s1 + $0x220] sm:$0xff]  }
  0x20   :  { %6398 = vmatpush3.bf16.msra.mxu0 %v7118_v36  ;;  %v7168_v36 = vld [vmem:[%s9305_s1 + $0x2a0] sm:$0xff]  }
  0x21   :  { %6420 = vmatpush3.bf16.msra.mxu1 %v7119_v37  ;;  %6427 = vmatprep.subr.bf16.mxu0 %v7121_v41  ;;  %v7169_v37 = vld [vmem:[%s9305_s1 + $0x258] sm:$0xff]   ;;  %v7173_v41 = vld [vmem:[%s9305_s1 + $0x250] sm:$0xff]  }
  0x22   :  { %6449 = vmatprep.subr.bf16.mxu1 %v7122_v42  ;;  %v7174_v42 = vld [vmem:[%s9305_s1 + $0x2d0] sm:$0xff]  }
  0x23   :  { %4613 = vmatmul.mubr.bf16.vlgmr.msra.gmra.mxu0 %v1075_v44  ;;  %v7176_v44 = vld [vmem:[%s9305_s1 + $0x290] sm:$0xff]  }
  0x24   :  { %6428 = vmatpush3.bf16.msra.mxu0 %v7123_v46  ;;  %4653 = vmatmul.mubr.bf16.vlgmr.msra.gmra.mxu1 %v1097_v50  ;;  %v7178_v46 = vld [vmem:[%s9305_s1 + $0x2c8] sm:$0xff]   ;;  %v7182_v50 = vld [vmem:[%s9305_s1 + $0x2c0] sm:$0xff]  }
  0x25   :  { %6429 = vmatprep.subr.bf16.mxu0 %v7125_v51  ;;  %6450 = vmatpush3.bf16.msra.mxu1 %v7124_v48  ;;  %v7180_v48 = vld [vmem:[%s9305_s1 + $0x288] sm:$0xff]   ;;  %v7183_v51 = vld [vmem:[%s9305_s1 + $0x200] sm:$0xff]  }
  0x26   :  { %4692 = vmatprep.mubr.bf16.mxu0 %v1096_v54  ;;  %6451 = vmatprep.subr.bf16.mxu1 %v7126_v53  ;;  %v7184_v53 = vld [vmem:[%s9305_s1 + $0x280] sm:$0xff]   ;;  %v1108_v54 = vrot.slane %v13_v52, %v7718_v35 }
  0x27   :  { %4732 = vmatprep.mubr.bf16.mxu1 %v1100_v57 }
  0x28   :  { %6430 = vmatpush3.bf16.msra.mxu0 %v7127_v55  ;;  %v1101_v55 = vcombine.high %v13_v52, %v13_v52  ;;  %v1116_v57 = vcombine.high %v1108_v54, %v1108_v54  ;;  %v7234_v52 = vld [vmem:[%s9305_s1 + $0x458] sm:$0xff]  }
  0x29   :  { %6431 = vmatprep.subr.bf16.mxu0 %v7129_v58  ;;  %6452 = vmatpush3.bf16.msra.mxu1 %v7128_v56  ;;  %v7185_v56 = vld [vmem:[%s9305_s1 + $0x378] sm:$0xff]   ;;  %v1124_v58 = vrot.slane %v1108_v54, %v7718_v35 }
  0x2a   :  { %6453 = vmatprep.subr.bf16.mxu1 %v7130_v59  ;;  %v7186_v59 = vld [vmem:[%s9305_s1 + $0x3f8] sm:$0xff]  }
  0x2b   :  { %v7236_v54 = vld [vmem:[%s9305_s1 + $0x418] sm:$0xff]  }
  0x2c   :  { %6432 = vmatpush3.bf16.msra.mxu0 %v7131_v60  ;;  %v7944_v60 = vrot.slane %v1101_v55, %v7718_v35  ;;  %v7237_v55 = vld [vmem:[%s9305_s1 + $0x498] sm:$0xff]  }
  0x2d   :  { %6433 = vmatprep.subr.bf16.mxu0 %v7133_v62  ;;  %6454 = vmatpush3.bf16.msra.mxu1 %v7132_v61  ;;  %v7187_v61 = vld [vmem:[%s9305_s1 + $0x338] sm:$0xff]   ;;  %v1138_v62 = vrot.slane %v1116_v57, %v7718_v35  ;;  %v7239_v57 = vld [vmem:[%s9305_s1 + $0x4d0] sm:$0xff]  }
  0x2e   :  { %6455 = vmatprep.subr.bf16.mxu1 %v7134_v63  ;;  %v7188_v63 = vld [vmem:[%s9305_s1 + $0x3b8] sm:$0xff]  }
  0x30   :  { %6434 = vmatpush3.bf16.msra.mxu0 %v7135_v0  ;;  %v1117_v0 = vcombine.high %v7944_v60, %v7944_v60 }
  0x31   :  { %6435 = vmatprep.subr.bf16.mxu0 %v7137_v2  ;;  %6456 = vmatpush3.bf16.msra.mxu1 %v7136_v1  ;;  %v1146_v1 = vcombine.high %v1124_v58, %v1124_v58  ;;  %v7189_v2 = vld [vmem:[%s9305_s1 + $0x370] sm:$0xff]  }
  0x32   :  { %6457 = vmatprep.subr.bf16.mxu1 %v7138_v3  ;;  %v1148_v3 = vcombine.high %v1138_v62, %v1138_v62 }
  0x34   :  { %6436 = vmatpush3.bf16.msra.mxu0 %v7139_v4  ;;  %v7190_v4 = vld [vmem:[%s9305_s1 + $0x3f0] sm:$0xff]  }
  0x35   :  { %6437 = vmatprep.subr.bf16.mxu0 %v7141_v6  ;;  %6458 = vmatpush3.bf16.msra.mxu1 %v7140_v5  ;;  %v1145_v5 = vrot.slane %v1117_v0, %v7718_v35  ;;  %v7191_v6 = vld [vmem:[%s9305_s1 + $0x330] sm:$0xff]   ;;  %v7246_v0 = vld [vmem:[%s9305_s1 + $0x440] sm:$0xff]  }
  0x36   :  { %6459 = vmatprep.subr.bf16.mxu1 %v7142_v7  ;;  %v7192_v7 = vld [vmem:[%s9305_s1 + $0x3b0] sm:$0xff]  }
  0x38   :  { %6438 = vmatpush3.bf16.msra.mxu0 %v7143_v8  ;;  %v1149_v8 = vcombine.high %v1145_v5, %v1145_v5 }
  0x39   :  { %6439 = vmatprep.subr.bf16.mxu0 %v7145_v10  ;;  %6460 = vmatpush3.bf16.msra.mxu1 %v7144_v9  ;;  %v7193_v9 = vld [vmem:[%s9305_s1 + $0x368] sm:$0xff]  }
  0x3a   :  { %6461 = vmatprep.subr.bf16.mxu1 %v7146_v11  ;;  %v7194_v10 = vld [vmem:[%s9305_s1 + $0x3e8] sm:$0xff]  }
  0x3b   :  { %v7195_v11 = vld [vmem:[%s9305_s1 + $0x328] sm:$0xff]  }
  0x3c   :  { %6440 = vmatpush3.bf16.msra.mxu0 %v7147_v12  ;;  %v7196_v12 = vld [vmem:[%s9305_s1 + $0x3a8] sm:$0xff]  }
  0x3d   :  { %6441 = vmatprep.subr.bf16.mxu0 %v7149_v14  ;;  %6462 = vmatpush3.bf16.msra.mxu1 %v7148_v13  ;;  %v7197_v13 = vld [vmem:[%s9305_s1 + $0x360] sm:$0xff]  }
  0x3e   :  { %6463 = vmatprep.subr.bf16.mxu1 %v7150_v15  ;;  %v7198_v14 = vld [vmem:[%s9305_s1 + $0x3e0] sm:$0xff]  }
  0x3f   :  { %v7199_v15 = vld [vmem:[%s9305_s1 + $0x320] sm:$0xff]  }
  0x40   :  { %6442 = vmatpush3.bf16.msra.mxu0 %v7151_v16  ;;  %v7200_v16 = vld [vmem:[%s9305_s1 + $0x3a0] sm:$0xff]  }
  0x41   :  { %6471 = vmatprep.subr.bf16.mxu0 %v7153_v19  ;;  %6464 = vmatpush3.bf16.msra.mxu1 %v7152_v17  ;;  %v7201_v17 = vld [vmem:[%s9305_s1 + $0x358] sm:$0xff]  }
  0x42   :  { %6493 = vmatprep.subr.bf16.mxu1 %v7154_v20  ;;  %v7203_v19 = vld [vmem:[%s9305_s1 + $0x318] sm:$0xff]  }
  0x43   :  { %4693 = vmatmul.mubr.bf16.vlgmr.msra.gmra.mxu0 %v1082_v18  ;;  %v7202_v18 = vld [vmem:[%s9305_s1 + $0x3d8] sm:$0xff]  }
  0x44   :  { %6472 = vmatpush3.bf16.msra.mxu0 %v7155_v21  ;;  %4733 = vmatmul.mubr.bf16.vlgmr.msra.gmra.mxu1 %v1098_v23  ;;  %v7204_v20 = vld [vmem:[%s9305_s1 + $0x398] sm:$0xff]   ;;  %v7205_v21 = vld [vmem:[%s9305_s1 + $0x350] sm:$0xff]  }
  0x45   :  { %6473 = vmatprep.subr.bf16.mxu0 %v7157_v24  ;;  %6494 = vmatpush3.bf16.msra.mxu1 %v7156_v22  ;;  %v7206_v22 = vld [vmem:[%s9305_s1 + $0x3d0] sm:$0xff]  }
  0x46   :  { %6495 = vmatprep.subr.bf16.mxu1 %v7158_v25  ;;  %4772 = vmatprep.mubr.bf16.mxu0 %v1138_v62  ;;  %v7207_v23 = vld [vmem:[%s9305_s1 + $0x310] sm:$0xff]   ;;  %v7209_v25 = vld [vmem:[%s9305_s1 + $0x348] sm:$0xff]  }
  0x47   :  { %4812 = vmatprep.mubr.bf16.mxu1 %v1148_v3  ;;  %v7208_v24 = vld [vmem:[%s9305_s1 + $0x390] sm:$0xff]   ;;  %v7244_v62 = vld [vmem:[%s9305_s1 + $0x408] sm:$0xff]  }
  0x48   :  { %6474 = vmatpush3.bf16.msra.mxu0 %v7159_v26  ;;  %v7210_v26 = vld [vmem:[%s9305_s1 + $0x3c8] sm:$0xff]   ;;  %v14_v3 = vld [vmem:[%s9306_s0 + $0x10] sm:$0xff] }
  0x49   :  { %6475 = vmatprep.subr.bf16.mxu0 %v7161_v28  ;;  %6496 = vmatpush3.bf16.msra.mxu1 %v7160_v27  ;;  %v7211_v27 = vld [vmem:[%s9305_s1 + $0x308] sm:$0xff]  }
  0x4a   :  { %6497 = vmatprep.subr.bf16.mxu1 %v7162_v29  ;;  %v7212_v28 = vld [vmem:[%s9305_s1 + $0x388] sm:$0xff]   ;;  %v7213_v29 = vld [vmem:[%s9305_s1 + $0x340] sm:$0xff]  }
  0x4c   :  { %6476 = vmatpush3.bf16.msra.mxu0 %v7163_v30  ;;  %v7214_v30 = vld [vmem:[%s9305_s1 + $0x3c0] sm:$0xff]  }
  0x4d   :  { %6477 = vmatprep.subr.bf16.mxu0 %v7165_v32  ;;  %6498 = vmatpush3.bf16.msra.mxu1 %v7164_v31  ;;  %v7215_v31 = vld [vmem:[%s9305_s1 + $0x300] sm:$0xff]  }
  0x4e   :  { %6499 = vmatprep.subr.bf16.mxu1 %v7166_v33  ;;  %v7216_v32 = vld [vmem:[%s9305_s1 + $0x380] sm:$0xff]   ;;  %v1131_v33 = vrot.slane %v7944_v60, %v7718_v35  ;;  %v7242_v60 = vld [vmem:[%s9305_s1 + $0x448] sm:$0xff]  }
  0x50   :  { %6478 = vmatpush3.bf16.msra.mxu0 %v7167_v34  ;;  %v7218_v34 = vld [vmem:[%s9305_s1 + $0x478] sm:$0xff]  }
  0x51   :  { %6479 = vmatprep.subr.bf16.mxu0 %v7169_v37  ;;  %6500 = vmatpush3.bf16.msra.mxu1 %v7168_v36  ;;  %v7219_v36 = vld [vmem:[%s9305_s1 + $0x4f8] sm:$0xff]  }
  0x52   :  { %6501 = vmatprep.subr.bf16.mxu1 %v7170_v38  ;;  %v7220_v37 = vld [vmem:[%s9305_s1 + $0x438] sm:$0xff]  }
  0x53   :  { %v7221_v38 = vld [vmem:[%s9305_s1 + $0x4b8] sm:$0xff]  }
  0x54   :  { %6480 = vmatpush3.bf16.msra.mxu0 %v7171_v39  ;;  %v1147_v39 = vcombine.high %v1131_v33, %v1131_v33 }
  0x55   :  { %6481 = vmatprep.subr.bf16.mxu0 %v7173_v41  ;;  %6502 = vmatpush3.bf16.msra.mxu1 %v7172_v40  ;;  %v7222_v40 = vld [vmem:[%s9305_s1 + $0x470] sm:$0xff]  }
  0x56   :  { %6503 = vmatprep.subr.bf16.mxu1 %v7174_v42  ;;  %v7223_v41 = vld [vmem:[%s9305_s1 + $0x4f0] sm:$0xff]  }
  0x57   :  { %v7224_v42 = vld [vmem:[%s9305_s1 + $0x430] sm:$0xff]  }
  0x58   :  { %6482 = vmatpush3.bf16.msra.mxu0 %v7175_v43  ;;  %v7225_v43 = vld [vmem:[%s9305_s1 + $0x4b0] sm:$0xff]  }
  0x59   :  { %6483 = vmatprep.subr.bf16.mxu0 %v7177_v45  ;;  %6504 = vmatpush3.bf16.msra.mxu1 %v7176_v44  ;;  %v7226_v44 = vld [vmem:[%s9305_s1 + $0x468] sm:$0xff]  }
  0x5a   :  { %6505 = vmatprep.subr.bf16.mxu1 %v7178_v46  ;;  %v7227_v45 = vld [vmem:[%s9305_s1 + $0x4e8] sm:$0xff]  }
  0x5b   :  { %v7228_v46 = vld [vmem:[%s9305_s1 + $0x428] sm:$0xff]  }
  0x5c   :  { %6484 = vmatpush3.bf16.msra.mxu0 %v7179_v47  ;;  %v7229_v47 = vld [vmem:[%s9305_s1 + $0x4a8] sm:$0xff]  }
  0x5d   :  { %6485 = vmatprep.subr.bf16.mxu0 %v7181_v49  ;;  %6506 = vmatpush3.bf16.msra.mxu1 %v7180_v48  ;;  %v7230_v48 = vld [vmem:[%s9305_s1 + $0x460] sm:$0xff]  }
  0x5e   :  { %6507 = vmatprep.subr.bf16.mxu1 %v7182_v50  ;;  %v7231_v49 = vld [vmem:[%s9305_s1 + $0x4e0] sm:$0xff]  }
  0x5f   :  { %v7232_v50 = vld [vmem:[%s9305_s1 + $0x420] sm:$0xff]  }
  0x60   :  { %6486 = vmatpush3.bf16.msra.mxu0 %v7183_v51  ;;  %v7233_v51 = vld [vmem:[%s9305_s1 + $0x4a0] sm:$0xff]  }
  0x61   :  { %6515 = vmatprep.subr.bf16.mxu0 %v7185_v56  ;;  %6508 = vmatpush3.bf16.msra.mxu1 %v7184_v53  ;;  %v7235_v53 = vld [vmem:[%s9305_s1 + $0x4d8] sm:$0xff]   ;;  %v7238_v56 = vld [vmem:[%s9305_s1 + $0x450] sm:$0xff]  }
  0x62   :  { %6537 = vmatprep.subr.bf16.mxu1 %v7186_v59  ;;  %v7241_v59 = vld [vmem:[%s9305_s1 + $0x490] sm:$0xff]  }
  0x63   :  { %4773 = vmatmul.mubr.bf16.vlgmr.msra.gmra.mxu0 %v1124_v58  ;;  %v7240_v58 = vld [vmem:[%s9305_s1 + $0x410] sm:$0xff]  }
  0x64   :  { %6516 = vmatpush3.bf16.msra.mxu0 %v7187_v61  ;;  %4813 = vmatmul.mubr.bf16.vlgmr.msra.gmra.mxu1 %v1146_v1  ;;  %v7243_v61 = vld [vmem:[%s9305_s1 + $0x4c8] sm:$0xff]   ;;  %v7247_v1 = vld [vmem:[%s9305_s1 + $0x4c0] sm:$0xff]  }
  0x65   :  { %6517 = vmatprep.subr.bf16.mxu0 %v7189_v2  ;;  %6538 = vmatpush3.bf16.msra.mxu1 %v7188_v63  ;;  %v7245_v63 = vld [vmem:[%s9305_s1 + $0x488] sm:$0xff]   ;;  %v7248_v2 = vld [vmem:[%s9305_s1 + $0x400] sm:$0xff]  }
  0x66   :  { %4852 = vmatprep.mubr.bf16.mxu0 %v1145_v5  ;;  %6539 = vmatprep.subr.bf16.mxu1 %v7190_v4  ;;  %v7249_v4 = vld [vmem:[%s9305_s1 + $0x480] sm:$0xff]   ;;  %v1157_v5 = vrot.slane %v14_v3, %v7718_v35 }
  0x67   :  { %4892 = vmatprep.mubr.bf16.mxu1 %v1149_v8 }
  0x68   :  { %6518 = vmatpush3.bf16.msra.mxu0 %v7191_v6  ;;  %v1150_v6 = vcombine.high %v14_v3, %v14_v3  ;;  %v1165_v8 = vcombine.high %v1157_v5, %v1157_v5  ;;  %v7299_v3 = vld [vmem:[%s9305_s1 + $0x658] sm:$0xff]  }
  0x69   :  { %6519 = vmatprep.subr.bf16.mxu0 %v7193_v9  ;;  %6540 = vmatpush3.bf16.msra.mxu1 %v7192_v7  ;;  %v7250_v7 = vld [vmem:[%s9305_s1 + $0x578] sm:$0xff]   ;;  %v1173_v9 = vrot.slane %v1157_v5, %v7718_v35 }
  0x6a   :  { %6541 = vmatprep.subr.bf16.mxu1 %v7194_v10  ;;  %v7251_v10 = vld [vmem:[%s9305_s1 + $0x5f8] sm:$0xff]  }
  0x6b   :  { %v7301_v5 = vld [vmem:[%s9305_s1 + $0x618] sm:$0xff]  }
  0x6c   :  { %6520 = vmatpush3.bf16.msra.mxu0 %v7195_v11  ;;  %v8150_v11 = vrot.slane %v1150_v6, %v7718_v35  ;;  %v7302_v6 = vld [vmem:[%s9305_s1 + $0x698] sm:$0xff]  }
  0x6d   :  { %6521 = vmatprep.subr.bf16.mxu0 %v7197_v13  ;;  %6542 = vmatpush3.bf16.msra.mxu1 %v7196_v12  ;;  %v7252_v12 = vld [vmem:[%s9305_s1 + $0x538] sm:$0xff]   ;;  %v1187_v13 = vrot.slane %v1165_v8, %v7718_v35  ;;  %v7304_v8 = vld [vmem:[%s9305_s1 + $0x6d0] sm:$0xff]  }
  0x6e   :  { %6543 = vmatprep.subr.bf16.mxu1 %v7198_v14  ;;  %v7253_v14 = vld [vmem:[%s9305_s1 + $0x5b8] sm:$0xff]  }
  0x70   :  { %6522 = vmatpush3.bf16.msra.mxu0 %v7199_v15  ;;  %v1166_v15 = vcombine.high %v8150_v11, %v8150_v11 }
  0x71   :  { %6523 = vmatprep.subr.bf16.mxu0 %v7201_v17  ;;  %6544 = vmatpush3.bf16.msra.mxu1 %v7200_v16  ;;  %v1195_v16 = vcombine.high %v1173_v9, %v1173_v9  ;;  %v7254_v17 = vld [vmem:[%s9305_s1 + $0x570] sm:$0xff]  }
  0x72   :  { %6545 = vmatprep.subr.bf16.mxu1 %v7202_v18  ;;  %v1197_v18 = vcombine.high %v1187_v13, %v1187_v13 }
  0x74   :  { %6524 = vmatpush3.bf16.msra.mxu0 %v7203_v19  ;;  %v7255_v19 = vld [vmem:[%s9305_s1 + $0x5f0] sm:$0xff]  }
  0x75   :  { %6525 = vmatprep.subr.bf16.mxu0 %v7205_v21  ;;  %6546 = vmatpush3.bf16.msra.mxu1 %v7204_v20  ;;  %v1194_v20 = vrot.slane %v1166_v15, %v7718_v35  ;;  %v7256_v21 = vld [vmem:[%s9305_s1 + $0x530] sm:$0xff]   ;;  %v7311_v15 = vld [vmem:[%s9305_s1 + $0x640] sm:$0xff]  }
  0x76   :  { %6547 = vmatprep.subr.bf16.mxu1 %v7206_v22  ;;  %v7257_v22 = vld [vmem:[%s9305_s1 + $0x5b0] sm:$0xff]  }
  0x78   :  { %6526 = vmatpush3.bf16.msra.mxu0 %v7207_v23  ;;  %v1198_v23 = vcombine.high %v1194_v20, %v1194_v20 }
  0x79   :  { %6527 = vmatprep.subr.bf16.mxu0 %v7209_v25  ;;  %6548 = vmatpush3.bf16.msra.mxu1 %v7208_v24  ;;  %v7258_v24 = vld [vmem:[%s9305_s1 + $0x568] sm:$0xff]  }
  0x7a   :  { %6549 = vmatprep.subr.bf16.mxu1 %v7210_v26  ;;  %v7259_v25 = vld [vmem:[%s9305_s1 + $0x5e8] sm:$0xff]  }
  0x7b   :  { %v7260_v26 = vld [vmem:[%s9305_s1 + $0x528] sm:$0xff]  }
  0x7c   :  { %6528 = vmatpush3.bf16.msra.mxu0 %v7211_v27  ;;  %v7261_v27 = vld [vmem:[%s9305_s1 + $0x5a8] sm:$0xff]  }
  0x7d   :  { %6529 = vmatprep.subr.bf16.mxu0 %v7213_v29  ;;  %6550 = vmatpush3.bf16.msra.mxu1 %v7212_v28  ;;  %v7262_v28 = vld [vmem:[%s9305_s1 + $0x560] sm:$0xff]  }
  0x7e   :  { %6551 = vmatprep.subr.bf16.mxu1 %v7214_v30  ;;  %v7263_v29 = vld [vmem:[%s9305_s1 + $0x5e0] sm:$0xff]  }
  0x7f   :  { %v7264_v30 = vld [vmem:[%s9305_s1 + $0x520] sm:$0xff]  }
  0x80   :  { %6530 = vmatpush3.bf16.msra.mxu0 %v7215_v31  ;;  %v7265_v31 = vld [vmem:[%s9305_s1 + $0x5a0] sm:$0xff]  }
  0x81   :  { %6559 = vmatprep.subr.bf16.mxu0 %v7218_v34  ;;  %6552 = vmatpush3.bf16.msra.mxu1 %v7216_v32  ;;  %v7266_v32 = vld [vmem:[%s9305_s1 + $0x558] sm:$0xff]  }
  0x82   :  { %6581 = vmatprep.subr.bf16.mxu1 %v7219_v36  ;;  %v7268_v34 = vld [vmem:[%s9305_s1 + $0x518] sm:$0xff]  }
  0x83   :  { %4853 = vmatmul.mubr.bf16.vlgmr.msra.gmra.mxu0 %v1131_v33  ;;  %v7267_v33 = vld [vmem:[%s9305_s1 + $0x5d8] sm:$0xff]  }
  0x84   :  { %6560 = vmatpush3.bf16.msra.mxu0 %v7220_v37  ;;  %4893 = vmatmul.mubr.bf16.vlgmr.msra.gmra.mxu1 %v1147_v39  ;;  %v7269_v36 = vld [vmem:[%s9305_s1 + $0x598] sm:$0xff]   ;;  %v7270_v37 = vld [vmem:[%s9305_s1 + $0x550] sm:$0xff]  }
  0x85   :  { %6561 = vmatprep.subr.bf16.mxu0 %v7222_v40  ;;  %6582 = vmatpush3.bf16.msra.mxu1 %v7221_v38  ;;  %v7271_v38 = vld [vmem:[%s9305_s1 + $0x5d0] sm:$0xff]  }
  0x86   :  { %6583 = vmatprep.subr.bf16.mxu1 %v7223_v41  ;;  %4932 = vmatprep.mubr.bf16.mxu0 %v1187_v13  ;;  %v7272_v39 = vld [vmem:[%s9305_s1 + $0x510] sm:$0xff]   ;;  %v7274_v41 = vld [vmem:[%s9305_s1 + $0x548] sm:$0xff]  }
  0x87   :  { %4972 = vmatprep.mubr.bf16.mxu1 %v1197_v18  ;;  %v7273_v40 = vld [vmem:[%s9305_s1 + $0x590] sm:$0xff]   ;;  %v7309_v13 = vld [vmem:[%s9305_s1 + $0x608] sm:$0xff]   ;;  %v15_v18 = vld [vmem:[%s9306_s0 + $0x18] sm:$0xff] }
  0x88   :  { %6562 = vmatpush3.bf16.msra.mxu0 %v7224_v42  ;;  %v7275_v42 = vld [vmem:[%s9305_s1 + $0x5c8] sm:$0xff]  }
  0x89   :  { %6563 = vmatprep.subr.bf16.mxu0 %v7226_v44  ;;  %6584 = vmatpush3.bf16.msra.mxu1 %v7225_v43  ;;  %v7276_v43 = vld [vmem:[%s9305_s1 + $0x508] sm:$0xff]  }
  0x8a   :  { %6585 = vmatprep.subr.bf16.mxu1 %v7227_v45  ;;  %v7277_v44 = vld [vmem:[%s9305_s1 + $0x588] sm:$0xff]   ;;  %v7278_v45 = vld [vmem:[%s9305_s1 + $0x540] sm:$0xff]  }
  0x8c   :  { %6564 = vmatpush3.bf16.msra.mxu0 %v7228_v46  ;;  %v7279_v46 = vld [vmem:[%s9305_s1 + $0x5c0] sm:$0xff]  }
  0x8d   :  { %6565 = vmatprep.subr.bf16.mxu0 %v7230_v48  ;;  %6586 = vmatpush3.bf16.msra.mxu1 %v7229_v47  ;;  %v7280_v47 = vld [vmem:[%s9305_s1 + $0x500] sm:$0xff]  }
  0x8e   :  { %6587 = vmatprep.subr.bf16.mxu1 %v7231_v49  ;;  %v7281_v48 = vld [vmem:[%s9305_s1 + $0x580] sm:$0xff]   ;;  %v1180_v49 = vrot.slane %v8150_v11, %v7718_v35  ;;  %v7307_v11 = vld [vmem:[%s9305_s1 + $0x648] sm:$0xff]  }
  0x90   :  { %6566 = vmatpush3.bf16.msra.mxu0 %v7232_v50  ;;  %v7283_v50 = vld [vmem:[%s9305_s1 + $0x678] sm:$0xff]  }
  0x91   :  { %6567 = vmatprep.subr.bf16.mxu0 %v7234_v52  ;;  %6588 = vmatpush3.bf16.msra.mxu1 %v7233_v51  ;;  %v7284_v51 = vld [vmem:[%s9305_s1 + $0x6f8] sm:$0xff]  }
  0x92   :  { %6589 = vmatprep.subr.bf16.mxu1 %v7235_v53  ;;  %v7285_v52 = vld [vmem:[%s9305_s1 + $0x638] sm:$0xff]  }
  0x93   :  { %v7286_v53 = vld [vmem:[%s9305_s1 + $0x6b8] sm:$0xff]  }
  0x94   :  { %6568 = vmatpush3.bf16.msra.mxu0 %v7236_v54  ;;  %v1196_v54 = vcombine.high %v1180_v49, %v1180_v49 }
  0x95   :  { %6569 = vmatprep.subr.bf16.mxu0 %v7238_v56  ;;  %6590 = vmatpush3.bf16.msra.mxu1 %v7237_v55  ;;  %v7287_v55 = vld [vmem:[%s9305_s1 + $0x670] sm:$0xff]  }
  0x96   :  { %6591 = vmatprep.subr.bf16.mxu1 %v7239_v57  ;;  %v7288_v56 = vld [vmem:[%s9305_s1 + $0x6f0] sm:$0xff]  }
  0x97   :  { %v7289_v57 = vld [vmem:[%s9305_s1 + $0x630] sm:$0xff]  }
  0x98   :  { %6570 = vmatpush3.bf16.msra.mxu0 %v7240_v58  ;;  %v7290_v58 = vld [vmem:[%s9305_s1 + $0x6b0] sm:$0xff]  }
  0x99   :  { %6571 = vmatprep.subr.bf16.mxu0 %v7242_v60  ;;  %6592 = vmatpush3.bf16.msra.mxu1 %v7241_v59  ;;  %v7291_v59 = vld [vmem:[%s9305_s1 + $0x668] sm:$0xff]  }
  0x9a   :  { %6593 = vmatprep.subr.bf16.mxu1 %v7243_v61  ;;  %v7292_v60 = vld [vmem:[%s9305_s1 + $0x6e8] sm:$0xff]  }
  0x9b   :  { %v7293_v61 = vld [vmem:[%s9305_s1 + $0x628] sm:$0xff]  }
  0x9c   :  { %6572 = vmatpush3.bf16.msra.mxu0 %v7244_v62  ;;  %v7294_v62 = vld [vmem:[%s9305_s1 + $0x6a8] sm:$0xff]  }
  0x9d   :  { %6573 = vmatprep.subr.bf16.mxu0 %v7246_v0  ;;  %6594 = vmatpush3.bf16.msra.mxu1 %v7245_v63  ;;  %v7295_v63 = vld [vmem:[%s9305_s1 + $0x660] sm:$0xff]  }
  0x9e   :  { %6595 = vmatprep.subr.bf16.mxu1 %v7247_v1  ;;  %v7296_v0 = vld [vmem:[%s9305_s1 + $0x6e0] sm:$0xff]  }
  0x9f   :  { %v7297_v1 = vld [vmem:[%s9305_s1 + $0x620] sm:$0xff]  }
  0xa0   :  { %6574 = vmatpush3.bf16.msra.mxu0 %v7248_v2  ;;  %v7298_v2 = vld [vmem:[%s9305_s1 + $0x6a0] sm:$0xff]  }
  0xa1   :  { %6603 = vmatprep.subr.bf16.mxu0 %v7250_v7  ;;  %6596 = vmatpush3.bf16.msra.mxu1 %v7249_v4  ;;  %v7300_v4 = vld [vmem:[%s9305_s1 + $0x6d8] sm:$0xff]   ;;  %v7303_v7 = vld [vmem:[%s9305_s1 + $0x650] sm:$0xff]  }
  0xa2   :  { %6625 = vmatprep.subr.bf16.mxu1 %v7251_v10  ;;  %v7306_v10 = vld [vmem:[%s9305_s1 + $0x690] sm:$0xff]  }
  0xa3   :  { %4933 = vmatmul.mubr.bf16.vlgmr.msra.gmra.mxu0 %v1173_v9  ;;  %v7305_v9 = vld [vmem:[%s9305_s1 + $0x610] sm:$0xff]  }
  0xa4   :  { %6604 = vmatpush3.bf16.msra.mxu0 %v7252_v12  ;;  %4973 = vmatmul.mubr.bf16.vlgmr.msra.gmra.mxu1 %v1195_v16  ;;  %v7308_v12 = vld [vmem:[%s9305_s1 + $0x6c8] sm:$0xff]   ;;  %v7312_v16 = vld [vmem:[%s9305_s1 + $0x6c0] sm:$0xff]  }
  0xa5   :  { %6605 = vmatprep.subr.bf16.mxu0 %v7254_v17  ;;  %6626 = vmatpush3.bf16.msra.mxu1 %v7253_v14  ;;  %v7310_v14 = vld [vmem:[%s9305_s1 + $0x688] sm:$0xff]   ;;  %v7313_v17 = vld [vmem:[%s9305_s1 + $0x600] sm:$0xff]  }
  0xa6   :  { %5012 = vmatprep.mubr.bf16.mxu0 %v1194_v20  ;;  %6627 = vmatprep.subr.bf16.mxu1 %v7255_v19  ;;  %v1206_v19 = vrot.slane %v15_v18, %v7718_v35  ;;  %v7315_v20 = vld [vmem:[%s9305_s1 + $0x778] sm:$0xff]  }
  0xa7   :  { %5052 = vmatprep.mubr.bf16.mxu1 %v1198_v23 }
  0xa8   :  { %6606 = vmatpush3.bf16.msra.mxu0 %v7256_v21  ;;  %v1199_v21 = vcombine.high %v15_v18, %v15_v18  ;;  %v1214_v23 = vcombine.high %v1206_v19, %v1206_v19 }
  0xa9   :  { %6607 = vmatprep.subr.bf16.mxu0 %v7258_v24  ;;  %6628 = vmatpush3.bf16.msra.mxu1 %v7257_v22  ;;  %v7314_v22 = vld [vmem:[%s9305_s1 + $0x680] sm:$0xff]   ;;  %v1222_v24 = vrot.slane %v1206_v19, %v7718_v35  ;;  %v7353_v19 = vld [vmem:[%s9305_s1 + $0x8f0] sm:$0xff]  }
  0xaa   :  { %6629 = vmatprep.subr.bf16.mxu1 %v7259_v25  ;;  %v7316_v25 = vld [vmem:[%s9305_s1 + $0x7f8] sm:$0xff]  }
  0xac   :  { %6608 = vmatpush3.bf16.msra.mxu0 %v7260_v26  ;;  %v8356_v26 = vrot.slane %v1199_v21, %v7718_v35 }
  0xad   :  { %6609 = vmatprep.subr.bf16.mxu0 %v7262_v28  ;;  %6630 = vmatpush3.bf16.msra.mxu1 %v7261_v27  ;;  %v7317_v27 = vld [vmem:[%s9305_s1 + $0x738] sm:$0xff]   ;;  %v1236_v28 = vrot.slane %v1214_v23, %v7718_v35  ;;  %v7355_v23 = vld [vmem:[%s9305_s1 + $0x8b0] sm:$0xff]  }
  0xae   :  { %6631 = vmatprep.subr.bf16.mxu1 %v7263_v29  ;;  %v7318_v29 = vld [vmem:[%s9305_s1 + $0x7b8] sm:$0xff]  }
  0xb0   :  { %6610 = vmatpush3.bf16.msra.mxu0 %v7264_v30  ;;  %v1215_v30 = vcombine.high %v8356_v26, %v8356_v26 }
  0xb1   :  { %6611 = vmatprep.subr.bf16.mxu0 %v7266_v32  ;;  %6632 = vmatpush3.bf16.msra.mxu1 %v7265_v31  ;;  %v1244_v31 = vcombine.high %v1222_v24, %v1222_v24  ;;  %v7319_v32 = vld [vmem:[%s9305_s1 + $0x770] sm:$0xff]  }
  0xb2   :  { %6633 = vmatprep.subr.bf16.mxu1 %v7267_v33  ;;  %v1246_v33 = vcombine.high %v1236_v28, %v1236_v28 }
  0xb4   :  { %6612 = vmatpush3.bf16.msra.mxu0 %v7268_v34 }
  0xb5   :  { %6613 = vmatprep.subr.bf16.mxu0 %v7270_v37  ;;  %6634 = vmatpush3.bf16.msra.mxu1 %v7269_v36  ;;  %v7320_v36 = vld [vmem:[%s9305_s1 + $0x7f0] sm:$0xff]   ;;  %v1243_v37 = vrot.slane %v1215_v30, %v7718_v35 }
  0xb6   :  { %6635 = vmatprep.subr.bf16.mxu1 %v7271_v38  ;;  %v7321_v38 = vld [vmem:[%s9305_s1 + $0x730] sm:$0xff]  }
  0xb8   :  { %6614 = vmatpush3.bf16.msra.mxu0 %v7272_v39 }
  0xb9   :  { %6615 = vmatprep.subr.bf16.mxu0 %v7274_v41  ;;  %6636 = vmatpush3.bf16.msra.mxu1 %v7273_v40  ;;  %v7322_v41 = vld [vmem:[%s9305_s1 + $0x7b0] sm:$0xff]  }
  0xba   :  { %6637 = vmatprep.subr.bf16.mxu1 %v7275_v42  ;;  %v1247_v42 = vcombine.high %v1243_v37, %v1243_v37 }
  0xbc   :  { %6616 = vmatpush3.bf16.msra.mxu0 %v7276_v43 }
  0xbd   :  { %6617 = vmatprep.subr.bf16.mxu0 %v7278_v45  ;;  %6638 = vmatpush3.bf16.msra.mxu1 %v7277_v44  ;;  %v7323_v44 = vld [vmem:[%s9305_s1 + $0x768] sm:$0xff]  }
  0xbe   :  { %6639 = vmatprep.subr.bf16.mxu1 %v7279_v46 }
  0xc0   :  { %6618 = vmatpush3.bf16.msra.mxu0 %v7280_v47  ;;  %v7324_v47 = vld [vmem:[%s9305_s1 + $0x7e8] sm:$0xff]  }
  0xc1   :  { %6647 = vmatprep.subr.bf16.mxu0 %v7283_v50  ;;  %6640 = vmatpush3.bf16.msra.mxu1 %v7281_v48 }
  0xc2   :  { %6669 = vmatprep.subr.bf16.mxu1 %v7284_v51 }
  0xc3   :  { %5013 = vmatmul.mubr.bf16.vlgmr.msra.gmra.mxu0 %v1180_v49  ;;  %v7325_v49 = vld [vmem:[%s9305_s1 + $0x728] sm:$0xff]  }
  0xc4   :  { %6648 = vmatpush3.bf16.msra.mxu0 %v7285_v52  ;;  %5053 = vmatmul.mubr.bf16.vlgmr.msra.gmra.mxu1 %v1196_v54  ;;  %v7326_v52 = vld [vmem:[%s9305_s1 + $0x7a8] sm:$0xff]   ;;  %v7327_v54 = vld [vmem:[%s9305_s1 + $0x760] sm:$0xff]  }
  0xc5   :  { %6649 = vmatprep.subr.bf16.mxu0 %v7287_v55  ;;  %6670 = vmatpush3.bf16.msra.mxu1 %v7286_v53 }
  0xc6   :  { %6671 = vmatprep.subr.bf16.mxu1 %v7288_v56  ;;  %5092 = vmatprep.mubr.bf16.mxu0 %v1236_v28  ;;  %v7328_v56 = vld [vmem:[%s9305_s1 + $0x7e0] sm:$0xff]   ;;  %v7357_v28 = vld [vmem:[%s9305_s1 + $0x8e8] sm:$0xff]  }
  0xc7   :  { %5132 = vmatprep.mubr.bf16.mxu1 %v1246_v33 }
  0xc8   :  { %6650 = vmatpush3.bf16.msra.mxu0 %v7289_v57  ;;  %v7329_v57 = vld [vmem:[%s9305_s1 + $0x720] sm:$0xff]  }
  0xc9   :  { %6651 = vmatprep.subr.bf16.mxu0 %v7291_v59  ;;  %6672 = vmatpush3.bf16.msra.mxu1 %v7290_v58  ;;  %v7330_v58 = vld [vmem:[%s9305_s1 + $0x7a0] sm:$0xff]   ;;  %v7331_v59 = vld [vmem:[%s9305_s1 + $0x758] sm:$0xff]  }
  0xca   :  { %6673 = vmatprep.subr.bf16.mxu1 %v7292_v60  ;;  %v7332_v60 = vld [vmem:[%s9305_s1 + $0x7d8] sm:$0xff]  }
  0xcc   :  { %6652 = vmatpush3.bf16.msra.mxu0 %v7293_v61  ;;  %v7333_v61 = vld [vmem:[%s9305_s1 + $0x718] sm:$0xff]  }
  0xcd   :  { %6653 = vmatprep.subr.bf16.mxu0 %v7295_v63  ;;  %6674 = vmatpush3.bf16.msra.mxu1 %v7294_v62  ;;  %v7334_v62 = vld [vmem:[%s9305_s1 + $0x798] sm:$0xff]   ;;  %v7335_v63 = vld [vmem:[%s9305_s1 + $0x750] sm:$0xff]  }
  0xce   :  { %6675 = vmatprep.subr.bf16.mxu1 %v7296_v0  ;;  %v7336_v0 = vld [vmem:[%s9305_s1 + $0x7d0] sm:$0xff]  }
  0xd0   :  { %6654 = vmatpush3.bf16.msra.mxu0 %v7297_v1  ;;  %v7337_v1 = vld [vmem:[%s9305_s1 + $0x710] sm:$0xff]  }
  0xd1   :  { %6655 = vmatprep.subr.bf16.mxu0 %v7299_v3  ;;  %6676 = vmatpush3.bf16.msra.mxu1 %v7298_v2  ;;  %v7338_v2 = vld [vmem:[%s9305_s1 + $0x790] sm:$0xff]   ;;  %v7339_v3 = vld [vmem:[%s9305_s1 + $0x748] sm:$0xff]  }
  0xd2   :  { %6677 = vmatprep.subr.bf16.mxu1 %v7300_v4  ;;  %v7340_v4 = vld [vmem:[%s9305_s1 + $0x7c8] sm:$0xff]  }
  0xd4   :  { %6656 = vmatpush3.bf16.msra.mxu0 %v7301_v5  ;;  %v7341_v5 = vld [vmem:[%s9305_s1 + $0x708] sm:$0xff]  }
  0xd5   :  { %6657 = vmatprep.subr.bf16.mxu0 %v7303_v7  ;;  %6678 = vmatpush3.bf16.msra.mxu1 %v7302_v6  ;;  %v7342_v6 = vld [vmem:[%s9305_s1 + $0x788] sm:$0xff]   ;;  %v7343_v7 = vld [vmem:[%s9305_s1 + $0x740] sm:$0xff]  }
  0xd6   :  { %6679 = vmatprep.subr.bf16.mxu1 %v7304_v8  ;;  %v7344_v8 = vld [vmem:[%s9305_s1 + $0x7c0] sm:$0xff]  }
  0xd8   :  { %6658 = vmatpush3.bf16.msra.mxu0 %v7305_v9  ;;  %v7345_v9 = vld [vmem:[%s9305_s1 + $0x700] sm:$0xff]  }
  0xd9   :  { %6659 = vmatprep.subr.bf16.mxu0 %v7307_v11  ;;  %6680 = vmatpush3.bf16.msra.mxu1 %v7306_v10  ;;  %v7346_v10 = vld [vmem:[%s9305_s1 + $0x780] sm:$0xff]   ;;  %v1229_v11 = vrot.slane %v8356_v26, %v7718_v35 }
  0xda   :  { %6681 = vmatprep.subr.bf16.mxu1 %v7308_v12  ;;  %v7348_v12 = vld [vmem:[%s9305_s1 + $0x878] sm:$0xff]  }
  0xdc   :  { %6660 = vmatpush3.bf16.msra.mxu0 %v7309_v13  ;;  %v7349_v13 = vld [vmem:[%s9305_s1 + $0x8f8] sm:$0xff]  }
  0xdd   :  { %6661 = vmatprep.subr.bf16.mxu0 %v7311_v15  ;;  %6682 = vmatpush3.bf16.msra.mxu1 %v7310_v14  ;;  %v7350_v14 = vld [vmem:[%s9305_s1 + $0x838] sm:$0xff]  }
  0xde   :  { %6683 = vmatprep.subr.bf16.mxu1 %v7312_v16  ;;  %v7351_v15 = vld [vmem:[%s9305_s1 + $0x8b8] sm:$0xff]   ;;  %v1245_v16 = vcombine.high %v1229_v11, %v1229_v11 }
  0xe0   :  { %6662 = vmatpush3.bf16.msra.mxu0 %v7313_v17  ;;  %v7352_v17 = vld [vmem:[%s9305_s1 + $0x870] sm:$0xff]  }
  0xe1   :  { %6691 = vmatprep.subr.bf16.mxu0 %v7315_v20  ;;  %6684 = vmatpush3.bf16.msra.mxu1 %v7314_v22  ;;  %v7354_v20 = vld [vmem:[%s9305_s1 + $0x830] sm:$0xff]  }
  0xe2   :  { %6713 = vmatprep.subr.bf16.mxu1 %v7316_v25  ;;  %v7356_v25 = vld [vmem:[%s9305_s1 + $0x868] sm:$0xff]  }
  0xe3   :  { %v6399_v34 = vpop.f32.mrf.mxu0  ;;  %5093 = vmatmul.mubr.bf16.vlgmr.msra.gmra.mxu0 %v1222_v24 }
  0xe4   :  { %v6421_v39 = vpop.f32.mrf.mxu1  ;;  %6692 = vmatpush3.bf16.msra.mxu0 %v7317_v27  ;;  %5133 = vmatmul.mubr.bf16.vlgmr.msra.gmra.mxu1 %v1244_v31  ;;  %v7358_v31 = vld [vmem:[%s9305_s1 + $0x828] sm:$0xff]  }
  0xe5   :  { %v6400_v40 = vpop.f32.mrf.mxu0  ;;  %6693 = vmatprep.subr.bf16.mxu0 %v7319_v32  ;;  %6714 = vmatpush3.bf16.msra.mxu1 %v7318_v29 }
  0xe6   :  { %v6401_v43 = vadd.f32 %v6400_v40, %v6399_v34  ;;  %v6422_v45 = vpop.f32.mrf.mxu1  ;;  %5172 = vmatprep.mubr.bf16.mxu0 %v1243_v37  ;;  %6715 = vmatprep.subr.bf16.mxu1 %v7320_v36  ;;  %v7359_v34 = vld [vmem:[%s9305_s1 + $0x8a8] sm:$0xff]   ;;  %v7360_v37 = vld [vmem:[%s9305_s1 + $0x860] sm:$0xff]  }
  0xe7   :  { %v6402_v46 = vpop.f32.mrf.mxu0  ;;  %v6423_v48 = vadd.f32 %v6422_v45, %v6421_v39  ;;  %5212 = vmatprep.mubr.bf16.mxu1 %v1247_v42  ;;  %v7361_v39 = vld [vmem:[%s9305_s1 + $0x8e0] sm:$0xff]   ;;  %v7364_v42 = vld [vmem:[%s9305_s1 + $0x858] sm:$0xff]  }
  0xe8   :  { %v6424_v50 = vpop.f32.mrf.mxu1  ;;  %6694 = vmatpush3.bf16.msra.mxu0 %v7321_v38  ;;  %v7362_v40 = vld [vmem:[%s9305_s1 + $0x820] sm:$0xff]   ;;  %v7367_v45 = vld [vmem:[%s9305_s1 + $0x898] sm:$0xff]   ;;  %v7368_v46 = vld [vmem:[%s9305_s1 + $0x850] sm:$0xff]  }
  0xe9   :  { %v6403_v51 = vpop.f32.mrf.mxu0  ;;  %v8392_v53 = vadd.f32 %v6423_v48, %v6401_v43  ;;  %6695 = vmatprep.subr.bf16.mxu0 %v7323_v44  ;;  %6716 = vmatpush3.bf16.msra.mxu1 %v7322_v41  ;;  %v7363_v41 = vld [vmem:[%s9305_s1 + $0x8a0] sm:$0xff]   ;;  %v7365_v43 = vld [vmem:[%s9305_s1 + $0x8d8] sm:$0xff]   ;;  %v7370_v48 = vld [vmem:[%s9305_s1 + $0x810] sm:$0xff]  }
  0xea   :  { %v6425_v55 = vpop.f32.mrf.mxu1  ;;  %6717 = vmatprep.subr.bf16.mxu1 %v7324_v47  ;;  %v7366_v44 = vld [vmem:[%s9305_s1 + $0x818] sm:$0xff]   ;;  %v7369_v47 = vld [vmem:[%s9305_s1 + $0x8d0] sm:$0xff]   ;;  %v7372_v50 = vld [vmem:[%s9305_s1 + $0x848] sm:$0xff]  }
  0xeb   :  { %v7373_v51 = vld [vmem:[%s9305_s1 + $0x8c8] sm:$0xff]   ;;  %v7377_v55 = vld [vmem:[%s9305_s1 + $0x8c0] sm:$0xff]  }
  0xec   :  { %6696 = vmatpush3.bf16.msra.mxu0 %v7325_v49  ;;  %v7371_v49 = vld [vmem:[%s9305_s1 + $0x890] sm:$0xff]  }
  0xed   :  { %6697 = vmatprep.subr.bf16.mxu0 %v7327_v54  ;;  %6718 = vmatpush3.bf16.msra.mxu1 %v7326_v52  ;;  %v7374_v52 = vld [vmem:[%s9305_s1 + $0x808] sm:$0xff]   ;;  %v7376_v54 = vld [vmem:[%s9305_s1 + $0x840] sm:$0xff]  }
  0xee   :  { %6719 = vmatprep.subr.bf16.mxu1 %v7328_v56  ;;  %v7378_v56 = vld [vmem:[%s9305_s1 + $0x800] sm:$0xff]  }
  0xf0   :  { %6698 = vmatpush3.bf16.msra.mxu0 %v7329_v57  ;;  %v16_v57 = vld [vmem:[%s9306_s0 + $0x20] sm:$0xff] }
  0xf1   :  { %6699 = vmatprep.subr.bf16.mxu0 %v7331_v59  ;;  %6720 = vmatpush3.bf16.msra.mxu1 %v7330_v58  ;;  %v7379_v58 = vld [vmem:[%s9305_s1 + $0x880] sm:$0xff]   ;;  %v1255_v59 = vrot.slane %v16_v57, %v7718_v35 }
  0xf2   :  { %6721 = vmatprep.subr.bf16.mxu1 %v7332_v60  ;;  %v1248_v60 = vcombine.high %v16_v57, %v16_v57  ;;  %v7417_v57 = vld [vmem:[%s9305_s1 + $0xa70] sm:$0xff]  }
  0xf4   :  { %6700 = vmatpush3.bf16.msra.mxu0 %v7333_v61  ;;  %v7380_v61 = vld [vmem:[%s9305_s1 + $0x978] sm:$0xff]  }
  0xf5   :  { %6701 = vmatprep.subr.bf16.mxu0 %v7335_v63  ;;  %6722 = vmatpush3.bf16.msra.mxu1 %v7334_v62  ;;  %v1263_v62 = vcombine.high %v1255_v59, %v1255_v59  ;;  %v1271_v63 = vrot.slane %v1255_v59, %v7718_v35  ;;  %v7418_v59 = vld [vmem:[%s9305_s1 + $0xaf0] sm:$0xff]  }
  0xf6   :  { %6723 = vmatprep.subr.bf16.mxu1 %v7336_v0  ;;  %v7381_v0 = vld [vmem:[%s9305_s1 + $0x9f8] sm:$0xff]  }
  0xf8   :  { %6702 = vmatpush3.bf16.msra.mxu0 %v7337_v1  ;;  %v8567_v1 = vrot.slane %v1248_v60, %v7718_v35  ;;  %v7419_v60 = vld [vmem:[%s9305_s1 + $0xa30] sm:$0xff]  }
  0xf9   :  { %6703 = vmatprep.subr.bf16.mxu0 %v7339_v3  ;;  %6724 = vmatpush3.bf16.msra.mxu1 %v7338_v2  ;;  %v7382_v2 = vld [vmem:[%s9305_s1 + $0x938] sm:$0xff]   ;;  %v1285_v3 = vrot.slane %v1263_v62, %v7718_v35 }
  0xfa   :  { %6725 = vmatprep.subr.bf16.mxu1 %v7340_v4  ;;  %v7383_v4 = vld [vmem:[%s9305_s1 + $0x9b8] sm:$0xff]  }
  0xfc   :  { %6704 = vmatpush3.bf16.msra.mxu0 %v7341_v5  ;;  %v1264_v5 = vcombine.high %v8567_v1, %v8567_v1 }
  0xfd   :  { %6705 = vmatprep.subr.bf16.mxu0 %v7343_v7  ;;  %6726 = vmatpush3.bf16.msra.mxu1 %v7342_v6  ;;  %v1293_v6 = vcombine.high %v1271_v63, %v1271_v63  ;;  %v7384_v7 = vld [vmem:[%s9305_s1 + $0x970] sm:$0xff]  }
  0xfe   :  { %6727 = vmatprep.subr.bf16.mxu1 %v7344_v8  ;;  %v1295_v8 = vcombine.high %v1285_v3, %v1285_v3 }
 0x100   :  { %6706 = vmatpush3.bf16.msra.mxu0 %v7345_v9 }
 0x101   :  { %6735 = vmatprep.subr.bf16.mxu0 %v7348_v12  ;;  %6728 = vmatpush3.bf16.msra.mxu1 %v7346_v10  ;;  %v7385_v10 = vld [vmem:[%s9305_s1 + $0x9f0] sm:$0xff]  }
 0x102   :  { %6757 = vmatprep.subr.bf16.mxu1 %v7349_v13  ;;  %v7386_v12 = vld [vmem:[%s9305_s1 + $0x930] sm:$0xff]  }
 0x103   :  { %v6443_v18 = vpop.f32.mrf.mxu0  ;;  %5173 = vmatmul.mubr.bf16.vlgmr.msra.gmra.mxu0 %v1229_v11  ;;  %v1292_v11 = vrot.slane %v1264_v5, %v7718_v35 }
 0x104   :  { %v6465_v21 = vpop.f32.mrf.mxu1  ;;  %6736 = vmatpush3.bf16.msra.mxu0 %v7350_v14  ;;  %5213 = vmatmul.mubr.bf16.vlgmr.msra.gmra.mxu1 %v1245_v16 }
 0x105   :  { %v6444_v22 = vpop.f32.mrf.mxu0  ;;  %6737 = vmatprep.subr.bf16.mxu0 %v7352_v17  ;;  %6758 = vmatpush3.bf16.msra.mxu1 %v7351_v15  ;;  %v7387_v15 = vld [vmem:[%s9305_s1 + $0x9b0] sm:$0xff]   ;;  %v1296_v16 = vcombine.high %v1292_v11, %v1292_v11 }
 0x106   :  { %v6445_v24 = vadd.f32 %v6444_v22, %v6443_v18  ;;  %v6466_v26 = vpop.f32.mrf.mxu1  ;;  %6759 = vmatprep.subr.bf16.mxu1 %v7353_v19  ;;  %5252 = vmatprep.mubr.bf16.mxu0 %v1285_v3  ;;  %v7388_v18 = vld [vmem:[%s9305_s1 + $0x968] sm:$0xff]  }
 0x107   :  { %v6446_v27 = vpop.f32.mrf.mxu0  ;;  %v6467_v30 = vadd.f32 %v6466_v26, %v6465_v21  ;;  %5292 = vmatprep.mubr.bf16.mxu1 %v1295_v8  ;;  %v7389_v21 = vld [vmem:[%s9305_s1 + $0x9e8] sm:$0xff]  }
 0x108   :  { %v4695_v29 = vadd.f32 %v6445_v24, %v8392_v53  ;;  %v6468_v32 = vpop.f32.mrf.mxu1  ;;  %6738 = vmatpush3.bf16.msra.mxu0 %v7354_v20  ;;  %v7375_v53 = vld [vmem:[%s9305_s1 + $0x888] sm:$0xff]  }
 0x109   :  { %v6447_v33 = vpop.f32.mrf.mxu0  ;;  %6739 = vmatprep.subr.bf16.mxu0 %v7356_v25  ;;  %6760 = vmatpush3.bf16.msra.mxu1 %v7355_v23  ;;  %v7390_v24 = vld [vmem:[%s9305_s1 + $0x928] sm:$0xff]   ;;  %v7394_v32 = vld [vmem:[%s9305_s1 + $0x920] sm:$0xff]  }
 0x10a   :  { %v8493_v36 = vadd.f32 %v6467_v30, %v4695_v29  ;;  %v6469_v38 = vpop.f32.mrf.mxu1  ;;  %6761 = vmatprep.subr.bf16.mxu1 %v7357_v28  ;;  %v7391_v27 = vld [vmem:[%s9305_s1 + $0x9a8] sm:$0xff]   ;;  %v7392_v29 = vld [vmem:[%s9305_s1 + $0x960] sm:$0xff]  }
 0x10b   :  { %v7395_v33 = vld [vmem:[%s9305_s1 + $0x9a0] sm:$0xff]   ;;  %v7399_v38 = vld [vmem:[%s9305_s1 + $0x998] sm:$0xff]  }
 0x10c   :  { %6740 = vmatpush3.bf16.msra.mxu0 %v7358_v31  ;;  %v7393_v31 = vld [vmem:[%s9305_s1 + $0x9e0] sm:$0xff]  }
 0x10d   :  { %6741 = vmatprep.subr.bf16.mxu0 %v7360_v37  ;;  %6762 = vmatpush3.bf16.msra.mxu1 %v7359_v34  ;;  %v7396_v34 = vld [vmem:[%s9305_s1 + $0x958] sm:$0xff]  }
 0x10e   :  { %6763 = vmatprep.subr.bf16.mxu1 %v7361_v39  ;;  %v7398_v37 = vld [vmem:[%s9305_s1 + $0x918] sm:$0xff]   ;;  %v7400_v39 = vld [vmem:[%s9305_s1 + $0x950] sm:$0xff]  }
 0x110   :  { %6742 = vmatpush3.bf16.msra.mxu0 %v7362_v40  ;;  %v7401_v40 = vld [vmem:[%s9305_s1 + $0x9d0] sm:$0xff]  }
 0x111   :  { %6743 = vmatprep.subr.bf16.mxu0 %v7364_v42  ;;  %6764 = vmatpush3.bf16.msra.mxu1 %v7363_v41  ;;  %v7402_v41 = vld [vmem:[%s9305_s1 + $0x910] sm:$0xff]  }
 0x112   :  { %6765 = vmatprep.subr.bf16.mxu1 %v7365_v43  ;;  %v7403_v42 = vld [vmem:[%s9305_s1 + $0x990] sm:$0xff]   ;;  %v7404_v43 = vld [vmem:[%s9305_s1 + $0x948] sm:$0xff]  }
 0x114   :  { %6744 = vmatpush3.bf16.msra.mxu0 %v7366_v44  ;;  %v7405_v44 = vld [vmem:[%s9305_s1 + $0x9c8] sm:$0xff]  }
 0x115   :  { %6745 = vmatprep.subr.bf16.mxu0 %v7368_v46  ;;  %6766 = vmatpush3.bf16.msra.mxu1 %v7367_v45  ;;  %v7406_v45 = vld [vmem:[%s9305_s1 + $0x908] sm:$0xff]  }
 0x116   :  { %6767 = vmatprep.subr.bf16.mxu1 %v7369_v47  ;;  %v7407_v46 = vld [vmem:[%s9305_s1 + $0x988] sm:$0xff]   ;;  %v7408_v47 = vld [vmem:[%s9305_s1 + $0x940] sm:$0xff]  }
 0x118   :  { %6746 = vmatpush3.bf16.msra.mxu0 %v7370_v48  ;;  %v7409_v48 = vld [vmem:[%s9305_s1 + $0x9c0] sm:$0xff]  }
 0x119   :  { %6747 = vmatprep.subr.bf16.mxu0 %v7372_v50  ;;  %6768 = vmatpush3.bf16.msra.mxu1 %v7371_v49  ;;  %v7410_v49 = vld [vmem:[%s9305_s1 + $0x900] sm:$0xff]  }
 0x11a   :  { %6769 = vmatprep.subr.bf16.mxu1 %v7373_v51  ;;  %v7411_v50 = vld [vmem:[%s9305_s1 + $0x980] sm:$0xff]   ;;  %v1278_v51 = vrot.slane %v8567_v1, %v7718_v35  ;;  %v7421_v1 = vld [vmem:[%s9305_s1 + $0xa68] sm:$0xff]  }
 0x11c   :  { %6748 = vmatpush3.bf16.msra.mxu0 %v7374_v52  ;;  %v7413_v52 = vld [vmem:[%s9305_s1 + $0xa78] sm:$0xff]  }
 0x11d   :  { %6749 = vmatprep.subr.bf16.mxu0 %v7376_v54  ;;  %6770 = vmatpush3.bf16.msra.mxu1 %v7375_v53  ;;  %v7414_v53 = vld [vmem:[%s9305_s1 + $0xaf8] sm:$0xff]  }
 0x11e   :  { %6771 = vmatprep.subr.bf16.mxu1 %v7377_v55  ;;  %v7415_v54 = vld [vmem:[%s9305_s1 + $0xa38] sm:$0xff]  }
 0x11f   :  { %v7416_v55 = vld [vmem:[%s9305_s1 + $0xab8] sm:$0xff]  }
 0x120   :  { %6750 = vmatpush3.bf16.msra.mxu0 %v7378_v56  ;;  %v1294_v56 = vcombine.high %v1278_v51, %v1278_v51 }
 0x121   :  { %6779 = vmatprep.subr.bf16.mxu0 %v7380_v61  ;;  %6772 = vmatpush3.bf16.msra.mxu1 %v7379_v58 }
 0x122   :  { %6801 = vmatprep.subr.bf16.mxu1 %v7381_v0 }
 0x123   :  { %v6487_v9 = vpop.f32.mrf.mxu0  ;;  %5253 = vmatmul.mubr.bf16.vlgmr.msra.gmra.mxu0 %v1271_v63  ;;  %v7420_v63 = vld [vmem:[%s9305_s1 + $0xab0] sm:$0xff]  }
 0x124   :  { %v6509_v13 = vpop.f32.mrf.mxu1  ;;  %6780 = vmatpush3.bf16.msra.mxu0 %v7382_v2  ;;  %5293 = vmatmul.mubr.bf16.vlgmr.msra.gmra.mxu1 %v1293_v6 }
 0x125   :  { %v6488_v14 = vpop.f32.mrf.mxu0  ;;  %6781 = vmatprep.subr.bf16.mxu0 %v7384_v7  ;;  %6802 = vmatpush3.bf16.msra.mxu1 %v7383_v4  ;;  %v7422_v4 = vld [vmem:[%s9305_s1 + $0xae8] sm:$0xff]  }
 0x126   :  { %v6489_v17 = vadd.f32 %v6488_v14, %v6487_v9  ;;  %v6510_v19 = vpop.f32.mrf.mxu1  ;;  %5332 = vmatprep.mubr.bf16.mxu0 %v1292_v11  ;;  %6803 = vmatprep.subr.bf16.mxu1 %v7385_v10  ;;  %v7423_v7 = vld [vmem:[%s9305_s1 + $0xa28] sm:$0xff]   ;;  %v7426_v14 = vld [vmem:[%s9305_s1 + $0xae0] sm:$0xff]  }
 0x127   :  { %v6490_v20 = vpop.f32.mrf.mxu0  ;;  %v6511_v23 = vadd.f32 %v6510_v19, %v6509_v13  ;;  %5372 = vmatprep.mubr.bf16.mxu1 %v1296_v16  ;;  %v7424_v10 = vld [vmem:[%s9305_s1 + $0xaa8] sm:$0xff]   ;;  %v7428_v16 = vld [vmem:[%s9305_s1 + $0xaa0] sm:$0xff]   ;;  %v7431_v19 = vld [vmem:[%s9305_s1 + $0xa18] sm:$0xff]  }
 0x128   :  { %v4775_v22 = vadd.f32 %v6489_v17, %v8493_v36  ;;  %v6512_v25 = vpop.f32.mrf.mxu1  ;;  %6782 = vmatpush3.bf16.msra.mxu0 %v7386_v12  ;;  %v7397_v36 = vld [vmem:[%s9305_s1 + $0x9d8] sm:$0xff]   ;;  %v7425_v12 = vld [vmem:[%s9305_s1 + $0xa60] sm:$0xff]  }
 0x129   :  { %v6491_v26 = vpop.f32.mrf.mxu0  ;;  %6783 = vmatprep.subr.bf16.mxu0 %v7388_v18  ;;  %6804 = vmatpush3.bf16.msra.mxu1 %v7387_v15  ;;  %v7427_v15 = vld [vmem:[%s9305_s1 + $0xa20] sm:$0xff]   ;;  %v7429_v17 = vld [vmem:[%s9305_s1 + $0xa58] sm:$0xff]   ;;  %v7437_v25 = vld [vmem:[%s9305_s1 + $0xa48] sm:$0xff]  }
 0x12a   :  { %v8604_v28 = vadd.f32 %v6511_v23, %v4775_v22  ;;  %v6513_v30 = vpop.f32.mrf.mxu1  ;;  %6805 = vmatprep.subr.bf16.mxu1 %v7389_v21  ;;  %v7430_v18 = vld [vmem:[%s9305_s1 + $0xad8] sm:$0xff]   ;;  %v7433_v21 = vld [vmem:[%s9305_s1 + $0xa50] sm:$0xff]   ;;  %v7438_v26 = vld [vmem:[%s9305_s1 + $0xac8] sm:$0xff]  }
 0x12b   :  { %v7432_v20 = vld [vmem:[%s9305_s1 + $0xa98] sm:$0xff]   ;;  %v7434_v22 = vld [vmem:[%s9305_s1 + $0xad0] sm:$0xff]   ;;  %v7442_v30 = vld [vmem:[%s9305_s1 + $0xac0] sm:$0xff]  }
 0x12c   :  { %6784 = vmatpush3.bf16.msra.mxu0 %v7390_v24  ;;  %v7435_v23 = vld [vmem:[%s9305_s1 + $0xa10] sm:$0xff]  }
 0x12d   :  { %6785 = vmatprep.subr.bf16.mxu0 %v7392_v29  ;;  %6806 = vmatpush3.bf16.msra.mxu1 %v7391_v27  ;;  %v7436_v24 = vld [vmem:[%s9305_s1 + $0xa90] sm:$0xff]   ;;  %v7439_v27 = vld [vmem:[%s9305_s1 + $0xa08] sm:$0xff]   ;;  %v7441_v29 = vld [vmem:[%s9305_s1 + $0xa40] sm:$0xff]  }
 0x12e   :  { %6807 = vmatprep.subr.bf16.mxu1 %v7393_v31  ;;  %v7443_v31 = vld [vmem:[%s9305_s1 + $0xa00] sm:$0xff]  }
 0x130   :  { %6786 = vmatpush3.bf16.msra.mxu0 %v7394_v32  ;;  %v17_v32 = vld [vmem:[%s9306_s0 + $0x28] sm:$0xff] }
 0x131   :  { %6787 = vmatprep.subr.bf16.mxu0 %v7396_v34  ;;  %6808 = vmatpush3.bf16.msra.mxu1 %v7395_v33  ;;  %v7444_v33 = vld [vmem:[%s9305_s1 + $0xa80] sm:$0xff]   ;;  %v1304_v34 = vrot.slane %v17_v32, %v7718_v35 }
 0x132   :  { %6809 = vmatprep.subr.bf16.mxu1 %v7397_v36  ;;  %v1297_v36 = vcombine.high %v17_v32, %v17_v32  ;;  %v7482_v32 = vld [vmem:[%s9305_s1 + $0xc70] sm:$0xff]  }
 0x134   :  { %6788 = vmatpush3.bf16.msra.mxu0 %v7398_v37  ;;  %v7445_v37 = vld [vmem:[%s9305_s1 + $0xb78] sm:$0xff]  }
 0x135   :  { %6789 = vmatprep.subr.bf16.mxu0 %v7400_v39  ;;  %6810 = vmatpush3.bf16.msra.mxu1 %v7399_v38  ;;  %v1312_v38 = vcombine.high %v1304_v34, %v1304_v34  ;;  %v1320_v39 = vrot.slane %v1304_v34, %v7718_v35  ;;  %v7483_v34 = vld [vmem:[%s9305_s1 + $0xcf0] sm:$0xff]  }
 0x136   :  { %6811 = vmatprep.subr.bf16.mxu1 %v7401_v40  ;;  %v7446_v40 = vld [vmem:[%s9305_s1 + $0xbf8] sm:$0xff]  }
 0x138   :  { %6790 = vmatpush3.bf16.msra.mxu0 %v7402_v41  ;;  %v8779_v41 = vrot.slane %v1297_v36, %v7718_v35  ;;  %v7484_v36 = vld [vmem:[%s9305_s1 + $0xc30] sm:$0xff]  }
 0x139   :  { %6791 = vmatprep.subr.bf16.mxu0 %v7404_v43  ;;  %6812 = vmatpush3.bf16.msra.mxu1 %v7403_v42  ;;  %v7447_v42 = vld [vmem:[%s9305_s1 + $0xb38] sm:$0xff]   ;;  %v1334_v43 = vrot.slane %v1312_v38, %v7718_v35 }
 0x13a   :  { %6813 = vmatprep.subr.bf16.mxu1 %v7405_v44  ;;  %v7448_v44 = vld [vmem:[%s9305_s1 + $0xbb8] sm:$0xff]  }
 0x13c   :  { %6792 = vmatpush3.bf16.msra.mxu0 %v7406_v45  ;;  %v1313_v45 = vcombine.high %v8779_v41, %v8779_v41 }
 0x13d   :  { %6793 = vmatprep.subr.bf16.mxu0 %v7408_v47  ;;  %6814 = vmatpush3.bf16.msra.mxu1 %v7407_v46  ;;  %v1342_v46 = vcombine.high %v1320_v39, %v1320_v39  ;;  %v7449_v47 = vld [vmem:[%s9305_s1 + $0xb70] sm:$0xff]  }
 0x13e   :  { %6815 = vmatprep.subr.bf16.mxu1 %v7409_v48  ;;  %v1344_v48 = vcombine.high %v1334_v43, %v1334_v43 }
 0x140   :  { %6794 = vmatpush3.bf16.msra.mxu0 %v7410_v49 }
 0x141   :  { %6823 = vmatprep.subr.bf16.mxu0 %v7413_v52  ;;  %6816 = vmatpush3.bf16.msra.mxu1 %v7411_v50  ;;  %v7450_v50 = vld [vmem:[%s9305_s1 + $0xbf0] sm:$0xff]  }
 0x142   :  { %6845 = vmatprep.subr.bf16.mxu1 %v7414_v53  ;;  %v7451_v52 = vld [vmem:[%s9305_s1 + $0xb30] sm:$0xff]  }
 0x143   :  { %v6531_v58 = vpop.f32.mrf.mxu0  ;;  %5333 = vmatmul.mubr.bf16.vlgmr.msra.gmra.mxu0 %v1278_v51  ;;  %v1341_v51 = vrot.slane %v1313_v45, %v7718_v35 }
 0x144   :  { %v6553_v61 = vpop.f32.mrf.mxu1  ;;  %6824 = vmatpush3.bf16.msra.mxu0 %v7415_v54  ;;  %5373 = vmatmul.mubr.bf16.vlgmr.msra.gmra.mxu1 %v1294_v56 }
 0x145   :  { %v6532_v62 = vpop.f32.mrf.mxu0  ;;  %6825 = vmatprep.subr.bf16.mxu0 %v7417_v57  ;;  %6846 = vmatpush3.bf16.msra.mxu1 %v7416_v55  ;;  %v7452_v55 = vld [vmem:[%s9305_s1 + $0xbb0] sm:$0xff]   ;;  %v1345_v56 = vcombine.high %v1341_v51, %v1341_v51 }
 0x146   :  { %v6533_v0 = vadd.f32 %v6532_v62, %v6531_v58  ;;  %v6554_v2 = vpop.f32.mrf.mxu1  ;;  %6847 = vmatprep.subr.bf16.mxu1 %v7418_v59  ;;  %5412 = vmatprep.mubr.bf16.mxu0 %v1334_v43  ;;  %v7453_v58 = vld [vmem:[%s9305_s1 + $0xb68] sm:$0xff]  }
 0x147   :  { %v6534_v3 = vpop.f32.mrf.mxu0  ;;  %v6555_v6 = vadd.f32 %v6554_v2, %v6553_v61  ;;  %5452 = vmatprep.mubr.bf16.mxu1 %v1344_v48  ;;  %v7454_v61 = vld [vmem:[%s9305_s1 + $0xbe8] sm:$0xff]  }
 0x148   :  { %v4855_v5 = vadd.f32 %v6533_v0, %v8604_v28  ;;  %v6556_v8 = vpop.f32.mrf.mxu1  ;;  %6826 = vmatpush3.bf16.msra.mxu0 %v7419_v60  ;;  %v7440_v28 = vld [vmem:[%s9305_s1 + $0xa88] sm:$0xff]  }
 0x149   :  { %v6535_v9 = vpop.f32.mrf.mxu0  ;;  %6827 = vmatprep.subr.bf16.mxu0 %v7421_v1  ;;  %6848 = vmatpush3.bf16.msra.mxu1 %v7420_v63  ;;  %v7455_v0 = vld [vmem:[%s9305_s1 + $0xb28] sm:$0xff]   ;;  %v7459_v8 = vld [vmem:[%s9305_s1 + $0xb20] sm:$0xff]  }
 0x14a   :  { %v8705_v11 = vadd.f32 %v6555_v6, %v4855_v5  ;;  %v6557_v13 = vpop.f32.mrf.mxu1  ;;  %6849 = vmatprep.subr.bf16.mxu1 %v7422_v4  ;;  %v7456_v3 = vld [vmem:[%s9305_s1 + $0xba8] sm:$0xff]   ;;  %v7457_v5 = vld [vmem:[%s9305_s1 + $0xb60] sm:$0xff]  }
 0x14b   :  { %v7460_v9 = vld [vmem:[%s9305_s1 + $0xba0] sm:$0xff]   ;;  %v7464_v13 = vld [vmem:[%s9305_s1 + $0xb98] sm:$0xff]  }
 0x14c   :  { %6828 = vmatpush3.bf16.msra.mxu0 %v7423_v7  ;;  %v7458_v7 = vld [vmem:[%s9305_s1 + $0xbe0] sm:$0xff]  }
 0x14d   :  { %6829 = vmatprep.subr.bf16.mxu0 %v7425_v12  ;;  %6850 = vmatpush3.bf16.msra.mxu1 %v7424_v10  ;;  %v7461_v10 = vld [vmem:[%s9305_s1 + $0xb58] sm:$0xff]  }
 0x14e   :  { %6851 = vmatprep.subr.bf16.mxu1 %v7426_v14  ;;  %v7463_v12 = vld [vmem:[%s9305_s1 + $0xb18] sm:$0xff]   ;;  %v7465_v14 = vld [vmem:[%s9305_s1 + $0xb50] sm:$0xff]  }
 0x150   :  { %6830 = vmatpush3.bf16.msra.mxu0 %v7427_v15  ;;  %v7466_v15 = vld [vmem:[%s9305_s1 + $0xbd0] sm:$0xff]  }
 0x151   :  { %6831 = vmatprep.subr.bf16.mxu0 %v7429_v17  ;;  %6852 = vmatpush3.bf16.msra.mxu1 %v7428_v16  ;;  %v7467_v16 = vld [vmem:[%s9305_s1 + $0xb10] sm:$0xff]  }
 0x152   :  { %6853 = vmatprep.subr.bf16.mxu1 %v7430_v18  ;;  %v7468_v17 = vld [vmem:[%s9305_s1 + $0xb90] sm:$0xff]   ;;  %v7469_v18 = vld [vmem:[%s9305_s1 + $0xb48] sm:$0xff]  }
 0x154   :  { %6832 = vmatpush3.bf16.msra.mxu0 %v7431_v19  ;;  %v7470_v19 = vld [vmem:[%s9305_s1 + $0xbc8] sm:$0xff]  }
 0x155   :  { %6833 = vmatprep.subr.bf16.mxu0 %v7433_v21  ;;  %6854 = vmatpush3.bf16.msra.mxu1 %v7432_v20  ;;  %v7471_v20 = vld [vmem:[%s9305_s1 + $0xb08] sm:$0xff]  }
 0x156   :  { %6855 = vmatprep.subr.bf16.mxu1 %v7434_v22  ;;  %v7472_v21 = vld [vmem:[%s9305_s1 + $0xb88] sm:$0xff]   ;;  %v7473_v22 = vld [vmem:[%s9305_s1 + $0xb40] sm:$0xff]  }
 0x158   :  { %6834 = vmatpush3.bf16.msra.mxu0 %v7435_v23  ;;  %v7474_v23 = vld [vmem:[%s9305_s1 + $0xbc0] sm:$0xff]  }
 0x159   :  { %6835 = vmatprep.subr.bf16.mxu0 %v7437_v25  ;;  %6856 = vmatpush3.bf16.msra.mxu1 %v7436_v24  ;;  %v7475_v24 = vld [vmem:[%s9305_s1 + $0xb00] sm:$0xff]  }
 0x15a   :  { %6857 = vmatprep.subr.bf16.mxu1 %v7438_v26  ;;  %v7476_v25 = vld [vmem:[%s9305_s1 + $0xb80] sm:$0xff]   ;;  %v1327_v26 = vrot.slane %v8779_v41, %v7718_v35  ;;  %v7486_v41 = vld [vmem:[%s9305_s1 + $0xc68] sm:$0xff]  }
 0x15c   :  { %6836 = vmatpush3.bf16.msra.mxu0 %v7439_v27  ;;  %v7478_v27 = vld [vmem:[%s9305_s1 + $0xc78] sm:$0xff]  }
 0x15d   :  { %6837 = vmatprep.subr.bf16.mxu0 %v7441_v29  ;;  %6858 = vmatpush3.bf16.msra.mxu1 %v7440_v28  ;;  %v7479_v28 = vld [vmem:[%s9305_s1 + $0xcf8] sm:$0xff]  }
 0x15e   :  { %6859 = vmatprep.subr.bf16.mxu1 %v7442_v30  ;;  %v7480_v29 = vld [vmem:[%s9305_s1 + $0xc38] sm:$0xff]  }
 0x15f   :  { %v7481_v30 = vld [vmem:[%s9305_s1 + $0xcb8] sm:$0xff]  }
 0x160   :  { %6838 = vmatpush3.bf16.msra.mxu0 %v7443_v31  ;;  %v1343_v31 = vcombine.high %v1327_v26, %v1327_v26 }
 0x161   :  { %6867 = vmatprep.subr.bf16.mxu0 %v7445_v37  ;;  %6860 = vmatpush3.bf16.msra.mxu1 %v7444_v33 }
 0x162   :  { %6889 = vmatprep.subr.bf16.mxu1 %v7446_v40 }
 0x163   :  { %v6575_v49 = vpop.f32.mrf.mxu0  ;;  %5413 = vmatmul.mubr.bf16.vlgmr.msra.gmra.mxu0 %v1320_v39  ;;  %v7485_v39 = vld [vmem:[%s9305_s1 + $0xcb0] sm:$0xff]  }
 0x164   :  { %v6597_v53 = vpop.f32.mrf.mxu1  ;;  %6868 = vmatpush3.bf16.msra.mxu0 %v7447_v42  ;;  %5453 = vmatmul.mubr.bf16.vlgmr.msra.gmra.mxu1 %v1342_v46 }
 0x165   :  { %v6576_v54 = vpop.f32.mrf.mxu0  ;;  %6869 = vmatprep.subr.bf16.mxu0 %v7449_v47  ;;  %6890 = vmatpush3.bf16.msra.mxu1 %v7448_v44  ;;  %v7487_v44 = vld [vmem:[%s9305_s1 + $0xce8] sm:$0xff]  }
 0x166   :  { %v6577_v57 = vadd.f32 %v6576_v54, %v6575_v49  ;;  %v6598_v59 = vpop.f32.mrf.mxu1  ;;  %5492 = vmatprep.mubr.bf16.mxu0 %v1341_v51  ;;  %6891 = vmatprep.subr.bf16.mxu1 %v7450_v50  ;;  %v7488_v47 = vld [vmem:[%s9305_s1 + $0xc28] sm:$0xff]   ;;  %v7491_v54 = vld [vmem:[%s9305_s1 + $0xce0] sm:$0xff]  }
 0x167   :  { %v6578_v60 = vpop.f32.mrf.mxu0  ;;  %v6599_v63 = vadd.f32 %v6598_v59, %v6597_v53  ;;  %5532 = vmatprep.mubr.bf16.mxu1 %v1345_v56  ;;  %v7489_v50 = vld [vmem:[%s9305_s1 + $0xca8] sm:$0xff]   ;;  %v7493_v56 = vld [vmem:[%s9305_s1 + $0xca0] sm:$0xff]   ;;  %v7496_v59 = vld [vmem:[%s9305_s1 + $0xc18] sm:$0xff]  }
 0x168   :  { %v4935_v62 = vadd.f32 %v6577_v57, %v8705_v11  ;;  %v6600_v1 = vpop.f32.mrf.mxu1  ;;  %6870 = vmatpush3.bf16.msra.mxu0 %v7451_v52  ;;  %v7462_v11 = vld [vmem:[%s9305_s1 + $0xbd8] sm:$0xff]   ;;  %v7490_v52 = vld [vmem:[%s9305_s1 + $0xc60] sm:$0xff]  }
 0x169   :  { %v6579_v2 = vpop.f32.mrf.mxu0  ;;  %6871 = vmatprep.subr.bf16.mxu0 %v7453_v58  ;;  %6892 = vmatpush3.bf16.msra.mxu1 %v7452_v55  ;;  %v7492_v55 = vld [vmem:[%s9305_s1 + $0xc20] sm:$0xff]   ;;  %v7494_v57 = vld [vmem:[%s9305_s1 + $0xc58] sm:$0xff]   ;;  %v7502_v1 = vld [vmem:[%s9305_s1 + $0xc48] sm:$0xff]  }
 0x16a   :  { %v8816_v4 = vadd.f32 %v6599_v63, %v4935_v62  ;;  %v6601_v6 = vpop.f32.mrf.mxu1  ;;  %6893 = vmatprep.subr.bf16.mxu1 %v7454_v61  ;;  %v7495_v58 = vld [vmem:[%s9305_s1 + $0xcd8] sm:$0xff]   ;;  %v7498_v61 = vld [vmem:[%s9305_s1 + $0xc50] sm:$0xff]   ;;  %v7503_v2 = vld [vmem:[%s9305_s1 + $0xcc8] sm:$0xff]  }
 0x16b   :  { %v7497_v60 = vld [vmem:[%s9305_s1 + $0xc98] sm:$0xff]   ;;  %v7499_v62 = vld [vmem:[%s9305_s1 + $0xcd0] sm:$0xff]   ;;  %v7507_v6 = vld [vmem:[%s9305_s1 + $0xcc0] sm:$0xff]  }
 0x16c   :  { %6872 = vmatpush3.bf16.msra.mxu0 %v7455_v0  ;;  %v7500_v63 = vld [vmem:[%s9305_s1 + $0xc10] sm:$0xff]  }
 0x16d   :  { %6873 = vmatprep.subr.bf16.mxu0 %v7457_v5  ;;  %6894 = vmatpush3.bf16.msra.mxu1 %v7456_v3  ;;  %v7501_v0 = vld [vmem:[%s9305_s1 + $0xc90] sm:$0xff]   ;;  %v7504_v3 = vld [vmem:[%s9305_s1 + $0xc08] sm:$0xff]   ;;  %v7506_v5 = vld [vmem:[%s9305_s1 + $0xc40] sm:$0xff]  }
 0x16e   :  { %6895 = vmatprep.subr.bf16.mxu1 %v7458_v7  ;;  %v7508_v7 = vld [vmem:[%s9305_s1 + $0xc00] sm:$0xff]  }
 0x170   :  { %6874 = vmatpush3.bf16.msra.mxu0 %v7459_v8  ;;  %v18_v8 = vld [vmem:[%s9306_s0 + $0x30] sm:$0xff] }
 0x171   :  { %6875 = vmatprep.subr.bf16.mxu0 %v7461_v10  ;;  %6896 = vmatpush3.bf16.msra.mxu1 %v7460_v9  ;;  %v1353_v9 = vrot.slane %v18_v8, %v7718_v35  ;;  %v7510_v10 = vld [vmem:[%s9305_s1 + $0xd78] sm:$0xff]  }
 0x172   :  { %6897 = vmatprep.subr.bf16.mxu1 %v7462_v11  ;;  %v1346_v11 = vcombine.high %v18_v8, %v18_v8 }
 0x174   :  { %6876 = vmatpush3.bf16.msra.mxu0 %v7463_v12  ;;  %v7509_v12 = vld [vmem:[%s9305_s1 + $0xc80] sm:$0xff]  }
 0x175   :  { %6877 = vmatprep.subr.bf16.mxu0 %v7465_v14  ;;  %6898 = vmatpush3.bf16.msra.mxu1 %v7464_v13  ;;  %v1361_v13 = vcombine.high %v1353_v9, %v1353_v9  ;;  %v1369_v14 = vrot.slane %v1353_v9, %v7718_v35  ;;  %v7546_v9 = vld [vmem:[%s9305_s1 + $0xeb8] sm:$0xff]  }
 0x176   :  { %6899 = vmatprep.subr.bf16.mxu1 %v7466_v15  ;;  %v7511_v15 = vld [vmem:[%s9305_s1 + $0xdf8] sm:$0xff]  }
 0x178   :  { %6878 = vmatpush3.bf16.msra.mxu0 %v7467_v16  ;;  %v8991_v16 = vrot.slane %v1346_v11, %v7718_v35 }
 0x179   :  { %6879 = vmatprep.subr.bf16.mxu0 %v7469_v18  ;;  %6900 = vmatpush3.bf16.msra.mxu1 %v7468_v17  ;;  %v1383_v17 = vrot.slane %v1361_v13, %v7718_v35  ;;  %v7512_v18 = vld [vmem:[%s9305_s1 + $0xd38] sm:$0xff]   ;;  %v7549_v13 = vld [vmem:[%s9305_s1 + $0xe30] sm:$0xff]  }
 0x17a   :  { %6901 = vmatprep.subr.bf16.mxu1 %v7470_v19  ;;  %v1362_v19 = vcombine.high %v8991_v16, %v8991_v16 }
 0x17c   :  { %6880 = vmatpush3.bf16.msra.mxu0 %v7471_v20  ;;  %v1391_v20 = vcombine.high %v1369_v14, %v1369_v14 }
 0x17d   :  { %6881 = vmatprep.subr.bf16.mxu0 %v7473_v22  ;;  %6902 = vmatpush3.bf16.msra.mxu1 %v7472_v21  ;;  %v7514_v21 = vld [vmem:[%s9305_s1 + $0xd70] sm:$0xff]   ;;  %v1393_v22 = vcombine.high %v1383_v17, %v1383_v17 }
 0x17e   :  { %6903 = vmatprep.subr.bf16.mxu1 %v7474_v23 }
 0x180   :  { %6882 = vmatpush3.bf16.msra.mxu0 %v7475_v24  ;;  %v7513_v24 = vld [vmem:[%s9305_s1 + $0xdb8] sm:$0xff]  }
 0x181   :  { %6911 = vmatprep.subr.bf16.mxu0 %v7478_v27  ;;  %6904 = vmatpush3.bf16.msra.mxu1 %v7476_v25  ;;  %v1390_v25 = vrot.slane %v1362_v19, %v7718_v35 }
 0x182   :  { %6933 = vmatprep.subr.bf16.mxu1 %v7479_v28 }
 0x183   :  { %v6619_v33 = vpop.f32.mrf.mxu0  ;;  %5493 = vmatmul.mubr.bf16.vlgmr.msra.gmra.mxu0 %v1327_v26  ;;  %v7515_v26 = vld [vmem:[%s9305_s1 + $0xdf0] sm:$0xff]  }
 0x184   :  { %v6641_v37 = vpop.f32.mrf.mxu1  ;;  %6912 = vmatpush3.bf16.msra.mxu0 %v7480_v29  ;;  %5533 = vmatmul.mubr.bf16.vlgmr.msra.gmra.mxu1 %v1343_v31  ;;  %v7516_v29 = vld [vmem:[%s9305_s1 + $0xd30] sm:$0xff]  }
 0x185   :  { %v6620_v38 = vpop.f32.mrf.mxu0  ;;  %6913 = vmatprep.subr.bf16.mxu0 %v7482_v32  ;;  %6934 = vmatpush3.bf16.msra.mxu1 %v7481_v30  ;;  %v1394_v30 = vcombine.high %v1390_v25, %v1390_v25  ;;  %v7518_v32 = vld [vmem:[%s9305_s1 + $0xd68] sm:$0xff]  }
 0x186   :  { %v6621_v40 = vadd.f32 %v6620_v38, %v6619_v33  ;;  %v6642_v42 = vpop.f32.mrf.mxu1  ;;  %6935 = vmatprep.subr.bf16.mxu1 %v7483_v34  ;;  %5572 = vmatprep.mubr.bf16.mxu0 %v1383_v17 }
 0x187   :  { %v6622_v43 = vpop.f32.mrf.mxu0  ;;  %v6643_v46 = vadd.f32 %v6642_v42, %v6641_v37  ;;  %5612 = vmatprep.mubr.bf16.mxu1 %v1393_v22  ;;  %v7520_v42 = vld [vmem:[%s9305_s1 + $0xd28] sm:$0xff]  }
 0x188   :  { %v5015_v45 = vadd.f32 %v6621_v40, %v8816_v4  ;;  %v6644_v48 = vpop.f32.mrf.mxu1  ;;  %6914 = vmatpush3.bf16.msra.mxu0 %v7484_v36  ;;  %v7505_v4 = vld [vmem:[%s9305_s1 + $0xc88] sm:$0xff]   ;;  %v7517_v36 = vld [vmem:[%s9305_s1 + $0xdb0] sm:$0xff]  }
 0x189   :  { %v6623_v49 = vpop.f32.mrf.mxu0  ;;  %6915 = vmatprep.subr.bf16.mxu0 %v7486_v41  ;;  %6936 = vmatpush3.bf16.msra.mxu1 %v7485_v39  ;;  %v7519_v39 = vld [vmem:[%s9305_s1 + $0xde8] sm:$0xff]   ;;  %v7524_v48 = vld [vmem:[%s9305_s1 + $0xd20] sm:$0xff]  }
 0x18a   :  { %v8917_v51 = vadd.f32 %v6643_v46, %v5015_v45  ;;  %v6645_v53 = vpop.f32.mrf.mxu1  ;;  %6937 = vmatprep.subr.bf16.mxu1 %v7487_v44  ;;  %v7522_v44 = vld [vmem:[%s9305_s1 + $0xd60] sm:$0xff]   ;;  %v7521_v46 = vld [vmem:[%s9305_s1 + $0xda8] sm:$0xff]   ;;  %v7526_v49 = vld [vmem:[%s9305_s1 + $0xd58] sm:$0xff]  }
 0x18b   :  { %v7530_v53 = vld [vmem:[%s9305_s1 + $0xd50] sm:$0xff]  }
 0x18c   :  { %6916 = vmatpush3.bf16.msra.mxu0 %v7488_v47  ;;  %v7523_v47 = vld [vmem:[%s9305_s1 + $0xde0] sm:$0xff]  }
 0x18d   :  { %6917 = vmatprep.subr.bf16.mxu0 %v7490_v52  ;;  %6938 = vmatpush3.bf16.msra.mxu1 %v7489_v50  ;;  %v7525_v50 = vld [vmem:[%s9305_s1 + $0xda0] sm:$0xff]   ;;  %v7528_v52 = vld [vmem:[%s9305_s1 + $0xd18] sm:$0xff]  }
 0x18e   :  { %6939 = vmatprep.subr.bf16.mxu1 %v7491_v54  ;;  %v7529_v54 = vld [vmem:[%s9305_s1 + $0xd98] sm:$0xff]  }
 0x190   :  { %6918 = vmatpush3.bf16.msra.mxu0 %v7492_v55  ;;  %v7531_v55 = vld [vmem:[%s9305_s1 + $0xdd0] sm:$0xff]  }
 0x191   :  { %6919 = vmatprep.subr.bf16.mxu0 %v7494_v57  ;;  %6940 = vmatpush3.bf16.msra.mxu1 %v7493_v56  ;;  %v7532_v56 = vld [vmem:[%s9305_s1 + $0xd10] sm:$0xff]   ;;  %v7534_v57 = vld [vmem:[%s9305_s1 + $0xd48] sm:$0xff]  }
 0x192   :  { %6941 = vmatprep.subr.bf16.mxu1 %v7495_v58  ;;  %v7533_v58 = vld [vmem:[%s9305_s1 + $0xd90] sm:$0xff]  }
 0x194   :  { %6920 = vmatpush3.bf16.msra.mxu0 %v7496_v59  ;;  %v7535_v59 = vld [vmem:[%s9305_s1 + $0xdc8] sm:$0xff]  }
 0x195   :  { %6921 = vmatprep.subr.bf16.mxu0 %v7498_v61  ;;  %6942 = vmatpush3.bf16.msra.mxu1 %v7497_v60  ;;  %v7536_v60 = vld [vmem:[%s9305_s1 + $0xd08] sm:$0xff]   ;;  %v7538_v61 = vld [vmem:[%s9305_s1 + $0xd40] sm:$0xff]  }
 0x196   :  { %6943 = vmatprep.subr.bf16.mxu1 %v7499_v62  ;;  %v7537_v62 = vld [vmem:[%s9305_s1 + $0xd88] sm:$0xff]  }
 0x198   :  { %6922 = vmatpush3.bf16.msra.mxu0 %v7500_v63  ;;  %v7539_v63 = vld [vmem:[%s9305_s1 + $0xdc0] sm:$0xff]  }
 0x199   :  { %6923 = vmatprep.subr.bf16.mxu0 %v7502_v1  ;;  %6944 = vmatpush3.bf16.msra.mxu1 %v7501_v0  ;;  %v7540_v0 = vld [vmem:[%s9305_s1 + $0xd00] sm:$0xff]   ;;  %v1376_v1 = vrot.slane %v8991_v16, %v7718_v35 }
 0x19a   :  { %6945 = vmatprep.subr.bf16.mxu1 %v7503_v2  ;;  %v7543_v2 = vld [vmem:[%s9305_s1 + $0xe78] sm:$0xff]  }
 0x19c   :  { %6924 = vmatpush3.bf16.msra.mxu0 %v7504_v3  ;;  %v7541_v3 = vld [vmem:[%s9305_s1 + $0xd80] sm:$0xff]  }
 0x19d   :  { %6925 = vmatprep.subr.bf16.mxu0 %v7506_v5  ;;  %6946 = vmatpush3.bf16.msra.mxu1 %v7505_v4  ;;  %v7544_v4 = vld [vmem:[%s9305_s1 + $0xef8] sm:$0xff]  }
 0x19e   :  { %6947 = vmatprep.subr.bf16.mxu1 %v7507_v6  ;;  %v7545_v5 = vld [vmem:[%s9305_s1 + $0xe38] sm:$0xff]   ;;  %v1392_v6 = vcombine.high %v1376_v1, %v1376_v1 }
 0x1a0   :  { %6926 = vmatpush3.bf16.msra.mxu0 %v7508_v7  ;;  %v7547_v7 = vld [vmem:[%s9305_s1 + $0xe70] sm:$0xff]  }
 0x1a1   :  { %6955 = vmatprep.subr.bf16.mxu0 %v7510_v10  ;;  %6948 = vmatpush3.bf16.msra.mxu1 %v7509_v12  ;;  %v7548_v10 = vld [vmem:[%s9305_s1 + $0xef0] sm:$0xff]  }
 0x1a2   :  { %6977 = vmatprep.subr.bf16.mxu1 %v7511_v15  ;;  %v7551_v15 = vld [vmem:[%s9305_s1 + $0xe68] sm:$0xff]  }
 0x1a3   :  { %v6663_v23 = vpop.f32.mrf.mxu0  ;;  %5573 = vmatmul.mubr.bf16.vlgmr.msra.gmra.mxu0 %v1369_v14 }
 0x1a4   :  { %v6685_v27 = vpop.f32.mrf.mxu1  ;;  %6956 = vmatpush3.bf16.msra.mxu0 %v7512_v18  ;;  %5613 = vmatmul.mubr.bf16.vlgmr.msra.gmra.mxu1 %v1391_v20  ;;  %v7550_v18 = vld [vmem:[%s9305_s1 + $0xeb0] sm:$0xff]  }
 0x1a5   :  { %v6664_v28 = vpop.f32.mrf.mxu0  ;;  %6957 = vmatprep.subr.bf16.mxu0 %v7514_v21  ;;  %6978 = vmatpush3.bf16.msra.mxu1 %v7513_v24  ;;  %v7552_v21 = vld [vmem:[%s9305_s1 + $0xee8] sm:$0xff]  }
 0x1a6   :  { %v6665_v31 = vadd.f32 %v6664_v28, %v6663_v23  ;;  %v6686_v33 = vpop.f32.mrf.mxu1  ;;  %5652 = vmatprep.mubr.bf16.mxu0 %v1390_v25  ;;  %6979 = vmatprep.subr.bf16.mxu1 %v7515_v26  ;;  %v7553_v24 = vld [vmem:[%s9305_s1 + $0xe28] sm:$0xff]   ;;  %v7555_v26 = vld [vmem:[%s9305_s1 + $0xe60] sm:$0xff]  }
 0x1a7   :  { %v6666_v34 = vpop.f32.mrf.mxu0  ;;  %v6687_v38 = vadd.f32 %v6686_v33, %v6685_v27  ;;  %5692 = vmatprep.mubr.bf16.mxu1 %v1394_v30  ;;  %v7554_v28 = vld [vmem:[%s9305_s1 + $0xea8] sm:$0xff]   ;;  %v7557_v30 = vld [vmem:[%s9305_s1 + $0xe20] sm:$0xff]   ;;  %v7560_v33 = vld [vmem:[%s9305_s1 + $0xed8] sm:$0xff]  }
 0x1a8   :  { %v5095_v37 = vadd.f32 %v6665_v31, %v8917_v51  ;;  %v6688_v40 = vpop.f32.mrf.mxu1  ;;  %6958 = vmatpush3.bf16.msra.mxu0 %v7516_v29  ;;  %v7527_v51 = vld [vmem:[%s9305_s1 + $0xdd8] sm:$0xff]   ;;  %v7556_v29 = vld [vmem:[%s9305_s1 + $0xee0] sm:$0xff]  }
 0x1a9   :  { %v6667_v41 = vpop.f32.mrf.mxu0  ;;  %6959 = vmatprep.subr.bf16.mxu0 %v7518_v32  ;;  %6980 = vmatpush3.bf16.msra.mxu1 %v7517_v36  ;;  %v7559_v31 = vld [vmem:[%s9305_s1 + $0xe58] sm:$0xff]   ;;  %v7558_v32 = vld [vmem:[%s9305_s1 + $0xea0] sm:$0xff]   ;;  %v7563_v36 = vld [vmem:[%s9305_s1 + $0xe50] sm:$0xff]  }
 0x1aa   :  { %v9025_v43 = vadd.f32 %v6687_v38, %v5095_v37  ;;  %v6689_v45 = vpop.f32.mrf.mxu1  ;;  %6981 = vmatprep.subr.bf16.mxu1 %v7519_v39  ;;  %v7561_v34 = vld [vmem:[%s9305_s1 + $0xe18] sm:$0xff]   ;;  %v7564_v38 = vld [vmem:[%s9305_s1 + $0xed0] sm:$0xff]   ;;  %v7567_v40 = vld [vmem:[%s9305_s1 + $0xe48] sm:$0xff]  }
 0x1ab   :  { %v7562_v37 = vld [vmem:[%s9305_s1 + $0xe98] sm:$0xff]   ;;  %v7565_v39 = vld [vmem:[%s9305_s1 + $0xe10] sm:$0xff]   ;;  %v7570_v45 = vld [vmem:[%s9305_s1 + $0xe88] sm:$0xff]  }
 0x1ac   :  { %6960 = vmatpush3.bf16.msra.mxu0 %v7520_v42  ;;  %v7566_v41 = vld [vmem:[%s9305_s1 + $0xe90] sm:$0xff]   ;;  %v7568_v42 = vld [vmem:[%s9305_s1 + $0xec8] sm:$0xff]  }
 0x1ad   :  { %6961 = vmatprep.subr.bf16.mxu0 %v7522_v44  ;;  %6982 = vmatpush3.bf16.msra.mxu1 %v7521_v46  ;;  %v7571_v44 = vld [vmem:[%s9305_s1 + $0xe40] sm:$0xff]  }
 0x1ae   :  { %6983 = vmatprep.subr.bf16.mxu1 %v7523_v47  ;;  %v7572_v46 = vld [vmem:[%s9305_s1 + $0xec0] sm:$0xff]   ;;  %v19_v47 = vld [vmem:[%s9306_s0 + $0x38] sm:$0xff] }
 0x1b0   :  { %6962 = vmatpush3.bf16.msra.mxu0 %v7524_v48  ;;  %v7573_v48 = vld [vmem:[%s9305_s1 + $0xe00] sm:$0xff]  }
 0x1b1   :  { %6963 = vmatprep.subr.bf16.mxu0 %v7526_v49  ;;  %6984 = vmatpush3.bf16.msra.mxu1 %v7525_v50  ;;  %v1402_v49 = vrot.slane %v19_v47, %v7718_v35  ;;  %v1395_v50 = vcombine.high %v19_v47, %v19_v47 }
 0x1b2   :  { %6985 = vmatprep.subr.bf16.mxu1 %v7527_v51  ;;  %v7575_v51 = vld [vmem:[%s9305_s1 + $0xf78] sm:$0xff]  }
 0x1b4   :  { %6964 = vmatpush3.bf16.msra.mxu0 %v7528_v52  ;;  %v7574_v52 = vld [vmem:[%s9305_s1 + $0xe80] sm:$0xff]  }
 0x1b5   :  { %6965 = vmatprep.subr.bf16.mxu0 %v7530_v53  ;;  %6986 = vmatpush3.bf16.msra.mxu1 %v7529_v54  ;;  %v1410_v53 = vcombine.high %v1402_v49, %v1402_v49  ;;  %v1418_v54 = vrot.slane %v1402_v49, %v7718_v35 }
 0x1b6   :  { %6987 = vmatprep.subr.bf16.mxu1 %v7531_v55  ;;  %v9200_v55 = vrot.slane %v1395_v50, %v7718_v35 }
 0x1b8   :  { %6966 = vmatpush3.bf16.msra.mxu0 %v7532_v56  ;;  %v7576_v56 = vld [vmem:[%s9305_s1 + $0xff8] sm:$0xff]  }
 0x1b9   :  { %6967 = vmatprep.subr.bf16.mxu0 %v7534_v57  ;;  %6988 = vmatpush3.bf16.msra.mxu1 %v7533_v58  ;;  %v1432_v57 = vrot.slane %v1410_v53, %v7718_v35  ;;  %v7577_v58 = vld [vmem:[%s9305_s1 + $0xf38] sm:$0xff]  }
 0x1ba   :  { %6989 = vmatprep.subr.bf16.mxu1 %v7535_v59  ;;  %v1411_v59 = vcombine.high %v9200_v55, %v9200_v55 }
 0x1bc   :  { %6968 = vmatpush3.bf16.msra.mxu0 %v7536_v60  ;;  %v1440_v60 = vcombine.high %v1418_v54, %v1418_v54 }
 0x1bd   :  { %6969 = vmatprep.subr.bf16.mxu0 %v7538_v61  ;;  %6990 = vmatpush3.bf16.msra.mxu1 %v7537_v62  ;;  %v7579_v61 = vld [vmem:[%s9305_s1 + $0xf70] sm:$0xff]   ;;  %v1442_v62 = vcombine.high %v1432_v57, %v1432_v57 }
 0x1be   :  { %6991 = vmatprep.subr.bf16.mxu1 %v7539_v63 }
 0x1c0   :  { %6970 = vmatpush3.bf16.msra.mxu0 %v7540_v0  ;;  %v7578_v0 = vld [vmem:[%s9305_s1 + $0xfb8] sm:$0xff]  }
 0x1c1   :  { %6999 = vmatprep.subr.bf16.mxu0 %v7543_v2  ;;  %6992 = vmatpush3.bf16.msra.mxu1 %v7541_v3  ;;  %v7580_v2 = vld [vmem:[%s9305_s1 + $0xff0] sm:$0xff]  }
 0x1c2   :  { %7021 = vmatprep.subr.bf16.mxu1 %v7544_v4 }
 0x1c3   :  { %v6707_v8 = vpop.f32.mrf.mxu0  ;;  %5653 = vmatmul.mubr.bf16.vlgmr.msra.gmra.mxu0 %v1376_v1  ;;  %v1439_v1 = vrot.slane %v1411_v59, %v7718_v35 }
 0x1c4   :  { %v6729_v11 = vpop.f32.mrf.mxu1  ;;  %7000 = vmatpush3.bf16.msra.mxu0 %v7545_v5  ;;  %5693 = vmatmul.mubr.bf16.vlgmr.msra.gmra.mxu1 %v1392_v6  ;;  %v7581_v5 = vld [vmem:[%s9305_s1 + $0xf30] sm:$0xff]  }
 0x1c5   :  { %v6708_v12 = vpop.f32.mrf.mxu0  ;;  %7001 = vmatprep.subr.bf16.mxu0 %v7547_v7  ;;  %7022 = vmatpush3.bf16.msra.mxu1 %v7546_v9  ;;  %v1443_v6 = vcombine.high %v1439_v1, %v1439_v1 }
 0x1c6   :  { %v6709_v14 = vadd.f32 %v6708_v12, %v6707_v8  ;;  %v6730_v16 = vpop.f32.mrf.mxu1  ;;  %7023 = vmatprep.subr.bf16.mxu1 %v7548_v10  ;;  %5732 = vmatprep.mubr.bf16.mxu0 %v1432_v57  ;;  %v7583_v8 = vld [vmem:[%s9305_s1 + $0xf68] sm:$0xff]  }
 0x1c7   :  { %v6710_v17 = vpop.f32.mrf.mxu0  ;;  %v6731_v20 = vadd.f32 %v6730_v16, %v6729_v11  ;;  %5772 = vmatprep.mubr.bf16.mxu1 %v1442_v62  ;;  %v7582_v11 = vld [vmem:[%s9305_s1 + $0xfb0] sm:$0xff]  }
 0x1c8   :  { %v5175_v19 = vadd.f32 %v6709_v14, %v9025_v43  ;;  %v6732_v22 = vpop.f32.mrf.mxu1  ;;  %7002 = vmatpush3.bf16.msra.mxu0 %v7549_v13  ;;  %v7569_v43 = vld [vmem:[%s9305_s1 + $0xe08] sm:$0xff]  }
 0x1c9   :  { %v6711_v23 = vpop.f32.mrf.mxu0  ;;  %7003 = vmatprep.subr.bf16.mxu0 %v7551_v15  ;;  %7024 = vmatpush3.bf16.msra.mxu1 %v7550_v18  ;;  %v7584_v14 = vld [vmem:[%s9305_s1 + $0xfe8] sm:$0xff]   ;;  %v7588_v22 = vld [vmem:[%s9305_s1 + $0xfe0] sm:$0xff]  }
 0x1ca   :  { %v9126_v25 = vadd.f32 %v6731_v20, %v5175_v19  ;;  %v6733_v27 = vpop.f32.mrf.mxu1  ;;  %7025 = vmatprep.subr.bf16.mxu1 %v7552_v21  ;;  %v7585_v17 = vld [vmem:[%s9305_s1 + $0xf28] sm:$0xff]   ;;  %v7587_v19 = vld [vmem:[%s9305_s1 + $0xf60] sm:$0xff]  }
 0x1cb   :  { %v7586_v21 = vld [vmem:[%s9305_s1 + $0xfa8] sm:$0xff]   ;;  %v7589_v23 = vld [vmem:[%s9305_s1 + $0xf20] sm:$0xff]   ;;  %v7593_v27 = vld [vmem:[%s9305_s1 + $0xf18] sm:$0xff]  }
 0x1cc   :  { %7004 = vmatpush3.bf16.msra.mxu0 %v7553_v24  ;;  %v7591_v24 = vld [vmem:[%s9305_s1 + $0xf58] sm:$0xff]  }
 0x1cd   :  { %7005 = vmatprep.subr.bf16.mxu0 %v7555_v26  ;;  %7026 = vmatpush3.bf16.msra.mxu1 %v7554_v28  ;;  %v7592_v26 = vld [vmem:[%s9305_s1 + $0xfd8] sm:$0xff]   ;;  %v7595_v28 = vld [vmem:[%s9305_s1 + $0xf50] sm:$0xff]  }
 0x1ce   :  { %7027 = vmatprep.subr.bf16.mxu1 %v7556_v29  ;;  %v7594_v29 = vld [vmem:[%s9305_s1 + $0xf98] sm:$0xff]  }
 0x1d0   :  { %7006 = vmatpush3.bf16.msra.mxu0 %v7557_v30  ;;  %v7596_v30 = vld [vmem:[%s9305_s1 + $0xfd0] sm:$0xff]  }
 0x1d1   :  { %7007 = vmatprep.subr.bf16.mxu0 %v7559_v31  ;;  %7028 = vmatpush3.bf16.msra.mxu1 %v7558_v32  ;;  %v7597_v31 = vld [vmem:[%s9305_s1 + $0xf10] sm:$0xff]   ;;  %v7599_v32 = vld [vmem:[%s9305_s1 + $0xf48] sm:$0xff]  }
 0x1d2   :  { %7029 = vmatprep.subr.bf16.mxu1 %v7560_v33  ;;  %v7598_v33 = vld [vmem:[%s9305_s1 + $0xf90] sm:$0xff]  }
 0x1d4   :  { %7008 = vmatpush3.bf16.msra.mxu0 %v7561_v34  ;;  %v7600_v34 = vld [vmem:[%s9305_s1 + $0xfc8] sm:$0xff]  }
 0x1d5   :  { %7009 = vmatprep.subr.bf16.mxu0 %v7563_v36  ;;  %7030 = vmatpush3.bf16.msra.mxu1 %v7562_v37  ;;  %v7601_v36 = vld [vmem:[%s9305_s1 + $0xf08] sm:$0xff]   ;;  %v7603_v37 = vld [vmem:[%s9305_s1 + $0xf40] sm:$0xff]  }
 0x1d6   :  { %7031 = vmatprep.subr.bf16.mxu1 %v7564_v38  ;;  %v7602_v38 = vld [vmem:[%s9305_s1 + $0xf88] sm:$0xff]  }
 0x1d8   :  { %7010 = vmatpush3.bf16.msra.mxu0 %v7565_v39  ;;  %v7604_v39 = vld [vmem:[%s9305_s1 + $0xfc0] sm:$0xff]  }
 0x1d9   :  { %7011 = vmatprep.subr.bf16.mxu0 %v7567_v40  ;;  %7032 = vmatpush3.bf16.msra.mxu1 %v7566_v41  ;;  %v7605_v40 = vld [vmem:[%s9305_s1 + $0xf00] sm:$0xff]   ;;  %v1425_v41 = vrot.slane %v9200_v55, %v7718_v35 }
 0x1da   :  { %7033 = vmatprep.subr.bf16.mxu1 %v7568_v42  ;;  %v7606_v42 = vld [vmem:[%s9305_s1 + $0xf80] sm:$0xff]  }
 0x1dc   :  { %7012 = vmatpush3.bf16.msra.mxu0 %v7569_v43  ;;  %v1441_v43 = vcombine.high %v1425_v41, %v1425_v41 }
 0x1dd   :  { %7013 = vmatprep.subr.bf16.mxu0 %v7571_v44  ;;  %7034 = vmatpush3.bf16.msra.mxu1 %v7570_v45 }
 0x1de   :  { %7035 = vmatprep.subr.bf16.mxu1 %v7572_v46 }
 0x1e0   :  { %7014 = vmatpush3.bf16.msra.mxu0 %v7573_v48 }
 0x1e1   :  { %7043 = vmatprep.subr.bf16.mxu0 %v7575_v51  ;;  %7036 = vmatpush3.bf16.msra.mxu1 %v7574_v52 }
 0x1e2   :  { %7065 = vmatprep.subr.bf16.mxu1 %v7576_v56 }
 0x1e3   :  { %v6751_v63 = vpop.f32.mrf.mxu0  ;;  %5733 = vmatmul.mubr.bf16.vlgmr.msra.gmra.mxu0 %v1418_v54 }
 0x1e4   :  { %v6773_v3 = vpop.f32.mrf.mxu1  ;;  %7044 = vmatpush3.bf16.msra.mxu0 %v7577_v58  ;;  %5773 = vmatmul.mubr.bf16.vlgmr.msra.gmra.mxu1 %v1440_v60 }
 0x1e5   :  { %v6752_v4 = vpop.f32.mrf.mxu0  ;;  %7045 = vmatprep.subr.bf16.mxu0 %v7579_v61  ;;  %7066 = vmatpush3.bf16.msra.mxu1 %v7578_v0 }
 0x1e6   :  { %v6753_v7 = vadd.f32 %v6752_v4, %v6751_v63  ;;  %v6774_v9 = vpop.f32.mrf.mxu1  ;;  %5812 = vmatprep.mubr.bf16.mxu0 %v1439_v1  ;;  %7067 = vmatprep.subr.bf16.mxu1 %v7580_v2 }
 0x1e7   :  { %v6754_v10 = vpop.f32.mrf.mxu0  ;;  %v6775_v13 = vadd.f32 %v6774_v9, %v6773_v3  ;;  %5852 = vmatprep.mubr.bf16.mxu1 %v1443_v6 }
 0x1e8   :  { %v5255_v12 = vadd.f32 %v6753_v7, %v9126_v25  ;;  %v6776_v15 = vpop.f32.mrf.mxu1  ;;  %7046 = vmatpush3.bf16.msra.mxu0 %v7581_v5  ;;  %v7590_v25 = vld [vmem:[%s9305_s1 + $0xfa0] sm:$0xff]  }
 0x1e9   :  { %v6755_v16 = vpop.f32.mrf.mxu0  ;;  %7047 = vmatprep.subr.bf16.mxu0 %v7583_v8  ;;  %7068 = vmatpush3.bf16.msra.mxu1 %v7582_v11 }
 0x1ea   :  { %v5295_v18 = vadd.f32 %v6775_v13, %v5255_v12  ;;  %v6777_v20 = vpop.f32.mrf.mxu1  ;;  %7069 = vmatprep.subr.bf16.mxu1 %v7584_v14 }
 0x1ec   :  { %7048 = vmatpush3.bf16.msra.mxu0 %v7585_v17 }
 0x1ed   :  { %7049 = vmatprep.subr.bf16.mxu0 %v7587_v19  ;;  %7070 = vmatpush3.bf16.msra.mxu1 %v7586_v21 }
 0x1ee   :  { %7071 = vmatprep.subr.bf16.mxu1 %v7588_v22 }
 0x1f0   :  { %7050 = vmatpush3.bf16.msra.mxu0 %v7589_v23 }
 0x1f1   :  { %7051 = vmatprep.subr.bf16.mxu0 %v7591_v24  ;;  %7072 = vmatpush3.bf16.msra.mxu1 %v7590_v25 }
 0x1f2   :  { %7073 = vmatprep.subr.bf16.mxu1 %v7592_v26 }
 0x1f4   :  { %7052 = vmatpush3.bf16.msra.mxu0 %v7593_v27 }
 0x1f5   :  { %7053 = vmatprep.subr.bf16.mxu0 %v7595_v28  ;;  %7074 = vmatpush3.bf16.msra.mxu1 %v7594_v29 }
 0x1f6   :  { %7075 = vmatprep.subr.bf16.mxu1 %v7596_v30 }
 0x1f8   :  { %7054 = vmatpush3.bf16.msra.mxu0 %v7597_v31 }
 0x1f9   :  { %7055 = vmatprep.subr.bf16.mxu0 %v7599_v32  ;;  %7076 = vmatpush3.bf16.msra.mxu1 %v7598_v33 }
 0x1fa   :  { %7077 = vmatprep.subr.bf16.mxu1 %v7600_v34 }
 0x1fc   :  { %7056 = vmatpush3.bf16.msra.mxu0 %v7601_v36 }
 0x1fd   :  { %7057 = vmatprep.subr.bf16.mxu0 %v7603_v37  ;;  %7078 = vmatpush3.bf16.msra.mxu1 %v7602_v38 }
 0x1fe   :  { %7079 = vmatprep.subr.bf16.mxu1 %v7604_v39 }
 0x200   :  { %7058 = vmatpush3.bf16.msra.mxu0 %v7605_v40 }
 0x201   :  { %7080 = vmatpush3.bf16.msra.mxu1 %v7606_v42 }
 0x203   :  { %v6795_v44 = vpop.f32.mrf.mxu0  ;;  %5813 = vmatmul.mubr.bf16.vlgmr.msra.gmra.mxu0 %v1425_v41 }
 0x204   :  { %v6817_v45 = vpop.f32.mrf.mxu1  ;;  %5853 = vmatmul.mubr.bf16.vlgmr.msra.gmra.mxu1 %v1441_v43 }
 0x205   :  { %v6796_v46 = vpop.f32.mrf.mxu0 }
 0x206   :  { %v6797_v47 = vadd.f32 %v6796_v46, %v6795_v44  ;;  %v6818_v48 = vpop.f32.mrf.mxu1 }
 0x207   :  { %v6798_v49 = vpop.f32.mrf.mxu0  ;;  %v6819_v51 = vadd.f32 %v6818_v48, %v6817_v45 }
 0x208   :  { %v5335_v50 = vadd.f32 %v6797_v47, %v5295_v18  ;;  %v6820_v35 = vpop.f32.mrf.mxu1 }
 0x209   :  { %v6799_v52 = vpop.f32.mrf.mxu0 }
 0x20a   :  { %v5375_v53 = vadd.f32 %v6819_v51, %v5335_v50  ;;  %v6821_v54 = vpop.f32.mrf.mxu1 }
 0x223   :  { %v6839_v55 = vpop.f32.mrf.mxu0 }
 0x224   :  { %v6861_v56 = vpop.f32.mrf.mxu1 }
 0x225   :  { %v6840_v57 = vpop.f32.mrf.mxu0 }
 0x226   :  { %v6841_v58 = vadd.f32 %v6840_v57, %v6839_v55  ;;  %v6862_v59 = vpop.f32.mrf.mxu1 }
 0x227   :  { %v6842_v60 = vpop.f32.mrf.mxu0  ;;  %v6863_v62 = vadd.f32 %v6862_v59, %v6861_v56 }
 0x228   :  { %v5415_v61 = vadd.f32 %v6841_v58, %v5375_v53  ;;  %v6864_v63 = vpop.f32.mrf.mxu1 }
 0x229   :  { %v6843_v0 = vpop.f32.mrf.mxu0 }
 0x22a   :  { %v5455_v1 = vadd.f32 %v6863_v62, %v5415_v61  ;;  %v6865_v2 = vpop.f32.mrf.mxu1 }
 0x243   :  { %v6883_v3 = vpop.f32.mrf.mxu0 }
 0x244   :  { %v6905_v4 = vpop.f32.mrf.mxu1 }
 0x245   :  { %v6884_v5 = vpop.f32.mrf.mxu0 }
 0x246   :  { %v6885_v6 = vadd.f32 %v6884_v5, %v6883_v3  ;;  %v6906_v7 = vpop.f32.mrf.mxu1 }
 0x247   :  { %v6886_v8 = vpop.f32.mrf.mxu0  ;;  %v6907_v10 = vadd.f32 %v6906_v7, %v6905_v4 }
 0x248   :  { %v5495_v9 = vadd.f32 %v6885_v6, %v5455_v1  ;;  %v6908_v11 = vpop.f32.mrf.mxu1 }
 0x249   :  { %v6887_v12 = vpop.f32.mrf.mxu0 }
 0x24a   :  { %v5535_v13 = vadd.f32 %v6907_v10, %v5495_v9  ;;  %v6909_v14 = vpop.f32.mrf.mxu1 }
 0x263   :  { %v6927_v15 = vpop.f32.mrf.mxu0 }
 0x264   :  { %v6949_v16 = vpop.f32.mrf.mxu1 }
 0x265   :  { %v6928_v17 = vpop.f32.mrf.mxu0 }
 0x266   :  { %v6929_v18 = vadd.f32 %v6928_v17, %v6927_v15  ;;  %v6950_v19 = vpop.f32.mrf.mxu1 }
 0x267   :  { %v6930_v20 = vpop.f32.mrf.mxu0  ;;  %v6951_v22 = vadd.f32 %v6950_v19, %v6949_v16 }
 0x268   :  { %v5575_v21 = vadd.f32 %v6929_v18, %v5535_v13  ;;  %v6952_v23 = vpop.f32.mrf.mxu1 }
 0x269   :  { %v6931_v24 = vpop.f32.mrf.mxu0 }
 0x26a   :  { %v5615_v25 = vadd.f32 %v6951_v22, %v5575_v21  ;;  %v6953_v26 = vpop.f32.mrf.mxu1 }
 0x283   :  { %v6971_v27 = vpop.f32.mrf.mxu0 }
 0x284   :  { %v6993_v28 = vpop.f32.mrf.mxu1 }
 0x285   :  { %v6972_v29 = vpop.f32.mrf.mxu0 }
 0x286   :  { %v6994_v30 = vpop.f32.mrf.mxu1  ;;  %v6973_v44 = vadd.f32 %v6972_v29, %v6971_v27 }
 0x287   :  { %v6974_v31 = vpop.f32.mrf.mxu0  ;;  %v6995_v46 = vadd.f32 %v6994_v30, %v6993_v28 }
 0x288   :  { %v6996_v32 = vpop.f32.mrf.mxu1  ;;  %v5655_v45 = vadd.f32 %v6973_v44, %v5615_v25 }
 0x289   :  { %v6975_v33 = vpop.f32.mrf.mxu0 }
 0x28a   :  { %v6997_v34 = vpop.f32.mrf.mxu1  ;;  %v5695_v48 = vadd.f32 %v6995_v46, %v5655_v45 }
 0x2a3   :  { %v7015_v36 = vpop.f32.mrf.mxu0 }
 0x2a4   :  { %v7037_v37 = vpop.f32.mrf.mxu1 }
 0x2a5   :  { %v7016_v38 = vpop.f32.mrf.mxu0 }
 0x2a6   :  { %v7038_v39 = vpop.f32.mrf.mxu1  ;;  %v7017_v47 = vadd.f32 %v7016_v38, %v7015_v36 }
 0x2a7   :  { %v7018_v40 = vpop.f32.mrf.mxu0  ;;  %v7039_v50 = vadd.f32 %v7038_v39, %v7037_v37 }
 0x2a8   :  { %v7040_v41 = vpop.f32.mrf.mxu1  ;;  %v5735_v49 = vadd.f32 %v7017_v47, %v5695_v48 }
 0x2a9   :  { %v7019_v42 = vpop.f32.mrf.mxu0 }
 0x2aa   :  { %v7041_v43 = vpop.f32.mrf.mxu1  ;;  %v5775_v53 = vadd.f32 %v7039_v50, %v5735_v49 }
 0x2c3   :  { %v7059_v51 = vpop.f32.mrf.mxu0 }
 0x2c4   :  { %v7081_v35 = vpop.f32.mrf.mxu1 }
 0x2c5   :  { %v7060_v52 = vpop.f32.mrf.mxu0 }
 0x2c6   :  { %v7061_v54 = vadd.f32 %v7060_v52, %v7059_v51  ;;  %v7082_v55 = vpop.f32.mrf.mxu1 }
 0x2c7   :  { %v7062_v56 = vpop.f32.mrf.mxu0  ;;  %v7083_v58 = vadd.f32 %v7082_v55, %v7081_v35 }
 0x2c8   :  { %v5815_v57 = vadd.f32 %v7061_v54, %v5775_v53  ;;  %v7084_v59 = vpop.f32.mrf.mxu1 }
 0x2c9   :  { %v7063_v60 = vpop.f32.mrf.mxu0 }
 0x2ca   :  { %v5855_v61 = vadd.f32 %v7083_v58, %v5815_v57  ;;  %v7085_v62 = vpop.f32.mrf.mxu1 }
 0x2cc   :  { %v5860_v63 = vsub.f32 0.0, %v5855_v61 }
 0x2ce   :  { %v5861_v0 = vmul.f32 1.442695, %v5860_v63 }
 0x2d0   :  { %7608 = vpow2.f32 %v5861_v0 }
 0x2dd   :  { %v7609_v1 = vpop.eup %7608 }
 0x2de   :  { %v5863_v2 = vadd.f32 1.0, %v7609_v1 }
 0x2e0   :  { %7610 = vrcp.f32 %v5863_v2 }
 0x2ed   :  { %v7611_v3 = vpop.eup %7610 }
 0x2ee   :  { %5866 = vst [vmem:[%s9307_s2] sm:$0x3] %v7611_v3 }

</bundles_post_ra>
